<compile_context>
chip_gen: v5e
topology: v5e:2x2
jax: 0.10.0
libtpu: 0.0.40
codegen_flags: <defaults>
</compile_context>

<pallas_src>
import functools

import numpy as np
import jax
import jax.numpy as jnp
from jax import lax
from jax.experimental import pallas as pl
from jax.experimental.pallas import tpu as pltpu

K1 = 3 * 5 * 5          # conv1 contraction size (75)
K1_PAD = 80             # padded to a bf16 sublane multiple of 16 (not 128)
LANE_PAD = 128          # zero tail so in-kernel shifted slices stay in bounds
SAMPLE_STRIDE = 256     # per-sample lane stride (14*14 = 196 rounded up)


def _full_spec(shape):
    nd = len(shape)
    return pl.BlockSpec(shape, lambda i: (0,) * nd)


# ---------------------------------------------------------------------------
# Fused LeNet kernel (conv1+pool, conv2+pool, fc1/fc2/fc3)
# ---------------------------------------------------------------------------
def _lenet_kernel(p1_ref, w1_ref, b1_ref, w2_ref, b2_ref, sel_ref,
                  wf1_ref, bf1_ref, wf2_ref, bf2_ref, wf3_ref, bf3_ref,
                  o_ref, *, n):
    f32 = jnp.float32
    m = n * SAMPLE_STRIDE                 # valid lane extent (256 per sample)

    # ---- conv1 + bias + ReLU + 2x2 maxpool --------------------------------
    # One block-diagonal matmul covers the 4 pooling offsets; rows
    # [16*o : 16*o+16] hold offset o's conv output, a 4-way sublane max is the
    # maxpool (relu/max commute, bias identical across offsets).
    z = jnp.dot(w1_ref[...], p1_ref[...], preferred_element_type=f32)  # (64, m+128)
    z = jnp.maximum(jnp.maximum(z[0:16], z[16:32]),
                    jnp.maximum(z[32:48], z[48:64]))
    a1 = jnp.maximum(z + b1_ref[...], 0.0).astype(jnp.bfloat16)        # (16, m+128)

    # ---- conv2 via in-kernel shift-and-matmul ------------------------------
    # acc[c2, n*256 + y*14 + x] (valid for y, x <= 9) accumulates the 25
    # (kh, kw) taps; shifted slices only ever read real, finite columns.
    acc = None
    for kh in range(5):
        for kw in range(5):
            s = kh * 14 + kw
            tap = jnp.dot(w2_ref[kh * 5 + kw], a1[:, s:s + m + 16],
                          preferred_element_type=f32)                   # (32, m+16)
            acc = tap if acc is None else acc + tap
    acc = acc + b2_ref[...]
    # 2x2 maxpool + ReLU; valid pooled values land at even (y, x) columns.
    pooled = jnp.maximum(jnp.maximum(acc[:, 0:m], acc[:, 1:m + 1]),
                         jnp.maximum(acc[:, 14:m + 14], acc[:, 15:m + 15]))
    pooled = jnp.maximum(pooled, 0.0).astype(jnp.bfloat16)              # (32, m)

    # ---- gather the 25 valid pooled columns per sample ----------------------
    # sel is a 0/1 matrix built offline; output lane order is (py, px, n) so
    # fc1 can consume contiguous (32, n) slabs -> no in-kernel relayout.
    dense = jnp.dot(pooled, sel_ref[...],
                    preferred_element_type=f32).astype(jnp.bfloat16)    # (32, 25n)

    # ---- fc1 (+ReLU) as 25 accumulated dots (flatten folded into weights) --
    h = None
    for s in range(25):
        d = jnp.dot(wf1_ref[s], dense[:, s * n:(s + 1) * n],
                    preferred_element_type=f32)                         # (120, n)
        h = d if h is None else h + d
    h = jnp.maximum(h + bf1_ref[...], 0.0).astype(jnp.bfloat16)

    # ---- fc2 (+ReLU), fc3 ---------------------------------------------------
    h = jnp.dot(wf2_ref[...], h, preferred_element_type=f32)
    h = jnp.maximum(h + bf2_ref[...], 0.0).astype(jnp.bfloat16)
    out = jnp.dot(wf3_ref[...], h, preferred_element_type=f32) + bf3_ref[...]
    o_ref[...] = out                                                     # (10, n)


# ---------------------------------------------------------------------------
# XLA-side glue: conv1 pool-offset im2col (controlled ordering, small graph)
# ---------------------------------------------------------------------------
def _conv1_pool_patches(x):
    """x (N,3,32,32) f32 -> (4*80, N*256 + 128) bf16 pool-offset im2col.

    Per pooling offset o=(dy,dx) the K rows are ordered (c, kh, kw) (the
    PyTorch weight flatten order) zero-padded 75->80; columns are ordered
    n*256 + py*14 + px with 60 zero pad columns per sample and a 128-column
    zero tail so the kernel's shifted slices never leave the array.
    """
    n = x.shape[0]
    xc = jnp.transpose(x, (1, 0, 2, 3)).astype(jnp.bfloat16)             # (3,N,32,32)
    taps = [xc[:, :, kh:kh + 28, kw:kw + 28]
            for kh in range(5) for kw in range(5)]
    pat = jnp.stack(taps, axis=1)                                        # (3,25,N,28,28)
    offs = [pat[:, :, :, dy::2, dx::2] for dy in range(2) for dx in range(2)]
    p = jnp.stack(offs, axis=0)                                          # (4,3,25,N,14,14)
    p = p.reshape(4, K1, n, 196)
    p = jnp.pad(p, ((0, 0), (0, K1_PAD - K1), (0, 0), (0, SAMPLE_STRIDE - 196)))
    p = p.reshape(4 * K1_PAD, n * SAMPLE_STRIDE)
    return jnp.pad(p, ((0, 0), (0, LANE_PAD)))                           # (320, n*256+128)


# ---------------------------------------------------------------------------
# Parameters
# ---------------------------------------------------------------------------
def init_params(key):
    ks = jax.random.split(key, 10)

    def u(k, shape, fan_in):
        bound = 1.0 / float(fan_in) ** 0.5
        return jax.random.uniform(k, shape, jnp.float32, -bound, bound)

    return {
        "conv1_w": u(ks[0], (16, 3, 5, 5), 3 * 25),
        "conv1_b": u(ks[1], (16,), 3 * 25),
        "conv2_w": u(ks[2], (32, 16, 5, 5), 16 * 25),
        "conv2_b": u(ks[3], (32,), 16 * 25),
        "fc1_w": u(ks[4], (120, 32 * 5 * 5), 32 * 5 * 5),
        "fc1_b": u(ks[5], (120,), 32 * 5 * 5),
        "fc2_w": u(ks[6], (84, 120), 120),
        "fc2_b": u(ks[7], (84,), 120),
        "fc3_w": u(ks[8], (10, 84), 84),
        "fc3_b": u(ks[9], (10,), 84),
    }


def prepare_params(p, n):
    """One-time weight relayout (outside the jitted hot path).

    Builds: block-diagonal conv1 weight (4 pool offsets), per-tap conv2
    weights, the pooled-column selection matrix (depends on batch n), fc1
    weights reordered to (spatial, out, channel), and all bf16 casts.
    """
    w1p = jnp.pad(p["conv1_w"].reshape(16, K1), ((0, 0), (0, K1_PAD - K1)))
    w1blk = jnp.kron(jnp.eye(4, dtype=w1p.dtype), w1p)                  # (64, 320)
    w2s = jnp.transpose(p["conv2_w"], (2, 3, 0, 1)).reshape(25, 32, 16)  # [kh*5+kw,c2,c1]
    sel = np.zeros((n * SAMPLE_STRIDE, 25 * n), np.float32)
    for nn in range(n):
        for py in range(5):
            for px in range(5):
                sel[nn * SAMPLE_STRIDE + 28 * py + 2 * px,
                    (5 * py + px) * n + nn] = 1.0
    w_fc1 = jnp.transpose(p["fc1_w"].reshape(120, 32, 25), (2, 0, 1))    # (25,120,32)
    return {
        "w1blk": w1blk.astype(jnp.bfloat16),
        "b1": p["conv1_b"].reshape(16, 1).astype(jnp.float32),
        "w2s": w2s.astype(jnp.bfloat16),
        "b2": p["conv2_b"].reshape(32, 1).astype(jnp.float32),
        "sel": jnp.asarray(sel, jnp.bfloat16),
        "w_fc1": w_fc1.astype(jnp.bfloat16),
        "b_fc1": p["fc1_b"].reshape(120, 1).astype(jnp.float32),
        "w_fc2": p["fc2_w"].astype(jnp.bfloat16),
        "b_fc2": p["fc2_b"].reshape(84, 1).astype(jnp.float32),
        "w_fc3": p["fc3_w"].astype(jnp.bfloat16),
        "b_fc3": p["fc3_b"].reshape(10, 1).astype(jnp.float32),
    }


# ---------------------------------------------------------------------------
# Forward pass (one pallas_call)
# ---------------------------------------------------------------------------
def lenet_forward(x, pp):
    n = x.shape[0]
    p1 = _conv1_pool_patches(x)                                          # (320, n*256+128)
    args = (p1, pp["w1blk"], pp["b1"], pp["w2s"], pp["b2"], pp["sel"],
            pp["w_fc1"], pp["b_fc1"], pp["w_fc2"], pp["b_fc2"],
            pp["w_fc3"], pp["b_fc3"])
    out = pl.pallas_call(
        functools.partial(_lenet_kernel, n=n),
        out_shape=jax.ShapeDtypeStruct((10, n), jnp.float32),
        grid=(1,),
        in_specs=[_full_spec(a.shape) for a in args],
        out_specs=_full_spec((10, n)),
        compiler_params=pltpu.CompilerParams(
            dimension_semantics=("arbitrary",)),
    )(*args)
    return out.T                                                          # (n, 10)


# ---------------------------------------------------------------------------
# Pure-JAX f32 reference (PyTorch semantics)
# ---------------------------------------------------------------------------
def _conv_relu_ref(x, w, b):
    y = lax.conv_general_dilated(x, w, window_strides=(1, 1), padding="VALID",
                                 dimension_numbers=("NCHW", "OIHW", "NCHW"))
    return jnp.maximum(y + b[None, :, None, None], 0.0)


def _maxpool2x2_ref(y):
    return jnp.maximum(
        jnp.maximum(y[:, :, 0::2, 0::2], y[:, :, 0::2, 1::2]),
        jnp.maximum(y[:, :, 1::2, 0::2], y[:, :, 1::2, 1::2]))


def lenet_reference(x, p):
    y = _maxpool2x2_ref(_conv_relu_ref(x, p["conv1_w"], p["conv1_b"]))
    y = _maxpool2x2_ref(_conv_relu_ref(y, p["conv2_w"], p["conv2_b"]))
    y = y.reshape(x.shape[0], -1)
    y = jnp.maximum(y @ p["fc1_w"].T + p["fc1_b"], 0.0)
    y = jnp.maximum(y @ p["fc2_w"].T + p["fc2_b"], 0.0)
    return y @ p["fc3_w"].T + p["fc3_b"]


if __name__ == "__main__":
    key = jax.random.PRNGKey(0)
    k_param, k_x = jax.random.split(key)
    params = init_params(k_param)
    # LeNet geometry requires 32x32 inputs (flatten gives 32*5*5 = 800).
    x = jax.random.normal(k_x, (2, 3, 32, 32), dtype=jnp.float32)
    prepped = prepare_params(params, x.shape[0])   # one-time relayout

    out = jax.jit(lenet_forward)(x, prepped)
    jax.block_until_ready(out)
    assert out.shape == (2, 10) and out.dtype == jnp.float32

    ref = lenet_reference(x, params)
    assert jnp.allclose(out, ref, rtol=1e-1, atol=1e-1), (
        "Pallas LeNet diverged from the f32 reference")
    print("KERNEL_OK")
</pallas_src>

<mosaic_0001>
module attributes {stable_mosaic.version = 11 : i64} {
  func.func @_lenet_kernel(%arg0: i32, %arg1: memref<320x640xbf16, #tpu.memory_space<vmem>>, %arg2: memref<64x320xbf16, #tpu.memory_space<vmem>>, %arg3: memref<16x1xf32, #tpu.memory_space<vmem>>, %arg4: memref<25x32x16xbf16, #tpu.memory_space<vmem>>, %arg5: memref<32x1xf32, #tpu.memory_space<vmem>>, %arg6: memref<512x50xbf16, #tpu.memory_space<vmem>>, %arg7: memref<25x120x32xbf16, #tpu.memory_space<vmem>>, %arg8: memref<120x1xf32, #tpu.memory_space<vmem>>, %arg9: memref<84x120xbf16, #tpu.memory_space<vmem>>, %arg10: memref<84x1xf32, #tpu.memory_space<vmem>>, %arg11: memref<10x84xbf16, #tpu.memory_space<vmem>>, %arg12: memref<10x1xf32, #tpu.memory_space<vmem>>, %arg13: memref<10x2xf32, #tpu.memory_space<vmem>>) attributes {dimension_semantics = [#tpu.dimension_semantics<arbitrary>], iteration_bounds = array<i64: 1>, scalar_prefetch = 0 : i64, scratch_operands = 0 : i64, tpu.core_type = #tpu.core_type<tc>, window_params = [{pipeline_mode = #tpu.pipeline_mode<synchronous>, transform_indices = @transform_0, window_bounds = array<i64: 320, 640>}, {pipeline_mode = #tpu.pipeline_mode<synchronous>, transform_indices = @transform_1, window_bounds = array<i64: 64, 320>}, {pipeline_mode = #tpu.pipeline_mode<synchronous>, transform_indices = @transform_2, window_bounds = array<i64: 16, 1>}, {pipeline_mode = #tpu.pipeline_mode<synchronous>, transform_indices = @transform_3, window_bounds = array<i64: 25, 32, 16>}, {pipeline_mode = #tpu.pipeline_mode<synchronous>, transform_indices = @transform_4, window_bounds = array<i64: 32, 1>}, {pipeline_mode = #tpu.pipeline_mode<synchronous>, transform_indices = @transform_5, window_bounds = array<i64: 512, 50>}, {pipeline_mode = #tpu.pipeline_mode<synchronous>, transform_indices = @transform_6, window_bounds = array<i64: 25, 120, 32>}, {pipeline_mode = #tpu.pipeline_mode<synchronous>, transform_indices = @transform_7, window_bounds = array<i64: 120, 1>}, {pipeline_mode = #tpu.pipeline_mode<synchronous>, transform_indices = @transform_8, window_bounds = array<i64: 84, 120>}, {pipeline_mode = #tpu.pipeline_mode<synchronous>, transform_indices = @transform_9, window_bounds = array<i64: 84, 1>}, {pipeline_mode = #tpu.pipeline_mode<synchronous>, transform_indices = @transform_10, window_bounds = array<i64: 10, 84>}, {pipeline_mode = #tpu.pipeline_mode<synchronous>, transform_indices = @transform_11, window_bounds = array<i64: 10, 1>}, {pipeline_mode = #tpu.pipeline_mode<synchronous>, transform_indices = @transform_12, window_bounds = array<i64: 10, 2>}]} {
    %c0 = arith.constant 0 : index
    %c0_0 = arith.constant 0 : index
    %0 = vector.load %arg2[%c0, %c0_0] : memref<64x320xbf16, #tpu.memory_space<vmem>>, vector<64x320xbf16>
    %c0_1 = arith.constant 0 : index
    %c0_2 = arith.constant 0 : index
    %1 = vector.load %arg1[%c0_1, %c0_2] : memref<320x640xbf16, #tpu.memory_space<vmem>>, vector<320x640xbf16>
    %cst = arith.constant dense<0.000000e+00> : vector<64x640xf32>
    %2 = tpu.matmul %0, %1, %cst {dimension_numbers = #tpu.dot_dimension_numbers<[1], [0], [0], [1], [0, 0, 1, 1], [], []>} : vector<64x320xbf16>, vector<320x640xbf16>, vector<64x640xf32> -> vector<64x640xf32>
    %3 = vector.extract_strided_slice %2 {offsets = [0, 0], sizes = [16, 640], strides = [1, 1]} : vector<64x640xf32> to vector<16x640xf32>
    %4 = vector.extract_strided_slice %2 {offsets = [16, 0], sizes = [16, 640], strides = [1, 1]} : vector<64x640xf32> to vector<16x640xf32>
    %5 = arith.maximumf %3, %4 : vector<16x640xf32>
    %6 = vector.extract_strided_slice %2 {offsets = [32, 0], sizes = [16, 640], strides = [1, 1]} : vector<64x640xf32> to vector<16x640xf32>
    %7 = vector.extract_strided_slice %2 {offsets = [48, 0], sizes = [16, 640], strides = [1, 1]} : vector<64x640xf32> to vector<16x640xf32>
    %8 = arith.maximumf %6, %7 : vector<16x640xf32>
    %9 = arith.maximumf %5, %8 : vector<16x640xf32>
    %c0_3 = arith.constant 0 : index
    %c0_4 = arith.constant 0 : index
    %10 = vector.load %arg3[%c0_3, %c0_4] : memref<16x1xf32, #tpu.memory_space<vmem>>, vector<16x1xf32>
    %11 = vector.broadcast %10 : vector<16x1xf32> to vector<16x640xf32>
    %12 = arith.addf %9, %11 : vector<16x640xf32>
    %cst_5 = arith.constant 0.000000e+00 : f32
    %13 = vector.broadcast %cst_5 : f32 to vector<16x640xf32>
    %14 = arith.maximumf %12, %13 : vector<16x640xf32>
    %15 = arith.truncf %14 : vector<16x640xf32> to vector<16x640xbf16>
    %c0_6 = arith.constant 0 : index
    %c0_7 = arith.constant 0 : index
    %c0_8 = arith.constant 0 : index
    %16 = vector.load %arg4[%c0_6, %c0_7, %c0_8] : memref<25x32x16xbf16, #tpu.memory_space<vmem>>, vector<1x32x16xbf16>
    %17 = vector.shape_cast %16 : vector<1x32x16xbf16> to vector<32x16xbf16>
    %18 = vector.extract_strided_slice %15 {offsets = [0, 0], sizes = [16, 528], strides = [1, 1]} : vector<16x640xbf16> to vector<16x528xbf16>
    %cst_9 = arith.constant dense<0.000000e+00> : vector<32x528xf32>
    %19 = tpu.matmul %17, %18, %cst_9 {dimension_numbers = #tpu.dot_dimension_numbers<[1], [0], [0], [1], [0, 0, 1, 1], [], []>} : vector<32x16xbf16>, vector<16x528xbf16>, vector<32x528xf32> -> vector<32x528xf32>
    %c1 = arith.constant 1 : index
    %c0_10 = arith.constant 0 : index
    %c0_11 = arith.constant 0 : index
    %20 = vector.load %arg4[%c1, %c0_10, %c0_11] : memref<25x32x16xbf16, #tpu.memory_space<vmem>>, vector<1x32x16xbf16>
    %21 = vector.shape_cast %20 : vector<1x32x16xbf16> to vector<32x16xbf16>
    %22 = vector.extract_strided_slice %15 {offsets = [0, 1], sizes = [16, 528], strides = [1, 1]} : vector<16x640xbf16> to vector<16x528xbf16>
    %cst_12 = arith.constant dense<0.000000e+00> : vector<32x528xf32>
    %23 = tpu.matmul %21, %22, %cst_12 {dimension_numbers = #tpu.dot_dimension_numbers<[1], [0], [0], [1], [0, 0, 1, 1], [], []>} : vector<32x16xbf16>, vector<16x528xbf16>, vector<32x528xf32> -> vector<32x528xf32>
    %24 = arith.addf %19, %23 : vector<32x528xf32>
    %c2 = arith.constant 2 : index
    %c0_13 = arith.constant 0 : index
    %c0_14 = arith.constant 0 : index
    %25 = vector.load %arg4[%c2, %c0_13, %c0_14] : memref<25x32x16xbf16, #tpu.memory_space<vmem>>, vector<1x32x16xbf16>
    %26 = vector.shape_cast %25 : vector<1x32x16xbf16> to vector<32x16xbf16>
    %27 = vector.extract_strided_slice %15 {offsets = [0, 2], sizes = [16, 528], strides = [1, 1]} : vector<16x640xbf16> to vector<16x528xbf16>
    %cst_15 = arith.constant dense<0.000000e+00> : vector<32x528xf32>
    %28 = tpu.matmul %26, %27, %cst_15 {dimension_numbers = #tpu.dot_dimension_numbers<[1], [0], [0], [1], [0, 0, 1, 1], [], []>} : vector<32x16xbf16>, vector<16x528xbf16>, vector<32x528xf32> -> vector<32x528xf32>
    %29 = arith.addf %24, %28 : vector<32x528xf32>
    %c3 = arith.constant 3 : index
    %c0_16 = arith.constant 0 : index
    %c0_17 = arith.constant 0 : index
    %30 = vector.load %arg4[%c3, %c0_16, %c0_17] : memref<25x32x16xbf16, #tpu.memory_space<vmem>>, vector<1x32x16xbf16>
    %31 = vector.shape_cast %30 : vector<1x32x16xbf16> to vector<32x16xbf16>
    %32 = vector.extract_strided_slice %15 {offsets = [0, 3], sizes = [16, 528], strides = [1, 1]} : vector<16x640xbf16> to vector<16x528xbf16>
    %cst_18 = arith.constant dense<0.000000e+00> : vector<32x528xf32>
    %33 = tpu.matmul %31, %32, %cst_18 {dimension_numbers = #tpu.dot_dimension_numbers<[1], [0], [0], [1], [0, 0, 1, 1], [], []>} : vector<32x16xbf16>, vector<16x528xbf16>, vector<32x528xf32> -> vector<32x528xf32>
    %34 = arith.addf %29, %33 : vector<32x528xf32>
    %c4 = arith.constant 4 : index
    %c0_19 = arith.constant 0 : index
    %c0_20 = arith.constant 0 : index
    %35 = vector.load %arg4[%c4, %c0_19, %c0_20] : memref<25x32x16xbf16, #tpu.memory_space<vmem>>, vector<1x32x16xbf16>
    %36 = vector.shape_cast %35 : vector<1x32x16xbf16> to vector<32x16xbf16>
    %37 = vector.extract_strided_slice %15 {offsets = [0, 4], sizes = [16, 528], strides = [1, 1]} : vector<16x640xbf16> to vector<16x528xbf16>
    %cst_21 = arith.constant dense<0.000000e+00> : vector<32x528xf32>
    %38 = tpu.matmul %36, %37, %cst_21 {dimension_numbers = #tpu.dot_dimension_numbers<[1], [0], [0], [1], [0, 0, 1, 1], [], []>} : vector<32x16xbf16>, vector<16x528xbf16>, vector<32x528xf32> -> vector<32x528xf32>
    %39 = arith.addf %34, %38 : vector<32x528xf32>
    %c5 = arith.constant 5 : index
    %c0_22 = arith.constant 0 : index
    %c0_23 = arith.constant 0 : index
    %40 = vector.load %arg4[%c5, %c0_22, %c0_23] : memref<25x32x16xbf16, #tpu.memory_space<vmem>>, vector<1x32x16xbf16>
    %41 = vector.shape_cast %40 : vector<1x32x16xbf16> to vector<32x16xbf16>
    %42 = vector.extract_strided_slice %15 {offsets = [0, 14], sizes = [16, 528], strides = [1, 1]} : vector<16x640xbf16> to vector<16x528xbf16>
    %cst_24 = arith.constant dense<0.000000e+00> : vector<32x528xf32>
    %43 = tpu.matmul %41, %42, %cst_24 {dimension_numbers = #tpu.dot_dimension_numbers<[1], [0], [0], [1], [0, 0, 1, 1], [], []>} : vector<32x16xbf16>, vector<16x528xbf16>, vector<32x528xf32> -> vector<32x528xf32>
    %44 = arith.addf %39, %43 : vector<32x528xf32>
    %c6 = arith.constant 6 : index
    %c0_25 = arith.constant 0 : index
    %c0_26 = arith.constant 0 : index
    %45 = vector.load %arg4[%c6, %c0_25, %c0_26] : memref<25x32x16xbf16, #tpu.memory_space<vmem>>, vector<1x32x16xbf16>
    %46 = vector.shape_cast %45 : vector<1x32x16xbf16> to vector<32x16xbf16>
    %47 = vector.extract_strided_slice %15 {offsets = [0, 15], sizes = [16, 528], strides = [1, 1]} : vector<16x640xbf16> to vector<16x528xbf16>
    %cst_27 = arith.constant dense<0.000000e+00> : vector<32x528xf32>
    %48 = tpu.matmul %46, %47, %cst_27 {dimension_numbers = #tpu.dot_dimension_numbers<[1], [0], [0], [1], [0, 0, 1, 1], [], []>} : vector<32x16xbf16>, vector<16x528xbf16>, vector<32x528xf32> -> vector<32x528xf32>
    %49 = arith.addf %44, %48 : vector<32x528xf32>
    %c7 = arith.constant 7 : index
    %c0_28 = arith.constant 0 : index
    %c0_29 = arith.constant 0 : index
    %50 = vector.load %arg4[%c7, %c0_28, %c0_29] : memref<25x32x16xbf16, #tpu.memory_space<vmem>>, vector<1x32x16xbf16>
    %51 = vector.shape_cast %50 : vector<1x32x16xbf16> to vector<32x16xbf16>
    %52 = vector.extract_strided_slice %15 {offsets = [0, 16], sizes = [16, 528], strides = [1, 1]} : vector<16x640xbf16> to vector<16x528xbf16>
    %cst_30 = arith.constant dense<0.000000e+00> : vector<32x528xf32>
    %53 = tpu.matmul %51, %52, %cst_30 {dimension_numbers = #tpu.dot_dimension_numbers<[1], [0], [0], [1], [0, 0, 1, 1], [], []>} : vector<32x16xbf16>, vector<16x528xbf16>, vector<32x528xf32> -> vector<32x528xf32>
    %54 = arith.addf %49, %53 : vector<32x528xf32>
    %c8 = arith.constant 8 : index
    %c0_31 = arith.constant 0 : index
    %c0_32 = arith.constant 0 : index
    %55 = vector.load %arg4[%c8, %c0_31, %c0_32] : memref<25x32x16xbf16, #tpu.memory_space<vmem>>, vector<1x32x16xbf16>
    %56 = vector.shape_cast %55 : vector<1x32x16xbf16> to vector<32x16xbf16>
    %57 = vector.extract_strided_slice %15 {offsets = [0, 17], sizes = [16, 528], strides = [1, 1]} : vector<16x640xbf16> to vector<16x528xbf16>
    %cst_33 = arith.constant dense<0.000000e+00> : vector<32x528xf32>
    %58 = tpu.matmul %56, %57, %cst_33 {dimension_numbers = #tpu.dot_dimension_numbers<[1], [0], [0], [1], [0, 0, 1, 1], [], []>} : vector<32x16xbf16>, vector<16x528xbf16>, vector<32x528xf32> -> vector<32x528xf32>
    %59 = arith.addf %54, %58 : vector<32x528xf32>
    %c9 = arith.constant 9 : index
    %c0_34 = arith.constant 0 : index
    %c0_35 = arith.constant 0 : index
    %60 = vector.load %arg4[%c9, %c0_34, %c0_35] : memref<25x32x16xbf16, #tpu.memory_space<vmem>>, vector<1x32x16xbf16>
    %61 = vector.shape_cast %60 : vector<1x32x16xbf16> to vector<32x16xbf16>
    %62 = vector.extract_strided_slice %15 {offsets = [0, 18], sizes = [16, 528], strides = [1, 1]} : vector<16x640xbf16> to vector<16x528xbf16>
    %cst_36 = arith.constant dense<0.000000e+00> : vector<32x528xf32>
    %63 = tpu.matmul %61, %62, %cst_36 {dimension_numbers = #tpu.dot_dimension_numbers<[1], [0], [0], [1], [0, 0, 1, 1], [], []>} : vector<32x16xbf16>, vector<16x528xbf16>, vector<32x528xf32> -> vector<32x528xf32>
    %64 = arith.addf %59, %63 : vector<32x528xf32>
    %c10 = arith.constant 10 : index
    %c0_37 = arith.constant 0 : index
    %c0_38 = arith.constant 0 : index
    %65 = vector.load %arg4[%c10, %c0_37, %c0_38] : memref<25x32x16xbf16, #tpu.memory_space<vmem>>, vector<1x32x16xbf16>
    %66 = vector.shape_cast %65 : vector<1x32x16xbf16> to vector<32x16xbf16>
    %67 = vector.extract_strided_slice %15 {offsets = [0, 28], sizes = [16, 528], strides = [1, 1]} : vector<16x640xbf16> to vector<16x528xbf16>
    %cst_39 = arith.constant dense<0.000000e+00> : vector<32x528xf32>
    %68 = tpu.matmul %66, %67, %cst_39 {dimension_numbers = #tpu.dot_dimension_numbers<[1], [0], [0], [1], [0, 0, 1, 1], [], []>} : vector<32x16xbf16>, vector<16x528xbf16>, vector<32x528xf32> -> vector<32x528xf32>
    %69 = arith.addf %64, %68 : vector<32x528xf32>
    %c11 = arith.constant 11 : index
    %c0_40 = arith.constant 0 : index
    %c0_41 = arith.constant 0 : index
    %70 = vector.load %arg4[%c11, %c0_40, %c0_41] : memref<25x32x16xbf16, #tpu.memory_space<vmem>>, vector<1x32x16xbf16>
    %71 = vector.shape_cast %70 : vector<1x32x16xbf16> to vector<32x16xbf16>
    %72 = vector.extract_strided_slice %15 {offsets = [0, 29], sizes = [16, 528], strides = [1, 1]} : vector<16x640xbf16> to vector<16x528xbf16>
    %cst_42 = arith.constant dense<0.000000e+00> : vector<32x528xf32>
    %73 = tpu.matmul %71, %72, %cst_42 {dimension_numbers = #tpu.dot_dimension_numbers<[1], [0], [0], [1], [0, 0, 1, 1], [], []>} : vector<32x16xbf16>, vector<16x528xbf16>, vector<32x528xf32> -> vector<32x528xf32>
    %74 = arith.addf %69, %73 : vector<32x528xf32>
    %c12 = arith.constant 12 : index
    %c0_43 = arith.constant 0 : index
    %c0_44 = arith.constant 0 : index
    %75 = vector.load %arg4[%c12, %c0_43, %c0_44] : memref<25x32x16xbf16, #tpu.memory_space<vmem>>, vector<1x32x16xbf16>
    %76 = vector.shape_cast %75 : vector<1x32x16xbf16> to vector<32x16xbf16>
    %77 = vector.extract_strided_slice %15 {offsets = [0, 30], sizes = [16, 528], strides = [1, 1]} : vector<16x640xbf16> to vector<16x528xbf16>
    %cst_45 = arith.constant dense<0.000000e+00> : vector<32x528xf32>
    %78 = tpu.matmul %76, %77, %cst_45 {dimension_numbers = #tpu.dot_dimension_numbers<[1], [0], [0], [1], [0, 0, 1, 1], [], []>} : vector<32x16xbf16>, vector<16x528xbf16>, vector<32x528xf32> -> vector<32x528xf32>
    %79 = arith.addf %74, %78 : vector<32x528xf32>
    %c13 = arith.constant 13 : index
    %c0_46 = arith.constant 0 : index
    %c0_47 = arith.constant 0 : index
    %80 = vector.load %arg4[%c13, %c0_46, %c0_47] : memref<25x32x16xbf16, #tpu.memory_space<vmem>>, vector<1x32x16xbf16>
    %81 = vector.shape_cast %80 : vector<1x32x16xbf16> to vector<32x16xbf16>
    %82 = vector.extract_strided_slice %15 {offsets = [0, 31], sizes = [16, 528], strides = [1, 1]} : vector<16x640xbf16> to vector<16x528xbf16>
    %cst_48 = arith.constant dense<0.000000e+00> : vector<32x528xf32>
    %83 = tpu.matmul %81, %82, %cst_48 {dimension_numbers = #tpu.dot_dimension_numbers<[1], [0], [0], [1], [0, 0, 1, 1], [], []>} : vector<32x16xbf16>, vector<16x528xbf16>, vector<32x528xf32> -> vector<32x528xf32>
    %84 = arith.addf %79, %83 : vector<32x528xf32>
    %c14 = arith.constant 14 : index
    %c0_49 = arith.constant 0 : index
    %c0_50 = arith.constant 0 : index
    %85 = vector.load %arg4[%c14, %c0_49, %c0_50] : memref<25x32x16xbf16, #tpu.memory_space<vmem>>, vector<1x32x16xbf16>
    %86 = vector.shape_cast %85 : vector<1x32x16xbf16> to vector<32x16xbf16>
    %87 = vector.extract_strided_slice %15 {offsets = [0, 32], sizes = [16, 528], strides = [1, 1]} : vector<16x640xbf16> to vector<16x528xbf16>
    %cst_51 = arith.constant dense<0.000000e+00> : vector<32x528xf32>
    %88 = tpu.matmul %86, %87, %cst_51 {dimension_numbers = #tpu.dot_dimension_numbers<[1], [0], [0], [1], [0, 0, 1, 1], [], []>} : vector<32x16xbf16>, vector<16x528xbf16>, vector<32x528xf32> -> vector<32x528xf32>
    %89 = arith.addf %84, %88 : vector<32x528xf32>
    %c15 = arith.constant 15 : index
    %c0_52 = arith.constant 0 : index
    %c0_53 = arith.constant 0 : index
    %90 = vector.load %arg4[%c15, %c0_52, %c0_53] : memref<25x32x16xbf16, #tpu.memory_space<vmem>>, vector<1x32x16xbf16>
    %91 = vector.shape_cast %90 : vector<1x32x16xbf16> to vector<32x16xbf16>
    %92 = vector.extract_strided_slice %15 {offsets = [0, 42], sizes = [16, 528], strides = [1, 1]} : vector<16x640xbf16> to vector<16x528xbf16>
    %cst_54 = arith.constant dense<0.000000e+00> : vector<32x528xf32>
    %93 = tpu.matmul %91, %92, %cst_54 {dimension_numbers = #tpu.dot_dimension_numbers<[1], [0], [0], [1], [0, 0, 1, 1], [], []>} : vector<32x16xbf16>, vector<16x528xbf16>, vector<32x528xf32> -> vector<32x528xf32>
    %94 = arith.addf %89, %93 : vector<32x528xf32>
    %c16 = arith.constant 16 : index
    %c0_55 = arith.constant 0 : index
    %c0_56 = arith.constant 0 : index
    %95 = vector.load %arg4[%c16, %c0_55, %c0_56] : memref<25x32x16xbf16, #tpu.memory_space<vmem>>, vector<1x32x16xbf16>
    %96 = vector.shape_cast %95 : vector<1x32x16xbf16> to vector<32x16xbf16>
    %97 = vector.extract_strided_slice %15 {offsets = [0, 43], sizes = [16, 528], strides = [1, 1]} : vector<16x640xbf16> to vector<16x528xbf16>
    %cst_57 = arith.constant dense<0.000000e+00> : vector<32x528xf32>
    %98 = tpu.matmul %96, %97, %cst_57 {dimension_numbers = #tpu.dot_dimension_numbers<[1], [0], [0], [1], [0, 0, 1, 1], [], []>} : vector<32x16xbf16>, vector<16x528xbf16>, vector<32x528xf32> -> vector<32x528xf32>
    %99 = arith.addf %94, %98 : vector<32x528xf32>
    %c17 = arith.constant 17 : index
    %c0_58 = arith.constant 0 : index
    %c0_59 = arith.constant 0 : index
    %100 = vector.load %arg4[%c17, %c0_58, %c0_59] : memref<25x32x16xbf16, #tpu.memory_space<vmem>>, vector<1x32x16xbf16>
    %101 = vector.shape_cast %100 : vector<1x32x16xbf16> to vector<32x16xbf16>
    %102 = vector.extract_strided_slice %15 {offsets = [0, 44], sizes = [16, 528], strides = [1, 1]} : vector<16x640xbf16> to vector<16x528xbf16>
    %cst_60 = arith.constant dense<0.000000e+00> : vector<32x528xf32>
    %103 = tpu.matmul %101, %102, %cst_60 {dimension_numbers = #tpu.dot_dimension_numbers<[1], [0], [0], [1], [0, 0, 1, 1], [], []>} : vector<32x16xbf16>, vector<16x528xbf16>, vector<32x528xf32> -> vector<32x528xf32>
    %104 = arith.addf %99, %103 : vector<32x528xf32>
    %c18 = arith.constant 18 : index
    %c0_61 = arith.constant 0 : index
    %c0_62 = arith.constant 0 : index
    %105 = vector.load %arg4[%c18, %c0_61, %c0_62] : memref<25x32x16xbf16, #tpu.memory_space<vmem>>, vector<1x32x16xbf16>
    %106 = vector.shape_cast %105 : vector<1x32x16xbf16> to vector<32x16xbf16>
    %107 = vector.extract_strided_slice %15 {offsets = [0, 45], sizes = [16, 528], strides = [1, 1]} : vector<16x640xbf16> to vector<16x528xbf16>
    %cst_63 = arith.constant dense<0.000000e+00> : vector<32x528xf32>
    %108 = tpu.matmul %106, %107, %cst_63 {dimension_numbers = #tpu.dot_dimension_numbers<[1], [0], [0], [1], [0, 0, 1, 1], [], []>} : vector<32x16xbf16>, vector<16x528xbf16>, vector<32x528xf32> -> vector<32x528xf32>
    %109 = arith.addf %104, %108 : vector<32x528xf32>
    %c19 = arith.constant 19 : index
    %c0_64 = arith.constant 0 : index
    %c0_65 = arith.constant 0 : index
    %110 = vector.load %arg4[%c19, %c0_64, %c0_65] : memref<25x32x16xbf16, #tpu.memory_space<vmem>>, vector<1x32x16xbf16>
    %111 = vector.shape_cast %110 : vector<1x32x16xbf16> to vector<32x16xbf16>
    %112 = vector.extract_strided_slice %15 {offsets = [0, 46], sizes = [16, 528], strides = [1, 1]} : vector<16x640xbf16> to vector<16x528xbf16>
    %cst_66 = arith.constant dense<0.000000e+00> : vector<32x528xf32>
    %113 = tpu.matmul %111, %112, %cst_66 {dimension_numbers = #tpu.dot_dimension_numbers<[1], [0], [0], [1], [0, 0, 1, 1], [], []>} : vector<32x16xbf16>, vector<16x528xbf16>, vector<32x528xf32> -> vector<32x528xf32>
    %114 = arith.addf %109, %113 : vector<32x528xf32>
    %c20 = arith.constant 20 : index
    %c0_67 = arith.constant 0 : index
    %c0_68 = arith.constant 0 : index
    %115 = vector.load %arg4[%c20, %c0_67, %c0_68] : memref<25x32x16xbf16, #tpu.memory_space<vmem>>, vector<1x32x16xbf16>
    %116 = vector.shape_cast %115 : vector<1x32x16xbf16> to vector<32x16xbf16>
    %117 = vector.extract_strided_slice %15 {offsets = [0, 56], sizes = [16, 528], strides = [1, 1]} : vector<16x640xbf16> to vector<16x528xbf16>
    %cst_69 = arith.constant dense<0.000000e+00> : vector<32x528xf32>
    %118 = tpu.matmul %116, %117, %cst_69 {dimension_numbers = #tpu.dot_dimension_numbers<[1], [0], [0], [1], [0, 0, 1, 1], [], []>} : vector<32x16xbf16>, vector<16x528xbf16>, vector<32x528xf32> -> vector<32x528xf32>
    %119 = arith.addf %114, %118 : vector<32x528xf32>
    %c21 = arith.constant 21 : index
    %c0_70 = arith.constant 0 : index
    %c0_71 = arith.constant 0 : index
    %120 = vector.load %arg4[%c21, %c0_70, %c0_71] : memref<25x32x16xbf16, #tpu.memory_space<vmem>>, vector<1x32x16xbf16>
    %121 = vector.shape_cast %120 : vector<1x32x16xbf16> to vector<32x16xbf16>
    %122 = vector.extract_strided_slice %15 {offsets = [0, 57], sizes = [16, 528], strides = [1, 1]} : vector<16x640xbf16> to vector<16x528xbf16>
    %cst_72 = arith.constant dense<0.000000e+00> : vector<32x528xf32>
    %123 = tpu.matmul %121, %122, %cst_72 {dimension_numbers = #tpu.dot_dimension_numbers<[1], [0], [0], [1], [0, 0, 1, 1], [], []>} : vector<32x16xbf16>, vector<16x528xbf16>, vector<32x528xf32> -> vector<32x528xf32>
    %124 = arith.addf %119, %123 : vector<32x528xf32>
    %c22 = arith.constant 22 : index
    %c0_73 = arith.constant 0 : index
    %c0_74 = arith.constant 0 : index
    %125 = vector.load %arg4[%c22, %c0_73, %c0_74] : memref<25x32x16xbf16, #tpu.memory_space<vmem>>, vector<1x32x16xbf16>
    %126 = vector.shape_cast %125 : vector<1x32x16xbf16> to vector<32x16xbf16>
    %127 = vector.extract_strided_slice %15 {offsets = [0, 58], sizes = [16, 528], strides = [1, 1]} : vector<16x640xbf16> to vector<16x528xbf16>
    %cst_75 = arith.constant dense<0.000000e+00> : vector<32x528xf32>
    %128 = tpu.matmul %126, %127, %cst_75 {dimension_numbers = #tpu.dot_dimension_numbers<[1], [0], [0], [1], [0, 0, 1, 1], [], []>} : vector<32x16xbf16>, vector<16x528xbf16>, vector<32x528xf32> -> vector<32x528xf32>
    %129 = arith.addf %124, %128 : vector<32x528xf32>
    %c23 = arith.constant 23 : index
    %c0_76 = arith.constant 0 : index
    %c0_77 = arith.constant 0 : index
    %130 = vector.load %arg4[%c23, %c0_76, %c0_77] : memref<25x32x16xbf16, #tpu.memory_space<vmem>>, vector<1x32x16xbf16>
    %131 = vector.shape_cast %130 : vector<1x32x16xbf16> to vector<32x16xbf16>
    %132 = vector.extract_strided_slice %15 {offsets = [0, 59], sizes = [16, 528], strides = [1, 1]} : vector<16x640xbf16> to vector<16x528xbf16>
    %cst_78 = arith.constant dense<0.000000e+00> : vector<32x528xf32>
    %133 = tpu.matmul %131, %132, %cst_78 {dimension_numbers = #tpu.dot_dimension_numbers<[1], [0], [0], [1], [0, 0, 1, 1], [], []>} : vector<32x16xbf16>, vector<16x528xbf16>, vector<32x528xf32> -> vector<32x528xf32>
    %134 = arith.addf %129, %133 : vector<32x528xf32>
    %c24 = arith.constant 24 : index
    %c0_79 = arith.constant 0 : index
    %c0_80 = arith.constant 0 : index
    %135 = vector.load %arg4[%c24, %c0_79, %c0_80] : memref<25x32x16xbf16, #tpu.memory_space<vmem>>, vector<1x32x16xbf16>
    %136 = vector.shape_cast %135 : vector<1x32x16xbf16> to vector<32x16xbf16>
    %137 = vector.extract_strided_slice %15 {offsets = [0, 60], sizes = [16, 528], strides = [1, 1]} : vector<16x640xbf16> to vector<16x528xbf16>
    %cst_81 = arith.constant dense<0.000000e+00> : vector<32x528xf32>
    %138 = tpu.matmul %136, %137, %cst_81 {dimension_numbers = #tpu.dot_dimension_numbers<[1], [0], [0], [1], [0, 0, 1, 1], [], []>} : vector<32x16xbf16>, vector<16x528xbf16>, vector<32x528xf32> -> vector<32x528xf32>
    %139 = arith.addf %134, %138 : vector<32x528xf32>
    %c0_82 = arith.constant 0 : index
    %c0_83 = arith.constant 0 : index
    %140 = vector.load %arg5[%c0_82, %c0_83] : memref<32x1xf32, #tpu.memory_space<vmem>>, vector<32x1xf32>
    %141 = vector.broadcast %140 : vector<32x1xf32> to vector<32x528xf32>
    %142 = arith.addf %139, %141 : vector<32x528xf32>
    %143 = vector.extract_strided_slice %142 {offsets = [0, 0], sizes = [32, 512], strides = [1, 1]} : vector<32x528xf32> to vector<32x512xf32>
    %144 = vector.extract_strided_slice %142 {offsets = [0, 1], sizes = [32, 512], strides = [1, 1]} : vector<32x528xf32> to vector<32x512xf32>
    %145 = arith.maximumf %143, %144 : vector<32x512xf32>
    %146 = vector.extract_strided_slice %142 {offsets = [0, 14], sizes = [32, 512], strides = [1, 1]} : vector<32x528xf32> to vector<32x512xf32>
    %147 = vector.extract_strided_slice %142 {offsets = [0, 15], sizes = [32, 512], strides = [1, 1]} : vector<32x528xf32> to vector<32x512xf32>
    %148 = arith.maximumf %146, %147 : vector<32x512xf32>
    %149 = arith.maximumf %145, %148 : vector<32x512xf32>
    %cst_84 = arith.constant 0.000000e+00 : f32
    %150 = vector.broadcast %cst_84 : f32 to vector<32x512xf32>
    %151 = arith.maximumf %149, %150 : vector<32x512xf32>
    %152 = arith.truncf %151 : vector<32x512xf32> to vector<32x512xbf16>
    %c0_85 = arith.constant 0 : index
    %c0_86 = arith.constant 0 : index
    %153 = vector.load %arg6[%c0_85, %c0_86] : memref<512x50xbf16, #tpu.memory_space<vmem>>, vector<512x50xbf16>
    %cst_87 = arith.constant dense<0.000000e+00> : vector<32x50xf32>
    %154 = tpu.matmul %152, %153, %cst_87 {dimension_numbers = #tpu.dot_dimension_numbers<[1], [0], [0], [1], [0, 0, 1, 1], [], []>} : vector<32x512xbf16>, vector<512x50xbf16>, vector<32x50xf32> -> vector<32x50xf32>
    %155 = arith.truncf %154 : vector<32x50xf32> to vector<32x50xbf16>
    %c0_88 = arith.constant 0 : index
    %c0_89 = arith.constant 0 : index
    %c0_90 = arith.constant 0 : index
    %156 = vector.load %arg7[%c0_88, %c0_89, %c0_90] : memref<25x120x32xbf16, #tpu.memory_space<vmem>>, vector<1x120x32xbf16>
    %157 = vector.shape_cast %156 : vector<1x120x32xbf16> to vector<120x32xbf16>
    %158 = vector.extract_strided_slice %155 {offsets = [0, 0], sizes = [32, 2], strides = [1, 1]} : vector<32x50xbf16> to vector<32x2xbf16>
    %cst_91 = arith.constant dense<0.000000e+00> : vector<120x2xf32>
    %159 = tpu.matmul %157, %158, %cst_91 {dimension_numbers = #tpu.dot_dimension_numbers<[1], [0], [0], [1], [0, 0, 1, 1], [], []>} : vector<120x32xbf16>, vector<32x2xbf16>, vector<120x2xf32> -> vector<120x2xf32>
    %c1_92 = arith.constant 1 : index
    %c0_93 = arith.constant 0 : index
    %c0_94 = arith.constant 0 : index
    %160 = vector.load %arg7[%c1_92, %c0_93, %c0_94] : memref<25x120x32xbf16, #tpu.memory_space<vmem>>, vector<1x120x32xbf16>
    %161 = vector.shape_cast %160 : vector<1x120x32xbf16> to vector<120x32xbf16>
    %162 = vector.extract_strided_slice %155 {offsets = [0, 2], sizes = [32, 2], strides = [1, 1]} : vector<32x50xbf16> to vector<32x2xbf16>
    %cst_95 = arith.constant dense<0.000000e+00> : vector<120x2xf32>
    %163 = tpu.matmul %161, %162, %cst_95 {dimension_numbers = #tpu.dot_dimension_numbers<[1], [0], [0], [1], [0, 0, 1, 1], [], []>} : vector<120x32xbf16>, vector<32x2xbf16>, vector<120x2xf32> -> vector<120x2xf32>
    %164 = arith.addf %159, %163 : vector<120x2xf32>
    %c2_96 = arith.constant 2 : index
    %c0_97 = arith.constant 0 : index
    %c0_98 = arith.constant 0 : index
    %165 = vector.load %arg7[%c2_96, %c0_97, %c0_98] : memref<25x120x32xbf16, #tpu.memory_space<vmem>>, vector<1x120x32xbf16>
    %166 = vector.shape_cast %165 : vector<1x120x32xbf16> to vector<120x32xbf16>
    %167 = vector.extract_strided_slice %155 {offsets = [0, 4], sizes = [32, 2], strides = [1, 1]} : vector<32x50xbf16> to vector<32x2xbf16>
    %cst_99 = arith.constant dense<0.000000e+00> : vector<120x2xf32>
    %168 = tpu.matmul %166, %167, %cst_99 {dimension_numbers = #tpu.dot_dimension_numbers<[1], [0], [0], [1], [0, 0, 1, 1], [], []>} : vector<120x32xbf16>, vector<32x2xbf16>, vector<120x2xf32> -> vector<120x2xf32>
    %169 = arith.addf %164, %168 : vector<120x2xf32>
    %c3_100 = arith.constant 3 : index
    %c0_101 = arith.constant 0 : index
    %c0_102 = arith.constant 0 : index
    %170 = vector.load %arg7[%c3_100, %c0_101, %c0_102] : memref<25x120x32xbf16, #tpu.memory_space<vmem>>, vector<1x120x32xbf16>
    %171 = vector.shape_cast %170 : vector<1x120x32xbf16> to vector<120x32xbf16>
    %172 = vector.extract_strided_slice %155 {offsets = [0, 6], sizes = [32, 2], strides = [1, 1]} : vector<32x50xbf16> to vector<32x2xbf16>
    %cst_103 = arith.constant dense<0.000000e+00> : vector<120x2xf32>
    %173 = tpu.matmul %171, %172, %cst_103 {dimension_numbers = #tpu.dot_dimension_numbers<[1], [0], [0], [1], [0, 0, 1, 1], [], []>} : vector<120x32xbf16>, vector<32x2xbf16>, vector<120x2xf32> -> vector<120x2xf32>
    %174 = arith.addf %169, %173 : vector<120x2xf32>
    %c4_104 = arith.constant 4 : index
    %c0_105 = arith.constant 0 : index
    %c0_106 = arith.constant 0 : index
    %175 = vector.load %arg7[%c4_104, %c0_105, %c0_106] : memref<25x120x32xbf16, #tpu.memory_space<vmem>>, vector<1x120x32xbf16>
    %176 = vector.shape_cast %175 : vector<1x120x32xbf16> to vector<120x32xbf16>
    %177 = vector.extract_strided_slice %155 {offsets = [0, 8], sizes = [32, 2], strides = [1, 1]} : vector<32x50xbf16> to vector<32x2xbf16>
    %cst_107 = arith.constant dense<0.000000e+00> : vector<120x2xf32>
    %178 = tpu.matmul %176, %177, %cst_107 {dimension_numbers = #tpu.dot_dimension_numbers<[1], [0], [0], [1], [0, 0, 1, 1], [], []>} : vector<120x32xbf16>, vector<32x2xbf16>, vector<120x2xf32> -> vector<120x2xf32>
    %179 = arith.addf %174, %178 : vector<120x2xf32>
    %c5_108 = arith.constant 5 : index
    %c0_109 = arith.constant 0 : index
    %c0_110 = arith.constant 0 : index
    %180 = vector.load %arg7[%c5_108, %c0_109, %c0_110] : memref<25x120x32xbf16, #tpu.memory_space<vmem>>, vector<1x120x32xbf16>
    %181 = vector.shape_cast %180 : vector<1x120x32xbf16> to vector<120x32xbf16>
    %182 = vector.extract_strided_slice %155 {offsets = [0, 10], sizes = [32, 2], strides = [1, 1]} : vector<32x50xbf16> to vector<32x2xbf16>
    %cst_111 = arith.constant dense<0.000000e+00> : vector<120x2xf32>
    %183 = tpu.matmul %181, %182, %cst_111 {dimension_numbers = #tpu.dot_dimension_numbers<[1], [0], [0], [1], [0, 0, 1, 1], [], []>} : vector<120x32xbf16>, vector<32x2xbf16>, vector<120x2xf32> -> vector<120x2xf32>
    %184 = arith.addf %179, %183 : vector<120x2xf32>
    %c6_112 = arith.constant 6 : index
    %c0_113 = arith.constant 0 : index
    %c0_114 = arith.constant 0 : index
    %185 = vector.load %arg7[%c6_112, %c0_113, %c0_114] : memref<25x120x32xbf16, #tpu.memory_space<vmem>>, vector<1x120x32xbf16>
    %186 = vector.shape_cast %185 : vector<1x120x32xbf16> to vector<120x32xbf16>
    %187 = vector.extract_strided_slice %155 {offsets = [0, 12], sizes = [32, 2], strides = [1, 1]} : vector<32x50xbf16> to vector<32x2xbf16>
    %cst_115 = arith.constant dense<0.000000e+00> : vector<120x2xf32>
    %188 = tpu.matmul %186, %187, %cst_115 {dimension_numbers = #tpu.dot_dimension_numbers<[1], [0], [0], [1], [0, 0, 1, 1], [], []>} : vector<120x32xbf16>, vector<32x2xbf16>, vector<120x2xf32> -> vector<120x2xf32>
    %189 = arith.addf %184, %188 : vector<120x2xf32>
    %c7_116 = arith.constant 7 : index
    %c0_117 = arith.constant 0 : index
    %c0_118 = arith.constant 0 : index
    %190 = vector.load %arg7[%c7_116, %c0_117, %c0_118] : memref<25x120x32xbf16, #tpu.memory_space<vmem>>, vector<1x120x32xbf16>
    %191 = vector.shape_cast %190 : vector<1x120x32xbf16> to vector<120x32xbf16>
    %192 = vector.extract_strided_slice %155 {offsets = [0, 14], sizes = [32, 2], strides = [1, 1]} : vector<32x50xbf16> to vector<32x2xbf16>
    %cst_119 = arith.constant dense<0.000000e+00> : vector<120x2xf32>
    %193 = tpu.matmul %191, %192, %cst_119 {dimension_numbers = #tpu.dot_dimension_numbers<[1], [0], [0], [1], [0, 0, 1, 1], [], []>} : vector<120x32xbf16>, vector<32x2xbf16>, vector<120x2xf32> -> vector<120x2xf32>
    %194 = arith.addf %189, %193 : vector<120x2xf32>
    %c8_120 = arith.constant 8 : index
    %c0_121 = arith.constant 0 : index
    %c0_122 = arith.constant 0 : index
    %195 = vector.load %arg7[%c8_120, %c0_121, %c0_122] : memref<25x120x32xbf16, #tpu.memory_space<vmem>>, vector<1x120x32xbf16>
    %196 = vector.shape_cast %195 : vector<1x120x32xbf16> to vector<120x32xbf16>
    %197 = vector.extract_strided_slice %155 {offsets = [0, 16], sizes = [32, 2], strides = [1, 1]} : vector<32x50xbf16> to vector<32x2xbf16>
    %cst_123 = arith.constant dense<0.000000e+00> : vector<120x2xf32>
    %198 = tpu.matmul %196, %197, %cst_123 {dimension_numbers = #tpu.dot_dimension_numbers<[1], [0], [0], [1], [0, 0, 1, 1], [], []>} : vector<120x32xbf16>, vector<32x2xbf16>, vector<120x2xf32> -> vector<120x2xf32>
    %199 = arith.addf %194, %198 : vector<120x2xf32>
    %c9_124 = arith.constant 9 : index
    %c0_125 = arith.constant 0 : index
    %c0_126 = arith.constant 0 : index
    %200 = vector.load %arg7[%c9_124, %c0_125, %c0_126] : memref<25x120x32xbf16, #tpu.memory_space<vmem>>, vector<1x120x32xbf16>
    %201 = vector.shape_cast %200 : vector<1x120x32xbf16> to vector<120x32xbf16>
    %202 = vector.extract_strided_slice %155 {offsets = [0, 18], sizes = [32, 2], strides = [1, 1]} : vector<32x50xbf16> to vector<32x2xbf16>
    %cst_127 = arith.constant dense<0.000000e+00> : vector<120x2xf32>
    %203 = tpu.matmul %201, %202, %cst_127 {dimension_numbers = #tpu.dot_dimension_numbers<[1], [0], [0], [1], [0, 0, 1, 1], [], []>} : vector<120x32xbf16>, vector<32x2xbf16>, vector<120x2xf32> -> vector<120x2xf32>
    %204 = arith.addf %199, %203 : vector<120x2xf32>
    %c10_128 = arith.constant 10 : index
    %c0_129 = arith.constant 0 : index
    %c0_130 = arith.constant 0 : index
    %205 = vector.load %arg7[%c10_128, %c0_129, %c0_130] : memref<25x120x32xbf16, #tpu.memory_space<vmem>>, vector<1x120x32xbf16>
    %206 = vector.shape_cast %205 : vector<1x120x32xbf16> to vector<120x32xbf16>
    %207 = vector.extract_strided_slice %155 {offsets = [0, 20], sizes = [32, 2], strides = [1, 1]} : vector<32x50xbf16> to vector<32x2xbf16>
    %cst_131 = arith.constant dense<0.000000e+00> : vector<120x2xf32>
    %208 = tpu.matmul %206, %207, %cst_131 {dimension_numbers = #tpu.dot_dimension_numbers<[1], [0], [0], [1], [0, 0, 1, 1], [], []>} : vector<120x32xbf16>, vector<32x2xbf16>, vector<120x2xf32> -> vector<120x2xf32>
    %209 = arith.addf %204, %208 : vector<120x2xf32>
    %c11_132 = arith.constant 11 : index
    %c0_133 = arith.constant 0 : index
    %c0_134 = arith.constant 0 : index
    %210 = vector.load %arg7[%c11_132, %c0_133, %c0_134] : memref<25x120x32xbf16, #tpu.memory_space<vmem>>, vector<1x120x32xbf16>
    %211 = vector.shape_cast %210 : vector<1x120x32xbf16> to vector<120x32xbf16>
    %212 = vector.extract_strided_slice %155 {offsets = [0, 22], sizes = [32, 2], strides = [1, 1]} : vector<32x50xbf16> to vector<32x2xbf16>
    %cst_135 = arith.constant dense<0.000000e+00> : vector<120x2xf32>
    %213 = tpu.matmul %211, %212, %cst_135 {dimension_numbers = #tpu.dot_dimension_numbers<[1], [0], [0], [1], [0, 0, 1, 1], [], []>} : vector<120x32xbf16>, vector<32x2xbf16>, vector<120x2xf32> -> vector<120x2xf32>
    %214 = arith.addf %209, %213 : vector<120x2xf32>
    %c12_136 = arith.constant 12 : index
    %c0_137 = arith.constant 0 : index
    %c0_138 = arith.constant 0 : index
    %215 = vector.load %arg7[%c12_136, %c0_137, %c0_138] : memref<25x120x32xbf16, #tpu.memory_space<vmem>>, vector<1x120x32xbf16>
    %216 = vector.shape_cast %215 : vector<1x120x32xbf16> to vector<120x32xbf16>
    %217 = vector.extract_strided_slice %155 {offsets = [0, 24], sizes = [32, 2], strides = [1, 1]} : vector<32x50xbf16> to vector<32x2xbf16>
    %cst_139 = arith.constant dense<0.000000e+00> : vector<120x2xf32>
    %218 = tpu.matmul %216, %217, %cst_139 {dimension_numbers = #tpu.dot_dimension_numbers<[1], [0], [0], [1], [0, 0, 1, 1], [], []>} : vector<120x32xbf16>, vector<32x2xbf16>, vector<120x2xf32> -> vector<120x2xf32>
    %219 = arith.addf %214, %218 : vector<120x2xf32>
    %c13_140 = arith.constant 13 : index
    %c0_141 = arith.constant 0 : index
    %c0_142 = arith.constant 0 : index
    %220 = vector.load %arg7[%c13_140, %c0_141, %c0_142] : memref<25x120x32xbf16, #tpu.memory_space<vmem>>, vector<1x120x32xbf16>
    %221 = vector.shape_cast %220 : vector<1x120x32xbf16> to vector<120x32xbf16>
    %222 = vector.extract_strided_slice %155 {offsets = [0, 26], sizes = [32, 2], strides = [1, 1]} : vector<32x50xbf16> to vector<32x2xbf16>
    %cst_143 = arith.constant dense<0.000000e+00> : vector<120x2xf32>
    %223 = tpu.matmul %221, %222, %cst_143 {dimension_numbers = #tpu.dot_dimension_numbers<[1], [0], [0], [1], [0, 0, 1, 1], [], []>} : vector<120x32xbf16>, vector<32x2xbf16>, vector<120x2xf32> -> vector<120x2xf32>
    %224 = arith.addf %219, %223 : vector<120x2xf32>
    %c14_144 = arith.constant 14 : index
    %c0_145 = arith.constant 0 : index
    %c0_146 = arith.constant 0 : index
    %225 = vector.load %arg7[%c14_144, %c0_145, %c0_146] : memref<25x120x32xbf16, #tpu.memory_space<vmem>>, vector<1x120x32xbf16>
    %226 = vector.shape_cast %225 : vector<1x120x32xbf16> to vector<120x32xbf16>
    %227 = vector.extract_strided_slice %155 {offsets = [0, 28], sizes = [32, 2], strides = [1, 1]} : vector<32x50xbf16> to vector<32x2xbf16>
    %cst_147 = arith.constant dense<0.000000e+00> : vector<120x2xf32>
    %228 = tpu.matmul %226, %227, %cst_147 {dimension_numbers = #tpu.dot_dimension_numbers<[1], [0], [0], [1], [0, 0, 1, 1], [], []>} : vector<120x32xbf16>, vector<32x2xbf16>, vector<120x2xf32> -> vector<120x2xf32>
    %229 = arith.addf %224, %228 : vector<120x2xf32>
    %c15_148 = arith.constant 15 : index
    %c0_149 = arith.constant 0 : index
    %c0_150 = arith.constant 0 : index
    %230 = vector.load %arg7[%c15_148, %c0_149, %c0_150] : memref<25x120x32xbf16, #tpu.memory_space<vmem>>, vector<1x120x32xbf16>
    %231 = vector.shape_cast %230 : vector<1x120x32xbf16> to vector<120x32xbf16>
    %232 = vector.extract_strided_slice %155 {offsets = [0, 30], sizes = [32, 2], strides = [1, 1]} : vector<32x50xbf16> to vector<32x2xbf16>
    %cst_151 = arith.constant dense<0.000000e+00> : vector<120x2xf32>
    %233 = tpu.matmul %231, %232, %cst_151 {dimension_numbers = #tpu.dot_dimension_numbers<[1], [0], [0], [1], [0, 0, 1, 1], [], []>} : vector<120x32xbf16>, vector<32x2xbf16>, vector<120x2xf32> -> vector<120x2xf32>
    %234 = arith.addf %229, %233 : vector<120x2xf32>
    %c16_152 = arith.constant 16 : index
    %c0_153 = arith.constant 0 : index
    %c0_154 = arith.constant 0 : index
    %235 = vector.load %arg7[%c16_152, %c0_153, %c0_154] : memref<25x120x32xbf16, #tpu.memory_space<vmem>>, vector<1x120x32xbf16>
    %236 = vector.shape_cast %235 : vector<1x120x32xbf16> to vector<120x32xbf16>
    %237 = vector.extract_strided_slice %155 {offsets = [0, 32], sizes = [32, 2], strides = [1, 1]} : vector<32x50xbf16> to vector<32x2xbf16>
    %cst_155 = arith.constant dense<0.000000e+00> : vector<120x2xf32>
    %238 = tpu.matmul %236, %237, %cst_155 {dimension_numbers = #tpu.dot_dimension_numbers<[1], [0], [0], [1], [0, 0, 1, 1], [], []>} : vector<120x32xbf16>, vector<32x2xbf16>, vector<120x2xf32> -> vector<120x2xf32>
    %239 = arith.addf %234, %238 : vector<120x2xf32>
    %c17_156 = arith.constant 17 : index
    %c0_157 = arith.constant 0 : index
    %c0_158 = arith.constant 0 : index
    %240 = vector.load %arg7[%c17_156, %c0_157, %c0_158] : memref<25x120x32xbf16, #tpu.memory_space<vmem>>, vector<1x120x32xbf16>
    %241 = vector.shape_cast %240 : vector<1x120x32xbf16> to vector<120x32xbf16>
    %242 = vector.extract_strided_slice %155 {offsets = [0, 34], sizes = [32, 2], strides = [1, 1]} : vector<32x50xbf16> to vector<32x2xbf16>
    %cst_159 = arith.constant dense<0.000000e+00> : vector<120x2xf32>
    %243 = tpu.matmul %241, %242, %cst_159 {dimension_numbers = #tpu.dot_dimension_numbers<[1], [0], [0], [1], [0, 0, 1, 1], [], []>} : vector<120x32xbf16>, vector<32x2xbf16>, vector<120x2xf32> -> vector<120x2xf32>
    %244 = arith.addf %239, %243 : vector<120x2xf32>
    %c18_160 = arith.constant 18 : index
    %c0_161 = arith.constant 0 : index
    %c0_162 = arith.constant 0 : index
    %245 = vector.load %arg7[%c18_160, %c0_161, %c0_162] : memref<25x120x32xbf16, #tpu.memory_space<vmem>>, vector<1x120x32xbf16>
    %246 = vector.shape_cast %245 : vector<1x120x32xbf16> to vector<120x32xbf16>
    %247 = vector.extract_strided_slice %155 {offsets = [0, 36], sizes = [32, 2], strides = [1, 1]} : vector<32x50xbf16> to vector<32x2xbf16>
    %cst_163 = arith.constant dense<0.000000e+00> : vector<120x2xf32>
    %248 = tpu.matmul %246, %247, %cst_163 {dimension_numbers = #tpu.dot_dimension_numbers<[1], [0], [0], [1], [0, 0, 1, 1], [], []>} : vector<120x32xbf16>, vector<32x2xbf16>, vector<120x2xf32> -> vector<120x2xf32>
    %249 = arith.addf %244, %248 : vector<120x2xf32>
    %c19_164 = arith.constant 19 : index
    %c0_165 = arith.constant 0 : index
    %c0_166 = arith.constant 0 : index
    %250 = vector.load %arg7[%c19_164, %c0_165, %c0_166] : memref<25x120x32xbf16, #tpu.memory_space<vmem>>, vector<1x120x32xbf16>
    %251 = vector.shape_cast %250 : vector<1x120x32xbf16> to vector<120x32xbf16>
    %252 = vector.extract_strided_slice %155 {offsets = [0, 38], sizes = [32, 2], strides = [1, 1]} : vector<32x50xbf16> to vector<32x2xbf16>
    %cst_167 = arith.constant dense<0.000000e+00> : vector<120x2xf32>
    %253 = tpu.matmul %251, %252, %cst_167 {dimension_numbers = #tpu.dot_dimension_numbers<[1], [0], [0], [1], [0, 0, 1, 1], [], []>} : vector<120x32xbf16>, vector<32x2xbf16>, vector<120x2xf32> -> vector<120x2xf32>
    %254 = arith.addf %249, %253 : vector<120x2xf32>
    %c20_168 = arith.constant 20 : index
    %c0_169 = arith.constant 0 : index
    %c0_170 = arith.constant 0 : index
    %255 = vector.load %arg7[%c20_168, %c0_169, %c0_170] : memref<25x120x32xbf16, #tpu.memory_space<vmem>>, vector<1x120x32xbf16>
    %256 = vector.shape_cast %255 : vector<1x120x32xbf16> to vector<120x32xbf16>
    %257 = vector.extract_strided_slice %155 {offsets = [0, 40], sizes = [32, 2], strides = [1, 1]} : vector<32x50xbf16> to vector<32x2xbf16>
    %cst_171 = arith.constant dense<0.000000e+00> : vector<120x2xf32>
    %258 = tpu.matmul %256, %257, %cst_171 {dimension_numbers = #tpu.dot_dimension_numbers<[1], [0], [0], [1], [0, 0, 1, 1], [], []>} : vector<120x32xbf16>, vector<32x2xbf16>, vector<120x2xf32> -> vector<120x2xf32>
    %259 = arith.addf %254, %258 : vector<120x2xf32>
    %c21_172 = arith.constant 21 : index
    %c0_173 = arith.constant 0 : index
    %c0_174 = arith.constant 0 : index
    %260 = vector.load %arg7[%c21_172, %c0_173, %c0_174] : memref<25x120x32xbf16, #tpu.memory_space<vmem>>, vector<1x120x32xbf16>
    %261 = vector.shape_cast %260 : vector<1x120x32xbf16> to vector<120x32xbf16>
    %262 = vector.extract_strided_slice %155 {offsets = [0, 42], sizes = [32, 2], strides = [1, 1]} : vector<32x50xbf16> to vector<32x2xbf16>
    %cst_175 = arith.constant dense<0.000000e+00> : vector<120x2xf32>
    %263 = tpu.matmul %261, %262, %cst_175 {dimension_numbers = #tpu.dot_dimension_numbers<[1], [0], [0], [1], [0, 0, 1, 1], [], []>} : vector<120x32xbf16>, vector<32x2xbf16>, vector<120x2xf32> -> vector<120x2xf32>
    %264 = arith.addf %259, %263 : vector<120x2xf32>
    %c22_176 = arith.constant 22 : index
    %c0_177 = arith.constant 0 : index
    %c0_178 = arith.constant 0 : index
    %265 = vector.load %arg7[%c22_176, %c0_177, %c0_178] : memref<25x120x32xbf16, #tpu.memory_space<vmem>>, vector<1x120x32xbf16>
    %266 = vector.shape_cast %265 : vector<1x120x32xbf16> to vector<120x32xbf16>
    %267 = vector.extract_strided_slice %155 {offsets = [0, 44], sizes = [32, 2], strides = [1, 1]} : vector<32x50xbf16> to vector<32x2xbf16>
    %cst_179 = arith.constant dense<0.000000e+00> : vector<120x2xf32>
    %268 = tpu.matmul %266, %267, %cst_179 {dimension_numbers = #tpu.dot_dimension_numbers<[1], [0], [0], [1], [0, 0, 1, 1], [], []>} : vector<120x32xbf16>, vector<32x2xbf16>, vector<120x2xf32> -> vector<120x2xf32>
    %269 = arith.addf %264, %268 : vector<120x2xf32>
    %c23_180 = arith.constant 23 : index
    %c0_181 = arith.constant 0 : index
    %c0_182 = arith.constant 0 : index
    %270 = vector.load %arg7[%c23_180, %c0_181, %c0_182] : memref<25x120x32xbf16, #tpu.memory_space<vmem>>, vector<1x120x32xbf16>
    %271 = vector.shape_cast %270 : vector<1x120x32xbf16> to vector<120x32xbf16>
    %272 = vector.extract_strided_slice %155 {offsets = [0, 46], sizes = [32, 2], strides = [1, 1]} : vector<32x50xbf16> to vector<32x2xbf16>
    %cst_183 = arith.constant dense<0.000000e+00> : vector<120x2xf32>
    %273 = tpu.matmul %271, %272, %cst_183 {dimension_numbers = #tpu.dot_dimension_numbers<[1], [0], [0], [1], [0, 0, 1, 1], [], []>} : vector<120x32xbf16>, vector<32x2xbf16>, vector<120x2xf32> -> vector<120x2xf32>
    %274 = arith.addf %269, %273 : vector<120x2xf32>
    %c24_184 = arith.constant 24 : index
    %c0_185 = arith.constant 0 : index
    %c0_186 = arith.constant 0 : index
    %275 = vector.load %arg7[%c24_184, %c0_185, %c0_186] : memref<25x120x32xbf16, #tpu.memory_space<vmem>>, vector<1x120x32xbf16>
    %276 = vector.shape_cast %275 : vector<1x120x32xbf16> to vector<120x32xbf16>
    %277 = vector.extract_strided_slice %155 {offsets = [0, 48], sizes = [32, 2], strides = [1, 1]} : vector<32x50xbf16> to vector<32x2xbf16>
    %cst_187 = arith.constant dense<0.000000e+00> : vector<120x2xf32>
    %278 = tpu.matmul %276, %277, %cst_187 {dimension_numbers = #tpu.dot_dimension_numbers<[1], [0], [0], [1], [0, 0, 1, 1], [], []>} : vector<120x32xbf16>, vector<32x2xbf16>, vector<120x2xf32> -> vector<120x2xf32>
    %279 = arith.addf %274, %278 : vector<120x2xf32>
    %c0_188 = arith.constant 0 : index
    %c0_189 = arith.constant 0 : index
    %280 = vector.load %arg8[%c0_188, %c0_189] : memref<120x1xf32, #tpu.memory_space<vmem>>, vector<120x1xf32>
    %281 = vector.broadcast %280 : vector<120x1xf32> to vector<120x2xf32>
    %282 = arith.addf %279, %281 : vector<120x2xf32>
    %cst_190 = arith.constant 0.000000e+00 : f32
    %283 = vector.broadcast %cst_190 : f32 to vector<120x2xf32>
    %284 = arith.maximumf %282, %283 : vector<120x2xf32>
    %285 = arith.truncf %284 : vector<120x2xf32> to vector<120x2xbf16>
    %c0_191 = arith.constant 0 : index
    %c0_192 = arith.constant 0 : index
    %286 = vector.load %arg9[%c0_191, %c0_192] : memref<84x120xbf16, #tpu.memory_space<vmem>>, vector<84x120xbf16>
    %cst_193 = arith.constant dense<0.000000e+00> : vector<84x2xf32>
    %287 = tpu.matmul %286, %285, %cst_193 {dimension_numbers = #tpu.dot_dimension_numbers<[1], [0], [0], [1], [0, 0, 1, 1], [], []>} : vector<84x120xbf16>, vector<120x2xbf16>, vector<84x2xf32> -> vector<84x2xf32>
    %c0_194 = arith.constant 0 : index
    %c0_195 = arith.constant 0 : index
    %288 = vector.load %arg10[%c0_194, %c0_195] : memref<84x1xf32, #tpu.memory_space<vmem>>, vector<84x1xf32>
    %289 = vector.broadcast %288 : vector<84x1xf32> to vector<84x2xf32>
    %290 = arith.addf %287, %289 : vector<84x2xf32>
    %cst_196 = arith.constant 0.000000e+00 : f32
    %291 = vector.broadcast %cst_196 : f32 to vector<84x2xf32>
    %292 = arith.maximumf %290, %291 : vector<84x2xf32>
    %293 = arith.truncf %292 : vector<84x2xf32> to vector<84x2xbf16>
    %c0_197 = arith.constant 0 : index
    %c0_198 = arith.constant 0 : index
    %294 = vector.load %arg11[%c0_197, %c0_198] : memref<10x84xbf16, #tpu.memory_space<vmem>>, vector<10x84xbf16>
    %cst_199 = arith.constant dense<0.000000e+00> : vector<10x2xf32>
    %295 = tpu.matmul %294, %293, %cst_199 {dimension_numbers = #tpu.dot_dimension_numbers<[1], [0], [0], [1], [0, 0, 1, 1], [], []>} : vector<10x84xbf16>, vector<84x2xbf16>, vector<10x2xf32> -> vector<10x2xf32>
    %c0_200 = arith.constant 0 : index
    %c0_201 = arith.constant 0 : index
    %296 = vector.load %arg12[%c0_200, %c0_201] : memref<10x1xf32, #tpu.memory_space<vmem>>, vector<10x1xf32>
    %297 = vector.broadcast %296 : vector<10x1xf32> to vector<10x2xf32>
    %298 = arith.addf %295, %297 : vector<10x2xf32>
    %c0_202 = arith.constant 0 : index
    %c0_203 = arith.constant 0 : index
    %299 = vector.load %arg13[%c0_202, %c0_203] : memref<10x2xf32, #tpu.memory_space<vmem>>, vector<10x2xf32>
    tpu.vector_store %arg13[%c0_202, %c0_203], %298 {strides = array<i32>} : memref<10x2xf32, #tpu.memory_space<vmem>>, vector<10x2xf32>,
    return
  }
  func.func @transform_0(%arg0: i32) -> (i32, i32) {
    %c0_i32 = arith.constant 0 : i32
    %c0_i32_0 = arith.constant 0 : i32
    %c0_i32_1 = arith.constant 0 : i32
    return %c0_i32, %c0_i32_0 : i32, i32
  }
  func.func @transform_1(%arg0: i32) -> (i32, i32) {
    %c0_i32 = arith.constant 0 : i32
    %c0_i32_0 = arith.constant 0 : i32
    %c0_i32_1 = arith.constant 0 : i32
    return %c0_i32, %c0_i32_0 : i32, i32
  }
  func.func @transform_2(%arg0: i32) -> (i32, i32) {
    %c0_i32 = arith.constant 0 : i32
    %c0_i32_0 = arith.constant 0 : i32
    %c0_i32_1 = arith.constant 0 : i32
    return %c0_i32, %c0_i32_0 : i32, i32
  }
  func.func @transform_3(%arg0: i32) -> (i32, i32, i32) {
    %c0_i32 = arith.constant 0 : i32
    %c0_i32_0 = arith.constant 0 : i32
    %c0_i32_1 = arith.constant 0 : i32
    %c0_i32_2 = arith.constant 0 : i32
    return %c0_i32, %c0_i32_0, %c0_i32_1 : i32, i32, i32
  }
  func.func @transform_4(%arg0: i32) -> (i32, i32) {
    %c0_i32 = arith.constant 0 : i32
    %c0_i32_0 = arith.constant 0 : i32
    %c0_i32_1 = arith.constant 0 : i32
    return %c0_i32, %c0_i32_0 : i32, i32
  }
  func.func @transform_5(%arg0: i32) -> (i32, i32) {
    %c0_i32 = arith.constant 0 : i32
    %c0_i32_0 = arith.constant 0 : i32
    %c0_i32_1 = arith.constant 0 : i32
    return %c0_i32, %c0_i32_0 : i32, i32
  }
  func.func @transform_6(%arg0: i32) -> (i32, i32, i32) {
    %c0_i32 = arith.constant 0 : i32
    %c0_i32_0 = arith.constant 0 : i32
    %c0_i32_1 = arith.constant 0 : i32
    %c0_i32_2 = arith.constant 0 : i32
    return %c0_i32, %c0_i32_0, %c0_i32_1 : i32, i32, i32
  }
  func.func @transform_7(%arg0: i32) -> (i32, i32) {
    %c0_i32 = arith.constant 0 : i32
    %c0_i32_0 = arith.constant 0 : i32
    %c0_i32_1 = arith.constant 0 : i32
    return %c0_i32, %c0_i32_0 : i32, i32
  }
  func.func @transform_8(%arg0: i32) -> (i32, i32) {
    %c0_i32 = arith.constant 0 : i32
    %c0_i32_0 = arith.constant 0 : i32
    %c0_i32_1 = arith.constant 0 : i32
    return %c0_i32, %c0_i32_0 : i32, i32
  }
  func.func @transform_9(%arg0: i32) -> (i32, i32) {
    %c0_i32 = arith.constant 0 : i32
    %c0_i32_0 = arith.constant 0 : i32
    %c0_i32_1 = arith.constant 0 : i32
    return %c0_i32, %c0_i32_0 : i32, i32
  }
  func.func @transform_10(%arg0: i32) -> (i32, i32) {
    %c0_i32 = arith.constant 0 : i32
    %c0_i32_0 = arith.constant 0 : i32
    %c0_i32_1 = arith.constant 0 : i32
    return %c0_i32, %c0_i32_0 : i32, i32
  }
  func.func @transform_11(%arg0: i32) -> (i32, i32) {
    %c0_i32 = arith.constant 0 : i32
    %c0_i32_0 = arith.constant 0 : i32
    %c0_i32_1 = arith.constant 0 : i32
    return %c0_i32, %c0_i32_0 : i32, i32
  }
  func.func @transform_12(%arg0: i32) -> (i32, i32) {
    %c0_i32 = arith.constant 0 : i32
    %c0_i32_0 = arith.constant 0 : i32
    %c0_i32_1 = arith.constant 0 : i32
    return %c0_i32, %c0_i32_0 : i32, i32
  }
}

</mosaic_0001>

<bundles_post_ra>
// kernel: lenet_forward.1
= control target key start
LH: loop header
LB: loop body
LE: loop exit
PB: predicated region body
PF: predicated region fallthrough
CT: control target
= control target key end

     0   :  { %vm758_vm0 = vcmask 523264   ;;  %vm1324_vm1 = vcmask 1039360   ;;  %vm1334_vm2 = vcmask 130048   ;;  %s12746_s29 = smov 124   ;;  %s12747_s30 = smov 114   ;;  %vm1577_vm3 = vcmask 1031168   ;;  %s17521_s0 = inlined_call_operand.vmem [shape: bf16[320,640], index: 0, kind: input, shape index: {}]   ;;  %s17522_s1 = inlined_call_operand.vmem [shape: bf16[64,320], index: 1, kind: input, shape index: {}]   ;;  %s17523_s2 = inlined_call_operand.vmem [shape: f32[16,1], index: 2, kind: input, shape index: {}]   ;;  %s17524_s3 = inlined_call_operand.vmem [shape: bf16[25,32,16], index: 3, kind: input, shape index: {}]   ;;  %s17525_s4 = inlined_call_operand.vmem [shape: f32[32,1], index: 4, kind: input, shape index: {}]   ;;  %s17526_s5 = inlined_call_operand.vmem [shape: bf16[512,50], index: 5, kind: input, shape index: {}]   ;;  %s17527_s6 = inlined_call_operand.vmem [shape: bf16[25,120,32], index: 6, kind: input, shape index: {}]   ;;  %s17528_s7 = inlined_call_operand.vmem [shape: f32[120,1], index: 7, kind: input, shape index: {}]   ;;  %s17529_s9 = inlined_call_operand.vmem [shape: f32[84,1], index: 9, kind: input, shape index: {}]   ;;  %s17530_s11 = inlined_call_operand.vmem [shape: f32[10,1], index: 11, kind: input, shape index: {}]   ;;  %s17531_s8 = inlined_call_operand.vmem [shape: bf16[84,120], index: 8, kind: input, shape index: {}]   ;;  %s17532_s10 = inlined_call_operand.vmem [shape: bf16[10,84], index: 10, kind: input, shape index: {}]   ;;  %s17533_s12 = inlined_call_operand.vmem [shape: f32[10,2], index: 12, kind: output, shape index: {}]  }
   0x1   :  { %v9971_v0 = vld [vmem:[%s17521_s0 + $0x118] sm:$0xf]  ;;  %v12263_v1 = vld [vmem:[%s17521_s0 + $0x128] sm:$0xf0]  ;;  %v9951_v9 = vld [vmem:[%s17521_s0 + $0xf0] sm:$0xf] }
   0x2   :  { %v10131_v2 = vld [vmem:[%s17521_s0 + $0x258] sm:$0xf]  ;;  %v9972_v3 = vor.u32 %v12263_v1, %v9971_v0  ;;  %v12303_v4 = vld [vmem:[%s17521_s0 + $0x268] sm:$0xf0]  ;;  %v12258_v10 = vld [vmem:[%s17521_s0 + $0x100] sm:$0xf0] }
   0x3   :  { %v10211_v5 = vld [vmem:[%s17521_s0 + $0x2f8] sm:$0xf]  ;;  %v12323_v6 = vld [vmem:[%s17521_s0 + $0x308] sm:$0xf0]  ;;  %v10132_v7 = vor.u32 %v12303_v4, %v10131_v2  ;;  %v10111_v11 = vld [vmem:[%s17521_s0 + $0x230] sm:$0xf]  ;;  %v9952_v12 = vor.u32 %v12258_v10, %v9951_v9 }
   0x4   :  { %v12863_v8 = vor.u32 %v12323_v6, %v10211_v5  ;;  %771 = vmatpush.bf16.msra.mxu0 %v9972_v3  ;;  %v12298_v13 = vld [vmem:[%s17521_s0 + $0x240] sm:$0xf0]  ;;  %v10191_v14 = vld [vmem:[%s17521_s0 + $0x2d0] sm:$0xf]  ;;  %v9931_v18 = vld [vmem:[%s17521_s0 + $0xc8] sm:$0xf] }
   0x5   :  { %v12318_v15 = vld [vmem:[%s17521_s0 + $0x2e0] sm:$0xf0]  ;;  %800 = vmatpush.bf16.msra.mxu1 %v10132_v7  ;;  %v10112_v16 = vor.u32 %v12298_v13, %v10111_v11  ;;  %v12253_v19 = vld [vmem:[%s17521_s0 + $0xd8] sm:$0xf0]  ;;  %v10091_v20 = vld [vmem:[%s17521_s0 + $0x208] sm:$0xf] }
   0x6   :  { %12589 = vmatpush.bf16.msra.mxu2 %v12863_v8  ;;  %v12884_v17 = vor.u32 %v12318_v15, %v10191_v14  ;;  %v12293_v21 = vld [vmem:[%s17521_s0 + $0x218] sm:$0xf0]  ;;  %v10171_v22 = vld [vmem:[%s17521_s0 + $0x2a8] sm:$0xf]  ;;  %v9932_v24 = vor.u32 %v12253_v19, %v9931_v18  ;;  %v9911_v27 = vld [vmem:[%s17521_s0 + $0xa0] sm:$0xf] }
   0x7   :  { %v12313_v23 = vld [vmem:[%s17521_s0 + $0x2b8] sm:$0xf0]  ;;  %v10092_v25 = vor.u32 %v12293_v21, %v10091_v20  ;;  %v12248_v28 = vld [vmem:[%s17521_s0 + $0xb0] sm:$0xf0]  ;;  %v10071_v29 = vld [vmem:[%s17521_s0 + $0x1e0] sm:$0xf] }
   0x8   :  { %772 = vmatpush.bf16.msra.mxu0 %v9952_v12  ;;  %v12905_v26 = vor.u32 %v12313_v23, %v10171_v22  ;;  %v12288_v30 = vld [vmem:[%s17521_s0 + $0x1f0] sm:$0xf0]  ;;  %v10151_v31 = vld [vmem:[%s17521_s0 + $0x280] sm:$0xf]  ;;  %v12301_v33 = vld [vmem:[%s17521_s0 + $0x25c] sm:$0xf]  ;;  %v9912_v35 = vor.u32 %v12248_v28, %v9911_v27 }
   0x9   :  { %801 = vmatpush.bf16.msra.mxu1 %v10112_v16  ;;  %v12308_v32 = vld [vmem:[%s17521_s0 + $0x290] sm:$0xf0]  ;;  %v10133_v34 = vld [vmem:[%s17521_s0 + $0x26c] sm:$0xf0]  ;;  %v9815_v36 = vld [vmem:[%s17522_s1 + $0x38] sm:$0xf]  ;;  %v10072_v37 = vor.u32 %v12288_v30, %v10071_v29 }
   0xa   :  { %12590 = vmatpush.bf16.msra.mxu2 %v12884_v17  ;;  %v12935_v38 = vor.u32 %v12308_v32, %v10151_v31  ;;  %v12222_v39 = vld [vmem:[%s17522_s1 + $0x40] sm:$0xf0]  ;;  %v9891_v40 = vld [vmem:[%s17521_s0 + $0x78] sm:$0xf]  ;;  %v12243_v41 = vld [vmem:[%s17521_s0 + $0x88] sm:$0xf0]  ;;  %v10136_v44 = vor.u32 %v12301_v33, %v10133_v34 }
   0xb   :  { %v10051_v42 = vld [vmem:[%s17521_s0 + $0x1b8] sm:$0xf]  ;;  %v12283_v43 = vld [vmem:[%s17521_s0 + $0x1c8] sm:$0xf0]  ;;  %v12296_v45 = vld [vmem:[%s17521_s0 + $0x234] sm:$0xf]  ;;  %v12958_v47 = vor.u32 %v12222_v39, %v9815_v36  ;;  %v9892_v48 = vor.u32 %v12243_v41, %v9891_v40 }
   0xc   :  { %773 = vmatpush.bf16.msra.mxu0 %v9932_v24  ;;  %v10113_v46 = vld [vmem:[%s17521_s0 + $0x244] sm:$0xf0]  ;;  %v10052_v49 = vor.u32 %v12283_v43, %v10051_v42  ;;  %v9871_v50 = vld [vmem:[%s17521_s0 + $0x50] sm:$0xf]  ;;  %v12238_v51 = vld [vmem:[%s17521_s0 + $0x60] sm:$0xf0] }
   0xd   :  { %802 = vmatpush.bf16.msra.mxu1 %v10092_v25  ;;  %v10031_v52 = vld [vmem:[%s17521_s0 + $0x190] sm:$0xf]  ;;  %v12278_v53 = vld [vmem:[%s17521_s0 + $0x1a0] sm:$0xf0]  ;;  %v10116_v54 = vor.u32 %v12296_v45, %v10113_v46  ;;  %v12291_v55 = vld [vmem:[%s17521_s0 + $0x20c] sm:$0xf]  ;;  %v9872_v57 = vor.u32 %v12238_v51, %v9871_v50 }
   0xe   :  { %12591 = vmatpush.bf16.msra.mxu2 %v12905_v26  ;;  %v10093_v56 = vld [vmem:[%s17521_s0 + $0x21c] sm:$0xf0]  ;;  %v9851_v58 = vld [vmem:[%s17521_s0 + $0x28] sm:$0xf]  ;;  %v10032_v59 = vor.u32 %v12278_v53, %v10031_v52  ;;  %v12233_v60 = vld [vmem:[%s17521_s0 + $0x38] sm:$0xf0] }
   0xf   :  { %v10011_v61 = vld [vmem:[%s17521_s0 + $0x168] sm:$0xf]  ;;  %v12261_v62 = vld [vmem:[%s17521_s0 + $0x11c] sm:$0xf]  ;;  %v10096_v0 = vor.u32 %v12291_v55, %v10093_v56  ;;  %v12286_v1 = vld [vmem:[%s17521_s0 + $0x1e4] sm:$0xf]  ;;  %v9852_v7 = vor.u32 %v12233_v60, %v9851_v58 }
  0x10   :  { %774 = vmatpush.bf16.msra.mxu0 %v9912_v35  ;;  %v12273_v63 = vld [vmem:[%s17521_s0 + $0x178] sm:$0xf0]  ;;  %v9973_v2 = vld [vmem:[%s17521_s0 + $0x12c] sm:$0xf0]  ;;  %v10073_v3 = vld [vmem:[%s17521_s0 + $0x1f4] sm:$0xf0] }
  0x11   :  { %803 = vmatpush.bf16.msra.mxu1 %v10072_v37  ;;  %v9976_v4 = vor.u32 %v12261_v62, %v9973_v2  ;;  %v12256_v5 = vld [vmem:[%s17521_s0 + $0xf4] sm:$0xf]  ;;  %v9953_v6 = vld [vmem:[%s17521_s0 + $0x104] sm:$0xf0]  ;;  %v10012_v9 = vor.u32 %v12273_v63, %v10011_v61  ;;  %v9831_v10 = vld [vmem:[%s17521_s0] sm:$0xf]  ;;  %v10076_v15 = vor.u32 %v12286_v1, %v10073_v3 }
  0x12   :  { %12592 = vmatpush.bf16.msra.mxu2 %v12935_v38  ;;  %v12228_v11 = vld [vmem:[%s17521_s0 + $0x10] sm:$0xf0]  ;;  %v9991_v12 = vld [vmem:[%s17521_s0 + $0x140] sm:$0xf]  ;;  %v9956_v13 = vor.u32 %v12256_v5, %v9953_v6  ;;  %v12251_v16 = vld [vmem:[%s17521_s0 + $0xcc] sm:$0xf] }
  0x13   :  { %858 = vmatpush.bf16.msra.mxu3 %v9976_v4  ;;  %v12268_v14 = vld [vmem:[%s17521_s0 + $0x150] sm:$0xf0]  ;;  %v9933_v18 = vld [vmem:[%s17521_s0 + $0xdc] sm:$0xf0]  ;;  %v12281_v19 = vld [vmem:[%s17521_s0 + $0x1bc] sm:$0xf]  ;;  %v9832_v21 = vor.u32 %v12228_v11, %v9831_v10 }
  0x14   :  { %775 = vmatpush.bf16.msra.mxu0 %v9892_v48  ;;  %v10053_v20 = vld [vmem:[%s17521_s0 + $0x1cc] sm:$0xf0]  ;;  %v9783_v22 = vld [vmem:[%s17522_s1] sm:$0xf]  ;;  %v12215_v23 = vld [vmem:[%s17522_s1 + $0x8] sm:$0xf0]  ;;  %v9992_v25 = vor.u32 %v12268_v14, %v9991_v12  ;;  %v9936_v30 = vor.u32 %v12251_v16, %v9933_v18 }
  0x15   :  { %10231 = vmatmul.msk.bf16.vlgmr.msra.gmra.mxu2 %vm758_vm0, %v12958_v47  ;;  %804 = vmatpush.bf16.msra.mxu1 %v10052_v49  ;;  %v12214_v24 = vld [vmem:[%s17522_s1 + $0x4] sm:$0xf]  ;;  %v9785_v27 = vld [vmem:[%s17522_s1 + $0xc] sm:$0xf0]  ;;  %v12225_v29 = vld [vmem:[%s17522_s1 + $0x58] sm:$0xf0]  ;;  %v10056_v31 = vor.u32 %v12281_v19, %v10053_v20  ;;  %v13059_v34 = vor.u32 %v12215_v23, %v9783_v22 }
  0x16   :  { %887 = vmatpush.bf16.msrb.mxu2 %v10136_v44  ;;  %v9827_v28 = vld [vmem:[%s17522_s1 + $0x50] sm:$0xf]  ;;  %v12246_v32 = vld [vmem:[%s17521_s0 + $0xa4] sm:$0xf]  ;;  %v9913_v33 = vld [vmem:[%s17521_s0 + $0xb4] sm:$0xf0]  ;;  %v13067_v37 = vor.u32 %v12214_v24, %v9785_v27 }
  0x17   :  { %859 = vmatpush.bf16.msra.mxu3 %v9956_v13  ;;  %v12276_v35 = vld [vmem:[%s17521_s0 + $0x194] sm:$0xf]  ;;  %v10033_v36 = vld [vmem:[%s17521_s0 + $0x1a4] sm:$0xf0]  ;;  %v13069_v39 = vor.u32 %v12225_v29, %v9827_v28  ;;  %v9916_v40 = vor.u32 %v12246_v32, %v9913_v33  ;;  %v12241_v41 = vld [vmem:[%s17521_s0 + $0x7c] sm:$0xf] }
  0x18   :  { %776 = vmatpush.bf16.msra.mxu0 %v9872_v57  ;;  %v10036_v42 = vor.u32 %v12276_v35, %v10033_v36  ;;  %v9893_v43 = vld [vmem:[%s17521_s0 + $0x8c] sm:$0xf0]  ;;  %v9979_v44 = vld [vmem:[%s17521_s0 + $0x120] sm:$0xf]  ;;  %v12264_v45 = vld [vmem:[%s17521_s0 + $0x130] sm:$0xf0] }
  0x19   :  { %805 = vmatpush.bf16.msra.mxu1 %v10032_v59  ;;  %v12271_v46 = vld [vmem:[%s17521_s0 + $0x16c] sm:$0xf]  ;;  %v10013_v48 = vld [vmem:[%s17521_s0 + $0x17c] sm:$0xf0]  ;;  %v9980_v49 = vor.u32 %v12264_v45, %v9979_v44  ;;  %v9896_v50 = vor.u32 %v12241_v41, %v9893_v43  ;;  %v12236_v51 = vld [vmem:[%s17521_s0 + $0x54] sm:$0xf] }
  0x1a   :  { %888 = vmatpush.bf16.msrb.mxu2 %v10116_v54  ;;  %v12259_v52 = vld [vmem:[%s17521_s0 + $0x108] sm:$0xf0]  ;;  %v10016_v53 = vor.u32 %v12271_v46, %v10013_v48  ;;  %v9873_v54 = vld [vmem:[%s17521_s0 + $0x64] sm:$0xf0]  ;;  %v9939_v56 = vld [vmem:[%s17521_s0 + $0xd0] sm:$0xf] }
  0x1b   :  { %860 = vmatpush.bf16.msra.mxu3 %v9936_v30  ;;  %v12254_v57 = vld [vmem:[%s17521_s0 + $0xe0] sm:$0xf0]  ;;  %v9993_v59 = vld [vmem:[%s17521_s0 + $0x154] sm:$0xf0]  ;;  %v9876_v60 = vor.u32 %v12236_v51, %v9873_v54  ;;  %v12231_v61 = vld [vmem:[%s17521_s0 + $0x2c] sm:$0xf] }
  0x1c   :  { %777 = vmatpush.bf16.msra.mxu0 %v9852_v7  ;;  %v12266_v58 = vld [vmem:[%s17521_s0 + $0x144] sm:$0xf]  ;;  %v9940_v62 = vor.u32 %v12254_v57, %v9939_v56  ;;  %v12249_v1 = vld [vmem:[%s17521_s0 + $0xb8] sm:$0xf0]  ;;  %v9795_v2 = vld [vmem:[%s17522_s1 + $0x18] sm:$0xf] }
  0x1d   :  { %806 = vmatpush.bf16.msra.mxu1 %v10012_v9  ;;  %v9996_v63 = vor.u32 %v12266_v58, %v9993_v59  ;;  %v12218_v3 = vld [vmem:[%s17522_s1 + $0x20] sm:$0xf0]  ;;  %v12217_v4 = vld [vmem:[%s17522_s1 + $0x1c] sm:$0xf]  ;;  %v9797_v5 = vld [vmem:[%s17522_s1 + $0x24] sm:$0xf0] }
  0x1e   :  { %889 = vmatpush.bf16.msrb.mxu2 %v10096_v0  ;;  %v9919_v0 = vld [vmem:[%s17521_s0 + $0xa8] sm:$0xf]  ;;  %v12226_v7 = vld [vmem:[%s17521_s0 + $0x4] sm:$0xf]  ;;  %v9833_v9 = vld [vmem:[%s17521_s0 + $0x14] sm:$0xf0]  ;;  %v13151_v10 = vor.u32 %v12218_v3, %v9795_v2  ;;  %v13153_v11 = vor.u32 %v12217_v4, %v9797_v5 }
  0x1f   :  { %861 = vmatpush.bf16.msra.mxu3 %v9916_v40  ;;  %v9836_v12 = vor.u32 %v12226_v7, %v9833_v9  ;;  %v9899_v13 = vld [vmem:[%s17521_s0 + $0x80] sm:$0xf]  ;;  %v12244_v14 = vld [vmem:[%s17521_s0 + $0x90] sm:$0xf0]  ;;  %v12239_v16 = vld [vmem:[%s17521_s0 + $0x68] sm:$0xf0] }
  0x20   :  { %778 = vmatpush.bf16.msra.mxu0 %v9832_v21  ;;  %v9859_v19 = vld [vmem:[%s17521_s0 + $0x30] sm:$0xf]  ;;  %v12234_v20 = vld [vmem:[%s17521_s0 + $0x40] sm:$0xf0]  ;;  %v9839_v22 = vld [vmem:[%s17521_s0 + $0x8] sm:$0xf] }
  0x21   :  { %807 = vmatpush.bf16.msra.mxu1 %v9992_v25  ;;  %v9860_v21 = vor.u32 %v12234_v20, %v9859_v19  ;;  %v12229_v23 = vld [vmem:[%s17521_s0 + $0x18] sm:$0xf0]  ;;  %v9807_v24 = vld [vmem:[%s17522_s1 + $0x30] sm:$0xf]  ;;  %v12220_v27 = vld [vmem:[%s17522_s1 + $0x34] sm:$0xf] }
  0x22   :  { %890 = vmatpush.bf16.msrb.mxu2 %v10076_v15  ;;  %v9900_v15 = vor.u32 %v12244_v14, %v9899_v13  ;;  %v12221_v25 = vld [vmem:[%s17522_s1 + $0x38] sm:$0xf0]  ;;  %v9809_v28 = vld [vmem:[%s17522_s1 + $0x3c] sm:$0xf0]  ;;  %v9840_v29 = vor.u32 %v12229_v23, %v9839_v22  ;;  %v12324_v33 = vld [vmem:[%s17521_s0 + $0x310] sm:$0xf0] }
  0x23   :  { %779 = vmatmul.bf16.vlgmr.msra.gmra.mxu0 %v13059_v34  ;;  %862 = vmatpush.bf16.msra.mxu3 %v9896_v50  ;;  %v13195_v30 = vor.u32 %v12221_v25, %v9807_v24  ;;  %v10219_v32 = vld [vmem:[%s17521_s0 + $0x300] sm:$0xf]  ;;  %v10199_v36 = vld [vmem:[%s17521_s0 + $0x2d8] sm:$0xf]  ;;  %v12319_v40 = vld [vmem:[%s17521_s0 + $0x2e8] sm:$0xf0] }
  0x24   :  { %833 = vmatpush.bf16.msrb.mxu0 %v12863_v8  ;;  %808 = vmatmul.bf16.vlgmr.msra.gmra.mxu1 %v13067_v37  ;;  %v9959_v8 = vld [vmem:[%s17521_s0 + $0xf8] sm:$0xf]  ;;  %v10220_v35 = vor.u32 %v12324_v33, %v10219_v32  ;;  %v10200_v41 = vor.u32 %v12319_v40, %v10199_v36  ;;  %v12304_v43 = vld [vmem:[%s17521_s0 + $0x270] sm:$0xf0]  ;;  %v10179_v44 = vld [vmem:[%s17521_s0 + $0x2b0] sm:$0xf] }
  0x25   :  { %10232 = vmatmul.msk.bf16.gmra.mxu2 %vm758_vm0, %v13069_v39  ;;  %945 = vmatpush.bf16.msrb.mxu1 %v9980_v49  ;;  %v9960_v55 = vor.u32 %v12259_v52, %v9959_v8  ;;  %v12314_v45 = vld [vmem:[%s17521_s0 + $0x2c0] sm:$0xf0]  ;;  %v10119_v48 = vld [vmem:[%s17521_s0 + $0x238] sm:$0xf]  ;;  %v12299_v49 = vld [vmem:[%s17521_s0 + $0x248] sm:$0xf0] }
  0x26   :  { %891 = vmatpush.bf16.msrb.mxu2 %v10056_v31  ;;  %v13197_v31 = vor.u32 %v12220_v27, %v9809_v28  ;;  %v10180_v8 = vor.u32 %v12314_v45, %v10179_v44  ;;  %v10120_v50 = vor.u32 %v12299_v49, %v10119_v48  ;;  %v10159_v51 = vld [vmem:[%s17521_s0 + $0x288] sm:$0xf]  ;;  %v12309_v52 = vld [vmem:[%s17521_s0 + $0x298] sm:$0xf0]  ;;  %v12224_v54 = vld [vmem:[%s17522_s1 + $0x50] sm:$0xf0] }
  0x27   :  { %863 = vmatpush.bf16.msra.mxu3 %v9876_v60  ;;  %v9821_v56 = vld [vmem:[%s17522_s1 + $0x54] sm:$0xf0]  ;;  %v10160_v57 = vor.u32 %v12309_v52, %v10159_v51  ;;  %v12321_v60 = vld [vmem:[%s17521_s0 + $0x2fc] sm:$0xf]  ;;  %v10193_v2 = vld [vmem:[%s17521_s0 + $0x2e4] sm:$0xf0] }
  0x28   :  { %834 = vmatpush.bf16.msrb.mxu0 %v12884_v17  ;;  %v9853_v17 = vld [vmem:[%s17521_s0 + $0x3c] sm:$0xf0]  ;;  %v10079_v3 = vld [vmem:[%s17521_s0 + $0x1e8] sm:$0xf]  ;;  %v12289_v4 = vld [vmem:[%s17521_s0 + $0x1f8] sm:$0xf0] }
  0x29   :  { %946 = vmatpush.bf16.msrb.mxu1 %v9960_v55  ;;  %v9856_v6 = vor.u32 %v12231_v61, %v9853_v17  ;;  %v12223_v55 = vld [vmem:[%s17522_s1 + $0x4c] sm:$0xf]  ;;  %v10213_v61 = vld [vmem:[%s17521_s0 + $0x30c] sm:$0xf0]  ;;  %v12294_v17 = vld [vmem:[%s17521_s0 + $0x220] sm:$0xf0]  ;;  %v10080_v7 = vor.u32 %v12289_v4, %v10079_v3 }
  0x2a   :  { %892 = vmatpush.bf16.msrb.mxu2 %v10036_v42  ;;  %v10139_v42 = vld [vmem:[%s17521_s0 + $0x260] sm:$0xf]  ;;  %v13253_v59 = vor.u32 %v12223_v55, %v9821_v56  ;;  %v12742_v14 = vmov 0   ;;  %v12216_v19 = vld [vmem:[%s17522_s1 + $0x10] sm:$0xf0]  ;;  %v1237_v36 = vld [vmem:[%s17523_s2 + $0x8] sm:$0xff] }
  0x2b   :  { %864 = vmatpush.bf16.msra.mxu3 %v9856_v6  ;;  %v10140_v46 = vor.u32 %v12304_v43, %v10139_v42  ;;  %v12311_v6 = vld [vmem:[%s17521_s0 + $0x2ac] sm:$0xf]  ;;  %v10059_v9 = vld [vmem:[%s17521_s0 + $0x1c0] sm:$0xf]  ;;  %12639 = vset.pattern.permute.xlu0 %v12742_v14  ;;  %v10039_v20 = vld [vmem:[%s17521_s0 + $0x198] sm:$0xf] }
  0x2c   :  { %835 = vmatpush.bf16.msrb.mxu0 %v12905_v26  ;;  %v9920_v26 = vor.u32 %v12249_v1, %v9919_v0  ;;  %v12316_v0 = vld [vmem:[%s17521_s0 + $0x2d4] sm:$0xf]  ;;  %12641 = vset.pattern.permute.xlu1 %v12742_v14  ;;  %v1236_v25 = vld [vmem:[%s17523_s2] sm:$0xff]  ;;  %v10019_v27 = vld [vmem:[%s17521_s0 + $0x170] sm:$0xf]  ;;  %s12745_s2 = smov 125  }
  0x2d   :  { %947 = vmatpush.bf16.msrb.mxu1 %v9940_v62  ;;  %v10216_v62 = vor.u32 %v12321_v60, %v10213_v61  ;;  %v10196_v5 = vor.u32 %v12316_v0, %v10193_v2  ;;  %12640 = vset.pattern.permute.xlu2 %v12742_v14  ;;  %v12274_v28 = vld [vmem:[%s17521_s0 + $0x180] sm:$0xf0]  ;;  %v9999_v32 = vld [vmem:[%s17521_s0 + $0x148] sm:$0xf]  ;;  %v12269_v33 = vld [vmem:[%s17521_s0 + $0x158] sm:$0xf0] }
  0x2e   :  { %893 = vmatpush.bf16.msrb.mxu2 %v10016_v53  ;;  %v9819_v53 = vld [vmem:[%s17522_s1 + $0x48] sm:$0xf]  ;;  %1240 = vperm.xlu0 %12639, %v1236_v25   ;;  %v9803_v40 = vld [vmem:[%s17522_s1 + $0x20] sm:$0xf]  ;;  %v12262_v43 = vld [vmem:[%s17521_s0 + $0x124] sm:$0xf] }
  0x2f   :  { %865 = vmatpush.bf16.msra.mxu3 %v9836_v12  ;;  %v13251_v58 = vor.u32 %v12224_v54, %v9819_v53  ;;  %v12284_v12 = vld [vmem:[%s17521_s0 + $0x1d0] sm:$0xf0]  ;;  %v9981_v44 = vld [vmem:[%s17521_s0 + $0x134] sm:$0xf0]  ;;  %v9961_v48 = vld [vmem:[%s17521_s0 + $0x10c] sm:$0xf0] }
  0x30   :  { %836 = vmatpush.bf16.msrb.mxu0 %v12935_v38  ;;  %v9879_v38 = vld [vmem:[%s17521_s0 + $0x58] sm:$0xf]  ;;  %v9984_v45 = vor.u32 %v12262_v43, %v9981_v44  ;;  %v12302_v52 = vld [vmem:[%s17521_s0 + $0x264] sm:$0xf]  ;;  %v12247_v55 = vld [vmem:[%s17521_s0 + $0xac] sm:$0xf] }
  0x31   :  { %948 = vmatpush.bf16.msrb.mxu1 %v9920_v26  ;;  %v9880_v18 = vor.u32 %v12239_v16, %v9879_v38  ;;  %v10173_v26 = vld [vmem:[%s17521_s0 + $0x2bc] sm:$0xf0]  ;;  %v10153_v38 = vld [vmem:[%s17521_s0 + $0x294] sm:$0xf0]  ;;  %v9791_v16 = vld [vmem:[%s17522_s1 + $0x8] sm:$0xf] }
  0x32   :  { %894 = vmatpush.bf16.msrb.mxu2 %v9996_v63  ;;  %866 = vmatmul.bf16.vlgmr.msra.gmra.mxu3 %v13059_v34  ;;  %v10099_v63 = vld [vmem:[%s17521_s0 + $0x210] sm:$0xf]  ;;  %v10176_v13 = vor.u32 %v12311_v6, %v10173_v26  ;;  %v13313_v23 = vor.u32 %v12216_v19, %v9791_v16  ;;  %v10141_v53 = vld [vmem:[%s17521_s0 + $0x274] sm:$0xf0]  ;;  %v9921_v56 = vld [vmem:[%s17521_s0 + $0xbc] sm:$0xf0] }
  0x33   :  { %784 = vmatmul.bf16.gmra.mxu0 %v13151_v10  ;;  %12593 = vmatpush.bf16.msrb.mxu3 %v10140_v46  ;;  %v10100_v1 = vor.u32 %v12294_v17, %v10099_v63  ;;  %v10144_v54 = vor.u32 %v12302_v52, %v10141_v53  ;;  %v12297_v60 = vld [vmem:[%s17521_s0 + $0x23c] sm:$0xf]  ;;  %v10121_v61 = vld [vmem:[%s17521_s0 + $0x24c] sm:$0xf0]  ;;  %v12242_v17 = vld [vmem:[%s17521_s0 + $0x84] sm:$0xf] }
  0x34   :  { %813 = vmatmul.bf16.gmra.mxu1 %v13153_v11  ;;  %920 = vmatpush.bf16.msra.mxu0 %v10216_v62  ;;  %v10124_v63 = vor.u32 %v12297_v60, %v10121_v61  ;;  %v9901_v0 = vld [vmem:[%s17521_s0 + $0x94] sm:$0xf0]  ;;  %v12292_v2 = vld [vmem:[%s17521_s0 + $0x214] sm:$0xf]  ;;  %v10101_v3 = vld [vmem:[%s17521_s0 + $0x224] sm:$0xf0] }
  0x35   :  { %895 = vmatmul.bf16.vlgmr.msrb.gmra.mxu2 %v13067_v37  ;;  %949 = vmatpush.bf16.msrb.mxu1 %v9900_v15  ;;  %v12306_v15 = vld [vmem:[%s17521_s0 + $0x284] sm:$0xf]  ;;  %v10104_v4 = vor.u32 %v12292_v2, %v10101_v3  ;;  %v9881_v6 = vld [vmem:[%s17521_s0 + $0x6c] sm:$0xf0]  ;;  %v9861_v19 = vld [vmem:[%s17521_s0 + $0x44] sm:$0xf0] }
  0x36   :  { %1007 = vmatpush.bf16.msra.mxu2 %v10220_v35  ;;  %v10156_v22 = vor.u32 %v12306_v15, %v10153_v38  ;;  %v10000_v35 = vor.u32 %v12269_v33, %v9999_v32  ;;  %1245 = vperm.xlu0 %12639, %v1237_v36   ;;  %v10221_v15 = vld [vmem:[%s17521_s0 + $0x314] sm:$0xf0]  ;;  %v12227_v33 = vld [vmem:[%s17521_s0 + $0xc] sm:$0xf]  ;;  %v12312_v43 = vld [vmem:[%s17521_s0 + $0x2b4] sm:$0xf] }
  0x37   :  { %12594 = vmatpush.bf16.msrb.mxu3 %v10120_v50  ;;  %v10061_v25 = vld [vmem:[%s17521_s0 + $0x1d4] sm:$0xf0]  ;;  %v10021_v52 = vld [vmem:[%s17521_s0 + $0x184] sm:$0xf0]  ;;  %v12307_v53 = vld [vmem:[%s17521_s0 + $0x28c] sm:$0xf] }
  0x38   :  { %921 = vmatpush.bf16.msra.mxu0 %v10196_v5  ;;  %v12237_v5 = vld [vmem:[%s17521_s0 + $0x5c] sm:$0xf]  ;;  %v10001_v60 = vld [vmem:[%s17521_s0 + $0x15c] sm:$0xf0]  ;;  %s12748_s13 = smov 113   ;;  %s12749_s14 = smov 112  }
  0x39   :  { %950 = vmatpush.bf16.msrb.mxu1 %v9880_v18  ;;  %v10060_v18 = vor.u32 %v12284_v12, %v10059_v9  ;;  %v9884_v26 = vor.u32 %v12237_v5, %v9881_v6  ;;  %v10081_v9 = vld [vmem:[%s17521_s0 + $0x1fc] sm:$0xf0]  ;;  %v12322_v12 = vld [vmem:[%s17521_s0 + $0x304] sm:$0xf]  ;;  %s12750_s15 = smov 111   ;;  %s12751_s18 = smov 110  }
  0x3a   :  { %1008 = vmatpush.bf16.msra.mxu2 %v10200_v41  ;;  %v12219_v41 = vld [vmem:[%s17522_s1 + $0x28] sm:$0xf0]  ;;  %v10224_v16 = vor.u32 %v12322_v12, %v10221_v15  ;;  %v12265_v15 = vld [vmem:[%s17521_s0 + $0x138] sm:$0xf0]  ;;  %s12744_s1 = smov 126   ;;  %s12752_s21 = smov 100  }
  0x3b   :  { %12595 = vmatpush.bf16.msrb.mxu3 %v10100_v1  ;;  %v13344_v42 = vor.u32 %v12219_v41, %v9803_v40  ;;  %v12277_v40 = vld [vmem:[%s17521_s0 + $0x19c] sm:$0xf]  ;;  %v10041_v41 = vld [vmem:[%s17521_s0 + $0x1ac] sm:$0xf0]  ;;  %s12753_s22 = smov 99   ;;  %s12755_s27 = smov 97  }
  0x3c   :  { %922 = vmatpush.bf16.msra.mxu0 %v10176_v13  ;;  %s12756_s28 = smov 96   ;;  %vm1889_vm4 = vcmask 1014784   ;;  %vm1733_vm5 = vcmask 1022976   ;;  %vm2045_vm6 = vcmask 932864   ;;  %s12758_s17 = smov 85   ;;  %vm2201_vm7 = vcmask 924672  }
  0x3d   :  { %951 = vmatpush.bf16.msrb.mxu1 %v9860_v21  ;;  %v12279_v21 = vld [vmem:[%s17521_s0 + $0x1a8] sm:$0xf0]  ;;  %s12760_s25 = smov 83   ;;  %s12762_s16 = smov 72   ;;  %vm2357_vm8 = vcmask 916480   ;;  %vm2513_vm9 = vcmask 908288  }
  0x3e   :  { %1009 = vmatpush.bf16.msra.mxu2 %v10180_v8  ;;  %v10040_v24 = vor.u32 %v12279_v21, %v10039_v20  ;;  %v12252_v8 = vld [vmem:[%s17521_s0 + $0xd4] sm:$0xf]  ;;  %s12763_s20 = smov 71   ;;  %s12765_s26 = smov 69   ;;  %vm4073_vm10 = vcmask 678912   ;;  %vm3761_vm11 = vcmask 695296  }
  0x3f   :  { %12596 = vmatpush.bf16.msrb.mxu3 %v10080_v7  ;;  %vm2669_vm12 = vcmask 900096   ;;  %vm4385_vm13 = vcmask 588800   ;;  %vm2825_vm14 = vcmask 818176   ;;  %vm4541_vm15 = vcmask 580608   ;;  %s12768_s23 = smov 120  }
  0x40   :  { %923 = vmatpush.bf16.msra.mxu0 %v10156_v22 }
  0x41   :  { %952 = vmatpush.bf16.msrb.mxu1 %v9840_v29  ;;  %v10020_v29 = vor.u32 %v12274_v28, %v10019_v27  ;;  %v12317_v27 = vld [vmem:[%s17521_s0 + $0x2dc] sm:$0xf] }
  0x42   :  { %871 = vmatmul.bf16.gmra.mxu3 %v13151_v10  ;;  %1010 = vmatpush.bf16.msra.mxu2 %v10160_v57  ;;  %v9924_v57 = vor.u32 %v12247_v55, %v9921_v56  ;;  %v10161_v55 = vld [vmem:[%s17521_s0 + $0x29c] sm:$0xf0] }
  0x43   :  { %789 = vmatmul.bf16.gmra.mxu0 %v13195_v30  ;;  %12597 = vmatpush.bf16.msrb.mxu3 %v10060_v18  ;;  %v10164_v56 = vor.u32 %v12307_v53, %v10161_v55 }
  0x44   :  { %818 = vmatmul.bf16.gmra.mxu1 %v13197_v31 }
  0x45   :  { %900 = vmatmul.bf16.gmra.mxu2 %v13153_v11  ;;  %974 = vmatpush.bf16.msra.mxu1 %v10140_v46  ;;  %v12257_v46 = vld [vmem:[%s17521_s0 + $0xfc] sm:$0xf] }
  0x46   :  { %v9964_v49 = vor.u32 %v12257_v46, %v9961_v48  ;;  %v10181_v46 = vld [vmem:[%s17521_s0 + $0x2c4] sm:$0xf0] }
  0x47   :  { %12598 = vmatpush.bf16.msrb.mxu3 %v10040_v24 }
  0x49   :  { %975 = vmatpush.bf16.msra.mxu1 %v10120_v50  ;;  %v9941_v50 = vld [vmem:[%s17521_s0 + $0xe4] sm:$0xf0] }
  0x4a   :  { %v9944_v51 = vor.u32 %v12252_v8, %v9941_v50 }
  0x4b   :  { %12599 = vmatpush.bf16.msrb.mxu3 %v10020_v29 }
  0x4d   :  { %976 = vmatpush.bf16.msra.mxu1 %v10100_v1  ;;  %v9904_v1 = vor.u32 %v12242_v17, %v9901_v0 }
  0x4f   :  { %12600 = vmatpush.bf16.msrb.mxu3 %v10000_v35 }
  0x51   :  { %977 = vmatpush.bf16.msra.mxu1 %v10080_v7  ;;  %v12287_v7 = vld [vmem:[%s17521_s0 + $0x1ec] sm:$0xf] }
  0x52   :  { %876 = vmatmul.bf16.gmra.mxu3 %v13195_v30  ;;  %v10084_v14 = vor.u32 %v12287_v7, %v10081_v9 }
  0x53   :  { %794 = vmatmul.bf16.gmra.mxu0 %v13251_v58  ;;  %1094 = vmatpush.bf16.msra.mxu3 %v10224_v16 }
  0x54   :  { %823 = vmatmul.bf16.gmra.mxu1 %v13253_v59 }
  0x55   :  { %905 = vmatmul.bf16.gmra.mxu2 %v13197_v31  ;;  %978 = vmatpush.bf16.msra.mxu1 %v10060_v18  ;;  %v12232_v18 = vld [vmem:[%s17521_s0 + $0x34] sm:$0xf] }
  0x56   :  { %v9864_v21 = vor.u32 %v12232_v18, %v9861_v19  ;;  %v9967_v18 = vld [vmem:[%s17521_s0 + $0x100] sm:$0xf]  ;;  %v12260_v19 = vld [vmem:[%s17521_s0 + $0x110] sm:$0xf0] }
  0x59   :  { %979 = vmatpush.bf16.msra.mxu1 %v10040_v24  ;;  %v12282_v24 = vld [vmem:[%s17521_s0 + $0x1c4] sm:$0xf] }
  0x5a   :  { %v10064_v28 = vor.u32 %v12282_v24, %v10061_v25  ;;  %v12305_v25 = vld [vmem:[%s17521_s0 + $0x278] sm:$0xf0] }
  0x5d   :  { %980 = vmatpush.bf16.msra.mxu1 %v10020_v29  ;;  %v10201_v29 = vld [vmem:[%s17521_s0 + $0x2ec] sm:$0xf0] }
  0x5e   :  { %v10204_v32 = vor.u32 %v12317_v27, %v10201_v29 }
  0x60   :  { %1095 = vmatpush.bf16.msra.mxu3 %v10204_v32  ;;  %v9947_v32 = vld [vmem:[%s17521_s0 + $0xd8] sm:$0xf] }
  0x61   :  { %981 = vmatpush.bf16.msra.mxu1 %v10000_v35  ;;  %v9841_v35 = vld [vmem:[%s17521_s0 + $0x1c] sm:$0xf0] }
  0x62   :  { %881 = vmatmul.bf16.gmra.mxu3 %v13251_v58  ;;  %v9844_v36 = vor.u32 %v12227_v33, %v9841_v35  ;;  %v12255_v33 = vld [vmem:[%s17521_s0 + $0xe8] sm:$0xf0] }
  0x63   :  { %10229 = vmatmul.msk.bf16.vlgmr.msrb.gmra.mxu0 %vm758_vm0, %v13313_v23 }
  0x64   :  { %953 = vmatmul.bf16.vlgmr.msrb.gmra.mxu1 %v13059_v34  ;;  %1032 = vmatpush.bf16.msrb.mxu0 %v9984_v45  ;;  %v10044_v45 = vor.u32 %v12277_v40, %v10041_v41  ;;  %v10127_v40 = vld [vmem:[%s17521_s0 + $0x240] sm:$0xf]  ;;  %v12300_v41 = vld [vmem:[%s17521_s0 + $0x250] sm:$0xf0] }
  0x65   :  { %910 = vmatmul.bf16.gmra.mxu2 %v13253_v59  ;;  %1061 = vmatpush.bf16.msrb.mxu1 %v10144_v54 }
  0x68   :  { %1033 = vmatpush.bf16.msrb.mxu0 %v9964_v49  ;;  %v10184_v49 = vor.u32 %v12312_v43, %v10181_v46  ;;  %v10128_v43 = vor.u32 %v12300_v41, %v10127_v40  ;;  %v12250_v46 = vld [vmem:[%s17521_s0 + $0xc0] sm:$0xf0] }
  0x69   :  { %1062 = vmatpush.bf16.msrb.mxu1 %v10124_v63 }
  0x6a   :  { %1096 = vmatpush.bf16.msra.mxu3 %v10184_v49 }
  0x6c   :  { %1034 = vmatpush.bf16.msrb.mxu0 %v9944_v51  ;;  %v12272_v51 = vld [vmem:[%s17521_s0 + $0x174] sm:$0xf] }
  0x6d   :  { %1063 = vmatpush.bf16.msrb.mxu1 %v10104_v4  ;;  %v10024_v54 = vor.u32 %v12272_v51, %v10021_v52  ;;  %v12295_v51 = vld [vmem:[%s17521_s0 + $0x228] sm:$0xf0] }
  0x6e   :  { %1097 = vmatpush.bf16.msra.mxu3 %v10164_v56  ;;  %v9907_v56 = vld [vmem:[%s17521_s0 + $0x88] sm:$0xf] }
  0x70   :  { %1035 = vmatpush.bf16.msrb.mxu0 %v9924_v57  ;;  %v12267_v57 = vld [vmem:[%s17521_s0 + $0x14c] sm:$0xf] }
  0x71   :  { %1064 = vmatpush.bf16.msrb.mxu1 %v10084_v14  ;;  %v10004_v63 = vor.u32 %v12267_v57, %v10001_v60  ;;  %v9987_v14 = vld [vmem:[%s17521_s0 + $0x128] sm:$0xf]  ;;  %v12245_v57 = vld [vmem:[%s17521_s0 + $0x98] sm:$0xf0] }
  0x72   :  { %997 = vmatmul.bf16.vlgmr.msrb.gmra.mxu3 %v13253_v59 }
  0x73   :  { %10230 = vmatmul.msk.bf16.gmra.mxu0 %vm758_vm0, %v13344_v42 }
  0x74   :  { %958 = vmatmul.bf16.gmra.mxu1 %v13151_v10  ;;  %1036 = vmatpush.bf16.msrb.mxu0 %v9904_v1 }
  0x75   :  { %10237 = vmatmul.msk.bf16.vlgmr.msra.gmra.mxu2 %vm758_vm0, %v13313_v23  ;;  %1065 = vmatpush.bf16.msrb.mxu1 %v10064_v28 }
  0x78   :  { %1037 = vmatpush.bf16.msrb.mxu0 %v9884_v26 }
  0x79   :  { %1066 = vmatpush.bf16.msrb.mxu1 %v10044_v45  ;;  %v9927_v45 = vld [vmem:[%s17521_s0 + $0xb0] sm:$0xf] }
  0x7c   :  { %1038 = vmatpush.bf16.msrb.mxu0 %v9864_v21  ;;  %v9968_v21 = vor.u32 %v12260_v19, %v9967_v18 }
  0x7d   :  { %1067 = vmatpush.bf16.msrb.mxu1 %v10024_v54 }
  0x80   :  { %1039 = vmatpush.bf16.msrb.mxu0 %v9844_v36  ;;  %v9948_v36 = vor.u32 %v12255_v33, %v9947_v32  ;;  %v10047_v33 = vld [vmem:[%s17521_s0 + $0x1a0] sm:$0xf] }
  0x81   :  { %1068 = vmatpush.bf16.msrb.mxu1 %v10004_v63  ;;  %v9908_v63 = vor.u32 %v12245_v57, %v9907_v56  ;;  %v12270_v56 = vld [vmem:[%s17521_s0 + $0x160] sm:$0xf0] }
  0x82   :  { %10241 = vmatmul.msk.bf16.vlgmr.msra.gmra.mxu3 %vm758_vm0, %v13313_v23 }
  0x83   :  { %10233 = vmatmul.msk.bf16.vlgmr.msra.gmra.mxu0 %vm758_vm0, %v13313_v23 }
  0x84   :  { %963 = vmatmul.bf16.gmra.mxu1 %v13195_v30 }
  0x85   :  { %10238 = vmatmul.msk.bf16.gmra.mxu2 %vm758_vm0, %v13344_v42 }
  0x92   :  { %10242 = vmatmul.msk.bf16.gmra.mxu3 %vm758_vm0, %v13344_v42 }
  0x93   :  { %10234 = vmatmul.msk.bf16.gmra.mxu0 %vm758_vm0, %v13344_v42 }
  0x94   :  { %968 = vmatmul.bf16.gmra.mxu1 %v13251_v58 }
  0x95   :  { %10239 = vmatmul.msk.bf16.gmra.mxu2 %vm758_vm0, %v12958_v47 }
  0x98   :  { %v13398_v62 = vpop.f32.mrf.mxu2 }
  0xa0   :  { %v13427_v13 = vpop.f32.mrf.mxu2  ;;  %v780_v38 = vpop.f32.mrf.mxu0 }
  0xa1   :  { %v809_v20 = vpop.f32.mrf.mxu1 }
  0xa2   :  { %v13438_v22 = vadd.f32 %v809_v20, %v780_v38  ;;  %v9988_v38 = vor.u32 %v12265_v15, %v9987_v14  ;;  %10243 = vmatmul.msk.bf16.gmra.mxu3 %vm758_vm0, %v12958_v47  ;;  %v10067_v15 = vld [vmem:[%s17521_s0 + $0x1c8] sm:$0xf] }
  0xa3   :  { %10235 = vmatmul.msk.bf16.gmra.mxu0 %vm758_vm0, %v12958_v47 }
  0xa4   :  { %982 = vmatmul.bf16.vlgmr.msra.gmra.mxu1 %v13067_v37  ;;  %1119 = vmatpush.bf16.msrb.mxu2 %v9988_v38  ;;  %v12285_v38 = vld [vmem:[%s17521_s0 + $0x1d8] sm:$0xf0] }
  0xa5   :  { %10240 = vmatmul.msk.bf16.gmra.mxu2 %vm758_vm0, %v13069_v39  ;;  %v10068_v19 = vor.u32 %v12285_v38, %v10067_v15  ;;  %v12315_v15 = vld [vmem:[%s17521_s0 + $0x2c8] sm:$0xf0] }
  0xa8   :  { %v13472_v44 = vpop.f32.mrf.mxu2  ;;  %v782_v48 = vpop.f32.mrf.mxu0  ;;  %1120 = vmatpush.bf16.msrb.mxu2 %v9968_v21 }
  0xa9   :  { %v811_v8 = vpop.f32.mrf.mxu1 }
  0xaa   :  { %v13477_v50 = vadd.f32 %v811_v8, %v782_v48  ;;  %v9928_v48 = vor.u32 %v12250_v46, %v9927_v45  ;;  %v10107_v8 = vld [vmem:[%s17521_s0 + $0x218] sm:$0xf] }
  0xab   :  { %v10108_v54 = vor.u32 %v12295_v51, %v10107_v8  ;;  %v10027_v46 = vld [vmem:[%s17521_s0 + $0x178] sm:$0xf] }
  0xac   :  { %1121 = vmatpush.bf16.msrb.mxu2 %v9948_v36  ;;  %v12280_v36 = vld [vmem:[%s17521_s0 + $0x1b0] sm:$0xf0] }
  0xad   :  { %v10048_v41 = vor.u32 %v12280_v36, %v10047_v33 }
  0xb0   :  { %v13497_v61 = vpop.f32.mrf.mxu2  ;;  %v785_v17 = vpop.f32.mrf.mxu0  ;;  %1122 = vmatpush.bf16.msrb.mxu2 %v9928_v48  ;;  %v12275_v48 = vld [vmem:[%s17521_s0 + $0x188] sm:$0xf0] }
  0xb1   :  { %v814_v0 = vpop.f32.mrf.mxu1  ;;  %v10028_v51 = vor.u32 %v12275_v48, %v10027_v46 }
  0xb2   :  { %v13501_v1 = vadd.f32 %v814_v0, %v785_v17  ;;  %v10087_v0 = vld [vmem:[%s17521_s0 + $0x1f0] sm:$0xf]  ;;  %10244 = vmatmul.msk.bf16.gmra.mxu3 %vm758_vm0, %v13069_v39 }
  0xb3   :  { %10236 = vmatmul.msk.bf16.gmra.mxu0 %vm758_vm0, %v13069_v39 }
  0xb4   :  { %987 = vmatmul.bf16.gmra.mxu1 %v13153_v11  ;;  %1123 = vmatpush.bf16.msrb.mxu2 %v9908_v63 }
  0xb5   :  { %v13512_v26 = vpop.f32.mrf.mxu3 }
  0xb8   :  { %v13506_v2 = vpop.f32.mrf.mxu2  ;;  %v787_v3 = vpop.f32.mrf.mxu0 }
  0xb9   :  { %v816_v4 = vpop.f32.mrf.mxu1 }
  0xba   :  { %v13508_v5 = vadd.f32 %v816_v4, %v787_v3  ;;  %v12290_v3 = vld [vmem:[%s17521_s0 + $0x200] sm:$0xf0] }
  0xbb   :  { %v10088_v4 = vor.u32 %v12290_v3, %v10087_v0  ;;  %v10207_v0 = vld [vmem:[%s17521_s0 + $0x2e0] sm:$0xf]  ;;  %v12320_v3 = vld [vmem:[%s17521_s0 + $0x2f0] sm:$0xf0] }
  0xbd   :  { %v13541_v28 = vpop.f32.mrf.mxu3 }
  0xc0   :  { %v13510_v6 = vpop.f32.mrf.mxu2  ;;  %v790_v7 = vpop.f32.mrf.mxu0 }
  0xc1   :  { %v819_v9 = vpop.f32.mrf.mxu1 }
  0xc2   :  { %v820_v12 = vadd.f32 %v819_v9, %v790_v7  ;;  %v12240_v9 = vld [vmem:[%s17521_s0 + $0x70] sm:$0xf0] }
  0xc3   :  { %1040 = vmatmul.bf16.vlgmr.msrb.gmra.mxu0 %v13059_v34 }
  0xc4   :  { %v13524_v16 = vadd.f32 %v13398_v62, %v820_v12  ;;  %992 = vmatmul.bf16.gmra.mxu1 %v13197_v31  ;;  %v10147_v62 = vld [vmem:[%s17521_s0 + $0x268] sm:$0xf] }
  0xc5   :  { %v10148_v29 = vor.u32 %v12305_v25, %v10147_v62  ;;  %v13578_v60 = vpop.f32.mrf.mxu3  ;;  %v12235_v62 = vld [vmem:[%s17521_s0 + $0x48] sm:$0xf0] }
  0xc7   :  { %1148 = vmatpush.bf16.msra.mxu0 %v10148_v29 }
  0xc8   :  { %v13533_v20 = vpop.f32.mrf.mxu2  ;;  %v792_v24 = vpop.f32.mrf.mxu0 }
  0xc9   :  { %v821_v27 = vpop.f32.mrf.mxu1 }
  0xca   :  { %v822_v35 = vadd.f32 %v821_v27, %v792_v24  ;;  %v9867_v24 = vld [vmem:[%s17521_s0 + $0x38] sm:$0xf] }
  0xcb   :  { %1149 = vmatpush.bf16.msra.mxu0 %v10128_v43  ;;  %v9868_v27 = vor.u32 %v12235_v62, %v9867_v24 }
  0xcc   :  { %v13613_v29 = vadd.f32 %v13427_v13, %v822_v35  ;;  %v12230_v35 = vld [vmem:[%s17521_s0 + $0x20] sm:$0xf0] }
  0xcd   :  { %v13624_v40 = vpop.f32.mrf.mxu3 }
  0xcf   :  { %1150 = vmatpush.bf16.msra.mxu0 %v10108_v54  ;;  %v12325_v54 = vld [vmem:[%s17521_s0 + $0x318] sm:$0xf0] }
  0xd0   :  { %v795_v49 = vpop.f32.mrf.mxu0  ;;  %v13567_v52 = vpop.f32.mrf.mxu2 }
  0xd1   :  { %v824_v53 = vpop.f32.mrf.mxu1 }
  0xd2   :  { %v825_v55 = vadd.f32 %v824_v53, %v795_v49  ;;  %v10227_v53 = vld [vmem:[%s17521_s0 + $0x308] sm:$0xf] }
  0xd3   :  { %1045 = vmatmul.bf16.gmra.mxu0 %v13151_v10 }
  0xd4   :  { %v13581_v17 = vadd.f32 %v13472_v44, %v825_v55  ;;  %1069 = vmatmul.bf16.vlgmr.msrb.gmra.mxu1 %v13067_v37  ;;  %v9887_v44 = vld [vmem:[%s17521_s0 + $0x60] sm:$0xf]  ;;  %1151 = vmatpush.bf16.msra.mxu0 %v10088_v4  ;;  %v10228_v55 = vor.u32 %v12325_v54, %v10227_v53 }
  0xd5   :  { %v9888_v12 = vor.u32 %v12240_v9, %v9887_v44  ;;  %v13668_v4 = vpop.f32.mrf.mxu3  ;;  %v10208_v44 = vor.u32 %v12320_v3, %v10207_v0  ;;  %v897_v3 = vadd.f32 %v13506_v2, %v13512_v26 }
  0xd6   :  { %v1216_v7 = vmax.f32 %v13524_v16, %v13581_v17  ;;  %1181 = vmatpush.bf16.msra.mxu1 %v10228_v55 }
  0xd7   :  { %1124 = vmatpush.bf16.msrb.mxu2 %v9888_v12 }
  0xd8   :  { %v797_v14 = vpop.f32.mrf.mxu0  ;;  %v13610_v25 = vpop.f32.mrf.mxu2  ;;  %1152 = vmatpush.bf16.msra.mxu0 %v10068_v19 }
  0xd9   :  { %v826_v18 = vpop.f32.mrf.mxu1 }
  0xda   :  { %v827_v21 = vadd.f32 %v826_v18, %v797_v14  ;;  %1182 = vmatpush.bf16.msra.mxu1 %v10208_v44  ;;  %v10167_v18 = vld [vmem:[%s17521_s0 + $0x290] sm:$0xf]  ;;  %v907_v44 = vadd.f32 %v13610_v25, %v13668_v4  ;;  %v899_v25 = vadd.f32 %v13510_v6, %v13541_v28 }
  0xdb   :  { %1125 = vmatpush.bf16.msrb.mxu2 %v9868_v27 }
  0xdc   :  { %v13616_v32 = vadd.f32 %v13497_v61, %v827_v21  ;;  %v9847_v61 = vld [vmem:[%s17521_s0 + $0x10] sm:$0xf]  ;;  %1153 = vmatpush.bf16.msra.mxu0 %v10048_v41 }
  0xdd   :  { %v9848_v43 = vor.u32 %v12230_v35, %v9847_v61 }
  0xde   :  { %v1221_v13 = vmax.f32 %v13613_v29, %v13616_v32  ;;  %v13686_v29 = vpop.f32.mrf.mxu3 }
  0xdf   :  { %1126 = vmatpush.bf16.msrb.mxu2 %v9848_v43 }
  0xe0   :  { %v838_v45 = vpop.f32.mrf.mxu0  ;;  %1154 = vmatpush.bf16.msra.mxu0 %v10028_v51  ;;  %v13659_v57 = vpop.f32.mrf.mxu2 }
  0xe1   :  { %v839_v49 = vadd.f32 %v838_v45, %v13438_v22  ;;  %v13641_v8 = vpop.f32.mrf.mxu1  ;;  %v10007_v22 = vld [vmem:[%s17521_s0 + $0x150] sm:$0xf]  ;;  %v909_v4 = vadd.f32 %v13659_v57, %v13686_v29 }
  0xe2   :  { %1127 = vmatmul.bf16.vlgmr.msrb.gmra.mxu2 %v13059_v34  ;;  %v10008_v63 = vor.u32 %v12270_v56, %v10007_v22  ;;  %v10187_v34 = vld [vmem:[%s17521_s0 + $0x2b8] sm:$0xf] }
  0xe3   :  { %1050 = vmatmul.bf16.gmra.mxu0 %v13195_v30  ;;  %v10188_v38 = vor.u32 %v12315_v15, %v10187_v34 }
  0xe4   :  { %1074 = vmatmul.bf16.gmra.mxu1 %v13153_v11  ;;  %1155 = vmatpush.bf16.msra.mxu0 %v10008_v63 }
  0xe5   :  { %1183 = vmatpush.bf16.msra.mxu1 %v10188_v38 }
  0xe6   :  { %v882_v43 = vpop.f32.mrf.mxu3 }
  0xe8   :  { %v840_v9 = vpop.f32.mrf.mxu0  ;;  %v911_v19 = vpop.f32.mrf.mxu2 }
  0xe9   :  { %v841_v12 = vadd.f32 %v840_v9, %v13477_v50  ;;  %v13671_v14 = vpop.f32.mrf.mxu1  ;;  %v12310_v50 = vld [vmem:[%s17521_s0 + $0x2a0] sm:$0xf0]  ;;  %v912_v9 = vadd.f32 %v911_v19, %v882_v43  ;;  %s12743_s0 = smov 127  }
  0xea   :  { %v10168_v21 = vor.u32 %v12310_v50, %v10167_v18 }
  0xec   :  { %1184 = vmatpush.bf16.msra.mxu1 %v10168_v21 }
  0xee   :  { %v884_v16 = vpop.f32.mrf.mxu3 }
  0xf0   :  { %v843_v24 = vpop.f32.mrf.mxu0  ;;  %v913_v41 = vpop.f32.mrf.mxu2 }
  0xf1   :  { %v844_v62 = vadd.f32 %v843_v24, %v13501_v1  ;;  %v959_v27 = vpop.f32.mrf.mxu1  ;;  %v914_v19 = vadd.f32 %v913_v41, %v884_v16 }
  0xf2   :  { %1132 = vmatmul.bf16.gmra.mxu2 %v13151_v10 }
  0xf3   :  { %v1206_v32 = vmax.f32 %v839_v49, %v844_v62  ;;  %1055 = vmatmul.bf16.gmra.mxu0 %v13251_v58 }
  0xf4   :  { %1079 = vmatmul.bf16.gmra.mxu1 %v13197_v31 }
  0xf5   :  { %v13693_v33 = vmax.f32 %v1206_v32, %v1216_v7 }
  0xf6   :  { %v998_v7 = vpop.f32.mrf.mxu3 }
  0xf8   :  { %v845_v36 = vpop.f32.mrf.mxu0  ;;  %v1012_v49 = vpop.f32.mrf.mxu2 }
  0xf9   :  { %v846_v1 = vadd.f32 %v845_v36, %v13508_v5  ;;  %v13697_v61 = vpop.f32.mrf.mxu1 }
  0xfb   :  { %v1211_v35 = vmax.f32 %v841_v12, %v846_v1 }
  0xfd   :  { %v13699_v45 = vmax.f32 %v1211_v35, %v1221_v13 }
  0xfe   :  { %v1000_v6 = vpop.f32.mrf.mxu3 }
 0x100   :  { %v925_v46 = vpop.f32.mrf.mxu0  ;;  %v1014_v5 = vpop.f32.mrf.mxu2 }
 0x101   :  { %v13701_v48 = vpop.f32.mrf.mxu1  ;;  %v926_v34 = vadd.f32 %v925_v46, %v897_v3 }
 0x102   :  { %1137 = vmatmul.bf16.gmra.mxu2 %v13195_v30 }
 0x103   :  { %1156 = vmatmul.bf16.vlgmr.msra.gmra.mxu0 %v13067_v37 }
 0x104   :  { %1084 = vmatmul.bf16.gmra.mxu1 %v13253_v59 }
 0x108   :  { %v927_v10 = vpop.f32.mrf.mxu0  ;;  %v1017_v37 = vpop.f32.mrf.mxu2 }
 0x109   :  { %v13706_v17 = vpop.f32.mrf.mxu1 }
 0x110   :  { %v930_v51 = vpop.f32.mrf.mxu0  ;;  %v1019_v22 = vpop.f32.mrf.mxu2 }
 0x111   :  { %v969_v53 = vpop.f32.mrf.mxu1 }
 0x112   :  { %v13708_v13 = vadd.f32 %v998_v7, %v969_v53  ;;  %1142 = vmatmul.bf16.gmra.mxu2 %v13251_v58 }
 0x113   :  { %1161 = vmatmul.bf16.gmra.mxu0 %v13153_v11 }
 0x114   :  { %10245 = vmatmul.msk.bf16.vlgmr.msra.gmra.mxu1 %vm758_vm0, %v13313_v23  ;;  %v902_v23 = vadd.f32 %v13533_v20, %v13578_v60  ;;  %v904_v20 = vadd.f32 %v13567_v52, %v13624_v40 }
 0x116   :  { %v931_v12 = vadd.f32 %v930_v51, %v902_v23 }
 0x118   :  { %v932_v54 = vpop.f32.mrf.mxu0  ;;  %v1022_v58 = vpop.f32.mrf.mxu2  ;;  %v1207_v60 = vmax.f32 %v926_v34, %v931_v12 }
 0x119   :  { %v13714_v55 = vpop.f32.mrf.mxu1  ;;  %v933_v52 = vadd.f32 %v932_v54, %v904_v20 }
 0x120   :  { %v935_v30 = vpop.f32.mrf.mxu0  ;;  %v1024_v21 = vpop.f32.mrf.mxu2 }
 0x121   :  { %v983_v56 = vpop.f32.mrf.mxu1  ;;  %v936_v15 = vadd.f32 %v935_v30, %v907_v44 }
 0x122   :  { %v984_v63 = vadd.f32 %v983_v56, %v13641_v8  ;;  %v13726_v8 = vpop.permute.xlu0 %1240 }
 0x123   :  { %1166 = vmatmul.bf16.gmra.mxu0 %v13197_v31  ;;  %v1248_v29 = vadd.f32 %v13726_v8, %v13693_v33 }
 0x124   :  { %10246 = vmatmul.msk.bf16.gmra.mxu1 %vm758_vm0, %v13344_v42  ;;  %v1013_v2 = vadd.f32 %v1012_v49, %v984_v63  ;;  %v1099_v63 = vpop.f32.mrf.mxu3 }
 0x125   :  { %v1258_v51 = vmax.f32 %v1248_v29, 0.0 }
 0x128   :  { %v937_v11 = vpop.f32.mrf.mxu0  ;;  %v1027_v7 = vpop.f32.mrf.mxu2 }
 0x129   :  { %v985_v0 = vpop.f32.mrf.mxu1  ;;  %v938_v32 = vadd.f32 %v937_v11, %v909_v4 }
 0x12a   :  { %v986_v40 = vadd.f32 %v985_v0, %v13671_v14  ;;  %v13739_v35 = vpop.permute.xlu0 %1245 }
 0x12b   :  { %v1253_v14 = vadd.f32 %v13739_v35, %v13699_v45 }
 0x12c   :  { %v1015_v43 = vadd.f32 %v1014_v5, %v986_v40 }
 0x130   :  { %v940_v31 = vpop.f32.mrf.mxu0 }
 0x131   :  { %v941_v42 = vadd.f32 %v940_v31, %v912_v9  ;;  %v988_v38 = vpop.f32.mrf.mxu1 }
 0x132   :  { %v989_v18 = vadd.f32 %v988_v38, %v959_v27  ;;  %v1101_v38 = vpop.f32.mrf.mxu3 }
 0x133   :  { %v1217_v50 = vmax.f32 %v936_v15, %v941_v42  ;;  %1171 = vmatmul.bf16.gmra.mxu0 %v13253_v59  ;;  %v928_v59 = vadd.f32 %v927_v10, %v899_v25 }
 0x134   :  { %v1018_v26 = vadd.f32 %v1017_v37, %v989_v18  ;;  %10247 = vmatmul.msk.bf16.gmra.mxu1 %vm758_vm0, %v12958_v47 }
 0x135   :  { %v1227_v24 = vmax.f32 %v1207_v60, %v1217_v50  ;;  %v1212_v57 = vmax.f32 %v928_v59, %v933_v52 }
 0x136   :  { %v1208_v62 = vmax.f32 %v1013_v2, %v1018_v26 }
 0x137   :  { %v1249_v36 = vadd.f32 %v13726_v8, %v1227_v24 }
 0x138   :  { %v942_v27 = vpop.f32.mrf.mxu0 }
 0x139   :  { %v943_v1 = vadd.f32 %v942_v27, %v914_v19  ;;  %v990_v47 = vpop.f32.mrf.mxu1  ;;  %v1259_v49 = vmax.f32 %v1249_v36, 0.0 }
 0x13a   :  { %v991_v28 = vadd.f32 %v990_v47, %v13697_v61  ;;  %v1263_v61 = vmax.f32 %v1253_v14, 0.0  ;;  %v1104_v2 = vpop.f32.mrf.mxu3 }
 0x13b   :  { %v1222_v41 = vmax.f32 %v938_v32, %v943_v1  ;;  %v1268_v54 = vpack.c.bf16 %v1259_v49, %v1258_v51 }
 0x13c   :  { %v1020_v46 = vadd.f32 %v1019_v22, %v991_v28  ;;  %v1028_v22 = vadd.f32 %v1027_v7, %v13708_v13  ;;  %v1001_v13 = vadd.f32 %v1000_v6, %v13714_v55 }
 0x13d   :  { %v1232_v16 = vmax.f32 %v1212_v57, %v1222_v41  ;;  %v1299_v45 = vunpack.c.l.b16 %v1268_v54  ;;  %v1300_v0 = vunpack.c.h.b16 %v1268_v54 }
 0x13e   :  { %v1213_v10 = vmax.f32 %v1015_v43, %v1020_v46 }
 0x13f   :  { %v1254_v53 = vadd.f32 %v13739_v35, %v1232_v16 }
 0x140   :  { %v1041_v37 = vpop.f32.mrf.mxu0 }
 0x141   :  { %v1264_v30 = vmax.f32 %v1254_v53, 0.0  ;;  %v993_v56 = vpop.f32.mrf.mxu1 }
 0x142   :  { %v994_v33 = vadd.f32 %v993_v56, %v13701_v48  ;;  %v1029_v48 = vpop.f32.mrf.mxu2  ;;  %v1106_v4 = vpop.f32.mrf.mxu3 }
 0x143   :  { %v1271_v5 = vpack.c.bf16 %v1264_v30, %v1263_v61 }
 0x144   :  { %v1023_v11 = vadd.f32 %v1022_v58, %v994_v33  ;;  %10248 = vmatmul.msk.bf16.gmra.mxu1 %vm758_vm0, %v13069_v39  ;;  %v1030_v58 = vadd.f32 %v1029_v48, %v1001_v13  ;;  %vm4697_vm0 = vcmask 572416  }
 0x145   :  { %v1304_v23 = vunpack.c.l.b16 %v1271_v5  ;;  %v1305_v3 = vunpack.c.h.b16 %v1271_v5 }
 0x146   :  { %v1218_v44 = vmax.f32 %v1023_v11, %v1028_v22 }
 0x147   :  { %v13751_v9 = vpack.c.b16 %v1304_v23, %v1299_v45  ;;  %v13753_v12 = vpack.c.b16 %v1305_v3, %v1300_v0 }
 0x148   :  { %v1228_v31 = vmax.f32 %v1208_v62, %v1218_v44  ;;  %v1043_v34 = vpop.f32.mrf.mxu0 }
 0x149   :  { %v995_v15 = vpop.f32.mrf.mxu1  ;;  %1314 = vrot.lane.b32.xlu1 %v13751_v9, %s12743_s0 }
 0x14a   :  { %v996_v39 = vadd.f32 %v995_v15, %v13706_v17  ;;  %v1109_v24 = vpop.f32.mrf.mxu3  ;;  %v1250_v45 = vadd.f32 %v13726_v8, %v1228_v31 }
 0x14c   :  { %v1025_v42 = vadd.f32 %v1024_v21, %v996_v39  ;;  %v1260_v15 = vmax.f32 %v1250_v45, 0.0 }
 0x14e   :  { %v1223_v18 = vmax.f32 %v1025_v42, %v1030_v58 }
 0x150   :  { %v1233_v20 = vmax.f32 %v1213_v10, %v1223_v18  ;;  %v1046_v60 = vpop.f32.mrf.mxu0 }
 0x151   :  { %v1070_v50 = vpop.f32.mrf.mxu1  ;;  %1316 = vrot.lane.b32.xlu1 %v13753_v12, %s12743_s0 }
 0x152   :  { %v1111_v40 = vpop.f32.mrf.mxu3  ;;  %v1071_v47 = vadd.f32 %v1070_v50, %v1041_v37  ;;  %v1255_v3 = vadd.f32 %v13739_v35, %v1233_v20 }
 0x154   :  { %v1100_v43 = vadd.f32 %v1099_v63, %v1071_v47  ;;  %v1265_v42 = vmax.f32 %v1255_v3, 0.0 }
 0x158   :  { %v1048_v26 = vpop.f32.mrf.mxu0 }
 0x159   :  { %v1072_v25 = vpop.f32.mrf.mxu1  ;;  %1567 = vrot.lane.b32.xlu1 %v13751_v9, %s12744_s1 }
 0x15a   :  { %v1114_v36 = vpop.f32.mrf.mxu3  ;;  %v1073_v7 = vadd.f32 %v1072_v25, %v1043_v34 }
 0x15c   :  { %v1102_v5 = vadd.f32 %v1101_v38, %v1073_v7 }
 0x160   :  { %v1051_v55 = vpop.f32.mrf.mxu0 }
 0x161   :  { %v1075_v17 = vpop.f32.mrf.mxu1 }
 0x162   :  { %v1076_v32 = vadd.f32 %v1075_v17, %v1046_v60  ;;  %v1116_v54 = vpop.f32.mrf.mxu3 }
 0x164   :  { %v1105_v29 = vadd.f32 %v1104_v2, %v1076_v32 }
 0x165   :  { %v13763_v1 = vpop.f32.mrf.mxu2 }
 0x166   :  { %v1209_v49 = vmax.f32 %v1100_v43, %v1105_v29 }
 0x168   :  { %v1053_v19 = vpop.f32.mrf.mxu0 }
 0x169   :  { %v1077_v21 = vpop.f32.mrf.mxu1 }
 0x16a   :  { %v1078_v16 = vadd.f32 %v1077_v21, %v1048_v26 }
 0x16c   :  { %v1107_v56 = vadd.f32 %v1106_v4, %v1078_v16 }
 0x16d   :  { %v13767_v61 = vpop.f32.mrf.mxu2 }
 0x16e   :  { %v1214_v0 = vmax.f32 %v1102_v5, %v1107_v56 }
 0x170   :  { %v1056_v62 = vpop.f32.mrf.mxu0 }
 0x171   :  { %v1080_v52 = vpop.f32.mrf.mxu1 }
 0x172   :  { %v1081_v6 = vadd.f32 %v1080_v52, %v1051_v55 }
 0x174   :  { %v1110_v46 = vadd.f32 %v1109_v24, %v1081_v6 }
 0x175   :  { %v1133_v39 = vpop.f32.mrf.mxu2 }
 0x178   :  { %v1058_v27 = vpop.f32.mrf.mxu0 }
 0x179   :  { %v1082_v59 = vpop.f32.mrf.mxu1 }
 0x17a   :  { %v1083_v51 = vadd.f32 %v1082_v59, %v1053_v19 }
 0x17c   :  { %v1112_v22 = vadd.f32 %v1111_v40, %v1083_v51 }
 0x17d   :  { %v1135_v4 = vpop.f32.mrf.mxu2 }
 0x180   :  { %v13765_v28 = vpop.f32.mrf.mxu0 }
 0x181   :  { %v1085_v57 = vpop.f32.mrf.mxu1 }
 0x182   :  { %v1086_v41 = vadd.f32 %v1085_v57, %v1056_v62  ;;  %v1158_v57 = vadd.f32 %v13765_v28, %v13763_v1 }
 0x184   :  { %v1115_v14 = vadd.f32 %v1114_v36, %v1086_v41 }
 0x185   :  { %v1138_v21 = vpop.f32.mrf.mxu2 }
 0x186   :  { %v1219_v10 = vmax.f32 %v1110_v46, %v1115_v14 }
 0x188   :  { %v1229_v53 = vmax.f32 %v1209_v49, %v1219_v10  ;;  %v13769_v37 = vpop.f32.mrf.mxu0 }
 0x189   :  { %v1087_v30 = vpop.f32.mrf.mxu1 }
 0x18a   :  { %v1088_v33 = vadd.f32 %v1087_v30, %v1058_v27  ;;  %v1251_v63 = vadd.f32 %v13726_v8, %v1229_v53 }
 0x18c   :  { %v1117_v11 = vadd.f32 %v1116_v54, %v1088_v33  ;;  %v1261_v44 = vmax.f32 %v1251_v63, 0.0  ;;  %v13795_v54 = vld [vmem:[%s17524_s3 + $0x10] sm:$0xff]  ;;  %v1160_v33 = vadd.f32 %v13769_v37, %v13767_v61 }
 0x18d   :  { %v1140_v52 = vpop.f32.mrf.mxu2 }
 0x18e   :  { %v1224_v23 = vmax.f32 %v1112_v22, %v1117_v11  ;;  %v1269_v38 = vpack.c.bf16 %v1261_v44, %v1260_v15 }
 0x190   :  { %v1234_v34 = vmax.f32 %v1214_v0, %v1224_v23  ;;  %v1162_v58 = vpop.f32.mrf.mxu0  ;;  %v1301_v50 = vunpack.c.l.b16 %v1269_v38  ;;  %v1302_v2 = vunpack.c.h.b16 %v1269_v38 }
 0x191   :  { %v1186_v48 = vpop.f32.mrf.mxu1  ;;  %v1163_v6 = vadd.f32 %v1162_v58, %v1133_v39  ;;  %v13806_v58 = vld [vmem:[%s17524_s3 + $0x18] sm:$0xff] }
 0x192   :  { %v1256_v13 = vadd.f32 %v13739_v35, %v1234_v34  ;;  %v1187_v14 = vadd.f32 %v1186_v48, %v1158_v57 }
 0x194   :  { %v1266_v18 = vmax.f32 %v1256_v13, 0.0 }
 0x195   :  { %v1143_v32 = vpop.f32.mrf.mxu2 }
 0x196   :  { %v1272_v60 = vpack.c.bf16 %v1266_v18, %v1265_v42 }
 0x198   :  { %v1306_v26 = vunpack.c.l.b16 %v1272_v60  ;;  %v1307_v31 = vunpack.c.h.b16 %v1272_v60  ;;  %v1164_v17 = vpop.f32.mrf.mxu0 }
 0x199   :  { %v1188_v25 = vpop.f32.mrf.mxu1  ;;  %v1165_v28 = vadd.f32 %v1164_v17, %v1135_v4  ;;  %v13896_v4 = vld [vmem:[%s17524_s3 + $0x8] sm:$0xff] }
 0x19a   :  { %v13775_v55 = vpack.c.b16 %v1306_v26, %v1301_v50  ;;  %v13777_v20 = vpack.c.b16 %v1307_v31, %v1302_v2  ;;  %v1189_v45 = vadd.f32 %v1188_v25, %v1160_v33  ;;  %v13878_v25 = vld [vmem:[%s17524_s3] sm:$0xff] }
 0x19c   :  { %1318 = vrot.lane.b32.xlu2 %v13775_v55, %s12743_s0  ;;  %1573 = vrot.lane.b32.xlu1 %v13777_v20, %s12744_s1 }
 0x19d   :  { %v1145_v30 = vpop.f32.mrf.mxu2 }
 0x1a0   :  { %v1167_v24 = vpop.f32.mrf.mxu0 }
 0x1a1   :  { %v1191_v19 = vpop.f32.mrf.mxu1  ;;  %v1168_v29 = vadd.f32 %v1167_v24, %v1138_v21 }
 0x1a2   :  { %v1192_v43 = vadd.f32 %v1191_v19, %v1163_v6 }
 0x1a4   :  { %1320 = vrot.lane.b32.xlu2 %v13777_v20, %s12743_s0  ;;  %1725 = vrot.lane.b32.xlu1 %v13753_v12, %s12745_s2  ;;  %v1210_v7 = vmax.f32 %v1187_v14, %v1192_v43 }
 0x1a8   :  { %v1169_v40 = vpop.f32.mrf.mxu0 }
 0x1a9   :  { %v1193_v62 = vpop.f32.mrf.mxu1  ;;  %v1170_v22 = vadd.f32 %v1169_v40, %v1140_v52 }
 0x1aa   :  { %v1194_v5 = vadd.f32 %v1193_v62, %v1165_v28  ;;  %v13926_v62 = vld [vmem:[%s17524_s3 + $0x20] sm:$0xff] }
 0x1ac   :  { %1569 = vrot.lane.b32.xlu2 %v13753_v12, %s12744_s1  ;;  %v1215_v44 = vmax.f32 %v1189_v45, %v1194_v5 }
 0x1b0   :  { %v1172_v36 = vpop.f32.mrf.mxu0 }
 0x1b1   :  { %v1196_v27 = vpop.f32.mrf.mxu1  ;;  %v1173_v41 = vadd.f32 %v1172_v36, %v1143_v32 }
 0x1b2   :  { %v1197_v49 = vadd.f32 %v1196_v27, %v1168_v29 }
 0x1b8   :  { %v1174_v1 = vpop.f32.mrf.mxu0 }
 0x1b9   :  { %v1198_v59 = vpop.f32.mrf.mxu1  ;;  %v1175_v63 = vadd.f32 %v1174_v1, %v1145_v30 }
 0x1ba   :  { %v1199_v0 = vadd.f32 %v1198_v59, %v1170_v22 }
 0x1bb   :  { %v1315_v47 = vpop.permute.xlu1 %1314 }
 0x1c1   :  { %v1201_v46 = vpop.f32.mrf.mxu1 }
 0x1c2   :  { %v1202_v16 = vadd.f32 %v1201_v46, %v1173_v41 }
 0x1c3   :  { %v1317_v10 = vpop.permute.xlu1 %1316 }
 0x1c4   :  { %v1220_v51 = vmax.f32 %v1197_v49, %v1202_v16  ;;  %v1325_v53 = vsel %vm1324_vm1, %v1315_v47, %v1317_v10  ;;  %v13959_v47 = vld [vmem:[%s17524_s3 + $0x28] sm:$0xff] }
 0x1c5   :  { %1348 = vmatpush.bf16.msrb.mxu3 %v1325_v53 }
 0x1c6   :  { %v1230_v56 = vmax.f32 %v1210_v7, %v1220_v51 }
 0x1c8   :  { %10261 = vmatmul.msk.bf16.vlgmr.msrb.gmra.mxu3 %vm1334_vm2, %v13795_v54  ;;  %v1252_v23 = vadd.f32 %v13726_v8, %v1230_v56 }
 0x1c9   :  { %v1203_v11 = vpop.f32.mrf.mxu1 }
 0x1ca   :  { %v1204_v3 = vadd.f32 %v1203_v11, %v1175_v63  ;;  %v1262_v48 = vmax.f32 %v1252_v23, 0.0 }
 0x1cb   :  { %v1568_v2 = vpop.permute.xlu1 %1567 }
 0x1cc   :  { %v1225_v34 = vmax.f32 %v1199_v0, %v1204_v3  ;;  %v1270_v39 = vpack.c.bf16 %v1262_v48, %v1262_v48 }
 0x1ce   :  { %v1235_v15 = vmax.f32 %v1215_v44, %v1225_v34  ;;  %v1303_v42 = vunpack.c.l.b16 %v1270_v39  ;;  %v14057_v44 = vld [vmem:[%s17524_s3 + $0x30] sm:$0xff] }
 0x1d0   :  { %v1257_v13 = vadd.f32 %v13739_v35, %v1235_v15 }
 0x1d2   :  { %v1267_v61 = vmax.f32 %v1257_v13, 0.0 }
 0x1d4   :  { %v1273_v37 = vpack.c.bf16 %v1267_v61, %v1267_v61 }
 0x1d6   :  { %v1308_v38 = vunpack.c.l.b16 %v1273_v37 }
 0x1d8   :  { %v13808_v18 = vpack.c.b16 %v1308_v38, %v1303_v42  ;;  %10262 = vmatmul.msk.bf16.gmra.mxu3 %vm1334_vm2, %v13806_v58 }
 0x1da   :  { %1322 = vrot.lane.b32.xlu0 %v13808_v18, %s12743_s0  ;;  %1575 = vrot.lane.b32.xlu2 %v13808_v18, %s12744_s1 }
 0x1db   :  { %1731 = vrot.lane.b32.xlu1 %v13808_v18, %s12745_s2 }
 0x1e2   :  { %1571 = vrot.lane.b32.xlu0 %v13775_v55, %s12744_s1  ;;  %1727 = vrot.lane.b32.xlu2 %v13775_v55, %s12745_s2 }
 0x1e3   :  { %1883 = vrot.lane.b32.xlu1 %v13775_v55, %s12746_s29 }
 0x1ea   :  { %1879 = vrot.lane.b32.xlu2 %v13751_v9, %s12746_s29  ;;  %1723 = vrot.lane.b32.xlu0 %v13751_v9, %s12745_s2 }
 0x1eb   :  { %2035 = vrot.lane.b32.xlu1 %v13751_v9, %s12747_s30 }
 0x1f2   :  { %1885 = vrot.lane.b32.xlu2 %v13777_v20, %s12746_s29  ;;  %1729 = vrot.lane.b32.xlu0 %v13777_v20, %s12745_s2  ;;  %s12754_s2 = smov 98  }
 0x1f3   :  { %2041 = vrot.lane.b32.xlu1 %v13777_v20, %s12747_s30 }
 0x1f6   :  { %v1319_v8 = vpop.permute.xlu2 %1318 }
 0x1f7   :  { %v1326_v35 = vsel %vm1324_vm1, %v1317_v10, %v1319_v8 }
 0x1f8   :  { %1367 = vmatpush.bf16.msra.mxu3 %v1326_v35  ;;  %v14103_v35 = vld [vmem:[%s17524_s3 + $0x38] sm:$0xff] }
 0x1fa   :  { %2037 = vrot.lane.b32.xlu2 %v13753_v12, %s12747_s30  ;;  %1881 = vrot.lane.b32.xlu0 %v13753_v12, %s12746_s29 }
 0x1fb   :  { %2193 = vrot.lane.b32.xlu1 %v13753_v12, %s12748_s13  ;;  %10263 = vmatmul.msk.bf16.vlgmr.msra.gmra.mxu3 %vm1334_vm2, %v13795_v54 }
 0x1fc   :  { %1464 = vmatpush.bf16.msrb.mxu3 %v13751_v9 }
 0x1fe   :  { %v13846_v60 = vpop.permute.xlu2 %1320 }
 0x1ff   :  { %v1327_v50 = vsel %vm1324_vm1, %v1319_v8, %v13846_v60 }
 0x200   :  { %1540 = vmatpush.bf16.msra.mxu3 %v13808_v18  ;;  %1386 = vmatpush.bf16.msra.mxu2 %v1327_v50 }
 0x202   :  { %2043 = vrot.lane.b32.xlu2 %v13808_v18, %s12747_s30  ;;  %1887 = vrot.lane.b32.xlu0 %v13808_v18, %s12746_s29 }
 0x203   :  { %2199 = vrot.lane.b32.xlu1 %v13808_v18, %s12748_s13  ;;  %10265 = vmatmul.msk.bf16.vlgmr.msra.gmra.mxu2 %vm1334_vm2, %v13795_v54 }
 0x204   :  { %1483 = vmatpush.bf16.msrb.mxu2 %v13753_v12 }
 0x206   :  { %v13858_v26 = vpop.permute.xlu2 %1569 }
 0x207   :  { %v1578_v31 = vsel %vm1577_vm3, %v1568_v2, %v13858_v26 }
 0x208   :  { %1600 = vmatpush.bf16.msra.mxu2 %v1578_v31 }
 0x20a   :  { %2195 = vrot.lane.b32.xlu2 %v13775_v55, %s12748_s13  ;;  %2039 = vrot.lane.b32.xlu0 %v13775_v55, %s12747_s30 }
 0x20b   :  { %2351 = vrot.lane.b32.xlu1 %v13775_v55, %s12749_s14  ;;  %10264 = vmatmul.msk.bf16.gmra.mxu3 %vm1334_vm2, %v13806_v58 }
 0x20e   :  { %v1574_v17 = vpop.permute.xlu1 %1573 }
 0x212   :  { %2347 = vrot.lane.b32.xlu2 %v13751_v9, %s12749_s14  ;;  %2191 = vrot.lane.b32.xlu0 %v13751_v9, %s12748_s13 }
 0x213   :  { %2503 = vrot.lane.b32.xlu1 %v13751_v9, %s12750_s15  ;;  %10266 = vmatmul.msk.bf16.gmra.mxu2 %vm1334_vm2, %v13806_v58 }
 0x216   :  { %v13938_v40 = vpop.permute.xlu1 %1725 }
 0x21a   :  { %2353 = vrot.lane.b32.xlu2 %v13777_v20, %s12749_s14  ;;  %2197 = vrot.lane.b32.xlu0 %v13777_v20, %s12748_s13  ;;  %s12757_s13 = smov 86  }
 0x21b   :  { %2509 = vrot.lane.b32.xlu1 %v13777_v20, %s12750_s15  ;;  %10279 = vmatmul.msk.bf16.vlgmr.msrb.gmra.mxu3 %vm1334_vm2, %v13878_v25 }
 0x222   :  { %2505 = vrot.lane.b32.xlu2 %v13753_v12, %s12750_s15  ;;  %2349 = vrot.lane.b32.xlu0 %v13753_v12, %s12749_s14 }
 0x223   :  { %2661 = vrot.lane.b32.xlu1 %v13753_v12, %s12751_s18  ;;  %10281 = vmatmul.msk.bf16.vlgmr.msrb.gmra.mxu2 %vm1334_vm2, %v13878_v25 }
 0x22a   :  { %2511 = vrot.lane.b32.xlu2 %v13808_v18, %s12750_s15  ;;  %2355 = vrot.lane.b32.xlu0 %v13808_v18, %s12749_s14 }
 0x22b   :  { %2667 = vrot.lane.b32.xlu1 %v13808_v18, %s12751_s18  ;;  %10280 = vmatmul.msk.bf16.gmra.mxu3 %vm1334_vm2, %v13896_v4 }
 0x232   :  { %2663 = vrot.lane.b32.xlu2 %v13775_v55, %s12751_s18  ;;  %2507 = vrot.lane.b32.xlu0 %v13775_v55, %s12750_s15  ;;  %s12761_s15 = smov 82  }
 0x233   :  { %2819 = vrot.lane.b32.xlu1 %v13775_v55, %s12752_s21  ;;  %10282 = vmatmul.msk.bf16.gmra.mxu2 %vm1334_vm2, %v13896_v4 }
 0x234   :  { %v1576_v19 = vpop.permute.xlu2 %1575 }
 0x235   :  { %1676 = vmatpush.bf16.msrb.mxu2 %v1576_v19  ;;  %v1581_v21 = vsel %vm1577_vm3, %v1574_v17, %v1576_v19 }
 0x236   :  { %1657 = vmatpush.bf16.msrb.mxu3 %v1581_v21 }
 0x23a   :  { %2815 = vrot.lane.b32.xlu2 %v13751_v9, %s12752_s21  ;;  %2659 = vrot.lane.b32.xlu0 %v13751_v9, %s12751_s18 }
 0x23b   :  { %2971 = vrot.lane.b32.xlu1 %v13751_v9, %s12753_s22  ;;  %10287 = vmatmul.msk.bf16.vlgmr.msra.gmra.mxu3 %vm1334_vm2, %v13878_v25 }
 0x23c   :  { %v13921_v24 = vpop.permute.xlu2 %1727 }
 0x23d   :  { %v1735_v63 = vsel %vm1733_vm5, %v13938_v40, %v13921_v24 }
 0x242   :  { %2821 = vrot.lane.b32.xlu2 %v13777_v20, %s12752_s21  ;;  %2665 = vrot.lane.b32.xlu0 %v13777_v20, %s12751_s18 }
 0x243   :  { %2977 = vrot.lane.b32.xlu1 %v13777_v20, %s12753_s22  ;;  %10301 = vmatmul.msk.bf16.vlgmr.msra.gmra.mxu2 %vm1334_vm2, %v13926_v62 }
 0x244   :  { %v13936_v52 = vpop.permute.xlu2 %1879 }
 0x24a   :  { %2973 = vrot.lane.b32.xlu2 %v13753_v12, %s12753_s22  ;;  %2817 = vrot.lane.b32.xlu0 %v13753_v12, %s12752_s21 }
 0x24b   :  { %3129 = vrot.lane.b32.xlu1 %v13753_v12, %s12754_s2  ;;  %10288 = vmatmul.msk.bf16.gmra.mxu3 %vm1334_vm2, %v13896_v4  ;;  %v13978_v46 = vpop.f32.mrf.mxu3 }
 0x24c   :  { %v1323_v27 = vpop.permute.xlu0 %1322  ;;  %v13948_v59 = vpop.permute.xlu2 %1885 }
 0x24d   :  { %v13950_v32 = vpop.permute.xlu1 %1731  ;;  %1424 = vmatpush.bf16.msrb.mxu1 %v1323_v27  ;;  %v1328_v36 = vsel %vm1324_vm1, %v13846_v60, %v1323_v27 }
 0x24e   :  { %1405 = vmatpush.bf16.msrb.mxu0 %v1328_v36 }
 0x250   :  { %10269 = vmatmul.msk.bf16.vlgmr.msrb.gmra.mxu1 %vm1334_vm2, %v13795_v54 }
 0x251   :  { %1521 = vmatpush.bf16.msra.mxu1 %v13777_v20  ;;  %10267 = vmatmul.msk.bf16.vlgmr.msrb.gmra.mxu0 %vm1334_vm2, %v13795_v54 }
 0x252   :  { %1502 = vmatpush.bf16.msra.mxu0 %v13775_v55  ;;  %2979 = vrot.lane.b32.xlu2 %v13808_v18, %s12753_s22 }
 0x253   :  { %2823 = vrot.lane.b32.xlu0 %v13808_v18, %s12752_s21  ;;  %3135 = vrot.lane.b32.xlu1 %v13808_v18, %s12754_s2  ;;  %v13990_v10 = vpop.f32.mrf.mxu3 }
 0x254   :  { %10302 = vmatmul.msk.bf16.gmra.mxu2 %vm1334_vm2, %v13959_v47  ;;  %v1572_v6 = vpop.permute.xlu0 %1571  ;;  %v13973_v57 = vpop.permute.xlu2 %2037 }
 0x255   :  { %v1884_v29 = vpop.permute.xlu1 %1883  ;;  %v1579_v41 = vsel %vm1577_vm3, %v13858_v26, %v1572_v6  ;;  %v1580_v43 = vsel %vm1577_vm3, %v1572_v6, %v1574_v17  ;;  %vm2981_vm3 = vcmask 809984  }
 0x256   :  { %1619 = vmatpush.bf16.msrb.mxu0 %v1579_v41  ;;  %1638 = vmatpush.bf16.msrb.mxu1 %v1580_v43  ;;  %v1892_v1 = vsel %vm1889_vm4, %v1884_v29, %v13948_v59 }
 0x25a   :  { %3131 = vrot.lane.b32.xlu2 %v13775_v55, %s12754_s2 }
 0x25b   :  { %2975 = vrot.lane.b32.xlu0 %v13775_v55, %s12753_s22  ;;  %3287 = vrot.lane.b32.xlu1 %v13775_v55, %s12755_s27  ;;  %v14014_v28 = vpop.f32.mrf.mxu3  ;;  %s12759_s22 = smov 84  }
 0x25c   :  { %10307 = vmatmul.msk.bf16.vlgmr.msrb.gmra.mxu3 %vm1334_vm2, %v13926_v62  ;;  %v13988_v14 = vpop.permute.xlu2 %2043  ;;  %v1724_v49 = vpop.permute.xlu0 %1723 }
 0x25d   :  { %v2036_v16 = vpop.permute.xlu1 %2035  ;;  %v1734_v11 = vsel %vm1733_vm5, %v1724_v49, %v13938_v40 }
 0x25e   :  { %v2046_v34 = vsel %vm2045_vm6, %v2036_v16, %v13973_v57  ;;  %v14200_v16 = vld [vmem:[%s17524_s3 + $0x48] sm:$0xff] }
 0x260   :  { %10270 = vmatmul.msk.bf16.gmra.mxu1 %vm1334_vm2, %v13806_v58 }
 0x261   :  { %10268 = vmatmul.msk.bf16.gmra.mxu0 %vm1334_vm2, %v13806_v58 }
 0x262   :  { %3283 = vrot.lane.b32.xlu2 %v13751_v9, %s12755_s27 }
 0x263   :  { %3127 = vrot.lane.b32.xlu0 %v13751_v9, %s12754_s2  ;;  %3439 = vrot.lane.b32.xlu1 %v13751_v9, %s12756_s28  ;;  %v14044_v45 = vpop.f32.mrf.mxu3 }
 0x264   :  { %10309 = vmatmul.msk.bf16.vlgmr.msrb.gmra.mxu2 %vm1334_vm2, %v13926_v62  ;;  %v14004_v7 = vpop.permute.xlu2 %2195  ;;  %v1730_v51 = vpop.permute.xlu0 %1729 }
 0x265   :  { %v14006_v53 = vpop.permute.xlu1 %2041  ;;  %v1736_v54 = vsel %vm1733_vm5, %v13921_v24, %v1730_v51  ;;  %v1737_v30 = vsel %vm1733_vm5, %v1730_v51, %v13950_v32  ;;  %vm3137_vm5 = vcmask 801792  }
 0x266   :  { %1794 = vmatpush.bf16.msra.mxu3 %v1736_v54  ;;  %1813 = vmatpush.bf16.msra.mxu2 %v1737_v30 }
 0x26a   :  { %1950 = vmatpush.bf16.msrb.mxu2 %v1892_v1  ;;  %3289 = vrot.lane.b32.xlu2 %v13777_v20, %s12755_s27 }
 0x26b   :  { %3133 = vrot.lane.b32.xlu0 %v13777_v20, %s12754_s2  ;;  %3445 = vrot.lane.b32.xlu1 %v13777_v20, %s12756_s28 }
 0x26c   :  { %10308 = vmatmul.msk.bf16.gmra.mxu3 %vm1334_vm2, %v13959_v47  ;;  %v14024_v56 = vpop.permute.xlu2 %2347  ;;  %v1882_v33 = vpop.permute.xlu0 %1881 }
 0x26d   :  { %v14026_v5 = vpop.permute.xlu1 %2193  ;;  %v1891_v22 = vsel %vm1889_vm4, %v1882_v33, %v1884_v29 }
 0x26e   :  { %1931 = vmatpush.bf16.msrb.mxu3 %v1891_v22 }
 0x270   :  { %10285 = vmatmul.msk.bf16.vlgmr.msra.gmra.mxu1 %vm1334_vm2, %v13878_v25 }
 0x271   :  { %1775 = vmatpush.bf16.msra.mxu1 %v1735_v63  ;;  %10283 = vmatmul.msk.bf16.vlgmr.msra.gmra.mxu0 %vm1334_vm2, %v13878_v25  ;;  %v1890_v25 = vsel %vm1889_vm4, %v13936_v52, %v1882_v33 }
 0x272   :  { %1756 = vmatpush.bf16.msra.mxu0 %v1734_v11  ;;  %3441 = vrot.lane.b32.xlu2 %v13753_v12, %s12756_s28 }
 0x273   :  { %3285 = vrot.lane.b32.xlu0 %v13753_v12, %s12755_s27  ;;  %3597 = vrot.lane.b32.xlu1 %v13753_v12, %s12757_s13 }
 0x274   :  { %10310 = vmatmul.msk.bf16.gmra.mxu2 %vm1334_vm2, %v13959_v47  ;;  %v14048_v0 = vpop.permute.xlu2 %2353  ;;  %v14050_v23 = vpop.permute.xlu0 %1887 }
 0x275   :  { %v14052_v3 = vpop.permute.xlu1 %2199  ;;  %v1893_v63 = vsel %vm1889_vm4, %v13948_v59, %v14050_v23  ;;  %vm5009_vm4 = vcmask 556032  }
 0x27a   :  { %3447 = vrot.lane.b32.xlu2 %v13808_v18, %s12756_s28 }
 0x27b   :  { %3291 = vrot.lane.b32.xlu0 %v13808_v18, %s12755_s27  ;;  %3603 = vrot.lane.b32.xlu1 %v13808_v18, %s12757_s13 }
 0x27c   :  { %10327 = vmatmul.msk.bf16.vlgmr.msra.gmra.mxu3 %vm1334_vm2, %v14057_v44  ;;  %v14069_v48 = vpop.permute.xlu2 %2505  ;;  %v14071_v15 = vpop.permute.xlu0 %2039 }
 0x27d   :  { %2068 = vmatpush.bf16.msra.mxu3 %v2046_v34  ;;  %v14073_v13 = vpop.permute.xlu1 %2351  ;;  %v2047_v61 = vsel %vm2045_vm6, %v13973_v57, %v14071_v15 }
 0x27e   :  { %v14075_v39 = vpop.f32.mrf.mxu3 }
 0x280   :  { %10286 = vmatmul.msk.bf16.gmra.mxu1 %vm1334_vm2, %v13896_v4 }
 0x281   :  { %10284 = vmatmul.msk.bf16.gmra.mxu0 %vm1334_vm2, %v13896_v4 }
 0x282   :  { %3599 = vrot.lane.b32.xlu2 %v13775_v55, %s12757_s13 }
 0x283   :  { %3443 = vrot.lane.b32.xlu0 %v13775_v55, %s12756_s28  ;;  %3755 = vrot.lane.b32.xlu1 %v13775_v55, %s12758_s17 }
 0x284   :  { %10329 = vmatmul.msk.bf16.vlgmr.msra.gmra.mxu2 %vm1334_vm2, %v14057_v44  ;;  %v14092_v37 = vpop.permute.xlu2 %2511  ;;  %v2192_v58 = vpop.permute.xlu0 %2191 }
 0x285   :  { %2087 = vmatpush.bf16.msra.mxu2 %v2047_v61  ;;  %v14094_v42 = vpop.permute.xlu1 %2503  ;;  %v2202_v6 = vsel %vm2201_vm7, %v2192_v58, %v14026_v5 }
 0x286   :  { %v14096_v38 = vpop.f32.mrf.mxu2  ;;  %v14098_v8 = vpop.f32.mrf.mxu3 }
 0x28a   :  { %3751 = vrot.lane.b32.xlu2 %v13751_v9, %s12758_s17 }
 0x28b   :  { %3595 = vrot.lane.b32.xlu0 %v13751_v9, %s12757_s13  ;;  %3907 = vrot.lane.b32.xlu1 %v13751_v9, %s12759_s22 }
 0x28c   :  { %10328 = vmatmul.msk.bf16.gmra.mxu3 %vm1334_vm2, %v14103_v35  ;;  %v14113_v60 = vpop.permute.xlu2 %2663  ;;  %v14115_v50 = vpop.permute.xlu0 %2197 }
 0x28d   :  { %v14117_v2 = vpop.permute.xlu1 %2509 }
 0x28e   :  { %v14119_v26 = vpop.f32.mrf.mxu2  ;;  %v14121_v31 = vpop.f32.mrf.mxu3 }
 0x290   :  { %10305 = vmatmul.msk.bf16.vlgmr.msrb.gmra.mxu1 %vm1334_vm2, %v13926_v62 }
 0x291   :  { %1912 = vmatpush.bf16.msrb.mxu1 %v1890_v25  ;;  %10303 = vmatmul.msk.bf16.vlgmr.msrb.gmra.mxu0 %vm1334_vm2, %v13926_v62  ;;  %v14151_v62 = vld [vmem:[%s17524_s3 + $0x40] sm:$0xff] }
 0x292   :  { %1832 = vmatpush.bf16.msrb.mxu0 %v13950_v32  ;;  %3757 = vrot.lane.b32.xlu2 %v13777_v20, %s12758_s17 }
 0x293   :  { %3601 = vrot.lane.b32.xlu0 %v13777_v20, %s12757_s13  ;;  %3913 = vrot.lane.b32.xlu1 %v13777_v20, %s12759_s22 }
 0x294   :  { %10330 = vmatmul.msk.bf16.gmra.mxu2 %vm1334_vm2, %v14103_v35  ;;  %v14138_v4 = vpop.permute.xlu2 %2815  ;;  %v14140_v17 = vpop.permute.xlu0 %2349 }
 0x295   :  { %v14142_v19 = vpop.permute.xlu1 %2661 }
 0x296   :  { %v14144_v21 = vpop.f32.mrf.mxu2  ;;  %v14146_v24 = vpop.f32.mrf.mxu3 }
 0x29a   :  { %3909 = vrot.lane.b32.xlu2 %v13753_v12, %s12759_s22 }
 0x29b   :  { %3753 = vrot.lane.b32.xlu0 %v13753_v12, %s12758_s17  ;;  %4065 = vrot.lane.b32.xlu1 %v13753_v12, %s12760_s25 }
 0x29c   :  { %10347 = vmatmul.msk.bf16.vlgmr.msrb.gmra.mxu3 %vm1334_vm2, %v14151_v62  ;;  %v14161_v52 = vpop.permute.xlu2 %2821  ;;  %v14163_v40 = vpop.permute.xlu0 %2355 }
 0x29d   :  { %2144 = vmatpush.bf16.msrb.mxu3 %v13988_v14  ;;  %v14166_v27 = vpop.permute.xlu1 %2667 }
 0x29e   :  { %v14168_v32 = vpop.f32.mrf.mxu2  ;;  %v14170_v36 = vpop.f32.mrf.mxu3 }
 0x2a0   :  { %10306 = vmatmul.msk.bf16.gmra.mxu1 %vm1334_vm2, %v13959_v47 }
 0x2a1   :  { %10304 = vmatmul.msk.bf16.gmra.mxu0 %vm1334_vm2, %v13959_v47 }
 0x2a2   :  { %3915 = vrot.lane.b32.xlu2 %v13808_v18, %s12759_s22 }
 0x2a3   :  { %3759 = vrot.lane.b32.xlu0 %v13808_v18, %s12758_s17  ;;  %4071 = vrot.lane.b32.xlu1 %v13808_v18, %s12760_s25  ;;  %s12766_s17 = smov 68  }
 0x2a4   :  { %10349 = vmatmul.msk.bf16.vlgmr.msrb.gmra.mxu2 %vm1334_vm2, %v14151_v62  ;;  %v14186_v57 = vpop.permute.xlu2 %2973  ;;  %v14188_v29 = vpop.permute.xlu0 %2507 }
 0x2a5   :  { %17570 = vst [vmem:[#allocation2_spill] sm:$0xff] %v14186_v57  ;;  %2224 = vmatpush.bf16.msrb.mxu2 %v2202_v6  ;;  %v14190_v47 = vpop.permute.xlu1 %2819  ;;  %v14300_v57 = vld [vmem:[%s17524_s3 + $0x58] sm:$0xff] }
 0x2a6   :  { %17571 = vst [vmem:[#allocation3_spill] sm:$0xff] %v14190_v47  ;;  %v1485_v41 = vpop.f32.mrf.mxu2  ;;  %v14192_v43 = vpop.f32.mrf.mxu3 }
 0x2a7   :  { %v14195_v49 = vadd.f32 %v1485_v41, %v14075_v39 }
 0x2aa   :  { %4067 = vrot.lane.b32.xlu2 %v13775_v55, %s12760_s25 }
 0x2ab   :  { %3911 = vrot.lane.b32.xlu0 %v13775_v55, %s12759_s22  ;;  %4223 = vrot.lane.b32.xlu1 %v13775_v55, %s12761_s15 }
 0x2ac   :  { %10348 = vmatmul.msk.bf16.gmra.mxu3 %vm1334_vm2, %v14200_v16  ;;  %v14210_v51 = vpop.permute.xlu2 %2979  ;;  %v14212_v54 = vpop.permute.xlu0 %2659 }
 0x2ad   :  { %17572 = vst [vmem:[#allocation4_spill] sm:$0xff] %v14210_v51  ;;  %v14214_v30 = vpop.permute.xlu1 %2971 }
 0x2ae   :  { %17573 = vst [vmem:[#allocation5_spill] sm:$0xff] %v14214_v30  ;;  %v1487_v1 = vpop.f32.mrf.mxu2  ;;  %v14216_v33 = vpop.f32.mrf.mxu3 }
 0x2af   :  { %v14219_v22 = vadd.f32 %v1487_v1, %v14098_v8  ;;  %v14252_v8 = vld [vmem:[%s17524_s3 + $0x50] sm:$0xff] }
 0x2b0   :  { %10325 = vmatmul.msk.bf16.vlgmr.msra.gmra.mxu1 %vm1334_vm2, %v14057_v44 }
 0x2b1   :  { %1988 = vmatpush.bf16.msra.mxu1 %v14050_v23  ;;  %10323 = vmatmul.msk.bf16.vlgmr.msra.gmra.mxu0 %vm1334_vm2, %v14057_v44 }
 0x2b2   :  { %1969 = vmatpush.bf16.msra.mxu0 %v1893_v63  ;;  %4219 = vrot.lane.b32.xlu2 %v13751_v9, %s12761_s15 }
 0x2b3   :  { %4063 = vrot.lane.b32.xlu0 %v13751_v9, %s12760_s25  ;;  %4375 = vrot.lane.b32.xlu1 %v13751_v9, %s12762_s16 }
 0x2b4   :  { %10350 = vmatmul.msk.bf16.gmra.mxu2 %vm1334_vm2, %v14200_v16  ;;  %v14237_v11 = vpop.permute.xlu2 %3131  ;;  %v14239_v34 = vpop.permute.xlu0 %2665 }
 0x2b5   :  { %17574 = vst [vmem:[#allocation6_spill] sm:$0xff] %v14237_v11  ;;  %v14241_v39 = vpop.permute.xlu1 %2977 }
 0x2b6   :  { %v1490_v59 = vpop.f32.mrf.mxu2  ;;  %v1473_v23 = vpop.f32.mrf.mxu3 }
 0x2b7   :  { %v14244_v61 = vadd.f32 %v1490_v59, %v14121_v31  ;;  %v14247_v58 = vadd.f32 %v1473_v23, %v14044_v45  ;;  %v2205_v45 = vsel %vm2201_vm7, %v14115_v50, %v14052_v3  ;;  %v1467_v23 = vadd.f32 %v14170_v36, %v13978_v46 }
 0x2b8   :  { %v1469_v36 = vadd.f32 %v14192_v43, %v13990_v10  ;;  %v2048_v10 = vsel %vm2045_vm6, %v14071_v15, %v14006_v53 }
 0x2ba   :  { %4225 = vrot.lane.b32.xlu2 %v13777_v20, %s12761_s15 }
 0x2bb   :  { %4069 = vrot.lane.b32.xlu0 %v13777_v20, %s12760_s25  ;;  %4381 = vrot.lane.b32.xlu1 %v13777_v20, %s12762_s16  ;;  %s12764_s25 = smov 70  }
 0x2bc   :  { %10367 = vmatmul.msk.bf16.vlgmr.msra.gmra.mxu3 %vm1334_vm2, %v14252_v8  ;;  %v14265_v31 = vpop.permute.xlu2 %3283  ;;  %v14267_v25 = vpop.permute.xlu0 %2817 }
 0x2bd   :  { %17575 = vst [vmem:[#allocation7_spill] sm:$0xff] %v14265_v31  ;;  %2281 = vmatpush.bf16.msra.mxu3 %v2205_v45  ;;  %v14269_v6 = vpop.permute.xlu1 %3129 }
 0x2be   :  { %17576 = vst [vmem:[#allocation8_spill] sm:$0xff] %v14269_v6  ;;  %v1492_v41 = vpop.f32.mrf.mxu2  ;;  %v1542_v1 = vpop.f32.mrf.mxu3 }
 0x2bf   :  { %v14272_v63 = vadd.f32 %v1492_v41, %v14146_v24 }
 0x2c0   :  { %10326 = vmatmul.msk.bf16.gmra.mxu1 %vm1334_vm2, %v14103_v35 }
 0x2c1   :  { %10324 = vmatmul.msk.bf16.gmra.mxu0 %vm1334_vm2, %v14103_v35 }
 0x2c2   :  { %4377 = vrot.lane.b32.xlu2 %v13753_v12, %s12762_s16 }
 0x2c3   :  { %4221 = vrot.lane.b32.xlu0 %v13753_v12, %s12761_s15  ;;  %4533 = vrot.lane.b32.xlu1 %v13753_v12, %s12763_s20 }
 0x2c4   :  { %10369 = vmatmul.msk.bf16.vlgmr.msra.gmra.mxu2 %vm1334_vm2, %v14252_v8  ;;  %v14286_v24 = vpop.permute.xlu2 %3289 }
 0x2c5   :  { %17577 = vst [vmem:[#allocation9_spill] sm:$0xff] %v14286_v24  ;;  %v14288_v59 = vpop.permute.xlu0 %2823  ;;  %2300 = vmatpush.bf16.msra.mxu2 %v14052_v3  ;;  %v14293_v45 = vpop.permute.xlu1 %3135 }
 0x2c6   :  { %17578 = vst [vmem:[#allocation10_spill] sm:$0xff] %v14293_v45  ;;  %v1602_v41 = vpop.f32.mrf.mxu2  ;;  %v1544_v31 = vpop.f32.mrf.mxu3 }
 0x2c7   :  { %v14295_v30 = vadd.f32 %v1602_v41, %v1467_v23 }
 0x2ca   :  { %4383 = vrot.lane.b32.xlu2 %v13808_v18, %s12762_s16 }
 0x2cb   :  { %4227 = vrot.lane.b32.xlu0 %v13808_v18, %s12761_s15  ;;  %4539 = vrot.lane.b32.xlu1 %v13808_v18, %s12763_s20 }
 0x2cc   :  { %10368 = vmatmul.msk.bf16.gmra.mxu3 %vm1334_vm2, %v14300_v57  ;;  %v14310_v46 = vpop.permute.xlu2 %3441 }
 0x2cd   :  { %17579 = vst [vmem:[#allocation11_spill] sm:$0xff] %v14310_v46  ;;  %v14312_v3 = vpop.permute.xlu0 %2975  ;;  %v14316_v23 = vpop.permute.xlu1 %3287  ;;  %v2049_v46 = vsel %vm2045_vm6, %v14006_v53, %v13988_v14  ;;  %v1472_v53 = vadd.f32 %v14216_v33, %v14014_v28  ;;  %v2360_v28 = vsel %vm2357_vm8, %v14073_v13, %v14048_v0 }
 0x2ce   :  { %17580 = vst [vmem:[#allocation12_spill] sm:$0xff] %v14316_v23  ;;  %v1426_v41 = vpop.f32.mrf.mxu1  ;;  %v14318_v24 = vpop.f32.mrf.mxu0 }
 0x2cf   :  { %v1543_v45 = vadd.f32 %v1542_v1, %v1426_v41  ;;  %v1604_v6 = vpop.f32.mrf.mxu2  ;;  %v1547_v47 = vpop.f32.mrf.mxu3 }
 0x2d0   :  { %v14320_v11 = vadd.f32 %v1604_v6, %v1469_v36  ;;  %10345 = vmatmul.msk.bf16.vlgmr.msrb.gmra.mxu1 %vm1334_vm2, %v14151_v62 }
 0x2d1   :  { %2125 = vmatpush.bf16.msrb.mxu1 %v2049_v46  ;;  %10331 = vmatmul.msk.bf16.vlgmr.msrb.gmra.mxu0 %vm1334_vm2, %v14057_v44 }
 0x2d2   :  { %2106 = vmatpush.bf16.msrb.mxu0 %v2048_v10  ;;  %4535 = vrot.lane.b32.xlu2 %v13775_v55, %s12763_s20 }
 0x2d3   :  { %4379 = vrot.lane.b32.xlu0 %v13775_v55, %s12762_s16  ;;  %4691 = vrot.lane.b32.xlu1 %v13775_v55, %s12764_s25  ;;  %s12770_s16 = smov 116  }
 0x2d4   :  { %10370 = vmatmul.msk.bf16.gmra.mxu2 %vm1334_vm2, %v14300_v57  ;;  %v14340_v14 = vpop.permute.xlu2 %3447 }
 0x2d5   :  { %17581 = vst [vmem:[#allocation13_spill] sm:$0xff] %v14340_v14  ;;  %v14342_v44 = vpop.permute.xlu0 %3127  ;;  %v14346_v15 = vpop.permute.xlu1 %3439 }
 0x2d6   :  { %17582 = vst [vmem:[#allocation14_spill] sm:$0xff] %v14342_v44  ;;  %v1428_v43 = vpop.f32.mrf.mxu1  ;;  %v14348_v6 = vpop.f32.mrf.mxu0 }
 0x2d7   :  { %17583 = vst [vmem:[#allocation15_spill] sm:$0xff] %v14346_v15  ;;  %v1545_v1 = vadd.f32 %v1544_v31, %v1428_v43  ;;  %v1607_v46 = vpop.f32.mrf.mxu2  ;;  %v1549_v41 = vpop.f32.mrf.mxu3 }
 0x2d8   :  { %v14350_v36 = vadd.f32 %v1607_v46, %v1472_v53 }
 0x2da   :  { %4687 = vrot.lane.b32.xlu2 %v13751_v9, %s12764_s25 }
 0x2db   :  { %4531 = vrot.lane.b32.xlu0 %v13751_v9, %s12763_s20  ;;  %4843 = vrot.lane.b32.xlu1 %v13751_v9, %s12765_s26 }
 0x2dc   :  { %10375 = vmatmul.msk.bf16.vlgmr.msrb.gmra.mxu3 %vm1334_vm2, %v14252_v8  ;;  %v14363_v33 = vpop.permute.xlu2 %3599 }
 0x2dd   :  { %17584 = vst [vmem:[#allocation16_spill] sm:$0xff] %v14363_v33  ;;  %v14365_v31 = vpop.permute.xlu0 %3133  ;;  %2418 = vmatpush.bf16.msrb.mxu3 %v2360_v28  ;;  %v14367_v10 = vpop.permute.xlu1 %3445  ;;  %v14379_v33 = vld [vmem:[%s17524_s3 + $0x60] sm:$0xff] }
 0x2de   :  { %17585 = vst [vmem:[#allocation17_spill] sm:$0xff] %v14365_v31  ;;  %v1431_v53 = vpop.f32.mrf.mxu1  ;;  %v14369_v43 = vpop.f32.mrf.mxu0 }
 0x2df   :  { %17586 = vst [vmem:[#allocation18_spill] sm:$0xff] %v14367_v10  ;;  %v1548_v46 = vadd.f32 %v1547_v47, %v1431_v53  ;;  %v1609_v14 = vpop.f32.mrf.mxu2  ;;  %v1659_v44 = vpop.f32.mrf.mxu3  ;;  %v2361_v47 = vsel %vm2357_vm8, %v14048_v0, %v14163_v40 }
 0x2e0   :  { %v14372_v15 = vadd.f32 %v1609_v14, %v14247_v58  ;;  %10346 = vmatmul.msk.bf16.gmra.mxu1 %vm1334_vm2, %v14200_v16 }
 0x2e1   :  { %10332 = vmatmul.msk.bf16.gmra.mxu0 %vm1334_vm2, %v14103_v35 }
 0x2e2   :  { %4693 = vrot.lane.b32.xlu2 %v13777_v20, %s12764_s25 }
 0x2e3   :  { %4537 = vrot.lane.b32.xlu0 %v13777_v20, %s12763_s20  ;;  %4849 = vrot.lane.b32.xlu1 %v13777_v20, %s12765_s26  ;;  %s12774_s20 = smov 102  }
 0x2e4   :  { %10389 = vmatmul.msk.bf16.vlgmr.msrb.gmra.mxu2 %vm1334_vm2, %v14379_v33  ;;  %v14394_v58 = vpop.permute.xlu2 %3751 }
 0x2e5   :  { %17587 = vst [vmem:[#allocation19_spill] sm:$0xff] %v14394_v58  ;;  %2437 = vmatpush.bf16.msrb.mxu2 %v2361_v47  ;;  %v14396_v35 = vpop.permute.xlu0 %3285  ;;  %v14398_v14 = vpop.permute.xlu1 %3597 }
 0x2e6   :  { %17588 = vst [vmem:[#allocation20_spill] sm:$0xff] %v14396_v35  ;;  %v1433_v28 = vpop.f32.mrf.mxu1  ;;  %v14400_v53 = vpop.f32.mrf.mxu0 }
 0x2e7   :  { %17589 = vst [vmem:[#allocation21_spill] sm:$0xff] %v14398_v14  ;;  %v1550_v10 = vadd.f32 %v1549_v41, %v1433_v28  ;;  %v1678_v23 = vpop.f32.mrf.mxu2  ;;  %v1661_v31 = vpop.f32.mrf.mxu3 }
 0x2e8   :  { %v14402_v51 = vadd.f32 %v1678_v23, %v1543_v45 }
 0x2ea   :  { %4845 = vrot.lane.b32.xlu2 %v13753_v12, %s12765_s26 }
 0x2eb   :  { %4689 = vrot.lane.b32.xlu0 %v13753_v12, %s12764_s25  ;;  %5001 = vrot.lane.b32.xlu1 %v13753_v12, %s12766_s17  ;;  %v2204_v12 = vsel %vm2201_vm7, %v14004_v7, %v14115_v50 }
 0x2ec   :  { %10376 = vmatmul.msk.bf16.gmra.mxu3 %vm1334_vm2, %v14300_v57  ;;  %v14412_v0 = vpop.permute.xlu2 %3757 }
 0x2ed   :  { %v14414_v41 = vpop.permute.xlu0 %3291  ;;  %v14416_v47 = vpop.permute.xlu1 %3603 }
 0x2ee   :  { %17590 = vst [vmem:[#allocation22_spill] sm:$0xff] %v14414_v41  ;;  %v1523_v45 = vpop.f32.mrf.mxu1  ;;  %v14418_v23 = vpop.f32.mrf.mxu0 }
 0x2ef   :  { %17591 = vst [vmem:[#allocation23_spill] sm:$0xff] %v14416_v47  ;;  %v1524_v28 = vadd.f32 %v1523_v45, %v14318_v24  ;;  %v1680_v58 = vpop.f32.mrf.mxu2  ;;  %v1664_v14 = vpop.f32.mrf.mxu3  ;;  %v14431_v47 = vld [vmem:[%s17524_s3 + $0x68] sm:$0xff]  ;;  %v2203_v24 = vsel %vm2201_vm7, %v14026_v5, %v14004_v7  ;;  %vm3293_vm7 = vcmask 793600  }
 0x2f0   :  { %v14421_v35 = vadd.f32 %v1680_v58, %v1545_v1  ;;  %10353 = vmatmul.msk.bf16.vlgmr.msra.gmra.mxu1 %vm1334_vm2, %v14151_v62 }
 0x2f1   :  { %v1691_v41 = vadd.f32 %v1659_v44, %v1524_v28  ;;  %2262 = vmatpush.bf16.msra.mxu1 %v2204_v12  ;;  %10351 = vmatmul.msk.bf16.vlgmr.msra.gmra.mxu0 %vm1334_vm2, %v14151_v62 }
 0x2f2   :  { %2243 = vmatpush.bf16.msra.mxu0 %v2203_v24  ;;  %4851 = vrot.lane.b32.xlu2 %v13808_v18, %s12765_s26 }
 0x2f3   :  { %4695 = vrot.lane.b32.xlu0 %v13808_v18, %s12764_s25  ;;  %5007 = vrot.lane.b32.xlu1 %v13808_v18, %s12766_s17  ;;  %v2515_v18 = vsel %vm2513_vm9, %v14069_v48, %v14188_v29 }
 0x2f4   :  { %10390 = vmatmul.msk.bf16.gmra.mxu2 %vm1334_vm2, %v14431_v47  ;;  %v14446_v50 = vpop.permute.xlu2 %3909 }
 0x2f5   :  { %17592 = vst [vmem:[#allocation24_spill] sm:$0xff] %v14446_v50  ;;  %v14448_v62 = vpop.permute.xlu0 %3443  ;;  %v14450_v44 = vpop.permute.xlu1 %3755 }
 0x2f6   :  { %17593 = vst [vmem:[#allocation25_spill] sm:$0xff] %v14450_v44  ;;  %v1525_v7 = vpop.f32.mrf.mxu1  ;;  %v14452_v5 = vpop.f32.mrf.mxu0 }
 0x2f7   :  { %v1526_v1 = vadd.f32 %v1525_v7, %v14348_v6  ;;  %v1683_v58 = vpop.f32.mrf.mxu2  ;;  %v1666_v45 = vpop.f32.mrf.mxu3 }
 0x2f8   :  { %v14455_v28 = vadd.f32 %v1683_v58, %v1548_v46 }
 0x2f9   :  { %v1696_v12 = vadd.f32 %v1661_v31, %v1526_v1 }
 0x2fa   :  { %5003 = vrot.lane.b32.xlu2 %v13775_v55, %s12766_s17 }
 0x2fb   :  { %4847 = vrot.lane.b32.xlu0 %v13775_v55, %s12765_s26 }
 0x2fc   :  { %10395 = vmatmul.msk.bf16.vlgmr.msra.gmra.mxu3 %vm1334_vm2, %v14379_v33  ;;  %v14466_v6 = vpop.permute.xlu2 %3915 }
 0x2fd   :  { %17594 = vst [vmem:[#allocation26_spill] sm:$0xff] %v14466_v6  ;;  %2555 = vmatpush.bf16.msra.mxu3 %v2515_v18  ;;  %v14468_v46 = vpop.permute.xlu0 %3595  ;;  %v14470_v31 = vpop.permute.xlu1 %3907 }
 0x2fe   :  { %17595 = vst [vmem:[#allocation27_spill] sm:$0xff] %v14468_v46  ;;  %v1528_v24 = vpop.f32.mrf.mxu1  ;;  %v14472_v7 = vpop.f32.mrf.mxu0 }
 0x2ff   :  { %17596 = vst [vmem:[#allocation28_spill] sm:$0xff] %v14470_v31  ;;  %v1529_v1 = vadd.f32 %v1528_v24, %v14369_v43  ;;  %v1685_v55 = vpop.f32.mrf.mxu2  ;;  %v1796_v58 = vpop.f32.mrf.mxu3  ;;  %v2516_v43 = vsel %vm2513_vm9, %v14188_v29, %v14117_v2 }
 0x300   :  { %v14475_v50 = vadd.f32 %v1685_v55, %v1550_v10  ;;  %10354 = vmatmul.msk.bf16.gmra.mxu1 %vm1334_vm2, %v14200_v16 }
 0x301   :  { %v1701_v44 = vadd.f32 %v1664_v14, %v1529_v1  ;;  %10352 = vmatmul.msk.bf16.gmra.mxu0 %vm1334_vm2, %v14200_v16 }
 0x303   :  { %4999 = vrot.lane.b32.xlu0 %v13751_v9, %s12766_s17 }
 0x304   :  { %10397 = vmatmul.msk.bf16.vlgmr.msra.gmra.mxu2 %vm1334_vm2, %v14379_v33  ;;  %v14488_v18 = vpop.permute.xlu2 %4067 }
 0x305   :  { %17597 = vst [vmem:[#allocation29_spill] sm:$0xff] %v14488_v18  ;;  %2574 = vmatpush.bf16.msra.mxu2 %v2516_v43  ;;  %v14490_v10 = vpop.permute.xlu0 %3601  ;;  %v14492_v24 = vpop.permute.xlu1 %3913  ;;  %v1505_v43 = vadd.f32 %v14418_v23, %v14096_v38  ;;  %v2359_v38 = vsel %vm2357_vm8, %v14140_v17, %v14073_v13  ;;  %v5141_v23 = vld [vmem:[%s17525_s4 + $0x8] sm:$0xff]  ;;  %v1507_v13 = vadd.f32 %v14452_v5, %v14119_v26  ;;  %v14557_v5 = vld [vmem:[%s17524_s3 + $0x70] sm:$0xff] }
 0x306   :  { %17598 = vst [vmem:[#allocation30_spill] sm:$0xff] %v14492_v24  ;;  %v1530_v14 = vpop.f32.mrf.mxu1  ;;  %v14494_v1 = vpop.f32.mrf.mxu0 }
 0x307   :  { %v1531_v16 = vadd.f32 %v1530_v14, %v14400_v53  ;;  %v1815_v9 = vpop.f32.mrf.mxu2  ;;  %v1798_v55 = vpop.f32.mrf.mxu3 }
 0x308   :  { %v14497_v6 = vadd.f32 %v1815_v9, %v1691_v41 }
 0x309   :  { %v1706_v31 = vadd.f32 %v1666_v45, %v1531_v16 }
 0x30b   :  { %5005 = vrot.lane.b32.xlu0 %v13777_v20, %s12766_s17  ;;  %s12772_s17 = smov 106  }
 0x30c   :  { %10396 = vmatmul.msk.bf16.gmra.mxu3 %vm1334_vm2, %v14431_v47  ;;  %v14503_v29 = vpop.permute.xlu2 %4219 }
 0x30d   :  { %17599 = vst [vmem:[#allocation31_spill] sm:$0xff] %v14503_v29  ;;  %v14507_v24 = vpop.permute.xlu0 %3753  ;;  %v14509_v53 = vpop.permute.xlu1 %4065 }
 0x30e   :  { %v14514_v41 = vsel %vm4073_vm10, %v14509_v53, %v14488_v18  ;;  %v1640_v45 = vpop.f32.mrf.mxu1  ;;  %v1621_v20 = vpop.f32.mrf.mxu0 }
 0x30f   :  { %17600 = vst [vmem:[#allocation32_spill] sm:$0xff] %v14514_v41  ;;  %v1690_v14 = vadd.f32 %v1640_v45, %v1505_v43  ;;  %v14517_v16 = vadd.f32 %v1621_v20, %v14195_v49  ;;  %v1817_v9 = vpop.f32.mrf.mxu2  ;;  %v1801_v29 = vpop.f32.mrf.mxu3  ;;  %v2358_v49 = vsel %vm2357_vm8, %v14024_v56, %v14140_v17  ;;  %vm3449_vm8 = vcmask 785408  }
 0x310   :  { %v14519_v46 = vadd.f32 %v1817_v9, %v1696_v12  ;;  %10373 = vmatmul.msk.bf16.vlgmr.msrb.gmra.mxu1 %vm1334_vm2, %v14252_v8 }
 0x311   :  { %v1846_v41 = vadd.f32 %v1796_v58, %v1690_v14  ;;  %2399 = vmatpush.bf16.msrb.mxu1 %v2359_v38  ;;  %10371 = vmatmul.msk.bf16.vlgmr.msrb.gmra.mxu0 %vm1334_vm2, %v14252_v8 }
 0x312   :  { %2380 = vmatpush.bf16.msrb.mxu0 %v2358_v49 }
 0x313   :  { %5151 = vperm.xlu0 %12639, %v5141_v23   ;;  %v2670_v23 = vsel %vm2669_vm12, %v14212_v54, %v14142_v19 }
 0x314   :  { %10398 = vmatmul.msk.bf16.gmra.mxu2 %vm1334_vm2, %v14431_v47  ;;  %v14550_v9 = vpop.permute.xlu2 %4225 }
 0x315   :  { %v14538_v12 = vpop.permute.xlu0 %3759  ;;  %v14540_v58 = vpop.permute.xlu1 %4071 }
 0x316   :  { %v14545_v8 = vsel %vm3761_vm11, %v14412_v0, %v14538_v12  ;;  %v1642_v43 = vpop.f32.mrf.mxu1  ;;  %v1623_v56 = vpop.f32.mrf.mxu0 }
 0x317   :  { %v1695_v17 = vadd.f32 %v1642_v43, %v1507_v13  ;;  %v14548_v45 = vadd.f32 %v1623_v56, %v14219_v22  ;;  %v1820_v20 = vpop.f32.mrf.mxu2  ;;  %v1803_v14 = vpop.f32.mrf.mxu3  ;;  %v1510_v22 = vadd.f32 %v14472_v7, %v14144_v21 }
 0x318   :  { %v14552_v26 = vadd.f32 %v1820_v20, %v1701_v44 }
 0x319   :  { %v1851_v38 = vadd.f32 %v1798_v55, %v1695_v17 }
 0x31c   :  { %10415 = vmatmul.msk.bf16.vlgmr.msrb.gmra.mxu3 %vm1334_vm2, %v14557_v5  ;;  %v14577_v21 = vpop.permute.xlu2 %4377 }
 0x31d   :  { %2692 = vmatpush.bf16.msrb.mxu3 %v2670_v23  ;;  %v14566_v44 = vpop.permute.xlu0 %3911  ;;  %v14568_v49 = vpop.permute.xlu1 %4223  ;;  %17602 = vst [vmem:[#allocation34_spill] sm:$0xff] %v14577_v21 }
 0x31e   :  { %17601 = vst [vmem:[#allocation33_spill] sm:$0xff] %v14568_v49  ;;  %v1645_v13 = vpop.f32.mrf.mxu1  ;;  %v1626_v43 = vpop.f32.mrf.mxu0 }
 0x31f   :  { %v1700_v56 = vadd.f32 %v1645_v13, %v1510_v22  ;;  %v1699_v55 = vadd.f32 %v1626_v43, %v14244_v61  ;;  %v1822_v17 = vpop.f32.mrf.mxu2  ;;  %v1933_v20 = vpop.f32.mrf.mxu3  ;;  %v2671_v61 = vsel %vm2669_vm12, %v14142_v19, %v14113_v60  ;;  %v14596_v19 = vld [vmem:[%s17524_s3 + $0x78] sm:$0xff] }
 0x320   :  { %v14571_v18 = vadd.f32 %v1822_v17, %v1706_v31  ;;  %10374 = vmatmul.msk.bf16.gmra.mxu1 %vm1334_vm2, %v14300_v57  ;;  %v1512_v31 = vadd.f32 %v14494_v1, %v14168_v32 }
 0x321   :  { %v1856_v54 = vadd.f32 %v1801_v29, %v1700_v56  ;;  %10372 = vmatmul.msk.bf16.gmra.mxu0 %vm1334_vm2, %v14300_v57 }
 0x324   :  { %10417 = vmatmul.msk.bf16.vlgmr.msrb.gmra.mxu2 %vm1334_vm2, %v14557_v5  ;;  %v14598_v1 = vpop.permute.xlu2 %4383 }
 0x325   :  { %2711 = vmatpush.bf16.msrb.mxu2 %v2671_v61  ;;  %v14586_v7 = vpop.permute.xlu0 %4063  ;;  %v14588_v23 = vpop.permute.xlu1 %4375  ;;  %17604 = vst [vmem:[#allocation36_spill] sm:$0xff] %v14598_v1 }
 0x326   :  { %17603 = vst [vmem:[#allocation35_spill] sm:$0xff] %v14588_v23  ;;  %v1647_v29 = vpop.f32.mrf.mxu1  ;;  %v1628_v22 = vpop.f32.mrf.mxu0  ;;  %v2514_v23 = vsel %vm2513_vm9, %v14094_v42, %v14069_v48 }
 0x327   :  { %v1705_v57 = vadd.f32 %v1647_v29, %v1512_v31  ;;  %v1704_v13 = vadd.f32 %v1628_v22, %v14272_v63  ;;  %v1952_v43 = vpop.f32.mrf.mxu2  ;;  %v1935_v56 = vpop.f32.mrf.mxu3 }
 0x328   :  { %v14591_v17 = vadd.f32 %v1952_v43, %v1846_v41 }
 0x329   :  { %v1861_v32 = vadd.f32 %v1803_v14, %v1705_v57 }
 0x32c   :  { %10416 = vmatmul.msk.bf16.gmra.mxu3 %vm1334_vm2, %v14596_v19 }
 0x32d   :  { %v14602_v61 = vpop.permute.xlu0 %4069  ;;  %v14604_v31 = vpop.permute.xlu1 %4381 }
 0x32e   :  { %v14609_v63 = vsel %vm4385_vm13, %v14604_v31, %v14598_v1  ;;  %v1777_v41 = vpop.f32.mrf.mxu1  ;;  %v1758_v29 = vpop.f32.mrf.mxu0 }
 0x32f   :  { %17605 = vst [vmem:[#allocation37_spill] sm:$0xff] %v14609_v63  ;;  %v1845_v22 = vadd.f32 %v1777_v41, %v14517_v16  ;;  %v1844_v14 = vadd.f32 %v1758_v29, %v14295_v30  ;;  %v1954_v57 = vpop.f32.mrf.mxu2  ;;  %v1938_v43 = vpop.f32.mrf.mxu3 }
 0x330   :  { %v14616_v21 = vadd.f32 %v1954_v57, %v1851_v38  ;;  %10393 = vmatmul.msk.bf16.vlgmr.msra.gmra.mxu1 %vm1334_vm2, %v14379_v33 }
 0x331   :  { %v2001_v49 = vadd.f32 %v1933_v20, %v1845_v22  ;;  %2536 = vmatpush.bf16.msra.mxu1 %v2514_v23  ;;  %10391 = vmatmul.msk.bf16.vlgmr.msra.gmra.mxu0 %vm1334_vm2, %v14379_v33  ;;  %v14634_v33 = vld [vmem:[%s17524_s3 + $0x80] sm:$0xff] }
 0x332   :  { %2456 = vmatpush.bf16.msra.mxu0 %v14163_v40 }
 0x334   :  { %10418 = vmatmul.msk.bf16.gmra.mxu2 %vm1334_vm2, %v14596_v19 }
 0x335   :  { %v14625_v30 = vpop.permute.xlu0 %4221  ;;  %v14638_v23 = vpop.permute.xlu1 %4533 }
 0x336   :  { %v1779_v16 = vpop.f32.mrf.mxu1  ;;  %v1760_v41 = vpop.f32.mrf.mxu0  ;;  %17606 = vst [vmem:[#allocation38_spill] sm:$0xff] %v14638_v23 }
 0x337   :  { %v1850_v48 = vadd.f32 %v1779_v16, %v14548_v45  ;;  %v1849_v42 = vadd.f32 %v1760_v41, %v14320_v11  ;;  %v1957_v38 = vpop.f32.mrf.mxu2  ;;  %v1940_v29 = vpop.f32.mrf.mxu3 }
 0x338   :  { %v14629_v20 = vadd.f32 %v1957_v38, %v1856_v54 }
 0x339   :  { %v2006_v40 = vadd.f32 %v1935_v56, %v1850_v48 }
 0x33c   :  { %10435 = vmatmul.msk.bf16.vlgmr.msra.gmra.mxu3 %vm1334_vm2, %v14634_v33 }
 0x33d   :  { %2768 = vmatpush.bf16.msra.mxu3 %v14166_v27  ;;  %v14641_v45 = vpop.permute.xlu0 %4227  ;;  %v14665_v63 = vpop.permute.xlu1 %4539 }
 0x33e   :  { %v1782_v11 = vpop.f32.mrf.mxu1  ;;  %v1763_v22 = vpop.f32.mrf.mxu0  ;;  %17607 = vst [vmem:[#allocation39_spill] sm:$0xff] %v14665_v63 }
 0x33f   :  { %v1855_v57 = vadd.f32 %v1782_v11, %v1699_v55  ;;  %v1854_v54 = vadd.f32 %v1763_v22, %v14350_v36  ;;  %v1959_v16 = vpop.f32.mrf.mxu2  ;;  %v2070_v41 = vpop.f32.mrf.mxu3  ;;  %v2826_v55 = vsel %vm2825_vm14, %v14138_v4, %v14267_v25 }
 0x340   :  { %v14644_v38 = vadd.f32 %v1959_v16, %v1861_v32  ;;  %10394 = vmatmul.msk.bf16.gmra.mxu1 %vm1334_vm2, %v14431_v47 }
 0x341   :  { %v2011_v56 = vadd.f32 %v1938_v43, %v1855_v57  ;;  %10392 = vmatmul.msk.bf16.gmra.mxu0 %vm1334_vm2, %v14431_v47  ;;  %v14663_v47 = vld [vmem:[%s17524_s3 + $0x88] sm:$0xff] }
 0x344   :  { %10437 = vmatmul.msk.bf16.vlgmr.msra.gmra.mxu2 %vm1334_vm2, %v14634_v33 }
 0x345   :  { %2848 = vmatpush.bf16.msra.mxu2 %v2826_v55  ;;  %v14655_v36 = vpop.permute.xlu0 %4379 }
 0x346   :  { %v1784_v32 = vpop.f32.mrf.mxu1  ;;  %v1765_v48 = vpop.f32.mrf.mxu0 }
 0x347   :  { %v1860_v11 = vadd.f32 %v1784_v32, %v1704_v13  ;;  %v1859_v22 = vadd.f32 %v1765_v48, %v14372_v15  ;;  %v2089_v43 = vpop.f32.mrf.mxu2  ;;  %v2072_v57 = vpop.f32.mrf.mxu3 }
 0x348   :  { %v14658_v16 = vadd.f32 %v2089_v43, %v2001_v49 }
 0x349   :  { %v2016_v4 = vadd.f32 %v1940_v29, %v1860_v11  ;;  %v2517_v29 = vsel %vm2513_vm9, %v14117_v2, %v14092_v37  ;;  %vm3605_vm9 = vcmask 703488  }
 0x34c   :  { %10436 = vmatmul.msk.bf16.gmra.mxu3 %vm1334_vm2, %v14663_v47 }
 0x34d   :  { %v14669_v55 = vpop.permute.xlu0 %4531 }
 0x34e   :  { %v1914_v13 = vpop.f32.mrf.mxu1  ;;  %v1834_v32 = vpop.f32.mrf.mxu0 }
 0x34f   :  { %v2000_v15 = vadd.f32 %v1914_v13, %v1844_v14  ;;  %v1848_v48 = vadd.f32 %v1834_v32, %v14402_v51  ;;  %v2091_v49 = vpop.f32.mrf.mxu2  ;;  %v2075_v43 = vpop.f32.mrf.mxu3 }
 0x350   :  { %v14672_v1 = vadd.f32 %v2091_v49, %v2006_v40  ;;  %10413 = vmatmul.msk.bf16.vlgmr.msrb.gmra.mxu1 %vm1334_vm2, %v14557_v5  ;;  %v14682_v14 = vpop.permute.xlu1 %4691  ;;  %v14686_v51 = vpop.permute.xlu2 %4535 }
 0x351   :  { %v2156_v23 = vadd.f32 %v2070_v41, %v2000_v15  ;;  %2612 = vmatpush.bf16.msrb.mxu1 %v14092_v37  ;;  %10411 = vmatmul.msk.bf16.vlgmr.msrb.gmra.mxu0 %vm1334_vm2, %v14557_v5  ;;  %17608 = vst [vmem:[#allocation40_spill] sm:$0xff] %v14682_v14 }
 0x352   :  { %2593 = vmatpush.bf16.msrb.mxu0 %v2517_v29  ;;  %17609 = vst [vmem:[#allocation41_spill] sm:$0xff] %v14686_v51  ;;  %v14701_v29 = vld [vmem:[%s17524_s3 + $0x90] sm:$0xff] }
 0x354   :  { %10438 = vmatmul.msk.bf16.gmra.mxu2 %vm1334_vm2, %v14663_v47 }
 0x355   :  { %v14688_v40 = vpop.permute.xlu0 %4537 }
 0x356   :  { %17610 = vst [vmem:[#allocation42_spill] sm:$0xff] %v14688_v40  ;;  %v14693_v41 = vsel %vm4541_vm15, %v14686_v51, %v14688_v40  ;;  %v1916_v11 = vpop.f32.mrf.mxu1  ;;  %v1836_v13 = vpop.f32.mrf.mxu0 }
 0x357   :  { %17611 = vst [vmem:[#allocation43_spill] sm:$0xff] %v14693_v41  ;;  %v2005_v32 = vadd.f32 %v1916_v11, %v1849_v42  ;;  %v1853_v37 = vadd.f32 %v1836_v13, %v14421_v35  ;;  %v2094_v2 = vpop.f32.mrf.mxu2  ;;  %v2077_v15 = vpop.f32.mrf.mxu3  ;;  %v2829_v41 = vsel %vm2825_vm14, %v14161_v52, %v14288_v59 }
 0x358   :  { %v14696_v49 = vadd.f32 %v2094_v2, %v2011_v56  ;;  %v14708_v42 = vpop.permute.xlu1 %4843 }
 0x359   :  { %v2161_v63 = vadd.f32 %v2072_v57, %v2005_v32  ;;  %17612 = vst [vmem:[#allocation44_spill] sm:$0xff] %v14708_v42 }
 0x35c   :  { %10455 = vmatmul.msk.bf16.vlgmr.msrb.gmra.mxu3 %vm1334_vm2, %v14701_v29 }
 0x35d   :  { %2905 = vmatpush.bf16.msrb.mxu3 %v2829_v41  ;;  %v14710_v35 = vpop.permute.xlu0 %4689 }
 0x35e   :  { %v14715_v56 = vsel %vm4697_vm0, %v14710_v35, %v14682_v14  ;;  %v1919_v11 = vpop.f32.mrf.mxu1  ;;  %v1839_v57 = vpop.f32.mrf.mxu0 }
 0x35f   :  { %17613 = vst [vmem:[#allocation45_spill] sm:$0xff] %v14715_v56  ;;  %v2010_v13 = vadd.f32 %v1919_v11, %v1854_v54  ;;  %v1858_v32 = vadd.f32 %v1839_v57, %v14455_v28  ;;  %v2096_v2 = vpop.f32.mrf.mxu2  ;;  %v2146_v40 = vpop.f32.mrf.mxu3 }
 0x360   :  { %v14718_v51 = vadd.f32 %v2096_v2, %v2016_v4  ;;  %10414 = vmatmul.msk.bf16.gmra.mxu1 %vm1334_vm2, %v14596_v19 }
 0x361   :  { %v2166_v41 = vadd.f32 %v2075_v43, %v2010_v13  ;;  %10412 = vmatmul.msk.bf16.gmra.mxu0 %vm1334_vm2, %v14596_v19  ;;  %v14735_v43 = vld [vmem:[%s17524_s3 + $0x98] sm:$0xff]  ;;  %v14737_v13 = vpop.permute.xlu1 %4849 }
 0x362   :  { %17615 = vst [vmem:[#allocation47_spill] sm:$0xff] %v14737_v13 }
 0x364   :  { %10457 = vmatmul.msk.bf16.vlgmr.msrb.gmra.mxu2 %vm1334_vm2, %v14701_v29 }
 0x365   :  { %2924 = vmatpush.bf16.msrb.mxu2 %v14288_v59  ;;  %v14727_v42 = vpop.permute.xlu0 %4695 }
 0x366   :  { %17614 = vst [vmem:[#allocation46_spill] sm:$0xff] %v14727_v42  ;;  %v1921_v54 = vpop.f32.mrf.mxu1  ;;  %v1841_v28 = vpop.f32.mrf.mxu0 }
 0x367   :  { %v2015_v11 = vadd.f32 %v1921_v54, %v1859_v22  ;;  %v1863_v4 = vadd.f32 %v1841_v28, %v14475_v50  ;;  %v2226_v57 = vpop.f32.mrf.mxu2  ;;  %v2148_v2 = vpop.f32.mrf.mxu3 }
 0x368   :  { %v14730_v56 = vadd.f32 %v2226_v57, %v2156_v23 }
 0x369   :  { %v2171_v14 = vadd.f32 %v2077_v15, %v2015_v11  ;;  %v2673_v15 = vsel %vm2669_vm12, %v14239_v34, %v14166_v27 }
 0x36c   :  { %10456 = vmatmul.msk.bf16.gmra.mxu3 %vm1334_vm2, %v14735_v43 }
 0x36d   :  { %v14741_v59 = vpop.permute.xlu0 %4847 }
 0x36e   :  { %17616 = vst [vmem:[#allocation48_spill] sm:$0xff] %v14741_v59  ;;  %v1990_v22 = vpop.f32.mrf.mxu1  ;;  %v1971_v54 = vpop.f32.mrf.mxu0 }
 0x36f   :  { %v2004_v50 = vadd.f32 %v1990_v22, %v1848_v48  ;;  %v2003_v28 = vadd.f32 %v1971_v54, %v14497_v6  ;;  %v2228_v23 = vpop.f32.mrf.mxu2  ;;  %v2151_v57 = vpop.f32.mrf.mxu3  ;;  %v2672_v6 = vsel %vm2669_vm12, %v14113_v60, %v14239_v34  ;;  %v2984_v60 = vsel %vm2981_vm3, %v14312_v3, %v14241_v39 }
 0x370   :  { %v14744_v42 = vadd.f32 %v2228_v23, %v2161_v63  ;;  %10433 = vmatmul.msk.bf16.vlgmr.msra.gmra.mxu1 %vm1334_vm2, %v14634_v33  ;;  %v14756_v48 = vpop.permute.xlu1 %5001  ;;  %vm3917_vm12 = vcmask 687104  }
 0x371   :  { %v2160_v11 = vadd.f32 %v2146_v40, %v2004_v50  ;;  %2749 = vmatpush.bf16.msra.mxu1 %v2673_v15  ;;  %10419 = vmatmul.msk.bf16.vlgmr.msra.gmra.mxu0 %vm1334_vm2, %v14557_v5  ;;  %17617 = vst [vmem:[#allocation49_spill] sm:$0xff] %v14756_v48 }
 0x372   :  { %2730 = vmatpush.bf16.msra.mxu0 %v2672_v6 }
 0x374   :  { %10458 = vmatmul.msk.bf16.gmra.mxu2 %vm1334_vm2, %v14735_v43 }
 0x375   :  { %v14760_v63 = vpop.permute.xlu0 %4999 }
 0x376   :  { %17618 = vst [vmem:[#allocation50_spill] sm:$0xff] %v14760_v63  ;;  %v1992_v22 = vpop.f32.mrf.mxu1  ;;  %v1973_v54 = vpop.f32.mrf.mxu0 }
 0x377   :  { %v2009_v27 = vadd.f32 %v1992_v22, %v1853_v37  ;;  %v2008_v40 = vadd.f32 %v1973_v54, %v14519_v46  ;;  %v2231_v50 = vpop.f32.mrf.mxu2  ;;  %v2153_v23 = vpop.f32.mrf.mxu3 }
 0x378   :  { %v14763_v5 = vadd.f32 %v2231_v50, %v2166_v41  ;;  %v14770_v34 = vpop.permute.xlu1 %5007 }
 0x379   :  { %v2165_v15 = vadd.f32 %v2148_v2, %v2009_v27  ;;  %17619 = vst [vmem:[#allocation51_spill] sm:$0xff] %v14770_v34 }
 0x37c   :  { %10463 = vmatmul.msk.bf16.vlgmr.msra.gmra.mxu3 %vm1334_vm2, %v14701_v29 }
 0x37d   :  { %3042 = vmatpush.bf16.msra.mxu3 %v2984_v60  ;;  %v14772_v37 = vpop.permute.xlu0 %5005  ;;  %v14787_v60 = vld [vmem:[%s17524_s3 + $0xa0] sm:$0xff] }
 0x37e   :  { %17620 = vst [vmem:[#allocation52_spill] sm:$0xff] %v14772_v37  ;;  %v14777_v46 = vsel %vm5009_vm4, %v14772_v37, %v14770_v34  ;;  %v1995_v41 = vpop.f32.mrf.mxu1  ;;  %v1976_v2 = vpop.f32.mrf.mxu0 }
 0x37f   :  { %17621 = vst [vmem:[#allocation53_spill] sm:$0xff] %v14777_v46  ;;  %v2014_v6 = vadd.f32 %v1995_v41, %v1858_v32  ;;  %v2013_v22 = vadd.f32 %v1976_v2, %v14552_v26  ;;  %v2233_v54 = vpop.f32.mrf.mxu2  ;;  %v2283_v27 = vpop.f32.mrf.mxu3  ;;  %v17622_v26 = vld [vmem:[#allocation4_spill] sm:$0xff] }
 0x380   :  { %v14780_v50 = vadd.f32 %v2233_v54, %v2171_v14  ;;  %10434 = vmatmul.msk.bf16.gmra.mxu1 %vm1334_vm2, %v14663_v47  ;;  %v2985_v14 = vsel %vm2981_vm3, %v14241_v39, %v17622_v26 }
 0x381   :  { %v2170_v63 = vadd.f32 %v2151_v57, %v2014_v6  ;;  %10420 = vmatmul.msk.bf16.gmra.mxu0 %vm1334_vm2, %v14596_v19 }
 0x384   :  { %10477 = vmatmul.msk.bf16.vlgmr.msra.gmra.mxu2 %vm1334_vm2, %v14787_v60 }
 0x385   :  { %3061 = vmatpush.bf16.msra.mxu2 %v2985_v14 }
 0x386   :  { %v1997_v32 = vpop.f32.mrf.mxu1  ;;  %v1978_v41 = vpop.f32.mrf.mxu0 }
 0x387   :  { %v2019_v2 = vadd.f32 %v1997_v32, %v1863_v4  ;;  %v2018_v54 = vadd.f32 %v1978_v41, %v14571_v18  ;;  %v2302_v46 = vpop.f32.mrf.mxu2  ;;  %v2285_v34 = vpop.f32.mrf.mxu3  ;;  %v17623_v18 = vld [vmem:[#allocation3_spill] sm:$0xff] }
 0x388   :  { %v14797_v37 = vadd.f32 %v2302_v46, %v2160_v11  ;;  %v2828_v4 = vsel %vm2825_vm14, %v17623_v18, %v14161_v52  ;;  %v14812_v11 = vld [vmem:[%s17524_s3 + $0xa8] sm:$0xff] }
 0x389   :  { %v2175_v57 = vadd.f32 %v2153_v23, %v2019_v2 }
 0x38c   :  { %10464 = vmatmul.msk.bf16.gmra.mxu3 %vm1334_vm2, %v14735_v43 }
 0x38e   :  { %v2127_v19 = vpop.f32.mrf.mxu1  ;;  %v2108_v6 = vpop.f32.mrf.mxu0 }
 0x38f   :  { %v2159_v48 = vadd.f32 %v2127_v19, %v2003_v28  ;;  %v2158_v59 = vadd.f32 %v2108_v6, %v14591_v17  ;;  %v2304_v39 = vpop.f32.mrf.mxu2  ;;  %v2288_v14 = vpop.f32.mrf.mxu3  ;;  %v2827_v17 = vsel %vm2825_vm14, %v14267_v25, %v17623_v18  ;;  %v17625_v25 = vld [vmem:[#allocation8_spill] sm:$0xff]  ;;  %vm9773_vm14 = vcmask 15360  }
 0x390   :  { %v14802_v13 = vadd.f32 %v2304_v39, %v2165_v15  ;;  %10441 = vmatmul.msk.bf16.vlgmr.msrb.gmra.mxu1 %vm1334_vm2, %v14634_v33 }
 0x391   :  { %v2315_v23 = vadd.f32 %v2283_v27, %v2159_v48  ;;  %2886 = vmatpush.bf16.msrb.mxu1 %v2828_v4  ;;  %10439 = vmatmul.msk.bf16.vlgmr.msrb.gmra.mxu0 %vm1334_vm2, %v14634_v33  ;;  %v17624_v33 = vld [vmem:[#allocation6_spill] sm:$0xff] }
 0x392   :  { %2867 = vmatpush.bf16.msrb.mxu0 %v2827_v17  ;;  %v3139_v2 = vsel %vm3137_vm5, %v17625_v25, %v17624_v33 }
 0x394   :  { %10478 = vmatmul.msk.bf16.gmra.mxu2 %vm1334_vm2, %v14812_v11 }
 0x396   :  { %v2129_v28 = vpop.f32.mrf.mxu1  ;;  %v2110_v52 = vpop.f32.mrf.mxu0 }
 0x397   :  { %v2164_v15 = vadd.f32 %v2129_v28, %v2008_v40  ;;  %v2163_v46 = vadd.f32 %v2110_v52, %v14616_v21  ;;  %v2307_v32 = vpop.f32.mrf.mxu2  ;;  %v2290_v41 = vpop.f32.mrf.mxu3 }
 0x398   :  { %v14822_v48 = vadd.f32 %v2307_v32, %v2170_v63 }
 0x399   :  { %v2320_v27 = vadd.f32 %v2285_v34, %v2164_v15  ;;  %v17626_v34 = vld [vmem:[#allocation17_spill] sm:$0xff] }
 0x39c   :  { %10483 = vmatmul.msk.bf16.vlgmr.msrb.gmra.mxu3 %vm1334_vm2, %v14787_v60 }
 0x39d   :  { %3179 = vmatpush.bf16.msrb.mxu3 %v3139_v2 }
 0x39e   :  { %v2132_v19 = vpop.f32.mrf.mxu1  ;;  %v2113_v6 = vpop.f32.mrf.mxu0 }
 0x39f   :  { %v2169_v39 = vadd.f32 %v2132_v19, %v2013_v22  ;;  %v2168_v40 = vadd.f32 %v2113_v6, %v14629_v20  ;;  %v2309_v21 = vpop.f32.mrf.mxu2  ;;  %v2420_v18 = vpop.f32.mrf.mxu3  ;;  %v3140_v22 = vsel %vm3137_vm5, %v17624_v33, %v17626_v34 }
 0x3a0   :  { %v14830_v4 = vadd.f32 %v2309_v21, %v2175_v57  ;;  %10442 = vmatmul.msk.bf16.gmra.mxu1 %vm1334_vm2, %v14663_v47 }
 0x3a1   :  { %v2325_v63 = vadd.f32 %v2288_v14, %v2169_v39  ;;  %10440 = vmatmul.msk.bf16.gmra.mxu0 %vm1334_vm2, %v14663_v47 }
 0x3a4   :  { %10485 = vmatmul.msk.bf16.vlgmr.msrb.gmra.mxu2 %vm1334_vm2, %v14787_v60 }
 0x3a5   :  { %3198 = vmatpush.bf16.msrb.mxu2 %v3140_v22 }
 0x3a6   :  { %v2134_v20 = vpop.f32.mrf.mxu1  ;;  %v2115_v17 = vpop.f32.mrf.mxu0 }
 0x3a7   :  { %v2174_v28 = vadd.f32 %v2134_v20, %v2018_v54  ;;  %v2173_v57 = vadd.f32 %v2115_v17, %v14644_v38  ;;  %v2439_v52 = vpop.f32.mrf.mxu2  ;;  %v2422_v15 = vpop.f32.mrf.mxu3  ;;  %v17627_v38 = vld [vmem:[#allocation2_spill] sm:$0xff] }
 0x3a8   :  { %v14842_v32 = vadd.f32 %v2439_v52, %v2315_v23  ;;  %v2983_v54 = vsel %vm2981_vm3, %v17627_v38, %v14312_v3  ;;  %v17628_v23 = vld [vmem:[#allocation5_spill] sm:$0xff] }
 0x3a9   :  { %v2330_v14 = vadd.f32 %v2290_v41, %v2174_v28  ;;  %v2982_v41 = vsel %vm2981_vm3, %v17628_v23, %v17627_v38  ;;  %v17631_v23 = vld [vmem:[#allocation12_spill] sm:$0xff] }
 0x3ac   :  { %10484 = vmatmul.msk.bf16.gmra.mxu3 %vm1334_vm2, %v14812_v11 }
 0x3ae   :  { %v2264_v47 = vpop.f32.mrf.mxu1  ;;  %v2245_v2 = vpop.f32.mrf.mxu0 }
 0x3af   :  { %v2314_v19 = vadd.f32 %v2264_v47, %v2158_v59  ;;  %v2313_v6 = vadd.f32 %v2245_v2, %v14658_v16  ;;  %v2441_v33 = vpop.f32.mrf.mxu2  ;;  %v2425_v39 = vpop.f32.mrf.mxu3  ;;  %v17630_v47 = vld [vmem:[#allocation7_spill] sm:$0xff] }
 0x3b0   :  { %v14847_v21 = vadd.f32 %v2441_v33, %v2320_v27  ;;  %10461 = vmatmul.msk.bf16.vlgmr.msra.gmra.mxu1 %vm1334_vm2, %v14701_v29 }
 0x3b1   :  { %v2470_v22 = vadd.f32 %v2420_v18, %v2314_v19  ;;  %3023 = vmatpush.bf16.msra.mxu1 %v2983_v54  ;;  %10459 = vmatmul.msk.bf16.vlgmr.msra.gmra.mxu0 %vm1334_vm2, %v14701_v29  ;;  %v14867_v18 = vld [vmem:[%s17524_s3 + $0xb0] sm:$0xff] }
 0x3b2   :  { %3004 = vmatpush.bf16.msra.mxu0 %v2982_v41  ;;  %v17629_v29 = vld [vmem:[#allocation20_spill] sm:$0xff] }
 0x3b4   :  { %10486 = vmatmul.msk.bf16.gmra.mxu2 %vm1334_vm2, %v14812_v11 }
 0x3b6   :  { %v2266_v16 = vpop.f32.mrf.mxu1  ;;  %v2247_v59 = vpop.f32.mrf.mxu0 }
 0x3b7   :  { %v2319_v27 = vadd.f32 %v2266_v16, %v2163_v46  ;;  %v2318_v20 = vadd.f32 %v2247_v59, %v14672_v1  ;;  %v2444_v17 = vpop.f32.mrf.mxu2  ;;  %v2427_v3 = vpop.f32.mrf.mxu3  ;;  %v3294_v46 = vsel %vm3293_vm7, %v17630_v47, %v17629_v29 }
 0x3b8   :  { %v14862_v28 = vadd.f32 %v2444_v17, %v2325_v63 }
 0x3b9   :  { %v2475_v52 = vadd.f32 %v2422_v15, %v2319_v27 }
 0x3bc   :  { %10503 = vmatmul.msk.bf16.vlgmr.msra.gmra.mxu3 %vm1334_vm2, %v14867_v18 }
 0x3bd   :  { %3316 = vmatpush.bf16.msra.mxu3 %v3294_v46 }
 0x3be   :  { %v2269_v1 = vpop.f32.mrf.mxu1  ;;  %v2250_v2 = vpop.f32.mrf.mxu0 }
 0x3bf   :  { %v2324_v19 = vadd.f32 %v2269_v1, %v2168_v40  ;;  %v2323_v63 = vadd.f32 %v2250_v2, %v14696_v49  ;;  %v2446_v33 = vpop.f32.mrf.mxu2  ;;  %v2557_v38 = vpop.f32.mrf.mxu3  ;;  %v3295_v40 = vsel %vm3293_vm7, %v17629_v29, %v17631_v23  ;;  %v17632_v2 = vld [vmem:[#allocation14_spill] sm:$0xff] }
 0x3c0   :  { %v14875_v54 = vadd.f32 %v2446_v33, %v2330_v14  ;;  %10462 = vmatmul.msk.bf16.gmra.mxu1 %vm1334_vm2, %v14735_v43 }
 0x3c1   :  { %v2480_v15 = vadd.f32 %v2425_v39, %v2324_v19  ;;  %10460 = vmatmul.msk.bf16.gmra.mxu0 %vm1334_vm2, %v14735_v43  ;;  %v14892_v43 = vld [vmem:[%s17524_s3 + $0xb8] sm:$0xff] }
 0x3c4   :  { %10505 = vmatmul.msk.bf16.vlgmr.msra.gmra.mxu2 %vm1334_vm2, %v14867_v18 }
 0x3c5   :  { %3335 = vmatpush.bf16.msra.mxu2 %v3295_v40 }
 0x3c6   :  { %v2271_v49 = vpop.f32.mrf.mxu1  ;;  %v2252_v41 = vpop.f32.mrf.mxu0 }
 0x3c7   :  { %v2329_v16 = vadd.f32 %v2271_v49, %v2173_v57  ;;  %v2328_v14 = vadd.f32 %v2252_v41, %v14718_v51  ;;  %v2576_v59 = vpop.f32.mrf.mxu2  ;;  %v2559_v27 = vpop.f32.mrf.mxu3 }
 0x3c8   :  { %v14887_v17 = vadd.f32 %v2576_v59, %v2470_v22  ;;  %v3138_v22 = vsel %vm3137_vm5, %v17632_v2, %v17625_v25 }
 0x3c9   :  { %v2485_v39 = vadd.f32 %v2427_v3, %v2329_v16 }
 0x3cc   :  { %10504 = vmatmul.msk.bf16.gmra.mxu3 %vm1334_vm2, %v14892_v43 }
 0x3ce   :  { %v2401_v29 = vpop.f32.mrf.mxu1  ;;  %v2382_v47 = vpop.f32.mrf.mxu0 }
 0x3cf   :  { %v2469_v46 = vadd.f32 %v2401_v29, %v2313_v6  ;;  %v2468_v57 = vadd.f32 %v2382_v47, %v14730_v56  ;;  %v2578_v1 = vpop.f32.mrf.mxu2  ;;  %v2562_v51 = vpop.f32.mrf.mxu3 }
 0x3d0   :  { %v14900_v19 = vadd.f32 %v2578_v1, %v2475_v52  ;;  %10481 = vmatmul.msk.bf16.vlgmr.msrb.gmra.mxu1 %vm1334_vm2, %v14787_v60 }
 0x3d1   :  { %v2625_v3 = vadd.f32 %v2557_v38, %v2469_v46  ;;  %3160 = vmatpush.bf16.msrb.mxu1 %v3138_v22  ;;  %10479 = vmatmul.msk.bf16.vlgmr.msrb.gmra.mxu0 %vm1334_vm2, %v14787_v60  ;;  %v14915_v38 = vld [vmem:[%s17524_s3 + $0xc0] sm:$0xff]  ;;  %v17635_v46 = vld [vmem:[#allocation15_spill] sm:$0xff] }
 0x3d2   :  { %3080 = vmatpush.bf16.msrb.mxu0 %v17622_v26  ;;  %v17633_v26 = vld [vmem:[#allocation22_spill] sm:$0xff] }
 0x3d4   :  { %10506 = vmatmul.msk.bf16.gmra.mxu2 %vm1334_vm2, %v14892_v43 }
 0x3d6   :  { %v2403_v56 = vpop.f32.mrf.mxu1  ;;  %v2384_v6 = vpop.f32.mrf.mxu0 }
 0x3d7   :  { %v2474_v33 = vadd.f32 %v2403_v56, %v2318_v20  ;;  %v2473_v25 = vadd.f32 %v2384_v6, %v14744_v42  ;;  %v2581_v52 = vpop.f32.mrf.mxu2  ;;  %v2564_v40 = vpop.f32.mrf.mxu3 }
 0x3d8   :  { %v14910_v49 = vadd.f32 %v2581_v52, %v2480_v15 }
 0x3d9   :  { %v2630_v60 = vadd.f32 %v2559_v27, %v2474_v33  ;;  %v17634_v27 = vld [vmem:[#allocation11_spill] sm:$0xff] }
 0x3da   :  { %v3450_v1 = vsel %vm3449_vm8, %v17635_v46, %v17634_v27 }
 0x3dc   :  { %10523 = vmatmul.msk.bf16.vlgmr.msrb.gmra.mxu3 %vm1334_vm2, %v14915_v38 }
 0x3dd   :  { %3392 = vmatpush.bf16.msrb.mxu3 %v17633_v26 }
 0x3de   :  { %v2406_v41 = vpop.f32.mrf.mxu1  ;;  %v2387_v16 = vpop.f32.mrf.mxu0 }
 0x3df   :  { %v2479_v20 = vadd.f32 %v2406_v41, %v2323_v63  ;;  %v2478_v42 = vadd.f32 %v2387_v16, %v14763_v5  ;;  %v2583_v59 = vpop.f32.mrf.mxu2  ;;  %v2694_v29 = vpop.f32.mrf.mxu3 }
 0x3e0   :  { %v14921_v15 = vadd.f32 %v2583_v59, %v2485_v39  ;;  %10482 = vmatmul.msk.bf16.gmra.mxu1 %vm1334_vm2, %v14812_v11  ;;  %v17636_v59 = vld [vmem:[#allocation10_spill] sm:$0xff] }
 0x3e1   :  { %v2635_v47 = vadd.f32 %v2562_v51, %v2479_v20  ;;  %10480 = vmatmul.msk.bf16.gmra.mxu0 %vm1334_vm2, %v14812_v11  ;;  %v14938_v11 = vld [vmem:[%s17524_s3 + $0xc8] sm:$0xff] }
 0x3e4   :  { %10525 = vmatmul.msk.bf16.vlgmr.msrb.gmra.mxu2 %vm1334_vm2, %v14915_v38 }
 0x3e5   :  { %3472 = vmatpush.bf16.msrb.mxu2 %v3450_v1 }
 0x3e6   :  { %v2408_v5 = vpop.f32.mrf.mxu1  ;;  %v2389_v63 = vpop.f32.mrf.mxu0 }
 0x3e7   :  { %v2484_v39 = vadd.f32 %v2408_v5, %v2328_v14  ;;  %v2483_v2 = vadd.f32 %v2389_v63, %v14780_v50  ;;  %v2713_v22 = vpop.f32.mrf.mxu2  ;;  %v2696_v56 = vpop.f32.mrf.mxu3  ;;  %v14961_v63 = vld [vmem:[%s17524_s3 + $0xd0] sm:$0xff] }
 0x3e8   :  { %v14933_v6 = vadd.f32 %v2713_v22, %v2625_v3  ;;  %v17638_v22 = vld [vmem:[#allocation18_spill] sm:$0xff] }
 0x3e9   :  { %v2640_v51 = vadd.f32 %v2564_v40, %v2484_v39  ;;  %v3141_v40 = vsel %vm3137_vm5, %v17626_v34, %v17636_v59  ;;  %v17637_v34 = vld [vmem:[#allocation13_spill] sm:$0xff] }
 0x3ec   :  { %10524 = vmatmul.msk.bf16.gmra.mxu3 %vm1334_vm2, %v14938_v11 }
 0x3ee   :  { %v2538_v33 = vpop.f32.mrf.mxu1  ;;  %v2458_v52 = vpop.f32.mrf.mxu0 }
 0x3ef   :  { %v2624_v41 = vadd.f32 %v2538_v33, %v2468_v57  ;;  %v2472_v14 = vadd.f32 %v2458_v52, %v14797_v37  ;;  %v2715_v16 = vpop.f32.mrf.mxu2  ;;  %v2699_v50 = vpop.f32.mrf.mxu3  ;;  %v3453_v33 = vsel %vm3449_vm8, %v17638_v22, %v17637_v34 }
 0x3f0   :  { %v14943_v20 = vadd.f32 %v2715_v16, %v2630_v60  ;;  %10501 = vmatmul.msk.bf16.vlgmr.msra.gmra.mxu1 %vm1334_vm2, %v14867_v18 }
 0x3f1   :  { %v2780_v3 = vadd.f32 %v2694_v29, %v2624_v41  ;;  %3236 = vmatpush.bf16.msra.mxu1 %v17636_v59  ;;  %10499 = vmatmul.msk.bf16.vlgmr.msra.gmra.mxu0 %vm1334_vm2, %v14867_v18 }
 0x3f2   :  { %3217 = vmatpush.bf16.msra.mxu0 %v3141_v40 }
 0x3f4   :  { %10526 = vmatmul.msk.bf16.gmra.mxu2 %vm1334_vm2, %v14938_v11 }
 0x3f6   :  { %v2540_v37 = vpop.f32.mrf.mxu1  ;;  %v2460_v57 = vpop.f32.mrf.mxu0 }
 0x3f7   :  { %v2629_v60 = vadd.f32 %v2540_v37, %v2473_v25  ;;  %v2477_v46 = vadd.f32 %v2460_v57, %v14802_v13  ;;  %v2718_v1 = vpop.f32.mrf.mxu2  ;;  %v2701_v29 = vpop.f32.mrf.mxu3 }
 0x3f8   :  { %v14956_v5 = vadd.f32 %v2718_v1, %v2635_v47 }
 0x3f9   :  { %v2785_v39 = vadd.f32 %v2696_v56, %v2629_v60 }
 0x3fc   :  { %10543 = vmatmul.msk.bf16.vlgmr.msra.gmra.mxu3 %vm1334_vm2, %v14961_v63 }
 0x3fd   :  { %3529 = vmatpush.bf16.msra.mxu3 %v3453_v33 }
 0x3fe   :  { %v2543_v25 = vpop.f32.mrf.mxu1  ;;  %v2463_v13 = vpop.f32.mrf.mxu0 }
 0x3ff   :  { %v2634_v52 = vadd.f32 %v2543_v25, %v2478_v42  ;;  %v2482_v47 = vadd.f32 %v2463_v13, %v14822_v48  ;;  %v2720_v41 = vpop.f32.mrf.mxu2  ;;  %v2770_v16 = vpop.f32.mrf.mxu3 }
 0x400   :  { %v14969_v59 = vadd.f32 %v2720_v41, %v2640_v51  ;;  %10502 = vmatmul.msk.bf16.gmra.mxu1 %vm1334_vm2, %v14892_v43 }
 0x401   :  { %v2790_v56 = vadd.f32 %v2699_v50, %v2634_v52  ;;  %10500 = vmatmul.msk.bf16.gmra.mxu0 %vm1334_vm2, %v14892_v43  ;;  %v14984_v50 = vld [vmem:[%s17524_s3 + $0xd8] sm:$0xff] }
 0x404   :  { %10545 = vmatmul.msk.bf16.vlgmr.msra.gmra.mxu2 %vm1334_vm2, %v14961_v63 }
 0x405   :  { %3548 = vmatpush.bf16.msra.mxu2 %v17637_v34 }
 0x406   :  { %v2545_v40 = vpop.f32.mrf.mxu1  ;;  %v2465_v42 = vpop.f32.mrf.mxu0 }
 0x407   :  { %v2639_v37 = vadd.f32 %v2545_v40, %v2483_v2  ;;  %v2487_v48 = vadd.f32 %v2465_v42, %v14830_v4  ;;  %v2850_v57 = vpop.f32.mrf.mxu2  ;;  %v2772_v51 = vpop.f32.mrf.mxu3 }
 0x408   :  { %v14979_v60 = vadd.f32 %v2850_v57, %v2780_v3  ;;  %v17639_v3 = vld [vmem:[#allocation9_spill] sm:$0xff] }
 0x409   :  { %v2795_v1 = vadd.f32 %v2701_v29, %v2639_v37  ;;  %v3297_v41 = vsel %vm3293_vm7, %v17639_v3, %v17633_v26 }
 0x40c   :  { %10544 = vmatmul.msk.bf16.gmra.mxu3 %vm1334_vm2, %v14984_v50 }
 0x40e   :  { %v2614_v33 = vpop.f32.mrf.mxu1  ;;  %v2595_v34 = vpop.f32.mrf.mxu0 }
 0x40f   :  { %v2628_v25 = vadd.f32 %v2614_v33, %v2472_v14  ;;  %v2627_v2 = vadd.f32 %v2595_v34, %v14842_v32  ;;  %v2852_v13 = vpop.f32.mrf.mxu2  ;;  %v2775_v4 = vpop.f32.mrf.mxu3  ;;  %v3296_v32 = vsel %vm3293_vm7, %v17631_v23, %v17639_v3 }
 0x410   :  { %v14989_v52 = vadd.f32 %v2852_v13, %v2785_v39  ;;  %10521 = vmatmul.msk.bf16.vlgmr.msrb.gmra.mxu1 %vm1334_vm2, %v14915_v38 }
 0x411   :  { %v2784_v29 = vadd.f32 %v2770_v16, %v2628_v25  ;;  %3373 = vmatpush.bf16.msrb.mxu1 %v3297_v41  ;;  %10507 = vmatmul.msk.bf16.vlgmr.msrb.gmra.mxu0 %vm1334_vm2, %v14867_v18  ;;  %v17640_v18 = vld [vmem:[#allocation16_spill] sm:$0xff]  ;;  %v17641_v41 = vld [vmem:[#allocation23_spill] sm:$0xff] }
 0x412   :  { %3354 = vmatpush.bf16.msrb.mxu0 %v3296_v32  ;;  %v3608_v33 = vsel %vm3605_vm9, %v17640_v18, %v14490_v10 }
 0x414   :  { %10546 = vmatmul.msk.bf16.gmra.mxu2 %vm1334_vm2, %v14984_v50 }
 0x416   :  { %v2616_v14 = vpop.f32.mrf.mxu1  ;;  %v2597_v39 = vpop.f32.mrf.mxu0 }
 0x417   :  { %v2633_v40 = vadd.f32 %v2616_v14, %v2477_v46  ;;  %v2632_v42 = vadd.f32 %v2597_v39, %v14847_v21  ;;  %v2855_v37 = vpop.f32.mrf.mxu2  ;;  %v2777_v26 = vpop.f32.mrf.mxu3 }
 0x418   :  { %v15004_v16 = vadd.f32 %v2855_v37, %v2790_v56  ;;  %v15019_v56 = vld [vmem:[%s17524_s3 + $0xe0] sm:$0xff] }
 0x419   :  { %v2789_v57 = vadd.f32 %v2772_v51, %v2633_v40 }
 0x41c   :  { %10551 = vmatmul.msk.bf16.vlgmr.msrb.gmra.mxu3 %vm1334_vm2, %v14961_v63 }
 0x41d   :  { %3666 = vmatpush.bf16.msrb.mxu3 %v3608_v33 }
 0x41e   :  { %v2619_v23 = vpop.f32.mrf.mxu1  ;;  %v2600_v34 = vpop.f32.mrf.mxu0 }
 0x41f   :  { %v2638_v25 = vadd.f32 %v2619_v23, %v2482_v47  ;;  %v2637_v46 = vadd.f32 %v2600_v34, %v14862_v28  ;;  %v2857_v21 = vpop.f32.mrf.mxu2  ;;  %v2907_v13 = vpop.f32.mrf.mxu3  ;;  %v3609_v28 = vsel %vm3605_vm9, %v14490_v10, %v17641_v41 }
 0x420   :  { %v15012_v3 = vadd.f32 %v2857_v21, %v2795_v1  ;;  %10522 = vmatmul.msk.bf16.gmra.mxu1 %vm1334_vm2, %v14938_v11 }
 0x421   :  { %v2794_v51 = vadd.f32 %v2775_v4, %v2638_v25  ;;  %10508 = vmatmul.msk.bf16.gmra.mxu0 %vm1334_vm2, %v14892_v43 }
 0x424   :  { %10565 = vmatmul.msk.bf16.vlgmr.msrb.gmra.mxu2 %vm1334_vm2, %v15019_v56 }
 0x425   :  { %3685 = vmatpush.bf16.msrb.mxu2 %v3609_v28 }
 0x426   :  { %v2621_v47 = vpop.f32.mrf.mxu1  ;;  %v2602_v1 = vpop.f32.mrf.mxu0 }
 0x427   :  { %v2643_v32 = vadd.f32 %v2621_v47, %v2487_v48  ;;  %v2642_v14 = vadd.f32 %v2602_v1, %v14875_v54  ;;  %v2926_v39 = vpop.f32.mrf.mxu2  ;;  %v2909_v40 = vpop.f32.mrf.mxu3  ;;  %v3452_v54 = vsel %vm3449_vm8, %v14448_v62, %v17638_v22  ;;  %v15044_v48 = vld [vmem:[%s17524_s3 + $0xe8] sm:$0xff] }
 0x428   :  { %v15029_v37 = vadd.f32 %v2926_v39, %v2784_v29 }
 0x429   :  { %v2799_v4 = vadd.f32 %v2777_v26, %v2643_v32  ;;  %v17642_v32 = vld [vmem:[#allocation25_spill] sm:$0xff] }
 0x42c   :  { %10552 = vmatmul.msk.bf16.gmra.mxu3 %vm1334_vm2, %v14984_v50 }
 0x42e   :  { %v2751_v43 = vpop.f32.mrf.mxu1  ;;  %v2732_v33 = vpop.f32.mrf.mxu0 }
 0x42f   :  { %v2783_v10 = vadd.f32 %v2751_v43, %v2627_v2  ;;  %v2782_v23 = vadd.f32 %v2732_v33, %v14887_v17  ;;  %v2928_v34 = vpop.f32.mrf.mxu2  ;;  %v2912_v25 = vpop.f32.mrf.mxu3  ;;  %v3451_v17 = vsel %vm3449_vm8, %v17634_v27, %v14448_v62 }
 0x430   :  { %v15034_v21 = vadd.f32 %v2928_v34, %v2789_v57  ;;  %10529 = vmatmul.msk.bf16.vlgmr.msra.gmra.mxu1 %vm1334_vm2, %v14915_v38 }
 0x431   :  { %v2939_v29 = vadd.f32 %v2907_v13, %v2783_v10  ;;  %3510 = vmatpush.bf16.msra.mxu1 %v3452_v54  ;;  %10527 = vmatmul.msk.bf16.vlgmr.msra.gmra.mxu0 %vm1334_vm2, %v14915_v38  ;;  %v3763_v38 = vsel %vm3761_vm11, %v14507_v24, %v17642_v32 }
 0x432   :  { %3491 = vmatpush.bf16.msra.mxu0 %v3451_v17 }
 0x434   :  { %10566 = vmatmul.msk.bf16.gmra.mxu2 %vm1334_vm2, %v15044_v48 }
 0x436   :  { %v2753_v2 = vpop.f32.mrf.mxu1  ;;  %v2734_v22 = vpop.f32.mrf.mxu0 }
 0x437   :  { %v2788_v26 = vadd.f32 %v2753_v2, %v2632_v42  ;;  %v2787_v57 = vadd.f32 %v2734_v22, %v14900_v19  ;;  %v2931_v28 = vpop.f32.mrf.mxu2  ;;  %v2914_v47 = vpop.f32.mrf.mxu3 }
 0x438   :  { %v15054_v13 = vadd.f32 %v2931_v28, %v2794_v51 }
 0x439   :  { %v2944_v1 = vadd.f32 %v2909_v40, %v2788_v26  ;;  %v3764_v40 = vsel %vm3761_vm11, %v17642_v32, %v14412_v0 }
 0x43c   :  { %10571 = vmatmul.msk.bf16.vlgmr.msra.gmra.mxu3 %vm1334_vm2, %v15019_v56 }
 0x43d   :  { %3803 = vmatpush.bf16.msra.mxu3 %v3763_v38 }
 0x43e   :  { %v2756_v62 = vpop.f32.mrf.mxu1  ;;  %v2737_v27 = vpop.f32.mrf.mxu0 }
 0x43f   :  { %v2793_v39 = vadd.f32 %v2756_v62, %v2637_v46  ;;  %v2792_v42 = vadd.f32 %v2737_v27, %v14910_v49  ;;  %v2933_v43 = vpop.f32.mrf.mxu2  ;;  %v3044_v19 = vpop.f32.mrf.mxu3 }
 0x440   :  { %v15062_v33 = vadd.f32 %v2933_v43, %v2799_v4  ;;  %10530 = vmatmul.msk.bf16.gmra.mxu1 %vm1334_vm2, %v14938_v11  ;;  %v15099_v43 = vld [vmem:[%s17524_s3 + $0xf0] sm:$0xff] }
 0x441   :  { %v2949_v51 = vadd.f32 %v2912_v25, %v2793_v39  ;;  %10528 = vmatmul.msk.bf16.gmra.mxu0 %vm1334_vm2, %v14938_v11 }
 0x444   :  { %10573 = vmatmul.msk.bf16.vlgmr.msra.gmra.mxu2 %vm1334_vm2, %v15019_v56 }
 0x445   :  { %3822 = vmatpush.bf16.msra.mxu2 %v3764_v40  ;;  %v17646_v40 = vld [vmem:[#allocation28_spill] sm:$0xff] }
 0x446   :  { %v2758_v49 = vpop.f32.mrf.mxu1  ;;  %v2739_v46 = vpop.f32.mrf.mxu0 }
 0x447   :  { %v2798_v10 = vadd.f32 %v2758_v49, %v2642_v14  ;;  %v2797_v4 = vadd.f32 %v2739_v46, %v14921_v15  ;;  %v3063_v34 = vpop.f32.mrf.mxu2  ;;  %v3046_v54 = vpop.f32.mrf.mxu3  ;;  %v17643_v15 = vld [vmem:[#allocation21_spill] sm:$0xff] }
 0x448   :  { %v15074_v17 = vadd.f32 %v3063_v34, %v2939_v29  ;;  %v3607_v14 = vsel %vm3605_vm9, %v17643_v15, %v17640_v18  ;;  %v17644_v29 = vld [vmem:[#allocation27_spill] sm:$0xff] }
 0x449   :  { %v2954_v25 = vadd.f32 %v2914_v47, %v2798_v10  ;;  %v3606_v47 = vsel %vm3605_vm9, %v17644_v29, %v17643_v15 }
 0x44c   :  { %10572 = vmatmul.msk.bf16.gmra.mxu3 %vm1334_vm2, %v15044_v48 }
 0x44e   :  { %v2888_v11 = vpop.f32.mrf.mxu1  ;;  %v2869_v2 = vpop.f32.mrf.mxu0 }
 0x44f   :  { %v2938_v0 = vadd.f32 %v2888_v11, %v2782_v23  ;;  %v2937_v22 = vadd.f32 %v2869_v2, %v14933_v6  ;;  %v3065_v26 = vpop.f32.mrf.mxu2  ;;  %v3049_v28 = vpop.f32.mrf.mxu3 }
 0x450   :  { %v15079_v32 = vadd.f32 %v3065_v26, %v2944_v1  ;;  %10549 = vmatmul.msk.bf16.vlgmr.msrb.gmra.mxu1 %vm1334_vm2, %v14961_v63 }
 0x451   :  { %v3094_v38 = vadd.f32 %v3044_v19, %v2938_v0  ;;  %3647 = vmatpush.bf16.msrb.mxu1 %v3607_v14  ;;  %10547 = vmatmul.msk.bf16.vlgmr.msrb.gmra.mxu0 %vm1334_vm2, %v14961_v63  ;;  %v17645_v19 = vld [vmem:[#allocation24_spill] sm:$0xff] }
 0x452   :  { %3628 = vmatpush.bf16.msrb.mxu0 %v3606_v47  ;;  %v3918_v49 = vsel %vm3917_vm12, %v17646_v40, %v17645_v19  ;;  %v3919_v2 = vsel %vm3917_vm12, %v17645_v19, %v14566_v44 }
 0x454   :  { %10574 = vmatmul.msk.bf16.gmra.mxu2 %vm1334_vm2, %v15044_v48 }
 0x456   :  { %v2890_v6 = vpop.f32.mrf.mxu1  ;;  %v2871_v23 = vpop.f32.mrf.mxu0 }
 0x457   :  { %v2943_v1 = vadd.f32 %v2890_v6, %v2787_v57  ;;  %v2942_v62 = vadd.f32 %v2871_v23, %v14943_v20  ;;  %v3068_v27 = vpop.f32.mrf.mxu2  ;;  %v3051_v18 = vpop.f32.mrf.mxu3 }
 0x458   :  { %v15094_v39 = vadd.f32 %v3068_v27, %v2949_v51 }
 0x459   :  { %v3099_v63 = vadd.f32 %v3046_v54, %v2943_v1  ;;  %v17647_v1 = vld [vmem:[#allocation19_spill] sm:$0xff] }
 0x45c   :  { %10591 = vmatmul.msk.bf16.vlgmr.msrb.gmra.mxu3 %vm1334_vm2, %v15099_v43 }
 0x45d   :  { %3940 = vmatpush.bf16.msrb.mxu3 %v3918_v49 }
 0x45e   :  { %v2893_v20 = vpop.f32.mrf.mxu1  ;;  %v2874_v57 = vpop.f32.mrf.mxu0 }
 0x45f   :  { %v2948_v46 = vadd.f32 %v2893_v20, %v2792_v42  ;;  %v2947_v51 = vadd.f32 %v2874_v57, %v14956_v5  ;;  %v3070_v10 = vpop.f32.mrf.mxu2  ;;  %v3181_v34 = vpop.f32.mrf.mxu3  ;;  %v15147_v20 = vld [vmem:[%s17524_s3 + $0x100] sm:$0xff] }
 0x460   :  { %v15107_v11 = vadd.f32 %v3070_v10, %v2954_v25  ;;  %10550 = vmatmul.msk.bf16.gmra.mxu1 %vm1334_vm2, %v14984_v50 }
 0x461   :  { %v3104_v54 = vadd.f32 %v3049_v28, %v2948_v46  ;;  %10548 = vmatmul.msk.bf16.gmra.mxu0 %vm1334_vm2, %v14984_v50  ;;  %v15124_v50 = vld [vmem:[%s17524_s3 + $0xf8] sm:$0xff] }
 0x464   :  { %10593 = vmatmul.msk.bf16.vlgmr.msrb.gmra.mxu2 %vm1334_vm2, %v15099_v43 }
 0x465   :  { %3959 = vmatpush.bf16.msrb.mxu2 %v3919_v2 }
 0x466   :  { %v2895_v5 = vpop.f32.mrf.mxu1  ;;  %v2876_v42 = vpop.f32.mrf.mxu0 }
 0x467   :  { %v2953_v0 = vadd.f32 %v2895_v5, %v2797_v4  ;;  %v2952_v25 = vadd.f32 %v2876_v42, %v14969_v59  ;;  %v3200_v26 = vpop.f32.mrf.mxu2  ;;  %v3183_v15 = vpop.f32.mrf.mxu3  ;;  %v4074_v5 = vsel %vm4073_vm10, %v14586_v7, %v14509_v53 }
 0x468   :  { %v15119_v14 = vadd.f32 %v3200_v26, %v3094_v38  ;;  %v3762_v38 = vsel %vm3761_vm11, %v17647_v1, %v14507_v24  ;;  %vm4229_vm11 = vcmask 670720  }
 0x469   :  { %v3109_v28 = vadd.f32 %v3051_v18, %v2953_v0 }
 0x46c   :  { %10592 = vmatmul.msk.bf16.gmra.mxu3 %vm1334_vm2, %v15124_v50 }
 0x46e   :  { %v3025_v29 = vpop.f32.mrf.mxu1  ;;  %v3006_v47 = vpop.f32.mrf.mxu0 }
 0x46f   :  { %v3093_v6 = vadd.f32 %v3025_v29, %v2937_v22  ;;  %v3092_v4 = vadd.f32 %v3006_v47, %v14979_v60  ;;  %v3202_v23 = vpop.f32.mrf.mxu2  ;;  %v3186_v59 = vpop.f32.mrf.mxu3 }
 0x470   :  { %v15132_v27 = vadd.f32 %v3202_v23, %v3099_v63  ;;  %10569 = vmatmul.msk.bf16.vlgmr.msra.gmra.mxu1 %vm1334_vm2, %v15019_v56 }
 0x471   :  { %v3249_v18 = vadd.f32 %v3181_v34, %v3093_v6  ;;  %3784 = vmatpush.bf16.msra.mxu1 %v3762_v38  ;;  %10567 = vmatmul.msk.bf16.vlgmr.msra.gmra.mxu0 %vm1334_vm2, %v15019_v56 }
 0x472   :  { %3704 = vmatpush.bf16.msra.mxu0 %v17641_v41  ;;  %v17648_v41 = vld [vmem:[#allocation26_spill] sm:$0xff] }
 0x474   :  { %10594 = vmatmul.msk.bf16.gmra.mxu2 %vm1334_vm2, %v15124_v50 }
 0x476   :  { %v3027_v60 = vpop.f32.mrf.mxu1  ;;  %v3008_v22 = vpop.f32.mrf.mxu0 }
 0x477   :  { %v3098_v19 = vadd.f32 %v3027_v60, %v2942_v62  ;;  %v3097_v24 = vadd.f32 %v3008_v22, %v14989_v52  ;;  %v3205_v63 = vpop.f32.mrf.mxu2  ;;  %v3188_v40 = vpop.f32.mrf.mxu3 }
 0x478   :  { %v15142_v49 = vadd.f32 %v3205_v63, %v3104_v54 }
 0x479   :  { %v3254_v56 = vadd.f32 %v3183_v15, %v3098_v19 }
 0x47c   :  { %10611 = vmatmul.msk.bf16.vlgmr.msra.gmra.mxu3 %vm1334_vm2, %v15147_v20 }
 0x47d   :  { %4016 = vmatpush.bf16.msra.mxu3 %v17648_v41 }
 0x47e   :  { %v3030_v57 = vpop.f32.mrf.mxu1  ;;  %v3011_v46 = vpop.f32.mrf.mxu0 }
 0x47f   :  { %v3103_v62 = vadd.f32 %v3030_v57, %v2947_v51  ;;  %v3102_v52 = vadd.f32 %v3011_v46, %v15004_v16  ;;  %v3207_v10 = vpop.f32.mrf.mxu2  ;;  %v3318_v34 = vpop.f32.mrf.mxu3 }
 0x480   :  { %v15153_v54 = vadd.f32 %v3207_v10, %v3109_v28  ;;  %10570 = vmatmul.msk.bf16.gmra.mxu1 %vm1334_vm2, %v15044_v48 }
 0x481   :  { %v3259_v2 = vadd.f32 %v3186_v59, %v3103_v62  ;;  %10568 = vmatmul.msk.bf16.gmra.mxu0 %vm1334_vm2, %v15044_v48  ;;  %v15170_v48 = vld [vmem:[%s17524_s3 + $0x108] sm:$0xff] }
 0x484   :  { %10613 = vmatmul.msk.bf16.vlgmr.msra.gmra.mxu2 %vm1334_vm2, %v15147_v20 }
 0x485   :  { %4096 = vmatpush.bf16.msra.mxu2 %v4074_v5 }
 0x486   :  { %v3032_v16 = vpop.f32.mrf.mxu1  ;;  %v3013_v51 = vpop.f32.mrf.mxu0 }
 0x487   :  { %v3108_v42 = vadd.f32 %v3032_v16, %v2952_v25  ;;  %v3107_v0 = vadd.f32 %v3013_v51, %v15012_v3  ;;  %v3337_v26 = vpop.f32.mrf.mxu2  ;;  %v3320_v15 = vpop.f32.mrf.mxu3  ;;  %v15214_v51 = vld [vmem:[%s17524_s3 + $0x118] sm:$0xff] }
 0x488   :  { %v15165_v28 = vadd.f32 %v3337_v26, %v3249_v18 }
 0x489   :  { %v3264_v29 = vadd.f32 %v3188_v40, %v3108_v42 }
 0x48c   :  { %10612 = vmatmul.msk.bf16.gmra.mxu3 %vm1334_vm2, %v15170_v48 }
 0x48e   :  { %v3162_v53 = vpop.f32.mrf.mxu1  ;;  %v3082_v7 = vpop.f32.mrf.mxu0 }
 0x48f   :  { %v3248_v47 = vadd.f32 %v3162_v53, %v3092_v4  ;;  %v3096_v25 = vadd.f32 %v3082_v7, %v15029_v37  ;;  %v3339_v6 = vpop.f32.mrf.mxu2  ;;  %v3323_v3 = vpop.f32.mrf.mxu3  ;;  %v17649_v53 = vld [vmem:[#allocation30_spill] sm:$0xff] }
 0x490   :  { %v15175_v23 = vadd.f32 %v3339_v6, %v3254_v56  ;;  %10589 = vmatmul.msk.bf16.vlgmr.msrb.gmra.mxu1 %vm1334_vm2, %v15099_v43  ;;  %v3921_v7 = vsel %vm3917_vm12, %v17649_v53, %v17648_v41  ;;  %v3920_v6 = vsel %vm3917_vm12, %v14566_v44, %v17649_v53 }
 0x491   :  { %v3404_v59 = vadd.f32 %v3318_v34, %v3248_v47  ;;  %3860 = vmatpush.bf16.msrb.mxu1 %v14538_v12  ;;  %10587 = vmatmul.msk.bf16.vlgmr.msrb.gmra.mxu0 %vm1334_vm2, %v15099_v43  ;;  %v15191_v12 = vld [vmem:[%s17524_s3 + $0x110] sm:$0xff] }
 0x492   :  { %3841 = vmatpush.bf16.msrb.mxu0 %v14545_v8  ;;  %v4077_v8 = vsel %vm4073_vm10, %v14602_v61, %v14540_v58 }
 0x494   :  { %10614 = vmatmul.msk.bf16.gmra.mxu2 %vm1334_vm2, %v15170_v48 }
 0x496   :  { %v3164_v4 = vpop.f32.mrf.mxu1  ;;  %v3084_v37 = vpop.f32.mrf.mxu0 }
 0x497   :  { %v3253_v1 = vadd.f32 %v3164_v4, %v3097_v24  ;;  %v3101_v38 = vadd.f32 %v3084_v37, %v15034_v21  ;;  %v3342_v18 = vpop.f32.mrf.mxu2  ;;  %v3325_v60 = vpop.f32.mrf.mxu3 }
 0x498   :  { %v15186_v22 = vadd.f32 %v3342_v18, %v3259_v2  ;;  %v17650_v18 = vld [vmem:[#allocation33_spill] sm:$0xff] }
 0x499   :  { %v3409_v19 = vadd.f32 %v3320_v15, %v3253_v1 }
 0x49c   :  { %10631 = vmatmul.msk.bf16.vlgmr.msrb.gmra.mxu3 %vm1334_vm2, %v15191_v12 }
 0x49d   :  { %4153 = vmatpush.bf16.msrb.mxu3 %v4077_v8 }
 0x49e   :  { %v3167_v24 = vpop.f32.mrf.mxu1  ;;  %v3087_v21 = vpop.f32.mrf.mxu0 }
 0x49f   :  { %v3258_v63 = vadd.f32 %v3167_v24, %v3102_v52  ;;  %v3106_v40 = vadd.f32 %v3087_v21, %v15054_v13  ;;  %v3344_v56 = vpop.f32.mrf.mxu2  ;;  %v3394_v57 = vpop.f32.mrf.mxu3 }
 0x4a0   :  { %v15199_v46 = vadd.f32 %v3344_v56, %v3264_v29  ;;  %10590 = vmatmul.msk.bf16.gmra.mxu1 %vm1334_vm2, %v15124_v50 }
 0x4a1   :  { %v3414_v62 = vadd.f32 %v3323_v3, %v3258_v63  ;;  %10588 = vmatmul.msk.bf16.gmra.mxu0 %vm1334_vm2, %v15124_v50  ;;  %v15249_v63 = vld [vmem:[%s17524_s3 + $0x120] sm:$0xff] }
 0x4a4   :  { %10633 = vmatmul.msk.bf16.vlgmr.msrb.gmra.mxu2 %vm1334_vm2, %v15191_v12 }
 0x4a5   :  { %4172 = vmatpush.bf16.msrb.mxu2 %v14540_v58 }
 0x4a6   :  { %v3169_v10 = vpop.f32.mrf.mxu1  ;;  %v3089_v52 = vpop.f32.mrf.mxu0 }
 0x4a7   :  { %v3263_v34 = vadd.f32 %v3169_v10, %v3107_v0  ;;  %v3111_v13 = vadd.f32 %v3089_v52, %v15062_v33  ;;  %v3474_v2 = vpop.f32.mrf.mxu2  ;;  %v3396_v5 = vpop.f32.mrf.mxu3 }
 0x4a8   :  { %v15209_v16 = vadd.f32 %v3474_v2, %v3404_v59 }
 0x4a9   :  { %v3419_v42 = vadd.f32 %v3325_v60, %v3263_v34  ;;  %v4232_v60 = vsel %vm4229_vm11, %v17650_v18, %v14550_v9 }
 0x4ac   :  { %10632 = vmatmul.msk.bf16.gmra.mxu3 %vm1334_vm2, %v15214_v51 }
 0x4ae   :  { %v3238_v26 = vpop.f32.mrf.mxu1  ;;  %v3219_v58 = vpop.f32.mrf.mxu0 }
 0x4af   :  { %v3252_v15 = vadd.f32 %v3238_v26, %v3096_v25  ;;  %v3251_v0 = vadd.f32 %v3219_v58, %v15074_v17  ;;  %v3476_v29 = vpop.f32.mrf.mxu2  ;;  %v3399_v33 = vpop.f32.mrf.mxu3 }
 0x4b0   :  { %v15222_v47 = vadd.f32 %v3476_v29, %v3409_v19  ;;  %10609 = vmatmul.msk.bf16.vlgmr.msra.gmra.mxu1 %vm1334_vm2, %v15147_v20  ;;  %v17651_v29 = vld [vmem:[#allocation29_spill] sm:$0xff] }
 0x4b1   :  { %v3408_v3 = vadd.f32 %v3394_v57, %v3252_v15  ;;  %3997 = vmatpush.bf16.msra.mxu1 %v3921_v7  ;;  %10595 = vmatmul.msk.bf16.vlgmr.msra.gmra.mxu0 %vm1334_vm2, %v15099_v43 }
 0x4b2   :  { %3978 = vmatpush.bf16.msra.mxu0 %v3920_v6 }
 0x4b4   :  { %10634 = vmatmul.msk.bf16.gmra.mxu2 %vm1334_vm2, %v15214_v51 }
 0x4b6   :  { %v3240_v17 = vpop.f32.mrf.mxu1  ;;  %v3221_v41 = vpop.f32.mrf.mxu0 }
 0x4b7   :  { %v3257_v25 = vadd.f32 %v3240_v17, %v3101_v38  ;;  %v3256_v59 = vadd.f32 %v3221_v41, %v15079_v32  ;;  %v3479_v4 = vpop.f32.mrf.mxu2  ;;  %v3401_v37 = vpop.f32.mrf.mxu3 }
 0x4b8   :  { %v15234_v1 = vadd.f32 %v3479_v4, %v3414_v62  ;;  %v17653_v4 = vld [vmem:[#allocation34_spill] sm:$0xff] }
 0x4b9   :  { %v3413_v44 = vadd.f32 %v3396_v5, %v3257_v25 }
 0x4bc   :  { %10639 = vmatmul.msk.bf16.vlgmr.msra.gmra.mxu3 %vm1334_vm2, %v15191_v12 }
 0x4bd   :  { %4290 = vmatpush.bf16.msra.mxu3 %v4232_v60 }
 0x4be   :  { %v3243_v43 = vpop.f32.mrf.mxu1  ;;  %v3224_v19 = vpop.f32.mrf.mxu0 }
 0x4bf   :  { %v3262_v8 = vadd.f32 %v3243_v43, %v3106_v40  ;;  %v3261_v38 = vadd.f32 %v3224_v19, %v15094_v39  ;;  %v3481_v32 = vpop.f32.mrf.mxu2  ;;  %v3531_v24 = vpop.f32.mrf.mxu3  ;;  %v4233_v39 = vsel %vm4229_vm11, %v14550_v9, %v14641_v45 }
 0x4c0   :  { %v15242_v21 = vadd.f32 %v3481_v32, %v3419_v42  ;;  %10610 = vmatmul.msk.bf16.gmra.mxu1 %vm1334_vm2, %v15170_v48  ;;  %v4388_v32 = vsel %vm4385_vm13, %v14655_v36, %v14604_v31 }
 0x4c1   :  { %v3418_v56 = vadd.f32 %v3399_v33, %v3262_v8  ;;  %10596 = vmatmul.msk.bf16.gmra.mxu0 %vm1334_vm2, %v15124_v50  ;;  %v15274_v33 = vld [vmem:[%s17524_s3 + $0x128] sm:$0xff] }
 0x4c4   :  { %10653 = vmatmul.msk.bf16.vlgmr.msra.gmra.mxu2 %vm1334_vm2, %v15249_v63 }
 0x4c5   :  { %4309 = vmatpush.bf16.msra.mxu2 %v4233_v39 }
 0x4c6   :  { %v3245_v40 = vpop.f32.mrf.mxu1  ;;  %v3226_v57 = vpop.f32.mrf.mxu0 }
 0x4c7   :  { %v3267_v62 = vadd.f32 %v3245_v40, %v3111_v13  ;;  %v3266_v10 = vadd.f32 %v3226_v57, %v15107_v11  ;;  %v3550_v52 = vpop.f32.mrf.mxu2  ;;  %v3533_v34 = vpop.f32.mrf.mxu3  ;;  %v4076_v13 = vsel %vm4073_vm10, %v17651_v29, %v14602_v61  ;;  %vm4853_vm10 = vcmask 564224  }
 0x4c8   :  { %v15259_v2 = vadd.f32 %v3550_v52, %v3408_v3 }
 0x4c9   :  { %v3423_v5 = vadd.f32 %v3401_v37, %v3267_v62  ;;  %v4387_v37 = vsel %vm4385_vm13, %v17653_v4, %v14655_v36 }
 0x4cc   :  { %10640 = vmatmul.msk.bf16.gmra.mxu3 %vm1334_vm2, %v15214_v51 }
 0x4ce   :  { %v3375_v50 = vpop.f32.mrf.mxu1  ;;  %v3356_v42 = vpop.f32.mrf.mxu0 }
 0x4cf   :  { %v3407_v9 = vadd.f32 %v3375_v50, %v3251_v0  ;;  %v3406_v26 = vadd.f32 %v3356_v42, %v15119_v14  ;;  %v3552_v58 = vpop.f32.mrf.mxu2  ;;  %v3536_v15 = vpop.f32.mrf.mxu3  ;;  %v17652_v14 = vld [vmem:[#allocation32_spill] sm:$0xff]  ;;  %v17654_v50 = vld [vmem:[#allocation31_spill] sm:$0xff] }
 0x4d0   :  { %v15267_v11 = vadd.f32 %v3552_v58, %v3413_v44  ;;  %10617 = vmatmul.msk.bf16.vlgmr.msrb.gmra.mxu1 %vm1334_vm2, %v15147_v20  ;;  %v4230_v42 = vsel %vm4229_vm11, %v17654_v50, %v14625_v30 }
 0x4d1   :  { %v3563_v53 = vadd.f32 %v3531_v24, %v3407_v9  ;;  %4134 = vmatpush.bf16.msrb.mxu1 %v4076_v13  ;;  %10615 = vmatmul.msk.bf16.vlgmr.msrb.gmra.mxu0 %vm1334_vm2, %v15147_v20 }
 0x4d2   :  { %4115 = vmatpush.bf16.msrb.mxu0 %v17652_v14 }
 0x4d4   :  { %10654 = vmatmul.msk.bf16.gmra.mxu2 %vm1334_vm2, %v15274_v33 }
 0x4d6   :  { %v3377_v61 = vpop.f32.mrf.mxu1  ;;  %v3358_v0 = vpop.f32.mrf.mxu0 }
 0x4d7   :  { %v3412_v7 = vadd.f32 %v3377_v61, %v3256_v59  ;;  %v3411_v6 = vadd.f32 %v3358_v0, %v15132_v27  ;;  %v3555_v3 = vpop.f32.mrf.mxu2  ;;  %v3538_v17 = vpop.f32.mrf.mxu3 }
 0x4d8   :  { %v15282_v41 = vadd.f32 %v3555_v3, %v3418_v56 }
 0x4d9   :  { %v3568_v25 = vadd.f32 %v3533_v34, %v3412_v7 }
 0x4dc   :  { %10659 = vmatmul.msk.bf16.vlgmr.msrb.gmra.mxu3 %vm1334_vm2, %v15249_v63 }
 0x4dd   :  { %4427 = vmatpush.bf16.msrb.mxu3 %v4387_v37 }
 0x4de   :  { %v3380_v20 = vpop.f32.mrf.mxu1  ;;  %v3361_v44 = vpop.f32.mrf.mxu0 }
 0x4df   :  { %v3417_v60 = vadd.f32 %v3380_v20, %v3261_v38  ;;  %v3416_v59 = vadd.f32 %v3361_v44, %v15142_v49  ;;  %v3557_v43 = vpop.f32.mrf.mxu2  ;;  %v3668_v27 = vpop.f32.mrf.mxu3 }
 0x4e0   :  { %v15290_v19 = vadd.f32 %v3557_v43, %v3423_v5  ;;  %10618 = vmatmul.msk.bf16.gmra.mxu1 %vm1334_vm2, %v15170_v48 }
 0x4e1   :  { %v3573_v8 = vadd.f32 %v3536_v15, %v3417_v60  ;;  %10616 = vmatmul.msk.bf16.gmra.mxu0 %vm1334_vm2, %v15170_v48 }
 0x4e4   :  { %10661 = vmatmul.msk.bf16.vlgmr.msrb.gmra.mxu2 %vm1334_vm2, %v15249_v63 }
 0x4e5   :  { %4446 = vmatpush.bf16.msrb.mxu2 %v4388_v32 }
 0x4e6   :  { %v3382_v49 = vpop.f32.mrf.mxu1  ;;  %v3363_v38 = vpop.f32.mrf.mxu0 }
 0x4e7   :  { %v3422_v24 = vadd.f32 %v3382_v49, %v3266_v10  ;;  %v3421_v56 = vadd.f32 %v3363_v38, %v15153_v54  ;;  %v3687_v39 = vpop.f32.mrf.mxu2  ;;  %v3670_v40 = vpop.f32.mrf.mxu3  ;;  %v4231_v10 = vsel %vm4229_vm11, %v14625_v30, %v17650_v18  ;;  %v15327_v30 = vld [vmem:[%s17524_s3 + $0x130] sm:$0xff] }
 0x4e8   :  { %v15302_v57 = vadd.f32 %v3687_v39, %v3563_v53  ;;  %v17657_v39 = vld [vmem:[#allocation35_spill] sm:$0xff] }
 0x4e9   :  { %v3578_v62 = vadd.f32 %v3538_v17, %v3422_v24 }
 0x4ec   :  { %10660 = vmatmul.msk.bf16.gmra.mxu3 %vm1334_vm2, %v15274_v33 }
 0x4ee   :  { %v3512_v48 = vpop.f32.mrf.mxu1  ;;  %v3493_v52 = vpop.f32.mrf.mxu0 }
 0x4ef   :  { %v3562_v31 = vadd.f32 %v3512_v48, %v3406_v26  ;;  %v3561_v36 = vadd.f32 %v3493_v52, %v15165_v28  ;;  %v3689_v34 = vpop.f32.mrf.mxu2  ;;  %v3673_v5 = vpop.f32.mrf.mxu3 }
 0x4f0   :  { %v15310_v54 = vadd.f32 %v3689_v34, %v3568_v25  ;;  %10637 = vmatmul.msk.bf16.vlgmr.msra.gmra.mxu1 %vm1334_vm2, %v15191_v12 }
 0x4f1   :  { %v3718_v9 = vadd.f32 %v3668_v27, %v3562_v31  ;;  %4271 = vmatpush.bf16.msra.mxu1 %v4231_v10  ;;  %10635 = vmatmul.msk.bf16.vlgmr.msra.gmra.mxu0 %vm1334_vm2, %v15191_v12  ;;  %v17655_v12 = vld [vmem:[#allocation38_spill] sm:$0xff] }
 0x4f2   :  { %4252 = vmatpush.bf16.msra.mxu0 %v4230_v42  ;;  %v4542_v14 = vsel %vm4541_vm15, %v14669_v55, %v17655_v12  ;;  %v17656_v55 = vld [vmem:[#allocation41_spill] sm:$0xff]  ;;  %v15375_v10 = vld [vmem:[%s17524_s3 + $0x140] sm:$0xff] }
 0x4f3   :  { %v4543_v37 = vsel %vm4541_vm15, %v17655_v12, %v17656_v55 }
 0x4f4   :  { %10662 = vmatmul.msk.bf16.gmra.mxu2 %vm1334_vm2, %v15274_v33 }
 0x4f6   :  { %v3514_v28 = vpop.f32.mrf.mxu1  ;;  %v3495_v18 = vpop.f32.mrf.mxu0 }
 0x4f7   :  { %v3567_v26 = vadd.f32 %v3514_v28, %v3411_v6  ;;  %v3566_v58 = vadd.f32 %v3495_v18, %v15175_v23  ;;  %v3692_v15 = vpop.f32.mrf.mxu2  ;;  %v3675_v29 = vpop.f32.mrf.mxu3 }
 0x4f8   :  { %v15322_v13 = vadd.f32 %v3692_v15, %v3573_v8  ;;  %v4688_v15 = vpop.permute.xlu2 %4687 }
 0x4f9   :  { %v3723_v53 = vadd.f32 %v3670_v40, %v3567_v26  ;;  %v4386_v40 = vsel %vm4385_vm13, %v17657_v39, %v17653_v4  ;;  %vm9755_vm13 = vcmask 1041408  }
 0x4fc   :  { %10679 = vmatmul.msk.bf16.vlgmr.msra.gmra.mxu3 %vm1334_vm2, %v15327_v30 }
 0x4fd   :  { %4564 = vmatpush.bf16.msra.mxu3 %v4542_v14 }
 0x4fe   :  { %v3517_v61 = vpop.f32.mrf.mxu1  ;;  %v3498_v23 = vpop.f32.mrf.mxu0 }
 0x4ff   :  { %v3572_v0 = vadd.f32 %v3517_v61, %v3416_v59  ;;  %v3571_v7 = vadd.f32 %v3498_v23, %v15186_v22  ;;  %v3694_v6 = vpop.f32.mrf.mxu2  ;;  %v3805_v3 = vpop.f32.mrf.mxu3 }
 0x500   :  { %v15335_v17 = vadd.f32 %v3694_v6, %v3578_v62  ;;  %10638 = vmatmul.msk.bf16.gmra.mxu1 %vm1334_vm2, %v15214_v51 }
 0x501   :  { %v3728_v25 = vadd.f32 %v3673_v5, %v3572_v0  ;;  %10636 = vmatmul.msk.bf16.gmra.mxu0 %vm1334_vm2, %v15214_v51  ;;  %v15352_v51 = vld [vmem:[%s17524_s3 + $0x138] sm:$0xff] }
 0x504   :  { %10681 = vmatmul.msk.bf16.vlgmr.msra.gmra.mxu2 %vm1334_vm2, %v15327_v30 }
 0x505   :  { %4583 = vmatpush.bf16.msra.mxu2 %v4543_v37 }
 0x506   :  { %v3519_v22 = vpop.f32.mrf.mxu1  ;;  %v3500_v20 = vpop.f32.mrf.mxu0 }
 0x507   :  { %v3577_v44 = vadd.f32 %v3519_v22, %v3421_v56  ;;  %v3576_v60 = vadd.f32 %v3500_v20, %v15199_v46  ;;  %v3824_v59 = vpop.f32.mrf.mxu2  ;;  %v3807_v43 = vpop.f32.mrf.mxu3  ;;  %v17659_v20 = vld [vmem:[#allocation36_spill] sm:$0xff] }
 0x508   :  { %v15347_v27 = vadd.f32 %v3824_v59, %v3718_v9 }
 0x509   :  { %v3733_v8 = vadd.f32 %v3675_v29, %v3577_v44  ;;  %v4698_v29 = vsel %vm4697_vm0, %v4688_v15, %v14710_v35  ;;  %v17660_v44 = vld [vmem:[#allocation37_spill] sm:$0xff] }
 0x50c   :  { %10680 = vmatmul.msk.bf16.gmra.mxu3 %vm1334_vm2, %v15352_v51 }
 0x50e   :  { %v3649_v32 = vpop.f32.mrf.mxu1  ;;  %v3630_v49 = vpop.f32.mrf.mxu0 }
 0x50f   :  { %v3717_v38 = vadd.f32 %v3649_v32, %v3561_v36  ;;  %v3716_v24 = vadd.f32 %v3630_v49, %v15209_v16  ;;  %v3826_v56 = vpop.f32.mrf.mxu2  ;;  %v3810_v46 = vpop.f32.mrf.mxu3 }
 0x510   :  { %v15360_v62 = vadd.f32 %v3826_v56, %v3723_v53  ;;  %10657 = vmatmul.msk.bf16.vlgmr.msrb.gmra.mxu1 %vm1334_vm2, %v15249_v63  ;;  %v15420_v56 = vpop.permute.xlu2 %4693 }
 0x511   :  { %v3873_v48 = vadd.f32 %v3805_v3, %v3717_v38  ;;  %4408 = vmatpush.bf16.msrb.mxu1 %v4386_v40  ;;  %10655 = vmatmul.msk.bf16.vlgmr.msrb.gmra.mxu0 %vm1334_vm2, %v15249_v63  ;;  %v15418_v38 = vld [vmem:[%s17524_s3 + $0x150] sm:$0xff] }
 0x512   :  { %4328 = vmatpush.bf16.msrb.mxu0 %v14641_v45  ;;  %v17658_v45 = vld [vmem:[#allocation39_spill] sm:$0xff] }
 0x514   :  { %10682 = vmatmul.msk.bf16.gmra.mxu2 %vm1334_vm2, %v15352_v51 }
 0x516   :  { %v3651_v16 = vpop.f32.mrf.mxu1  ;;  %v3632_v52 = vpop.f32.mrf.mxu0 }
 0x517   :  { %v3722_v31 = vadd.f32 %v3651_v16, %v3566_v58  ;;  %v3721_v4 = vadd.f32 %v3632_v52, %v15222_v47  ;;  %v3829_v36 = vpop.f32.mrf.mxu2  ;;  %v3812_v34 = vpop.f32.mrf.mxu3 }
 0x518   :  { %v15370_v5 = vadd.f32 %v3829_v36, %v3728_v25 }
 0x519   :  { %v3878_v63 = vadd.f32 %v3807_v43, %v3722_v31 }
 0x51c   :  { %10699 = vmatmul.msk.bf16.vlgmr.msrb.gmra.mxu3 %vm1334_vm2, %v15375_v10 }
 0x51d   :  { %4640 = vmatpush.bf16.msrb.mxu3 %v17658_v45 }
 0x51e   :  { %v3654_v50 = vpop.f32.mrf.mxu1  ;;  %v3635_v42 = vpop.f32.mrf.mxu0 }
 0x51f   :  { %v3727_v9 = vadd.f32 %v3654_v50, %v3571_v7  ;;  %v3726_v47 = vadd.f32 %v3635_v42, %v15234_v1  ;;  %v3831_v28 = vpop.f32.mrf.mxu2  ;;  %v3942_v18 = vpop.f32.mrf.mxu3 }
 0x520   :  { %v15381_v26 = vadd.f32 %v3831_v28, %v3733_v8  ;;  %10658 = vmatmul.msk.bf16.gmra.mxu1 %vm1334_vm2, %v15274_v33  ;;  %v15443_v28 = vld [vmem:[%s17524_s3 + $0x158] sm:$0xff] }
 0x521   :  { %v3883_v58 = vadd.f32 %v3810_v46, %v3727_v9  ;;  %10656 = vmatmul.msk.bf16.gmra.mxu0 %vm1334_vm2, %v15274_v33  ;;  %v15397_v33 = vld [vmem:[%s17524_s3 + $0x148] sm:$0xff]  ;;  %v17661_v46 = vld [vmem:[#allocation46_spill] sm:$0xff] }
 0x522   :  { %v4701_v39 = vsel %vm4697_vm0, %v15420_v56, %v17661_v46 }
 0x524   :  { %10701 = vmatmul.msk.bf16.vlgmr.msrb.gmra.mxu2 %vm1334_vm2, %v15375_v10 }
 0x525   :  { %4720 = vmatpush.bf16.msrb.mxu2 %v4698_v29 }
 0x526   :  { %v3656_v1 = vpop.f32.mrf.mxu1  ;;  %v3637_v53 = vpop.f32.mrf.mxu0 }
 0x527   :  { %v3732_v12 = vadd.f32 %v3656_v1, %v3576_v60  ;;  %v3731_v14 = vadd.f32 %v3637_v53, %v15242_v21  ;;  %v3961_v61 = vpop.f32.mrf.mxu2  ;;  %v3944_v23 = vpop.f32.mrf.mxu3 }
 0x528   :  { %v15392_v0 = vadd.f32 %v3961_v61, %v3873_v48 }
 0x529   :  { %v3888_v7 = vadd.f32 %v3812_v34, %v3732_v12  ;;  %v17662_v12 = vld [vmem:[#allocation42_spill] sm:$0xff] }
 0x52c   :  { %10700 = vmatmul.msk.bf16.gmra.mxu3 %vm1334_vm2, %v15397_v33 }
 0x52e   :  { %v3786_v35 = vpop.f32.mrf.mxu1  ;;  %v3706_v6 = vpop.f32.mrf.mxu0 }
 0x52f   :  { %v3872_v3 = vadd.f32 %v3786_v35, %v3716_v24  ;;  %v3720_v25 = vadd.f32 %v3706_v6, %v15259_v2  ;;  %v3963_v55 = vpop.f32.mrf.mxu2  ;;  %v3947_v21 = vpop.f32.mrf.mxu3 }
 0x530   :  { %v15402_v37 = vadd.f32 %v3963_v55, %v3878_v63  ;;  %10677 = vmatmul.msk.bf16.vlgmr.msra.gmra.mxu1 %vm1334_vm2, %v15327_v30 }
 0x531   :  { %v4028_v22 = vadd.f32 %v3942_v18, %v3872_v3  ;;  %4484 = vmatpush.bf16.msra.mxu1 %v17659_v20  ;;  %10675 = vmatmul.msk.bf16.vlgmr.msra.gmra.mxu0 %vm1334_vm2, %v15327_v30  ;;  %v17664_v20 = vld [vmem:[#allocation47_spill] sm:$0xff] }
 0x532   :  { %4465 = vmatpush.bf16.msra.mxu0 %v17660_v44 }
 0x534   :  { %10702 = vmatmul.msk.bf16.gmra.mxu2 %vm1334_vm2, %v15397_v33 }
 0x536   :  { %v3788_v60 = vpop.f32.mrf.mxu1  ;;  %v3708_v2 = vpop.f32.mrf.mxu0 }
 0x537   :  { %v3877_v59 = vadd.f32 %v3788_v60, %v3721_v4  ;;  %v3725_v43 = vadd.f32 %v3708_v2, %v15267_v11  ;;  %v3966_v8 = vpop.f32.mrf.mxu2  ;;  %v3949_v32 = vpop.f32.mrf.mxu3 }
 0x538   :  { %v15413_v49 = vadd.f32 %v3966_v8, %v3883_v58 }
 0x539   :  { %v4033_v24 = vadd.f32 %v3944_v23, %v3877_v59 }
 0x53c   :  { %10719 = vmatmul.msk.bf16.vlgmr.msra.gmra.mxu3 %vm1334_vm2, %v15418_v38 }
 0x53d   :  { %4777 = vmatpush.bf16.msra.mxu3 %v4701_v39 }
 0x53e   :  { %v3791_v11 = vpop.f32.mrf.mxu1  ;;  %v3711_v40 = vpop.f32.mrf.mxu0 }
 0x53f   :  { %v3882_v48 = vadd.f32 %v3791_v11, %v3726_v47  ;;  %v3730_v16 = vadd.f32 %v3711_v40, %v15282_v41  ;;  %v3968_v52 = vpop.f32.mrf.mxu2  ;;  %v4018_v31 = vpop.f32.mrf.mxu3 }
 0x540   :  { %v15428_v4 = vadd.f32 %v3968_v52, %v3888_v7  ;;  %10678 = vmatmul.msk.bf16.gmra.mxu1 %vm1334_vm2, %v15352_v51  ;;  %v17663_v7 = vld [vmem:[#allocation43_spill] sm:$0xff] }
 0x541   :  { %v4038_v36 = vadd.f32 %v3947_v21, %v3882_v48  ;;  %10676 = vmatmul.msk.bf16.gmra.mxu0 %vm1334_vm2, %v15352_v51  ;;  %v15463_v21 = vpop.permute.xlu2 %4845 }
 0x544   :  { %10721 = vmatmul.msk.bf16.vlgmr.msra.gmra.mxu2 %vm1334_vm2, %v15418_v38 }
 0x545   :  { %4796 = vmatpush.bf16.msra.mxu2 %v17661_v46 }
 0x546   :  { %v3793_v34 = vpop.f32.mrf.mxu1  ;;  %v3713_v63 = vpop.f32.mrf.mxu0 }
 0x547   :  { %v3887_v50 = vadd.f32 %v3793_v34, %v3731_v14  ;;  %v3735_v41 = vadd.f32 %v3713_v63, %v15290_v19  ;;  %v4098_v42 = vpop.f32.mrf.mxu2  ;;  %v4020_v9 = vpop.f32.mrf.mxu3  ;;  %v4545_v14 = vsel %vm4541_vm15, %v17662_v12, %v17658_v45  ;;  %vm9775_vm15 = vcmask 9216  }
 0x548   :  { %v15438_v47 = vadd.f32 %v4098_v42, %v4028_v22 }
 0x549   :  { %v4043_v18 = vadd.f32 %v3949_v32, %v3887_v50  ;;  %v15482_v39 = vpop.permute.xlu2 %4851 }
 0x54c   :  { %10720 = vmatmul.msk.bf16.gmra.mxu3 %vm1334_vm2, %v15443_v28 }
 0x54e   :  { %v3862_v58 = vpop.f32.mrf.mxu1  ;;  %v3843_v15 = vpop.f32.mrf.mxu0 }
 0x54f   :  { %v3876_v29 = vadd.f32 %v3862_v58, %v3720_v25  ;;  %v3875_v1 = vadd.f32 %v3843_v15, %v15302_v57  ;;  %v4100_v53 = vpop.f32.mrf.mxu2  ;;  %v4023_v19 = vpop.f32.mrf.mxu3  ;;  %v17666_v58 = vld [vmem:[#allocation40_spill] sm:$0xff]  ;;  %v15505_v15 = vld [vmem:[%s17524_s3 + $0x168] sm:$0xff] }
 0x550   :  { %v15451_v61 = vadd.f32 %v4100_v53, %v4033_v24  ;;  %10697 = vmatmul.msk.bf16.vlgmr.msrb.gmra.mxu1 %vm1334_vm2, %v15375_v10  ;;  %v15478_v24 = vld [vmem:[%s17524_s3 + $0x160] sm:$0xff] }
 0x551   :  { %v4032_v23 = vadd.f32 %v4018_v31, %v3876_v29  ;;  %4621 = vmatpush.bf16.msrb.mxu1 %v4545_v14  ;;  %10683 = vmatmul.msk.bf16.vlgmr.msrb.gmra.mxu0 %vm1334_vm2, %v15327_v30  ;;  %v17665_v30 = vld [vmem:[#allocation48_spill] sm:$0xff] }
 0x552   :  { %4602 = vmatpush.bf16.msrb.mxu0 %v17663_v7  ;;  %v4856_v44 = vsel %vm4853_vm10, %v17665_v30, %v17664_v20 }
 0x554   :  { %10722 = vmatmul.msk.bf16.gmra.mxu2 %vm1334_vm2, %v15443_v28 }
 0x556   :  { %v3864_v57 = vpop.f32.mrf.mxu1  ;;  %v3845_v35 = vpop.f32.mrf.mxu0 }
 0x557   :  { %v3881_v6 = vadd.f32 %v3864_v57, %v3725_v43  ;;  %v3880_v45 = vadd.f32 %v3845_v35, %v15310_v54  ;;  %v4103_v3 = vpop.f32.mrf.mxu2  ;;  %v4025_v25 = vpop.f32.mrf.mxu3  ;;  %v17668_v35 = vld [vmem:[#allocation49_spill] sm:$0xff] }
 0x558   :  { %v15461_v55 = vadd.f32 %v4103_v3, %v4038_v36  ;;  %v5004_v57 = vpop.permute.xlu2 %5003 }
 0x559   :  { %v4037_v22 = vadd.f32 %v4020_v9, %v3881_v6  ;;  %v5011_v6 = vsel %vm5009_vm4, %v17668_v35, %v5004_v57 }
 0x55c   :  { %10727 = vmatmul.msk.bf16.vlgmr.msrb.gmra.mxu3 %vm1334_vm2, %v15418_v38 }
 0x55d   :  { %4914 = vmatpush.bf16.msrb.mxu3 %v4856_v44 }
 0x55e   :  { %v3867_v60 = vpop.f32.mrf.mxu1  ;;  %v3848_v2 = vpop.f32.mrf.mxu0 }
 0x55f   :  { %v3886_v59 = vadd.f32 %v3867_v60, %v3730_v16  ;;  %v3885_v54 = vadd.f32 %v3848_v2, %v15322_v13  ;;  %v4105_v43 = vpop.f32.mrf.mxu2  ;;  %v4155_v8 = vpop.f32.mrf.mxu3  ;;  %v4857_v13 = vsel %vm4853_vm10, %v17664_v20, %v15482_v39  ;;  %v17669_v60 = vld [vmem:[#allocation52_spill] sm:$0xff] }
 0x560   :  { %v15471_v32 = vadd.f32 %v4105_v43, %v4043_v18  ;;  %10698 = vmatmul.msk.bf16.gmra.mxu1 %vm1334_vm2, %v15397_v33  ;;  %v5012_v2 = vsel %vm5009_vm4, %v5004_v57, %v17669_v60 }
 0x561   :  { %v4042_v46 = vadd.f32 %v4023_v19, %v3886_v59  ;;  %10684 = vmatmul.msk.bf16.gmra.mxu0 %vm1334_vm2, %v15352_v51 }
 0x564   :  { %10741 = vmatmul.msk.bf16.vlgmr.msrb.gmra.mxu2 %vm1334_vm2, %v15478_v24 }
 0x565   :  { %4933 = vmatpush.bf16.msrb.mxu2 %v4857_v13 }
 0x566   :  { %v3869_v11 = vpop.f32.mrf.mxu1  ;;  %v3850_v40 = vpop.f32.mrf.mxu0 }
 0x567   :  { %v3891_v48 = vadd.f32 %v3869_v11, %v3735_v41  ;;  %v3890_v16 = vadd.f32 %v3850_v40, %v15335_v17  ;;  %v4174_v52 = vpop.f32.mrf.mxu2  ;;  %v4157_v31 = vpop.f32.mrf.mxu3  ;;  %v4700_v41 = vsel %vm4697_vm0, %v17666_v58, %v15420_v56 }
 0x568   :  { %v15490_v36 = vadd.f32 %v4174_v52, %v4032_v23 }
 0x569   :  { %v4047_v51 = vadd.f32 %v4025_v25, %v3891_v48 }
 0x56c   :  { %10728 = vmatmul.msk.bf16.gmra.mxu3 %vm1334_vm2, %v15443_v28 }
 0x56e   :  { %v3999_v34 = vpop.f32.mrf.mxu1  ;;  %v3980_v63 = vpop.f32.mrf.mxu0 }
 0x56f   :  { %v4031_v50 = vadd.f32 %v3999_v34, %v3875_v1  ;;  %v4030_v42 = vadd.f32 %v3980_v63, %v15347_v27  ;;  %v4176_v9 = vpop.f32.mrf.mxu2  ;;  %v4160_v18 = vpop.f32.mrf.mxu3  ;;  %v17667_v27 = vld [vmem:[#allocation45_spill] sm:$0xff]  ;;  %v17670_v34 = vld [vmem:[#allocation44_spill] sm:$0xff] }
 0x570   :  { %v15498_v17 = vadd.f32 %v4176_v9, %v4037_v22  ;;  %10705 = vmatmul.msk.bf16.vlgmr.msra.gmra.mxu1 %vm1334_vm2, %v15375_v10  ;;  %v4854_v63 = vsel %vm4853_vm10, %v17670_v34, %v15463_v21 }
 0x571   :  { %v4187_v29 = vadd.f32 %v4155_v8, %v4031_v50  ;;  %4758 = vmatpush.bf16.msra.mxu1 %v4700_v41  ;;  %10703 = vmatmul.msk.bf16.vlgmr.msra.gmra.mxu0 %vm1334_vm2, %v15375_v10 }
 0x572   :  { %4739 = vmatpush.bf16.msra.mxu0 %v17667_v27 }
 0x574   :  { %10742 = vmatmul.msk.bf16.gmra.mxu2 %vm1334_vm2, %v15505_v15 }
 0x576   :  { %v4001_v56 = vpop.f32.mrf.mxu1  ;;  %v3982_v1 = vpop.f32.mrf.mxu0 }
 0x577   :  { %v4036_v53 = vadd.f32 %v4001_v56, %v3880_v45  ;;  %v4035_v19 = vadd.f32 %v3982_v1, %v15360_v62  ;;  %v4179_v12 = vpop.f32.mrf.mxu2  ;;  %v4162_v14 = vpop.f32.mrf.mxu3 }
 0x578   :  { %v15513_v23 = vadd.f32 %v4179_v12, %v4042_v46 }
 0x579   :  { %v4192_v7 = vadd.f32 %v4157_v31, %v4036_v53 }
 0x57c   :  { %10747 = vmatmul.msk.bf16.vlgmr.msra.gmra.mxu3 %vm1334_vm2, %v15478_v24 }
 0x57d   :  { %5051 = vmatpush.bf16.msra.mxu3 %v5011_v6 }
 0x57e   :  { %v4004_v10 = vpop.f32.mrf.mxu1  ;;  %v3985_v3 = vpop.f32.mrf.mxu0 }
 0x57f   :  { %v4041_v25 = vadd.f32 %v4004_v10, %v3885_v54  ;;  %v4040_v45 = vadd.f32 %v3985_v3, %v15370_v5  ;;  %v4181_v22 = vpop.f32.mrf.mxu2  ;;  %v4292_v62 = vpop.f32.mrf.mxu3 }
 0x580   :  { %v15520_v20 = vadd.f32 %v4181_v22, %v4047_v51  ;;  %10706 = vmatmul.msk.bf16.gmra.mxu1 %vm1334_vm2, %v15397_v33 }
 0x581   :  { %v4197_v44 = vadd.f32 %v4160_v18, %v4041_v25  ;;  %10704 = vmatmul.msk.bf16.gmra.mxu0 %vm1334_vm2, %v15397_v33 }
 0x584   :  { %10749 = vmatmul.msk.bf16.vlgmr.msra.gmra.mxu2 %vm1334_vm2, %v15478_v24 }
 0x585   :  { %5070 = vmatpush.bf16.msra.mxu2 %v5012_v2  ;;  %v17672_v2 = vld [vmem:[#allocation50_spill] sm:$0xff] }
 0x586   :  { %v4006_v59 = vpop.f32.mrf.mxu1  ;;  %v3987_v5 = vpop.f32.mrf.mxu0 }
 0x587   :  { %v4046_v54 = vadd.f32 %v4006_v59, %v3890_v16  ;;  %v4045_v43 = vadd.f32 %v3987_v5, %v15381_v26  ;;  %v4311_v8 = vpop.f32.mrf.mxu2  ;;  %v4294_v46 = vpop.f32.mrf.mxu3  ;;  %v4855_v16 = vsel %vm4853_vm10, %v15463_v21, %v17665_v30  ;;  %v15558_v21 = vld [vmem:[%s17524_s3 + $0x170] sm:$0xff]  ;;  %v5010_v59 = vsel %vm5009_vm4, %v17672_v2, %v17668_v35 }
 0x588   :  { %v15531_v13 = vadd.f32 %v4311_v8, %v4187_v29 }
 0x589   :  { %v4202_v11 = vadd.f32 %v4162_v14, %v4046_v54 }
 0x58c   :  { %10748 = vmatmul.msk.bf16.gmra.mxu3 %vm1334_vm2, %v15505_v15 }
 0x58e   :  { %v4136_v33 = vpop.f32.mrf.mxu1  ;;  %v4117_v40 = vpop.f32.mrf.mxu0 }
 0x58f   :  { %v4186_v48 = vadd.f32 %v4136_v33, %v4030_v42  ;;  %v4185_v52 = vadd.f32 %v4117_v40, %v15392_v0  ;;  %v4313_v31 = vpop.f32.mrf.mxu2  ;;  %v4297_v51 = vpop.f32.mrf.mxu3 }
 0x590   :  { %v15539_v26 = vadd.f32 %v4313_v31, %v4192_v7  ;;  %10725 = vmatmul.msk.bf16.vlgmr.msrb.gmra.mxu1 %vm1334_vm2, %v15418_v38 }
 0x591   :  { %v4342_v50 = vadd.f32 %v4292_v62, %v4186_v48  ;;  %4895 = vmatpush.bf16.msrb.mxu1 %v4855_v16  ;;  %10723 = vmatmul.msk.bf16.vlgmr.msrb.gmra.mxu0 %vm1334_vm2, %v15418_v38 }
 0x592   :  { %4876 = vmatpush.bf16.msrb.mxu0 %v4854_v63 }
 0x594   :  { %10750 = vmatmul.msk.bf16.gmra.mxu2 %vm1334_vm2, %v15505_v15 }
 0x596   :  { %v4138_v0 = vpop.f32.mrf.mxu1  ;;  %v4119_v30 = vpop.f32.mrf.mxu0 }
 0x597   :  { %v4191_v42 = vadd.f32 %v4138_v0, %v4035_v19  ;;  %v4190_v9 = vadd.f32 %v4119_v30, %v15402_v37  ;;  %v4316_v18 = vpop.f32.mrf.mxu2  ;;  %v4299_v58 = vpop.f32.mrf.mxu3  ;;  %v5142_v0 = vld [vmem:[%s17525_s4 + $0x10] sm:$0xff] }
 0x598   :  { %v15551_v41 = vadd.f32 %v4316_v18, %v4197_v44  ;;  %5156 = vperm.xlu1 %12641, %v5142_v0  }
 0x599   :  { %v15553_v29 = vadd.f32 %v4294_v46, %v4191_v42 }
 0x59c   :  { %10767 = vmatmul.msk.bf16.vlgmr.msrb.gmra.mxu3 %vm1334_vm2, %v15558_v21 }
 0x59e   :  { %v4141_v38 = vpop.f32.mrf.mxu1  ;;  %v4122_v27 = vpop.f32.mrf.mxu0 }
 0x59f   :  { %v4196_v56 = vadd.f32 %v4141_v38, %v4040_v45  ;;  %v4195_v1 = vadd.f32 %v4122_v27, %v15413_v49  ;;  %v4318_v37 = vpop.f32.mrf.mxu2  ;;  %v4429_v53 = vpop.f32.mrf.mxu3  ;;  %v15581_v45 = vld [vmem:[%s17524_s3 + $0x178] sm:$0xff]  ;;  %v5140_v27 = vld [vmem:[%s17525_s4] sm:$0xff] }
 0x5a0   :  { %v15563_v19 = vadd.f32 %v4318_v37, %v4202_v11  ;;  %10726 = vmatmul.msk.bf16.gmra.mxu1 %vm1334_vm2, %v15443_v28  ;;  %5146 = vperm.xlu2 %12640, %v5140_v27   ;;  %v17675_v37 = vld [vmem:[#allocation53_spill] sm:$0xff] }
 0x5a1   :  { %v4352_v12 = vadd.f32 %v4297_v51, %v4196_v56  ;;  %10724 = vmatmul.msk.bf16.gmra.mxu0 %vm1334_vm2, %v15443_v28 }
 0x5a2   :  { %17671 = vst [vmem:[#allocation4_spill] sm:$0xff] %v15563_v19 }
 0x5a4   :  { %10769 = vmatmul.msk.bf16.vlgmr.msrb.gmra.mxu2 %vm1334_vm2, %v15558_v21 }
 0x5a6   :  { %v4143_v14 = vpop.f32.mrf.mxu1  ;;  %v4124_v7 = vpop.f32.mrf.mxu0 }
 0x5a7   :  { %v4201_v57 = vadd.f32 %v4143_v14, %v4045_v43  ;;  %v4200_v6 = vadd.f32 %v4124_v7, %v15428_v4  ;;  %v4448_v49 = vpop.f32.mrf.mxu2  ;;  %v15572_v10 = vpop.f32.mrf.mxu3 }
 0x5a8   :  { %v15574_v3 = vadd.f32 %v4448_v49, %v4342_v50 }
 0x5a9   :  { %v15576_v25 = vadd.f32 %v4299_v58, %v4201_v57 }
 0x5ac   :  { %10768 = vmatmul.msk.bf16.gmra.mxu3 %vm1334_vm2, %v15581_v45 }
 0x5ae   :  { %v4273_v28 = vpop.f32.mrf.mxu1  ;;  %v4254_v22 = vpop.f32.mrf.mxu0 }
 0x5af   :  { %v4341_v62 = vadd.f32 %v4273_v28, %v4185_v52  ;;  %v4340_v4 = vadd.f32 %v4254_v22, %v15438_v47  ;;  %v15586_v44 = vpop.f32.mrf.mxu2  ;;  %v4434_v60 = vpop.f32.mrf.mxu3 }
 0x5b0   :  { %10745 = vmatmul.msk.bf16.vlgmr.msra.gmra.mxu1 %vm1334_vm2, %v15478_v24 }
 0x5b1   :  { %v4497_v5 = vadd.f32 %v4429_v53, %v4341_v62  ;;  %5032 = vmatpush.bf16.msra.mxu1 %v5010_v59  ;;  %10743 = vmatmul.msk.bf16.vlgmr.msra.gmra.mxu0 %vm1334_vm2, %v15478_v24  ;;  %v15608_v24 = vld [vmem:[%s17524_s3 + $0x180] sm:$0xff] }
 0x5b2   :  { %4952 = vmatpush.bf16.msra.mxu0 %v15482_v39 }
 0x5b4   :  { %10770 = vmatmul.msk.bf16.gmra.mxu2 %vm1334_vm2, %v15581_v45 }
 0x5b6   :  { %v4275_v47 = vpop.f32.mrf.mxu1  ;;  %v4256_v54 = vpop.f32.mrf.mxu0 }
 0x5b7   :  { %v15598_v43 = vadd.f32 %v4275_v47, %v4190_v9  ;;  %v4345_v8 = vadd.f32 %v4256_v54, %v15451_v61  ;;  %v4453_v35 = vpop.f32.mrf.mxu2  ;;  %v15601_v46 = vpop.f32.mrf.mxu3 }
 0x5b8   :  { %v15603_v11 = vadd.f32 %v4453_v35, %v4352_v12 }
 0x5bc   :  { %10787 = vmatmul.msk.bf16.vlgmr.msra.gmra.mxu3 %vm1334_vm2, %v15608_v24 }
 0x5be   :  { %v4278_v39 = vpop.f32.mrf.mxu1  ;;  %v4259_v33 = vpop.f32.mrf.mxu0 }
 0x5bf   :  { %v4351_v40 = vadd.f32 %v4278_v39, %v4195_v1  ;;  %v4350_v48 = vadd.f32 %v4259_v33, %v15461_v55  ;;  %v15613_v52 = vpop.f32.mrf.mxu2  ;;  %v4566_v61 = vpop.f32.mrf.mxu3  ;;  %v17674_v1 = vld [vmem:[#allocation51_spill] sm:$0xff] }
 0x5c0   :  { %17673 = vst [vmem:[#allocation3_spill] sm:$0xff] %v15613_v52  ;;  %10746 = vmatmul.msk.bf16.gmra.mxu1 %vm1334_vm2, %v15505_v15 }
 0x5c1   :  { %v4507_v31 = vadd.f32 %v4434_v60, %v4351_v40  ;;  %10744 = vmatmul.msk.bf16.gmra.mxu0 %vm1334_vm2, %v15505_v15  ;;  %v15634_v15 = vld [vmem:[%s17524_s3 + $0x188] sm:$0xff] }
 0x5c4   :  { %10789 = vmatmul.msk.bf16.vlgmr.msra.gmra.mxu2 %vm1334_vm2, %v15608_v24 }
 0x5c6   :  { %v4280_v51 = vpop.f32.mrf.mxu1  ;;  %v4261_v16 = vpop.f32.mrf.mxu0 }
 0x5c7   :  { %v15621_v34 = vadd.f32 %v4280_v51, %v4200_v6  ;;  %v4355_v63 = vadd.f32 %v4261_v16, %v15471_v32  ;;  %v4585_v55 = vpop.f32.mrf.mxu2  ;;  %v15624_v50 = vpop.f32.mrf.mxu3 }
 0x5c8   :  { %v15629_v30 = vadd.f32 %v4585_v55, %v4497_v5 }
 0x5cc   :  { %10788 = vmatmul.msk.bf16.gmra.mxu3 %vm1334_vm2, %v15634_v15 }
 0x5ce   :  { %v4410_v42 = vpop.f32.mrf.mxu1  ;;  %v4330_v32 = vpop.f32.mrf.mxu0 }
 0x5cf   :  { %v4496_v9 = vadd.f32 %v4410_v42, %v4340_v4  ;;  %v4344_v18 = vadd.f32 %v4330_v32, %v15490_v36  ;;  %v15639_v58 = vpop.f32.mrf.mxu2  ;;  %v4571_v38 = vpop.f32.mrf.mxu3 }
 0x5d0   :  { %10765 = vmatmul.msk.bf16.vlgmr.msrb.gmra.mxu1 %vm1334_vm2, %v15558_v21 }
 0x5d1   :  { %v15646_v56 = vadd.f32 %v4566_v61, %v4496_v9  ;;  %5108 = vmatpush.bf16.msrb.mxu1 %v17674_v1  ;;  %10763 = vmatmul.msk.bf16.vlgmr.msrb.gmra.mxu0 %vm1334_vm2, %v15558_v21 }
 0x5d2   :  { %5089 = vmatpush.bf16.msrb.mxu0 %v17675_v37 }
 0x5d4   :  { %10790 = vmatmul.msk.bf16.gmra.mxu2 %vm1334_vm2, %v15634_v15 }
 0x5d6   :  { %v4412_v36 = vpop.f32.mrf.mxu1  ;;  %v4332_v53 = vpop.f32.mrf.mxu0 }
 0x5d7   :  { %v15654_v12 = vadd.f32 %v4412_v36, %v4345_v8  ;;  %v15657_v14 = vadd.f32 %v4332_v53, %v15498_v17  ;;  %v4590_v7 = vpop.f32.mrf.mxu2  ;;  %v15659_v57 = vpop.f32.mrf.mxu3 }
 0x5d8   :  { %v15661_v6 = vadd.f32 %v4590_v7, %v4507_v31 }
 0x5de   :  { %v4415_v49 = vpop.f32.mrf.mxu1  ;;  %v4335_v28 = vpop.f32.mrf.mxu0 }
 0x5df   :  { %v4506_v22 = vadd.f32 %v4415_v49, %v4350_v48  ;;  %v4354_v62 = vadd.f32 %v4335_v28, %v15513_v23  ;;  %v15664_v4 = vpop.f32.mrf.mxu2  ;;  %v4642_v17 = vpop.f32.mrf.mxu3  ;;  %v5143_v23 = vld [vmem:[%s17525_s4 + $0x18] sm:$0xff]  ;;  %s12773_s4 = smov 104  }
 0x5e0   :  { %10766 = vmatmul.msk.bf16.gmra.mxu1 %vm1334_vm2, %v15581_v45  ;;  %5161 = vperm.xlu2 %12640, %v5143_v23  }
 0x5e1   :  { %v15668_v60 = vadd.f32 %v4571_v38, %v4506_v22  ;;  %10764 = vmatmul.msk.bf16.gmra.mxu0 %vm1334_vm2, %v15581_v45 }
 0x5e6   :  { %v4417_v2 = vpop.f32.mrf.mxu1  ;;  %v4337_v59 = vpop.f32.mrf.mxu0 }
 0x5e7   :  { %v15672_v5 = vadd.f32 %v4417_v2, %v4355_v63  ;;  %v15675_v47 = vadd.f32 %v4337_v59, %v15520_v20  ;;  %v15677_v54 = vpop.f32.mrf.mxu2  ;;  %v15682_v8 = vpop.f32.mrf.mxu3 }
 0x5e9   :  { %17676 = vst [vmem:[#allocation6_spill] sm:$0xff] %v15675_v47 }
 0x5ee   :  { %v4486_v35 = vpop.f32.mrf.mxu1  ;;  %v4467_v39 = vpop.f32.mrf.mxu0 }
 0x5ef   :  { %v4500_v33 = vadd.f32 %v4486_v35, %v4344_v18  ;;  %v4499_v40 = vadd.f32 %v4467_v39, %v15531_v13  ;;  %v15685_v48 = vpop.f32.mrf.mxu2  ;;  %v4647_v61 = vpop.f32.mrf.mxu3 }
 0x5f0   :  { %10785 = vmatmul.msk.bf16.vlgmr.msra.gmra.mxu1 %vm1334_vm2, %v15608_v24 }
 0x5f1   :  { %v4656_v20 = vadd.f32 %v4642_v17, %v4500_v33  ;;  %10771 = vmatmul.msk.bf16.vlgmr.msra.gmra.mxu0 %vm1334_vm2, %v15558_v21 }
 0x5f6   :  { %v15691_v31 = vpop.f32.mrf.mxu1  ;;  %v15693_v51 = vpop.f32.mrf.mxu0 }
 0x5f7   :  { %v15695_v16 = vpop.f32.mrf.mxu2  ;;  %v15700_v32 = vpop.f32.mrf.mxu3 }
 0x5f8   :  { %17677 = vst [vmem:[#allocation8_spill] sm:$0xff] %v15700_v32 }
 0x5fa   :  { %v15776_v52 = vpop.permute.xlu2 %5146 }
 0x5fe   :  { %v4491_v63 = vpop.f32.mrf.mxu1  ;;  %v4472_v55 = vpop.f32.mrf.mxu0 }
 0x5ff   :  { %v4510_v0 = vadd.f32 %v4491_v63, %v4354_v62  ;;  %v4509_v13 = vadd.f32 %v4472_v55, %v15551_v41  ;;  %v15698_v42 = vpop.f32.mrf.mxu2  ;;  %v4779_v1 = vpop.f32.mrf.mxu3 }
 0x600   :  { %10786 = vmatmul.msk.bf16.gmra.mxu1 %vm1334_vm2, %v15634_v15 }
 0x601   :  { %v4666_v21 = vadd.f32 %v4647_v61, %v4510_v0  ;;  %10772 = vmatmul.msk.bf16.gmra.mxu0 %vm1334_vm2, %v15581_v45 }
 0x606   :  { %v15706_v9 = vpop.f32.mrf.mxu1  ;;  %v15708_v18 = vpop.f32.mrf.mxu0 }
 0x607   :  { %17678 = vst [vmem:[#allocation17_spill] sm:$0xff] %v15706_v9  ;;  %v4798_v38 = vpop.f32.mrf.mxu2  ;;  %v15721_v45 = vpop.f32.mrf.mxu3 }
 0x608   :  { %17679 = vst [vmem:[#allocation2_spill] sm:$0xff] %v15708_v18  ;;  %v15710_v27 = vadd.f32 %v4798_v38, %v4656_v20 }
 0x60e   :  { %v4623_v41 = vpop.f32.mrf.mxu1  ;;  %v4604_v37 = vpop.f32.mrf.mxu0 }
 0x60f   :  { %v4655_v36 = vadd.f32 %v4623_v41, %v4499_v40  ;;  %v4654_v53 = vadd.f32 %v4604_v37, %v15574_v3  ;;  %v15713_v7 = vpop.f32.mrf.mxu2  ;;  %v4784_v3 = vpop.f32.mrf.mxu3 }
 0x610   :  { %10793 = vmatmul.msk.bf16.vlgmr.msrb.gmra.mxu1 %vm1334_vm2, %v15608_v24 }
 0x611   :  { %v15717_v49 = vadd.f32 %v4779_v1, %v4655_v36  ;;  %10791 = vmatmul.msk.bf16.vlgmr.msrb.gmra.mxu0 %vm1334_vm2, %v15608_v24 }
 0x616   :  { %v15723_v28 = vpop.f32.mrf.mxu1  ;;  %v15725_v22 = vpop.f32.mrf.mxu0 }
 0x617   :  { %v4803_v62 = vpop.f32.mrf.mxu2  ;;  %v15742_v63 = vpop.f32.mrf.mxu3 }
 0x618   :  { %v15727_v17 = vadd.f32 %v4803_v62, %v4666_v21  ;;  %17684 = vst [vmem:[#allocation14_spill] sm:$0xff] %v15742_v63 }
 0x61a   :  { %17680 = vst [vmem:[#allocation5_spill] sm:$0xff] %v15727_v17 }
 0x61e   :  { %v4628_v2 = vpop.f32.mrf.mxu1  ;;  %v4609_v59 = vpop.f32.mrf.mxu0 }
 0x61f   :  { %v4665_v23 = vadd.f32 %v4628_v2, %v4509_v13  ;;  %v4664_v35 = vadd.f32 %v4609_v59, %v15603_v11  ;;  %v15746_v0 = vpop.f32.mrf.mxu3 }
 0x620   :  { %10794 = vmatmul.msk.bf16.gmra.mxu1 %vm1334_vm2, %v15634_v15 }
 0x621   :  { %v15732_v39 = vadd.f32 %v4784_v3, %v4665_v23  ;;  %10792 = vmatmul.msk.bf16.gmra.mxu0 %vm1334_vm2, %v15634_v15  ;;  %vm9673_vm2 = vcmask 1043456  }
 0x623   :  { %17681 = vst [vmem:[#allocation20_spill] sm:$0xff] %v15732_v39  ;;  %v4808_v39 = vadd.f32 %v15677_v54, %v15646_v56 }
 0x626   :  { %v15736_v24 = vpop.f32.mrf.mxu1  ;;  %v15738_v33 = vpop.f32.mrf.mxu0 }
 0x627   :  { %17682 = vst [vmem:[#allocation7_spill] sm:$0xff] %v15736_v24  ;;  %v15754_v41 = vpop.f32.mrf.mxu3 }
 0x628   :  { %17683 = vst [vmem:[#allocation12_spill] sm:$0xff] %v15738_v33 }
 0x62e   :  { %v4760_v40 = vpop.f32.mrf.mxu1  ;;  %v4741_v20 = vpop.f32.mrf.mxu0 }
 0x62f   :  { %v15740_v61 = vadd.f32 %v4760_v40, %v4654_v53  ;;  %v15756_v53 = vpop.f32.mrf.mxu2  ;;  %v15758_v62 = vpop.f32.mrf.mxu3 }
 0x630   :  { %17687 = vst [vmem:[#allocation15_spill] sm:$0xff] %v15756_v53  ;;  %v4502_v53 = vadd.f32 %v15572_v10, %v15598_v43 }
 0x631   :  { %17688 = vst [vmem:[#allocation10_spill] sm:$0xff] %v15758_v62 }
 0x636   :  { %v15744_v55 = vpop.f32.mrf.mxu1  ;;  %v4743_v11 = vpop.f32.mrf.mxu0 }
 0x637   :  { %v4935_v59 = vpop.f32.mrf.mxu2  ;;  %v15760_v23 = vpop.f32.mrf.mxu3 }
 0x638   :  { %17689 = vst [vmem:[#allocation13_spill] sm:$0xff] %v15760_v23  ;;  %v4658_v23 = vadd.f32 %v15639_v58, %v4502_v53 }
 0x63a   :  { %v4814_v47 = vadd.f32 %v4743_v11, %v4658_v23 }
 0x63e   :  { %v4765_v13 = vpop.f32.mrf.mxu1  ;;  %v4746_v21 = vpop.f32.mrf.mxu0 }
 0x63f   :  { %v15748_v38 = vadd.f32 %v4765_v13, %v4664_v35  ;;  %v15762_v13 = vpop.f32.mrf.mxu2  ;;  %v5053_v17 = vpop.f32.mrf.mxu3 }
 0x641   :  { %17685 = vst [vmem:[#allocation22_spill] sm:$0xff] %v15748_v38 }
 0x646   :  { %v15750_v15 = vpop.f32.mrf.mxu1  ;;  %v15752_v1 = vpop.f32.mrf.mxu0 }
 0x647   :  { %17686 = vst [vmem:[#allocation11_spill] sm:$0xff] %v15750_v15  ;;  %v4809_v15 = vadd.f32 %v4741_v20, %v15629_v30  ;;  %v15774_v62 = vpop.f32.mrf.mxu2  ;;  %v5055_v30 = vpop.f32.mrf.mxu3  ;;  %v4657_v20 = vadd.f32 %v15624_v50, %v15654_v12  ;;  %v4819_v50 = vadd.f32 %v4746_v21, %v15661_v6 }
 0x649   :  { %v4813_v56 = vadd.f32 %v15685_v48, %v4657_v20  ;;  %v4503_v20 = vadd.f32 %v15586_v44, %v15553_v29 }
 0x64e   :  { %v4897_v37 = vpop.f32.mrf.mxu1  ;;  %v4878_v36 = vpop.f32.mrf.mxu0 }
 0x64f   :  { %v4965_v24 = vadd.f32 %v4897_v37, %v4809_v15  ;;  %v4964_v33 = vadd.f32 %v4878_v36, %v4808_v39  ;;  %v4818_v15 = vadd.f32 %v15695_v16, %v15668_v60 }
 0x651   :  { %v5121_v18 = vadd.f32 %v5053_v17, %v4965_v24 }
 0x653   :  { %v15781_v10 = vadd.f32 %v15776_v52, %v5121_v18  ;;  %v15791_v18 = vpop.permute.xlu0 %5151 }
 0x656   :  { %v4899_v3 = vpop.f32.mrf.mxu1  ;;  %v4880_v2 = vpop.f32.mrf.mxu0 }
 0x657   :  { %v4970_v43 = vadd.f32 %v4899_v3, %v4814_v47  ;;  %v4969_v17 = vadd.f32 %v4880_v2, %v4813_v56  ;;  %v15793_v47 = vpop.f32.mrf.mxu2  ;;  %v15808_v2 = vpop.permute.xlu1 %5156  ;;  %v4659_v56 = vadd.f32 %v15725_v22, %v4503_v20 }
 0x65e   :  { %v4902_v40 = vpop.f32.mrf.mxu1  ;;  %v4883_v35 = vpop.f32.mrf.mxu0 }
 0x65f   :  { %v4975_v48 = vadd.f32 %v4902_v40, %v4819_v50  ;;  %v4974_v6 = vadd.f32 %v4883_v35, %v4818_v15  ;;  %v5072_v60 = vpop.f32.mrf.mxu2 }
 0x666   :  { %v15764_v63 = vpop.f32.mrf.mxu1  ;;  %v15766_v32 = vpop.f32.mrf.mxu0 }
 0x667   :  { %v5074_v50 = vpop.f32.mrf.mxu2 }
 0x66e   :  { %v5034_v19 = vpop.f32.mrf.mxu1  ;;  %v4954_v9 = vpop.f32.mrf.mxu0 }
 0x66f   :  { %v5120_v38 = vadd.f32 %v5034_v19, %v4964_v33  ;;  %v5126_v19 = vadd.f32 %v5055_v30, %v4970_v43  ;;  %v4966_v43 = vadd.f32 %v15746_v0, %v15740_v61 }
 0x671   :  { %v15784_v58 = vadd.f32 %v15776_v52, %v5120_v38  ;;  %v15796_v33 = vadd.f32 %v15791_v18, %v5126_v19  ;;  %v5058_v38 = vpop.f32.mrf.mxu3  ;;  %v4967_v19 = vadd.f32 %v4935_v59, %v15717_v49  ;;  %v4667_v59 = vadd.f32 %v15659_v57, %v15672_v5 }
 0x672   :  { %v5131_v21 = vadd.f32 %v5058_v38, %v4975_v48 }
 0x673   :  { %v12642_v54 = vpack.i.bf16 %v15781_v10, %v15784_v58 }
 0x674   :  { %v15811_v23 = vadd.f32 %v15808_v2, %v5131_v21 }
 0x675   :  { %12643 = vrot.lane.b32.xlu0 %v12642_v54, %s12743_s0  ;;  %v4505_v54 = vadd.f32 %v15691_v31, %v15657_v14 }
 0x676   :  { %v5036_v39 = vpop.f32.mrf.mxu1  ;;  %v4956_v24 = vpop.f32.mrf.mxu0 }
 0x677   :  { %v5125_v12 = vadd.f32 %v5036_v39, %v4969_v17  ;;  %v4504_v17 = vadd.f32 %v15693_v51, %v15539_v26  ;;  %v5122_v39 = vadd.f32 %v5072_v60, %v4966_v43  ;;  %v4661_v61 = vadd.f32 %v15682_v8, %v4505_v54  ;;  %v17692_v60 = vld [vmem:[#allocation10_spill] sm:$0xff]  ;;  %v17694_v43 = vld [vmem:[#allocation17_spill] sm:$0xff]  ;;  %v17695_v54 = vld [vmem:[#allocation4_spill] sm:$0xff] }
 0x678   :  { %v4512_v26 = vadd.f32 %v15601_v46, %v15621_v34 }
 0x679   :  { %v15799_v11 = vadd.f32 %v15791_v18, %v5125_v12  ;;  %v4815_v12 = vadd.f32 %v15744_v55, %v4659_v56  ;;  %v4660_v29 = vadd.f32 %v15723_v28, %v4504_v17  ;;  %v15838_v14 = vadd.f32 %v15776_v52, %v5122_v39 }
 0x67a   :  { %v4817_v51 = vadd.f32 %v15713_v7, %v4661_v61  ;;  %v4968_v28 = vadd.f32 %v4954_v9, %v15710_v27  ;;  %v4668_v55 = vadd.f32 %v15664_v4, %v4512_v26  ;;  %v4823_v9 = vadd.f32 %v15698_v42, %v4667_v59  ;;  %v17690_v42 = vld [vmem:[#allocation3_spill] sm:$0xff] }
 0x67b   :  { %v12647_v37 = vpack.i.bf16 %v15796_v33, %v15799_v11  ;;  %v4971_v31 = vadd.f32 %v15754_v41, %v4815_v12  ;;  %v4816_v49 = vadd.f32 %v15721_v45, %v4660_v29  ;;  %v4513_v21 = vadd.f32 %v17690_v42, %v15576_v25  ;;  %v17698_v25 = vld [vmem:[#allocation20_spill] sm:$0xff]  ;;  %v17700_v26 = vld [vmem:[#allocation11_spill] sm:$0xff] }
 0x67c   :  { %v4973_v46 = vadd.f32 %v4956_v24, %v4817_v51  ;;  %v4824_v7 = vadd.f32 %v15752_v1, %v4668_v55  ;;  %v4979_v5 = vadd.f32 %v15766_v32, %v4823_v9  ;;  %v17702_v59 = vld [vmem:[#allocation15_spill] sm:$0xff]  ;;  %v17705_v9 = vld [vmem:[#allocation5_spill] sm:$0xff] }
 0x67d   :  { %12648 = vrot.lane.b32.xlu2 %v12647_v37, %s12743_s0  ;;  %v5127_v0 = vadd.f32 %v5074_v50, %v4971_v31  ;;  %v4972_v15 = vadd.f32 %v15762_v13, %v4816_v49  ;;  %v4977_v50 = vadd.f32 %v15774_v62, %v17698_v25 }
 0x67e   :  { %v5039_v36 = vpop.f32.mrf.mxu1  ;;  %v15806_v53 = vpop.f32.mrf.mxu0  ;;  %v4980_v57 = vadd.f32 %v15764_v63, %v4824_v7  ;;  %v17693_v63 = vld [vmem:[#allocation6_spill] sm:$0xff] }
 0x67f   :  { %v5130_v3 = vadd.f32 %v5039_v36, %v4974_v6  ;;  %v15856_v4 = vadd.f32 %v15791_v18, %v5127_v0  ;;  %v5077_v6 = vpop.f32.mrf.mxu2  ;;  %v5060_v36 = vpop.f32.mrf.mxu3  ;;  %v4515_v56 = vadd.f32 %v17694_v43, %v17693_v63 }
 0x681   :  { %v15814_v40 = vadd.f32 %v15808_v2, %v5130_v3  ;;  %v17691_v3 = vld [vmem:[#allocation22_spill] sm:$0xff] }
 0x683   :  { %v12667_v16 = vpack.i.bf16 %v15811_v23, %v15814_v40 }
 0x685   :  { %12668 = vrot.lane.b32.xlu2 %v12667_v16, %s12743_s0  ;;  %v4976_v16 = vadd.f32 %v17692_v60, %v17691_v3 }
 0x686   :  { %v5041_v35 = vpop.f32.mrf.mxu1  ;;  %v15819_v30 = vpop.f32.mrf.mxu0 }
 0x687   :  { %v5135_v20 = vadd.f32 %v5041_v35, %v4979_v5  ;;  %v5132_v12 = vadd.f32 %v5077_v6, %v4976_v16  ;;  %v5136_v35 = vadd.f32 %v5060_v36, %v4980_v57  ;;  %v5079_v7 = vpop.f32.mrf.mxu2 }
 0x689   :  { %v15897_v0 = vadd.f32 %v15808_v2, %v5132_v12 }
 0x68e   :  { %v5110_v48 = vpop.f32.mrf.mxu1  ;;  %v5091_v38 = vpop.f32.mrf.mxu0 }
 0x68f   :  { %v5123_v44 = vadd.f32 %v5091_v38, %v4967_v19  ;;  %v5124_v34 = vadd.f32 %v5110_v48, %v4968_v28  ;;  %v17697_v19 = vld [vmem:[#allocation12_spill] sm:$0xff]  ;;  %v5162_v48 = vpop.permute.xlu2 %5161  ;;  %v17699_v38 = vld [vmem:[#allocation7_spill] sm:$0xff] }
 0x690   :  { %v4669_v39 = vadd.f32 %v17697_v19, %v4513_v21  ;;  %v15888_v51 = vadd.f32 %v5162_v48, %v5135_v20  ;;  %v17701_v28 = vld [vmem:[#allocation8_spill] sm:$0xff]  ;;  %v15891_v55 = vadd.f32 %v5162_v48, %v5136_v35 }
 0x691   :  { %v15835_v22 = vadd.f32 %v15776_v52, %v5123_v44  ;;  %v15861_v13 = vadd.f32 %v15776_v52, %v5124_v34 }
 0x692   :  { %v4825_v31 = vadd.f32 %v17700_v26, %v4669_v39 }
 0x693   :  { %v12652_v8 = vpack.i.bf16 %v15835_v22, %v15838_v14 }
 0x695   :  { %12653 = vrot.lane.b32.xlu1 %v12652_v8, %s12743_s0  ;;  %v4671_v8 = vadd.f32 %v17701_v28, %v4515_v56 }
 0x696   :  { %v5112_v45 = vpop.f32.mrf.mxu1  ;;  %v5093_v41 = vpop.f32.mrf.mxu0 }
 0x697   :  { %v5129_v27 = vadd.f32 %v5112_v45, %v4973_v46  ;;  %v5128_v37 = vadd.f32 %v5093_v41, %v4972_v15  ;;  %v4827_v15 = vadd.f32 %v17702_v59, %v4671_v8  ;;  %v17703_v46 = vld [vmem:[#allocation14_spill] sm:$0xff]  ;;  %v17704_v45 = vld [vmem:[#allocation13_spill] sm:$0xff] }
 0x698   :  { %v4981_v41 = vadd.f32 %v17704_v45, %v4825_v31 }
 0x699   :  { %v15864_v24 = vadd.f32 %v15791_v18, %v5129_v27  ;;  %v15867_v1 = vadd.f32 %v15791_v18, %v5128_v37  ;;  %v17696_v18 = vld [vmem:[#allocation2_spill] sm:$0xff]  ;;  %v4978_v27 = vadd.f32 %v15806_v53, %v17705_v9  ;;  %v12672_v37 = vpack.i.bf16 %v15891_v55, %v15888_v51 }
 0x69a   :  { %v4514_v17 = vadd.f32 %v17696_v18, %v17695_v54  ;;  %v5137_v5 = vadd.f32 %v5079_v7, %v4981_v41  ;;  %v4983_v42 = vadd.f32 %v15819_v30, %v4827_v15 }
 0x69b   :  { %v12662_v32 = vpack.i.bf16 %v15864_v24, %v15861_v13  ;;  %v12657_v52 = vpack.i.bf16 %v15867_v1, %v15856_v4 }
 0x69c   :  { %v4670_v29 = vadd.f32 %v17699_v38, %v4514_v17 }
 0x69d   :  { %12663 = vrot.lane.b32.xlu1 %v12662_v32, %s12743_s0  ;;  %12658 = vrot.lane.b32.xlu0 %v12657_v52, %s12743_s0 }
 0x69e   :  { %v5115_v44 = vpop.f32.mrf.mxu1  ;;  %v5096_v61 = vpop.f32.mrf.mxu0  ;;  %v4826_v34 = vadd.f32 %v17703_v46, %v4670_v29 }
 0x69f   :  { %v5133_v49 = vadd.f32 %v5096_v61, %v4977_v50  ;;  %v5134_v21 = vadd.f32 %v5115_v44, %v4978_v27 }
 0x6a0   :  { %v4982_v57 = vadd.f32 %v15793_v47, %v4826_v34  ;;  %v15919_v47 = vadd.f32 %v5162_v48, %v5137_v5 }
 0x6a1   :  { %v15894_v62 = vadd.f32 %v15808_v2, %v5133_v49  ;;  %v15913_v16 = vadd.f32 %v15808_v2, %v5134_v21 }
 0x6a3   :  { %v12677_v6 = vpack.i.bf16 %v15894_v62, %v15897_v0 }
 0x6a5   :  { %12673 = vrot.lane.b32.xlu1 %v12672_v37, %s12743_s0  ;;  %12678 = vrot.lane.b32.xlu0 %v12677_v6, %s12743_s0 }
 0x6a6   :  { %v5117_v36 = vpop.f32.mrf.mxu1  ;;  %v5098_v3 = vpop.f32.mrf.mxu0 }
 0x6a7   :  { %v5139_v60 = vadd.f32 %v5117_v36, %v4983_v42  ;;  %v5138_v53 = vadd.f32 %v5098_v3, %v4982_v57 }
 0x6a9   :  { %v15915_v20 = vadd.f32 %v5162_v48, %v5139_v60  ;;  %v15917_v32 = vadd.f32 %v5162_v48, %v5138_v53 }
 0x6ab   :  { %v12687_v30 = vpack.i.bf16 %v15915_v20, %v15913_v16  ;;  %v12682_v52 = vpack.i.bf16 %v15917_v32, %v15919_v47 }
 0x6ad   :  { %12688 = vrot.lane.b32.xlu0 %v12687_v30, %s12743_s0  ;;  %12683 = vrot.lane.b32.xlu2 %v12682_v52, %s12743_s0 }
 0x6d7   :  { %v12649_v63 = vpop.permute.xlu2 %12648 }
 0x6d8   :  { %v12651_v2 = vunpack.i.h.bf16 %v12649_v63  ;;  %v12650_v56 = vunpack.i.l.bf16 %v12649_v63 }
 0x6da   :  { %v5249_v39 = vsel %vm1324_vm1, %v12650_v56, %v12651_v2 }
 0x6db   :  { %v15935_v29 = vmax.f32 %v15799_v11, %v5249_v39 }
 0x6df   :  { %v12669_v17 = vpop.permute.xlu2 %12668 }
 0x6e0   :  { %v12671_v15 = vunpack.i.h.bf16 %v12669_v17 }
 0x6e7   :  { %v12644_v43 = vpop.permute.xlu0 %12643 }
 0x6e8   :  { %v12646_v54 = vunpack.i.h.bf16 %v12644_v43  ;;  %v12645_v18 = vunpack.i.l.bf16 %v12644_v43 }
 0x6ea   :  { %v5245_v25 = vsel %vm1324_vm1, %v12645_v18, %v12646_v54 }
 0x6eb   :  { %v15938_v44 = vmax.f32 %v15784_v58, %v5245_v25 }
 0x707   :  { %v12654_v19 = vpop.permute.xlu1 %12653  ;;  %v12684_v49 = vpop.permute.xlu2 %12683 }
 0x708   :  { %v12656_v50 = vunpack.i.h.bf16 %v12654_v19  ;;  %v12655_v12 = vunpack.i.l.bf16 %v12654_v19  ;;  %v12686_v46 = vunpack.i.h.bf16 %v12684_v49  ;;  %v12685_v34 = vunpack.i.l.bf16 %v12684_v49  ;;  %v12382_v49 = vld [vmem:[%s17526_s5 + $0x30] sm:$0xff] }
 0x70a   :  { %v5246_v48 = vsel %vm1324_vm1, %v12646_v54, %v12655_v12  ;;  %v5247_v35 = vsel %vm1324_vm1, %v12655_v12, %v12656_v50 }
 0x70b   :  { %v15932_v38 = vmax.f32 %v15838_v14, %v5247_v35  ;;  %v15941_v61 = vmax.f32 %v15781_v10, %v5246_v48  ;;  %v12670_v10 = vunpack.i.l.bf16 %v12669_v17 }
 0x70d   :  { %v12697_v26 = vpack.i.bf16 %v15935_v29, %v15932_v38  ;;  %v12692_v31 = vpack.i.bf16 %v15941_v61, %v15938_v44  ;;  %v5253_v36 = vsel %vm1324_vm1, %v12670_v10, %v12671_v15  ;;  %v12380_v10 = vld [vmem:[%s17526_s5 + $0x20] sm:$0xff] }
 0x70e   :  { %v15977_v30 = vmax.f32 %v15814_v40, %v5253_v36  ;;  %v12402_v36 = vld [vmem:[%s17526_s5 + $0xd0] sm:$0xff] }
 0x70f   :  { %v12659_v28 = vpop.permute.xlu0 %12658  ;;  %v12664_v8 = vpop.permute.xlu1 %12663  ;;  %12698 = vrot.lane.b32.xlu2 %v12697_v26, %s12747_s30  ;;  %12693 = vrot.lane.b32.xlu1 %v12692_v31, %s12747_s30 }
 0x710   :  { %v12661_v11 = vunpack.i.h.bf16 %v12659_v28  ;;  %v12660_v14 = vunpack.i.l.bf16 %v12659_v28  ;;  %v12666_v58 = vunpack.i.h.bf16 %v12664_v8  ;;  %v12665_v59 = vunpack.i.l.bf16 %v12664_v8  ;;  %v12390_v28 = vld [vmem:[%s17526_s5 + $0x70] sm:$0xff] }
 0x711   :  { %v12398_v8 = vld [vmem:[%s17526_s5 + $0xb0] sm:$0xff] }
 0x712   :  { %v5250_v7 = vsel %vm1324_vm1, %v12651_v2, %v12660_v14  ;;  %v5251_v45 = vsel %vm1324_vm1, %v12660_v14, %v12661_v11  ;;  %v5252_v41 = vsel %vm1324_vm1, %v12661_v11, %v12666_v58  ;;  %v5298_v9 = vmax.f32 %v15864_v24, %v12666_v58  ;;  %v12406_v11 = vld [vmem:[%s17526_s5 + $0xf0] sm:$0xff]  ;;  %v12381_v14 = vld [vmem:[%s17526_s5 + $0x28] sm:$0xff] }
 0x713   :  { %v5248_v27 = vsel %vm1324_vm1, %v12656_v50, %v12665_v59  ;;  %v5297_v37 = vmax.f32 %v15861_v13, %v12665_v59  ;;  %v15956_v6 = vmax.f32 %v15796_v33, %v5250_v7  ;;  %v15959_v57 = vmax.f32 %v15856_v4, %v5251_v45  ;;  %v12389_v58 = vld [vmem:[%s17526_s5 + $0x68] sm:$0xff]  ;;  %v12404_v7 = vld [vmem:[%s17526_s5 + $0xe0] sm:$0xff]  ;;  %v12379_v45 = vld [vmem:[%s17526_s5 + $0x18] sm:$0xff] }
 0x714   :  { %v15962_v5 = vmax.f32 %v15835_v22, %v5248_v27  ;;  %v15965_v42 = vmax.f32 %v15867_v1, %v5252_v41  ;;  %v5259_v13 = vsel %vm1324_vm1, %v12685_v34, %v12686_v46  ;;  %v12397_v59 = vld [vmem:[%s17526_s5 + $0xa8] sm:$0xff]  ;;  %v12387_v41 = vld [vmem:[%s17526_s5 + $0x58] sm:$0xff] }
 0x715   :  { %v12702_v21 = vpack.i.bf16 %v15959_v57, %v15956_v6  ;;  %v12707_v24 = vpack.i.bf16 %v5298_v9, %v5297_v37  ;;  %v15980_v52 = vmax.f32 %v15919_v47, %v5259_v13  ;;  %v12395_v9 = vld [vmem:[%s17526_s5 + $0x98] sm:$0xff]  ;;  %v12378_v37 = vld [vmem:[%s17526_s5 + $0x10] sm:$0xff]  ;;  %v12377_v13 = vld [vmem:[%s17526_s5 + $0x8] sm:$0xff] }
 0x716   :  { %v12717_v33 = vpack.i.bf16 %v15965_v42, %v15962_v5  ;;  %v12403_v27 = vld [vmem:[%s17526_s5 + $0xd8] sm:$0xff] }
 0x717   :  { %12703 = vrot.lane.b32.xlu0 %v12702_v21, %s12747_s30  ;;  %v12679_v4 = vpop.permute.xlu0 %12678  ;;  %v12674_v3 = vpop.permute.xlu1 %12673  ;;  %12708 = vrot.lane.b32.xlu2 %v12707_v24, %s12747_s30  ;;  %v12386_v21 = vld [vmem:[%s17526_s5 + $0x50] sm:$0xff] }
 0x718   :  { %v12681_v22 = vunpack.i.h.bf16 %v12679_v4  ;;  %v12680_v1 = vunpack.i.l.bf16 %v12679_v4  ;;  %v12676_v60 = vunpack.i.h.bf16 %v12674_v3  ;;  %v12675_v53 = vunpack.i.l.bf16 %v12674_v3  ;;  %12718 = vrot.lane.b32.xlu1 %v12717_v33, %s12747_s30  ;;  %v12394_v24 = vld [vmem:[%s17526_s5 + $0x90] sm:$0xff]  ;;  %v12385_v33 = vld [vmem:[%s17526_s5 + $0x48] sm:$0xff] }
 0x719   :  { %v12393_v4 = vld [vmem:[%s17526_s5 + $0x88] sm:$0xff] }
 0x71a   :  { %v5254_v63 = vsel %vm1324_vm1, %v12671_v15, %v12680_v1  ;;  %v5255_v43 = vsel %vm1324_vm1, %v12680_v1, %v12681_v22  ;;  %v5258_v2 = vsel %vm1324_vm1, %v12676_v60, %v12685_v34  ;;  %v5257_v56 = vsel %vm1324_vm1, %v12675_v53, %v12676_v60  ;;  %v12405_v15 = vld [vmem:[%s17526_s5 + $0xe8] sm:$0xff]  ;;  %v12396_v34 = vld [vmem:[%s17526_s5 + $0xa0] sm:$0xff] }
 0x71b   :  { %v15987_v54 = vmax.f32 %v15811_v23, %v5254_v63  ;;  %v15990_v18 = vmax.f32 %v15891_v55, %v5258_v2  ;;  %v15993_v40 = vmax.f32 %v15897_v0, %v5255_v43  ;;  %v15996_v47 = vmax.f32 %v15888_v51, %v5257_v56  ;;  %v12401_v3 = vld [vmem:[%s17526_s5 + $0xc8] sm:$0xff]  ;;  %v12384_v1 = vld [vmem:[%s17526_s5 + $0x40] sm:$0xff] }
 0x71c   :  { %v12392_v60 = vld [vmem:[%s17526_s5 + $0x80] sm:$0xff] }
 0x71d   :  { %v12712_v17 = vpack.i.bf16 %v15987_v54, %v15977_v30  ;;  %v12727_v19 = vpack.i.bf16 %v15980_v52, %v15990_v18  ;;  %v12722_v39 = vpack.i.bf16 %v15996_v47, %v15993_v40  ;;  %v12400_v53 = vld [vmem:[%s17526_s5 + $0xc0] sm:$0xff] }
 0x71f   :  { %v12689_v23 = vpop.permute.xlu0 %12688  ;;  %12713 = vrot.lane.b32.xlu0 %v12712_v17, %s12747_s30  ;;  %12728 = vrot.lane.b32.xlu2 %v12727_v19, %s12747_s30 }
 0x720   :  { %v12691_v55 = vunpack.i.h.bf16 %v12689_v23  ;;  %v12690_v0 = vunpack.i.l.bf16 %v12689_v23  ;;  %12723 = vrot.lane.b32.xlu1 %v12722_v39, %s12747_s30 }
 0x722   :  { %v5300_v51 = vmax.f32 %v15915_v20, %v12691_v55  ;;  %v5256_v25 = vsel %vm1324_vm1, %v12681_v22, %v12690_v0  ;;  %v5260_v50 = vsel %vm1324_vm1, %v12686_v46, %v12691_v55  ;;  %v5299_v12 = vmax.f32 %v15913_v16, %v12690_v0  ;;  %v12383_v20 = vld [vmem:[%s17526_s5 + $0x38] sm:$0xff]  ;;  %v12388_v46 = vld [vmem:[%s17526_s5 + $0x60] sm:$0xff] }
 0x723   :  { %v16012_v48 = vmax.f32 %v15894_v62, %v5256_v25  ;;  %v16015_v35 = vmax.f32 %v15917_v32, %v5260_v50  ;;  %v12391_v62 = vld [vmem:[%s17526_s5 + $0x78] sm:$0xff]  ;;  %5690 = vmatpush.bf16.msrb.mxu3 %v12383_v20  ;;  %v12376_v22 = vld [vmem:[%s17526_s5] sm:$0xff]  ;;  %vm5855_vm1 = vcmask 261120  }
 0x724   :  { %v12737_v26 = vpack.i.bf16 %v5300_v51, %v5299_v12  ;;  %v12399_v16 = vld [vmem:[%s17526_s5 + $0xb8] sm:$0xff]  ;;  %5709 = vmatpush.bf16.msrb.mxu2 %v12391_v62 }
 0x725   :  { %v12732_v31 = vpack.i.bf16 %v16015_v35, %v16012_v48  ;;  %v12407_v32 = vld [vmem:[%s17526_s5 + $0xf8] sm:$0xff]  ;;  %5728 = vmatpush.bf16.msra.mxu0 %v12399_v16  ;;  %s12767_s5 = smov 122  }
 0x726   :  { %5747 = vmatpush.bf16.msra.mxu1 %v12407_v32 }
 0x727   :  { %12733 = vrot.lane.b32.xlu0 %v12732_v31, %s12747_s30  ;;  %5691 = vmatpush.bf16.msrb.mxu3 %v12382_v49 }
 0x728   :  { %12738 = vrot.lane.b32.xlu1 %v12737_v26, %s12747_s30  ;;  %5710 = vmatpush.bf16.msrb.mxu2 %v12390_v28 }
 0x729   :  { %5729 = vmatpush.bf16.msra.mxu0 %v12398_v8 }
 0x72a   :  { %5748 = vmatpush.bf16.msra.mxu1 %v12406_v11 }
 0x72b   :  { %5692 = vmatpush.bf16.msrb.mxu3 %v12381_v14 }
 0x72c   :  { %5711 = vmatpush.bf16.msrb.mxu2 %v12389_v58 }
 0x72d   :  { %5730 = vmatpush.bf16.msra.mxu0 %v12397_v59 }
 0x72e   :  { %5749 = vmatpush.bf16.msra.mxu1 %v12405_v15 }
 0x72f   :  { %5693 = vmatpush.bf16.msrb.mxu3 %v12380_v10 }
 0x730   :  { %5712 = vmatpush.bf16.msrb.mxu2 %v12388_v46 }
 0x731   :  { %5731 = vmatpush.bf16.msra.mxu0 %v12396_v34 }
 0x732   :  { %5750 = vmatpush.bf16.msra.mxu1 %v12404_v7 }
 0x733   :  { %5694 = vmatpush.bf16.msrb.mxu3 %v12379_v45 }
 0x734   :  { %5713 = vmatpush.bf16.msrb.mxu2 %v12387_v41 }
 0x735   :  { %5732 = vmatpush.bf16.msra.mxu0 %v12395_v9 }
 0x736   :  { %5751 = vmatpush.bf16.msra.mxu1 %v12403_v27 }
 0x737   :  { %5695 = vmatpush.bf16.msrb.mxu3 %v12378_v37 }
 0x738   :  { %5714 = vmatpush.bf16.msrb.mxu2 %v12386_v21 }
 0x739   :  { %5733 = vmatpush.bf16.msra.mxu0 %v12394_v24 }
 0x73a   :  { %5752 = vmatpush.bf16.msra.mxu1 %v12402_v36 }
 0x73b   :  { %5696 = vmatpush.bf16.msrb.mxu3 %v12377_v13 }
 0x73c   :  { %5715 = vmatpush.bf16.msrb.mxu2 %v12385_v33 }
 0x73d   :  { %5734 = vmatpush.bf16.msra.mxu0 %v12393_v4 }
 0x73e   :  { %5753 = vmatpush.bf16.msra.mxu1 %v12401_v3 }
 0x73f   :  { %5697 = vmatpush.bf16.msrb.mxu3 %v12376_v22 }
 0x740   :  { %5716 = vmatpush.bf16.msrb.mxu2 %v12384_v1 }
 0x741   :  { %5735 = vmatpush.bf16.msra.mxu0 %v12392_v60 }
 0x742   :  { %5754 = vmatpush.bf16.msra.mxu1 %v12400_v53 }
 0x769   :  { %v12699_v63 = vpop.permute.xlu2 %12698 }
 0x76a   :  { %v12700_v17 = vunpack.i.l.bf16 %v12699_v63  ;;  %v12701_v25 = vunpack.i.h.bf16 %v12699_v63 }
 0x771   :  { %v12709_v19 = vpop.permute.xlu2 %12708 }
 0x772   :  { %v12711_v31 = vunpack.i.h.bf16 %v12709_v19  ;;  %v12710_v20 = vunpack.i.l.bf16 %v12709_v19 }
 0x779   :  { %v12729_v46 = vpop.permute.xlu2 %12728 }
 0x77a   :  { %v12730_v24 = vunpack.i.l.bf16 %v12729_v46 }
 0x781   :  { %v12694_v43 = vpop.permute.xlu1 %12693 }
 0x782   :  { %v12696_v2 = vunpack.i.h.bf16 %v12694_v43  ;;  %v12695_v56 = vunpack.i.l.bf16 %v12694_v43 }
 0x784   :  { %v5363_v39 = vsel %vm2045_vm6, %v12696_v2, %v12700_v17  ;;  %v5362_v23 = vsel %vm2045_vm6, %v12695_v56, %v12696_v2 }
 0x785   :  { %v5395_v55 = vmax.f32 %v15941_v61, %v5363_v39  ;;  %v5394_v0 = vmax.f32 %v15938_v44, %v5362_v23 }
 0x787   :  { %v5411_v32 = vmax.f32 %v5395_v55, 0.0  ;;  %v5410_v49 = vmax.f32 %v5394_v0, 0.0 }
 0x789   :  { %v12704_v51 = vpop.permute.xlu0 %12703 }
 0x78a   :  { %v12706_v50 = vunpack.i.h.bf16 %v12704_v51  ;;  %v12705_v12 = vunpack.i.l.bf16 %v12704_v51  ;;  %v12719_v26 = vpop.permute.xlu1 %12718 }
 0x78b   :  { %v12721_v62 = vunpack.i.h.bf16 %v12719_v26  ;;  %v12720_v16 = vunpack.i.l.bf16 %v12719_v26 }
 0x78c   :  { %v5366_v28 = vsel %vm2045_vm6, %v12701_v25, %v12705_v12  ;;  %v5367_v8 = vsel %vm2045_vm6, %v12705_v12, %v12706_v50 }
 0x78d   :  { %v5398_v11 = vmax.f32 %v15935_v29, %v5366_v28  ;;  %v5399_v61 = vmax.f32 %v15956_v6, %v5367_v8  ;;  %v5368_v44 = vsel %vm2045_vm6, %v12706_v50, %v12721_v62  ;;  %v5369_v14 = vsel %vm2045_vm6, %v12721_v62, %v12711_v31 }
 0x78e   :  { %v5400_v58 = vmax.f32 %v15959_v57, %v5368_v44  ;;  %v5401_v59 = vmax.f32 %v15965_v42, %v5369_v14  ;;  %v5364_v15 = vsel %vm2045_vm6, %v12700_v17, %v12720_v16  ;;  %v5365_v10 = vsel %vm2045_vm6, %v12720_v16, %v12710_v20 }
 0x78f   :  { %v5414_v34 = vmax.f32 %v5398_v11, 0.0  ;;  %v5415_v7 = vmax.f32 %v5399_v61, 0.0  ;;  %v5396_v45 = vmax.f32 %v15932_v38, %v5364_v15  ;;  %v5397_v29 = vmax.f32 %v15962_v5, %v5365_v10 }
 0x790   :  { %v5416_v6 = vmax.f32 %v5400_v58, 0.0  ;;  %v5417_v41 = vmax.f32 %v5401_v59, 0.0  ;;  %v12731_v38 = vunpack.i.h.bf16 %v12729_v46 }
 0x791   :  { %v5426_v9 = vpack.c.bf16 %v5414_v34, %v5410_v49  ;;  %v5427_v27 = vpack.c.bf16 %v5415_v7, %v5411_v32  ;;  %v5412_v37 = vmax.f32 %v5396_v45, 0.0  ;;  %v5413_v21 = vmax.f32 %v5397_v29, 0.0  ;;  %v12714_v57 = vpop.permute.xlu0 %12713 }
 0x792   :  { %v12716_v42 = vunpack.i.h.bf16 %v12714_v57  ;;  %v12715_v36 = vunpack.i.l.bf16 %v12714_v57  ;;  %v12724_v13 = vpop.permute.xlu1 %12723  ;;  %v5375_v63 = vsel %vm2045_vm6, %v12730_v24, %v12731_v38 }
 0x793   :  { %v5428_v33 = vpack.c.bf16 %v5416_v6, %v5412_v37  ;;  %v5429_v4 = vpack.c.bf16 %v5417_v41, %v5413_v21  ;;  %v12726_v3 = vunpack.i.h.bf16 %v12724_v13  ;;  %v12725_v22 = vunpack.i.l.bf16 %v12724_v13  ;;  %5698 = vmatmul.bf16.vlgmr.msrb.gmra.mxu3 %v5426_v9  ;;  %5717 = vmatmul.bf16.vlgmr.msrb.gmra.mxu2 %v5427_v27 }
 0x794   :  { %v5370_v5 = vsel %vm2045_vm6, %v12715_v36, %v12716_v42  ;;  %v5407_v51 = vmax.f32 %v15990_v18, %v5375_v63 }
 0x795   :  { %v5374_v1 = vsel %vm2045_vm6, %v12726_v3, %v12730_v24  ;;  %v5371_v60 = vsel %vm2045_vm6, %v12716_v42, %v12725_v22  ;;  %5736 = vmatmul.bf16.vlgmr.msra.gmra.mxu0 %v5428_v33  ;;  %5755 = vmatmul.bf16.vlgmr.msra.gmra.mxu1 %v5429_v4  ;;  %v5402_v53 = vmax.f32 %v15977_v30, %v5370_v5 }
 0x796   :  { %v5406_v43 = vmax.f32 %v15996_v47, %v5374_v1  ;;  %v5403_v2 = vmax.f32 %v15987_v54, %v5371_v60  ;;  %v5423_v16 = vmax.f32 %v5407_v51, 0.0 }
 0x797   :  { %v5418_v0 = vmax.f32 %v5402_v53, 0.0 }
 0x798   :  { %v5422_v30 = vmax.f32 %v5406_v43, 0.0  ;;  %v5419_v12 = vmax.f32 %v5403_v2, 0.0 }
 0x799   :  { %v12734_v56 = vpop.permute.xlu0 %12733 }
 0x79a   :  { %v12736_v17 = vunpack.i.h.bf16 %v12734_v56  ;;  %v12735_v19 = vunpack.i.l.bf16 %v12734_v56  ;;  %v12739_v39 = vpop.permute.xlu1 %12738  ;;  %v5430_v8 = vpack.c.bf16 %v5422_v30, %v5418_v0  ;;  %v5431_v11 = vpack.c.bf16 %v5423_v16, %v5419_v12  ;;  %v12413_v0 = vld [vmem:[%s17527_s6 + $0x28] sm:$0xff]  ;;  %v12414_v12 = vld [vmem:[%s17527_s6 + $0x30] sm:$0xff] }
 0x79b   :  { %v12741_v23 = vunpack.i.h.bf16 %v12739_v39  ;;  %v12740_v55 = vunpack.i.l.bf16 %v12739_v39  ;;  %v12410_v39 = vld [vmem:[%s17527_s6 + $0x10] sm:$0xff]  ;;  %v12416_v16 = vld [vmem:[%s17527_s6 + $0x44] sm:$0xff] }
 0x79c   :  { %v5372_v25 = vsel %vm2045_vm6, %v12725_v22, %v12735_v19  ;;  %v5376_v50 = vsel %vm2045_vm6, %v12731_v38, %v12736_v17 }
 0x79d   :  { %v5377_v26 = vsel %vm2045_vm6, %v12736_v17, %v12741_v23  ;;  %v5373_v47 = vsel %vm2045_vm6, %v12735_v19, %v12740_v55  ;;  %v5404_v54 = vmax.f32 %v15993_v40, %v5372_v25  ;;  %v5408_v31 = vmax.f32 %v15980_v52, %v5376_v50  ;;  %v12408_v17 = vld [vmem:[%s17527_s6] sm:$0xff]  ;;  %v12409_v19 = vld [vmem:[%s17527_s6 + $0x8] sm:$0xff]  ;;  %v12411_v23 = vld [vmem:[%s17527_s6 + $0x18] sm:$0xff] }
 0x79e   :  { %v5405_v20 = vmax.f32 %v16012_v48, %v5373_v47  ;;  %v5409_v62 = vmax.f32 %v16015_v35, %v5377_v26  ;;  %v12412_v55 = vld [vmem:[%s17527_s6 + $0x20] sm:$0xff]  ;;  %v12422_v47 = vld [vmem:[%s17527_s6 + $0x78] sm:$0xff]  ;;  %vm9654_vm6 = vcmask 982016  }
 0x79f   :  { %v5420_v18 = vmax.f32 %v5404_v54, 0.0  ;;  %v5424_v32 = vmax.f32 %v5408_v31, 0.0  ;;  %v12415_v50 = vld [vmem:[%s17527_s6 + $0x3c] sm:$0xff]  ;;  %v5784_v54 = vld [vmem:[%s17527_s6 + $0x38] sm:$0xf] }
 0x7a0   :  { %v5421_v49 = vmax.f32 %v5405_v20, 0.0  ;;  %v5425_v28 = vmax.f32 %v5409_v62, 0.0  ;;  %v5957_v31 = vunpack.c.l.b16 %v5784_v54  ;;  %v12420_v54 = vld [vmem:[%s17527_s6 + $0x64] sm:$0xff] }
 0x7a1   :  { %v5432_v61 = vpack.c.bf16 %v5424_v32, %v5420_v18  ;;  %v9433_v32 = vld [vmem:[%s17528_s7 + $0x60] sm:$0xff] }
 0x7a2   :  { %v5433_v44 = vpack.c.bf16 %v5425_v28, %v5421_v49  ;;  %v5965_v49 = vpack.c.b16 %v5957_v31, %v5957_v31 }
 0x7a3   :  { %5703 = vmatmul.bf16.gmra.mxu3 %v5430_v8  ;;  %5722 = vmatmul.bf16.gmra.mxu2 %v5431_v11  ;;  %v12429_v11 = vld [vmem:[%s17527_s6 + $0xb4] sm:$0xff] }
 0x7a5   :  { %5741 = vmatmul.bf16.gmra.mxu0 %v5432_v61  ;;  %5760 = vmatmul.bf16.gmra.mxu1 %v5433_v44  ;;  %v12423_v44 = vld [vmem:[%s17527_s6 + $0x80] sm:$0xff] }
 0x812   :  { %v5737_v40 = vpop.f32.mrf.mxu0  ;;  %v5756_v14 = vpop.f32.mrf.mxu1 }
 0x816   :  { %v5699_v52 = vpop.f32.mrf.mxu3  ;;  %v5718_v58 = vpop.f32.mrf.mxu2 }
 0x817   :  { %v5719_v48 = vadd.f32 %v5718_v58, %v5699_v52  ;;  %v9435_v52 = vld [vmem:[%s17528_s7 + $0x70] sm:$0xff] }
 0x819   :  { %v5738_v59 = vadd.f32 %v5737_v40, %v5719_v48  ;;  %v9432_v40 = vld [vmem:[%s17528_s7 + $0x58] sm:$0xff] }
 0x81a   :  { %v5739_v35 = vpop.f32.mrf.mxu0  ;;  %v5758_v15 = vpop.f32.mrf.mxu1 }
 0x81b   :  { %v5757_v34 = vadd.f32 %v5756_v14, %v5738_v59  ;;  %v9434_v14 = vld [vmem:[%s17528_s7 + $0x68] sm:$0xff] }
 0x81c   :  { %v12417_v59 = vld [vmem:[%s17527_s6 + $0x4c] sm:$0xff] }
 0x81d   :  { %v5766_v29 = vpack.c.bf16 %v5757_v34, %v5757_v34  ;;  %v12443_v34 = vld [vmem:[%s17527_s6 + $0x12c] sm:$0xff] }
 0x81e   :  { %v5701_v10 = vpop.f32.mrf.mxu3  ;;  %v5720_v46 = vpop.f32.mrf.mxu2 }
 0x81f   :  { %v5721_v7 = vadd.f32 %v5720_v46, %v5701_v10  ;;  %v5843_v21 = vunpack.c.l.b16 %v5766_v29  ;;  %v9429_v10 = vld [vmem:[%s17528_s7 + $0x40] sm:$0xff]  ;;  %v9431_v46 = vld [vmem:[%s17528_s7 + $0x50] sm:$0xff] }
 0x820   :  { %v12430_v29 = vld [vmem:[%s17527_s6 + $0xbc] sm:$0xff] }
 0x821   :  { %v5740_v45 = vadd.f32 %v5739_v35, %v5721_v7 }
 0x822   :  { %v5742_v9 = vpop.f32.mrf.mxu0  ;;  %v5761_v42 = vpop.f32.mrf.mxu1 }
 0x823   :  { %v5759_v6 = vadd.f32 %v5758_v15, %v5740_v45  ;;  %v9427_v15 = vld [vmem:[%s17528_s7 + $0x30] sm:$0xff] }
 0x825   :  { %v5767_v41 = vpack.c.bf16 %v5759_v6, %v5759_v6 }
 0x826   :  { %v5704_v27 = vpop.f32.mrf.mxu3  ;;  %v5723_v37 = vpop.f32.mrf.mxu2 }
 0x827   :  { %v5844_v57 = vunpack.c.l.b16 %v5767_v41  ;;  %v5724_v24 = vadd.f32 %v5723_v37, %v5704_v27  ;;  %v12424_v41 = vld [vmem:[%s17527_s6 + $0x88] sm:$0xff]  ;;  %v9428_v27 = vld [vmem:[%s17528_s7 + $0x38] sm:$0xff] }
 0x828   :  { %v9430_v37 = vld [vmem:[%s17528_s7 + $0x48] sm:$0xff] }
 0x829   :  { %v16149_v36 = vpack.c.b16 %v5844_v57, %v5843_v21  ;;  %v5743_v13 = vadd.f32 %v5742_v9, %v5724_v24  ;;  %v9426_v9 = vld [vmem:[%s17528_s7 + $0x28] sm:$0xff]  ;;  %v12418_v24 = vld [vmem:[%s17527_s6 + $0x54] sm:$0xff] }
 0x82a   :  { %v5744_v38 = vpop.f32.mrf.mxu0  ;;  %v5763_v1 = vpop.f32.mrf.mxu1 }
 0x82b   :  { %5849 = vrot.lane.b32.xlu0 %v16149_v36, %s12744_s1  ;;  %v5762_v3 = vadd.f32 %v5761_v42, %v5743_v13  ;;  %v9423_v13 = vld [vmem:[%s17528_s7 + $0x10] sm:$0xff] }
 0x82d   :  { %v5768_v60 = vpack.c.bf16 %v5762_v3, %v5762_v3 }
 0x82e   :  { %v5706_v33 = vpop.f32.mrf.mxu3  ;;  %v5725_v4 = vpop.f32.mrf.mxu2 }
 0x82f   :  { %v5726_v22 = vadd.f32 %v5725_v4, %v5706_v33  ;;  %v5845_v43 = vunpack.c.l.b16 %v5768_v60  ;;  %v9425_v33 = vld [vmem:[%s17528_s7 + $0x20] sm:$0xff]  ;;  %v12444_v4 = vld [vmem:[%s17527_s6 + $0x134] sm:$0xff] }
 0x830   :  { %v9568_v60 = vld [vmem:[%s17529_s9 + $0x40] sm:$0xff] }
 0x831   :  { %v5745_v5 = vadd.f32 %v5744_v38, %v5726_v22  ;;  %v12431_v38 = vld [vmem:[%s17527_s6 + $0xc4] sm:$0xff] }
 0x833   :  { %v5764_v53 = vadd.f32 %v5763_v1, %v5745_v5  ;;  %v12425_v1 = vld [vmem:[%s17527_s6 + $0x90] sm:$0xff] }
 0x835   :  { %v5769_v63 = vpack.c.bf16 %v5764_v53, %v5764_v53  ;;  %v9422_v53 = vld [vmem:[%s17528_s7 + $0x8] sm:$0xff] }
 0x837   :  { %v5846_v2 = vunpack.c.l.b16 %v5769_v63  ;;  %v9424_v63 = vld [vmem:[%s17528_s7 + $0x18] sm:$0xff] }
 0x839   :  { %v16153_v56 = vpack.c.b16 %v5846_v2, %v5845_v43 }
 0x83b   :  { %6243 = vrot.lane.b32.xlu0 %v16153_v56, %s12767_s5  ;;  %6390 = vrot.lane.b32.xlu1 %v16153_v56, %s12768_s23 }
 0x83c   :  { %5851 = vrot.lane.b32.xlu2 %v16153_v56, %s12744_s1  ;;  %5998 = vmatpush.bf16.msra.mxu2 %v16153_v56  ;;  %s12769_s1 = smov 118  }
 0x840   :  { %5999 = vmatpush.bf16.msra.mxu2 %v16149_v36 }
 0x843   :  { %6241 = vrot.lane.b32.xlu0 %v16149_v36, %s12767_s5  ;;  %6388 = vrot.lane.b32.xlu1 %v16149_v36, %s12768_s23  ;;  %s12775_s5 = smov 88   ;;  %s12776_s23 = smov 94  }
 0x844   :  { %6096 = vrot.lane.b32.xlu2 %v16153_v56, %s12746_s29  ;;  %11002 = vmatmul.msk.bf16.vlgmr.msra.gmra.mxu2 %vm5855_vm1, %v12408_v17 }
 0x84b   :  { %6978 = vrot.lane.b32.xlu0 %v16153_v56, %s12749_s14  ;;  %6537 = vrot.lane.b32.xlu1 %v16153_v56, %s12769_s1 }
 0x84c   :  { %6094 = vrot.lane.b32.xlu2 %v16149_v36, %s12746_s29 }
 0x853   :  { %6976 = vrot.lane.b32.xlu0 %v16149_v36, %s12749_s14  ;;  %6684 = vrot.lane.b32.xlu1 %v16153_v56, %s12770_s16  ;;  %s12771_s14 = smov 108  }
 0x854   :  { %6535 = vrot.lane.b32.xlu2 %v16149_v36, %s12769_s1  ;;  %11003 = vmatmul.msk.bf16.gmra.mxu2 %vm5855_vm1, %v12409_v19  ;;  %v9567_v19 = vld [vmem:[%s17529_s9 + $0x38] sm:$0xff] }
 0x85b   :  { %7125 = vrot.lane.b32.xlu0 %v16153_v56, %s12751_s18  ;;  %6682 = vrot.lane.b32.xlu1 %v16149_v36, %s12770_s16 }
 0x85c   :  { %6831 = vrot.lane.b32.xlu2 %v16153_v56, %s12747_s30 }
 0x863   :  { %7272 = vrot.lane.b32.xlu0 %v16153_v56, %s12771_s14  ;;  %7123 = vrot.lane.b32.xlu1 %v16149_v36, %s12751_s18 }
 0x864   :  { %6829 = vrot.lane.b32.xlu2 %v16149_v36, %s12747_s30  ;;  %11004 = vmatmul.msk.bf16.gmra.mxu2 %vm5855_vm1, %v12410_v39  ;;  %v9569_v39 = vld [vmem:[%s17529_s9 + $0x48] sm:$0xff] }
 0x86b   :  { %7270 = vrot.lane.b32.xlu0 %v16149_v36, %s12771_s14  ;;  %7419 = vrot.lane.b32.xlu1 %v16153_v56, %s12772_s17 }
 0x86c   :  { %7566 = vrot.lane.b32.xlu2 %v16153_v56, %s12773_s4 }
 0x873   :  { %7711 = vrot.lane.b32.xlu0 %v16149_v36, %s12774_s20  ;;  %7417 = vrot.lane.b32.xlu1 %v16149_v36, %s12772_s17 }
 0x874   :  { %7564 = vrot.lane.b32.xlu2 %v16149_v36, %s12773_s4  ;;  %11005 = vmatmul.msk.bf16.gmra.mxu2 %vm5855_vm1, %v12411_v23  ;;  %v9570_v23 = vld [vmem:[%s17529_s9 + $0x50] sm:$0xf] }
 0x87b   :  { %8007 = vrot.lane.b32.xlu0 %v16153_v56, %s12754_s2  ;;  %8154 = vrot.lane.b32.xlu1 %v16153_v56, %s12756_s28 }
 0x87c   :  { %7713 = vrot.lane.b32.xlu2 %v16153_v56, %s12774_s20 }
 0x883   :  { %8005 = vrot.lane.b32.xlu0 %v16149_v36, %s12754_s2  ;;  %8152 = vrot.lane.b32.xlu1 %v16149_v36, %s12756_s28  ;;  %s12777_s2 = smov 92  }
 0x884   :  { %7860 = vrot.lane.b32.xlu2 %v16153_v56, %s12752_s21  ;;  %11006 = vmatmul.msk.bf16.gmra.mxu2 %vm5855_vm1, %v12412_v55  ;;  %v12445_v55 = vld [vmem:[%s17527_s6 + $0x13c] sm:$0xff] }
 0x88b   :  { %8742 = vrot.lane.b32.xlu0 %v16153_v56, %s12775_s5  ;;  %8301 = vrot.lane.b32.xlu1 %v16153_v56, %s12776_s23 }
 0x88c   :  { %7858 = vrot.lane.b32.xlu2 %v16149_v36, %s12752_s21  ;;  %s12778_s21 = smov 90  }
 0x893   :  { %8740 = vrot.lane.b32.xlu0 %v16149_v36, %s12775_s5  ;;  %8448 = vrot.lane.b32.xlu1 %v16153_v56, %s12777_s2 }
 0x894   :  { %8299 = vrot.lane.b32.xlu2 %v16149_v36, %s12776_s23  ;;  %11007 = vmatmul.msk.bf16.gmra.mxu2 %vm5855_vm1, %v12413_v0 }
 0x896   :  { %v5852_v51 = vpop.permute.xlu2 %5851 }
 0x897   :  { %5886 = vmatpush.bf16.msra.mxu3 %v5852_v51 }
 0x89b   :  { %8889 = vrot.lane.b32.xlu0 %v16153_v56, %s12757_s13  ;;  %8446 = vrot.lane.b32.xlu1 %v16149_v36, %s12777_s2 }
 0x89c   :  { %8595 = vrot.lane.b32.xlu2 %v16153_v56, %s12778_s21 }
 0x89d   :  { %v5850_v25 = vpop.permute.xlu0 %5849 }
 0x89e   :  { %v6097_v30 = vpop.permute.xlu2 %6096  ;;  %5887 = vmatpush.bf16.msra.mxu3 %v5850_v25  ;;  %v12432_v25 = vld [vmem:[%s17527_s6 + $0xcc] sm:$0xff] }
 0x89f   :  { %6130 = vmatpush.bf16.msrb.mxu0 %v6097_v30 }
 0x8a1   :  { %10966 = vmatmul.msk.bf16.vlgmr.msra.gmra.mxu3 %vm5855_vm1, %v12415_v50  ;;  %v12426_v50 = vld [vmem:[%s17527_s6 + $0x98] sm:$0xff] }
 0x8a3   :  { %9036 = vrot.lane.b32.xlu0 %v16153_v56, %s12759_s22  ;;  %8887 = vrot.lane.b32.xlu1 %v16149_v36, %s12757_s13  ;;  %s12779_s13 = smov 80  }
 0x8a4   :  { %8593 = vrot.lane.b32.xlu2 %v16149_v36, %s12778_s21  ;;  %11008 = vmatmul.msk.bf16.gmra.mxu2 %vm5855_vm1, %v12414_v12  ;;  %v9562_v12 = vld [vmem:[%s17529_s9 + $0x10] sm:$0xff] }
 0x8a6   :  { %v6095_v26 = vpop.permute.xlu2 %6094 }
 0x8a7   :  { %6131 = vmatpush.bf16.msrb.mxu0 %v6095_v26  ;;  %v9564_v26 = vld [vmem:[%s17529_s9 + $0x20] sm:$0xff] }
 0x8aa   :  { %11053 = vmatmul.msk.bf16.vlgmr.msrb.gmra.mxu0 %vm5855_vm1, %v12422_v47  ;;  %v9566_v47 = vld [vmem:[%s17529_s9 + $0x30] sm:$0xff] }
 0x8ab   :  { %9034 = vrot.lane.b32.xlu0 %v16149_v36, %s12759_s22  ;;  %9183 = vrot.lane.b32.xlu1 %v16153_v56, %s12761_s15 }
 0x8ac   :  { %9330 = vrot.lane.b32.xlu2 %v16153_v56, %s12779_s13  ;;  %v12419_v56 = vld [vmem:[%s17527_s6 + $0x5c] sm:$0xff] }
 0x8ad   :  { %v6244_v20 = vpop.permute.xlu0 %6243  ;;  %v6391_v62 = vpop.permute.xlu1 %6390 }
 0x8ae   :  { %v6536_v18 = vpop.permute.xlu2 %6535  ;;  %6277 = vmatpush.bf16.msrb.mxu1 %v6244_v20  ;;  %6424 = vmatpush.bf16.msrb.mxu3 %v6391_v62  ;;  %v9561_v20 = vld [vmem:[%s17529_s9 + $0x8] sm:$0xff]  ;;  %v9563_v62 = vld [vmem:[%s17529_s9 + $0x18] sm:$0xff] }
 0x8b1   :  { %10967 = vmatmul.msk.bf16.gmra.mxu3 %vm5855_vm1, %v12416_v16  ;;  %v9565_v16 = vld [vmem:[%s17529_s9 + $0x28] sm:$0xff] }
 0x8b3   :  { %9498 = vperm.xlu0 %12639, %v9433_v32   ;;  %9181 = vrot.lane.b32.xlu1 %v16149_v36, %s12761_s15  ;;  %v12433_v32 = vld [vmem:[%s17527_s6 + $0xd4] sm:$0xff] }
 0x8b4   :  { %9328 = vrot.lane.b32.xlu2 %v16149_v36, %s12779_s13  ;;  %11009 = vmatmul.msk.bf16.gmra.mxu2 %vm5855_vm1, %v5965_v49  ;;  %v9421_v36 = vld [vmem:[%s17528_s7] sm:$0xff] }
 0x8b5   :  { %v6242_v28 = vpop.permute.xlu0 %6241  ;;  %v6389_v8 = vpop.permute.xlu1 %6388  ;;  %v12427_v49 = vld [vmem:[%s17527_s6 + $0xa0] sm:$0xff] }
 0x8b6   :  { %v6832_v61 = vpop.permute.xlu2 %6831  ;;  %6278 = vmatpush.bf16.msrb.mxu1 %v6242_v28  ;;  %6425 = vmatpush.bf16.msrb.mxu3 %v6389_v8  ;;  %v9734_v8 = vld [vmem:[%s17530_s11] sm:$0xff] }
 0x8b9   :  { %11104 = vmatmul.msk.bf16.vlgmr.msrb.gmra.mxu1 %vm5855_vm1, %v12429_v11  ;;  %v9560_v11 = vld [vmem:[%s17529_s9] sm:$0xff] }
 0x8ba   :  { %6865 = vmatpush.bf16.msra.mxu1 %v6832_v61  ;;  %11054 = vmatmul.msk.bf16.gmra.mxu0 %vm5855_vm1, %v12423_v44  ;;  %v12421_v61 = vld [vmem:[%s17527_s6 + $0x6c] sm:$0xff] }
 0x8bb   :  { %9493 = vperm.xlu0 %12639, %v9432_v40   ;;  %9503 = vperm.xlu1 %12641, %v9434_v14   ;;  %v9735_v40 = vld [vmem:[%s17530_s11 + $0x8] sm:$0x3]  ;;  %v12447_v14 = vld [vmem:[%s17527_s6 + $0x14c] sm:$0xff] }
 0x8bc   :  { %9508 = vperm.xlu2 %12640, %v9435_v52   ;;  %v12434_v52 = vld [vmem:[%s17527_s6 + $0xdc] sm:$0xff] }
 0x8bd   :  { %v6979_v58 = vpop.permute.xlu0 %6978  ;;  %v6538_v48 = vpop.permute.xlu1 %6537 }
 0x8be   :  { %v6830_v35 = vpop.permute.xlu2 %6829  ;;  %6571 = vmatpush.bf16.msrb.mxu2 %v6538_v48  ;;  %7012 = vmatpush.bf16.msra.mxu3 %v6979_v58  ;;  %v12428_v58 = vld [vmem:[%s17527_s6 + $0xa8] sm:$0xff]  ;;  %v10937_v48 = vld [vmem:[%s17527_s6 + $0x74] sm:$0xf] }
 0x8bf   :  { %6866 = vmatpush.bf16.msra.mxu1 %v6830_v35  ;;  %v5830_v35 = vunpack.c.l.b16 %v10937_v48 }
 0x8c1   :  { %10968 = vmatmul.msk.bf16.gmra.mxu3 %vm5855_vm1, %v12417_v59 }
 0x8c2   :  { %6572 = vmatpush.bf16.msrb.mxu2 %v6536_v18  ;;  %v12446_v18 = vld [vmem:[%s17527_s6 + $0x144] sm:$0xff] }
 0x8c3   :  { %9468 = vperm.xlu0 %12639, %v9427_v15   ;;  %9478 = vperm.xlu1 %12641, %v9429_v10   ;;  %v5838_v15 = vpack.c.b16 %v5830_v35, %v5830_v35  ;;  %v11024_v10 = vld [vmem:[%s17527_s6 + $0xb0] sm:$0xf] }
 0x8c4   :  { %9488 = vperm.xlu2 %12640, %v9431_v46  }
 0x8c5   :  { %v6977_v7 = vpop.permute.xlu0 %6976  ;;  %v6685_v45 = vpop.permute.xlu1 %6684  ;;  %11206 = vmatmul.msk.bf16.vlgmr.msrb.gmra.mxu2 %vm5855_vm1, %v12443_v34  ;;  %v12448_v34 = vld [vmem:[%s17527_s6 + $0x154] sm:$0xff] }
 0x8c6   :  { %v16309_v6 = vpop.permute.xlu2 %7566  ;;  %6718 = vmatpush.bf16.msra.mxu0 %v6685_v45  ;;  %7013 = vmatpush.bf16.msra.mxu3 %v6977_v7  ;;  %v6085_v7 = vunpack.c.l.b16 %v11024_v10  ;;  %v12435_v45 = vld [vmem:[%s17527_s6 + $0xe4] sm:$0xff] }
 0x8c7   :  { %v16364_v17 = vpop.f32.mrf.mxu2 }
 0x8c9   :  { %11105 = vmatmul.msk.bf16.gmra.mxu1 %vm5855_vm1, %v12430_v29  ;;  %v6093_v29 = vpack.c.b16 %v6085_v7, %v6085_v7  ;;  %v12439_v7 = vld [vmem:[%s17527_s6 + $0x108] sm:$0xff] }
 0x8ca   :  { %11055 = vmatmul.msk.bf16.gmra.mxu0 %vm5855_vm1, %v12424_v41 }
 0x8cb   :  { %9463 = vperm.xlu0 %12639, %v9426_v9   ;;  %9473 = vperm.xlu1 %12641, %v9428_v27   ;;  %v12436_v9 = vld [vmem:[%s17527_s6 + $0xf0] sm:$0xff]  ;;  %v11075_v27 = vld [vmem:[%s17527_s6 + $0xec] sm:$0xf] }
 0x8cc   :  { %9483 = vperm.xlu2 %12640, %v9430_v37  }
 0x8cd   :  { %v7126_v21 = vpop.permute.xlu0 %7125  ;;  %v6683_v57 = vpop.permute.xlu1 %6682 }
 0x8ce   :  { %v16328_v42 = vpop.permute.xlu2 %7564  ;;  %6719 = vmatpush.bf16.msra.mxu0 %v6683_v57  ;;  %7159 = vmatpush.bf16.msra.mxu2 %v7126_v21  ;;  %v12449_v21 = vld [vmem:[%s17527_s6 + $0x15c] sm:$0xff]  ;;  %v6232_v57 = vunpack.c.l.b16 %v11075_v27 }
 0x8cf   :  { %v16386_v30 = vpop.f32.mrf.mxu2 }
 0x8d1   :  { %10969 = vmatmul.msk.bf16.gmra.mxu3 %vm5855_vm1, %v12418_v24 }
 0x8d3   :  { %9438 = vperm.xlu0 %12639, %v9421_v36   ;;  %9448 = vperm.xlu1 %12641, %v9423_v13  }
 0x8d4   :  { %9458 = vperm.xlu2 %12640, %v9425_v33   ;;  %v6240_v33 = vpack.c.b16 %v6232_v57, %v6232_v57  ;;  %v12472_v57 = vld [vmem:[%s17527_s6 + $0x224] sm:$0xff] }
 0x8d5   :  { %v7273_v3 = vpop.permute.xlu0 %7272  ;;  %v7124_v22 = vpop.permute.xlu1 %7123  ;;  %11207 = vmatmul.msk.bf16.gmra.mxu2 %vm5855_vm1, %v12444_v4  ;;  %v12450_v4 = vld [vmem:[%s17527_s6 + $0x168] sm:$0xff] }
 0x8d6   :  { %v7714_v5 = vpop.permute.xlu2 %7713  ;;  %7160 = vmatpush.bf16.msra.mxu2 %v7124_v22  ;;  %7306 = vmatpush.bf16.msrb.mxu0 %v7273_v3 }
 0x8d7   :  { %v16402_v31 = vpop.f32.mrf.mxu2 }
 0x8d9   :  { %11106 = vmatmul.msk.bf16.gmra.mxu1 %vm5855_vm1, %v12431_v38 }
 0x8da   :  { %7747 = vmatpush.bf16.msrb.mxu2 %v7714_v5  ;;  %11056 = vmatmul.msk.bf16.gmra.mxu0 %vm5855_vm1, %v12425_v1  ;;  %v12437_v1 = vld [vmem:[%s17527_s6 + $0xf8] sm:$0xff] }
 0x8db   :  { %9613 = vperm.xlu0 %12639, %v9568_v60   ;;  %9443 = vperm.xlu1 %12641, %v9422_v53  }
 0x8dc   :  { %9453 = vperm.xlu2 %12640, %v9424_v63  }
 0x8dd   :  { %v7271_v43 = vpop.permute.xlu0 %7270  ;;  %v7420_v2 = vpop.permute.xlu1 %7419 }
 0x8de   :  { %7307 = vmatpush.bf16.msrb.mxu0 %v7271_v43  ;;  %7453 = vmatpush.bf16.msrb.mxu1 %v7420_v2  ;;  %v7861_v24 = vpop.permute.xlu2 %7860 }
 0x8df   :  { %v16424_v28 = vpop.f32.mrf.mxu2 }
 0x8e1   :  { %10970 = vmatmul.msk.bf16.gmra.mxu3 %vm5855_vm1, %v12419_v56 }
 0x8e3   :  { %9608 = vperm.xlu0 %12639, %v9567_v19   ;;  %9618 = vperm.xlu1 %12641, %v9569_v39  }
 0x8e4   :  { %9623 = vperm.xlu2 %12640, %v9570_v23  }
 0x8e5   :  { %v7712_v0 = vpop.permute.xlu0 %7711  ;;  %v7418_v51 = vpop.permute.xlu1 %7417  ;;  %11208 = vmatmul.msk.bf16.gmra.mxu2 %vm5855_vm1, %v12445_v55  ;;  %v12457_v55 = vld [vmem:[%s17527_s6 + $0x1a4] sm:$0xff] }
 0x8e6   :  { %7454 = vmatpush.bf16.msrb.mxu1 %v7418_v51  ;;  %7748 = vmatpush.bf16.msrb.mxu2 %v7712_v0  ;;  %v7859_v53 = vpop.permute.xlu2 %7858  ;;  %v12451_v51 = vld [vmem:[%s17527_s6 + $0x170] sm:$0xff] }
 0x8e7   :  { %v16437_v44 = vpop.f32.mrf.mxu2 }
 0x8e9   :  { %11107 = vmatmul.msk.bf16.gmra.mxu1 %vm5855_vm1, %v12432_v25 }
 0x8ea   :  { %11057 = vmatmul.msk.bf16.gmra.mxu0 %vm5855_vm1, %v12426_v50 }
 0x8eb   :  { %9583 = vperm.xlu0 %12639, %v9562_v12   ;;  %9593 = vperm.xlu1 %12641, %v9564_v26  }
 0x8ec   :  { %9603 = vperm.xlu2 %12640, %v9566_v47  }
 0x8ed   :  { %v16509_v56 = vpop.permute.xlu1 %8154  ;;  %v8008_v19 = vpop.permute.xlu0 %8007 }
 0x8ee   :  { %v8300_v10 = vpop.permute.xlu2 %8299 }
 0x8ef   :  { %v16456_v59 = vpop.f32.mrf.mxu2 }
 0x8f1   :  { %10971 = vmatmul.msk.bf16.gmra.mxu3 %vm5855_vm1, %v12420_v54 }
 0x8f3   :  { %9578 = vperm.xlu0 %12639, %v9561_v20   ;;  %9588 = vperm.xlu1 %12641, %v9563_v62   ;;  %v12438_v20 = vld [vmem:[%s17527_s6 + $0x100] sm:$0xff] }
 0x8f4   :  { %9598 = vperm.xlu2 %12640, %v9565_v16  }
 0x8f5   :  { %11209 = vmatmul.msk.bf16.gmra.mxu2 %vm5855_vm1, %v12446_v18  ;;  %v16526_v26 = vpop.permute.xlu1 %8152  ;;  %v8006_v54 = vpop.permute.xlu0 %8005 }
 0x8f7   :  { %v16463_v46 = vpop.f32.mrf.mxu2 }
 0x8f9   :  { %11108 = vmatmul.msk.bf16.gmra.mxu1 %vm5855_vm1, %v12433_v32 }
 0x8fa   :  { %11058 = vmatmul.msk.bf16.gmra.mxu0 %vm5855_vm1, %v12427_v49 }
 0x8fb   :  { %9738 = vperm.xlu1 %12641, %v9734_v8   ;;  %v12471_v8 = vld [vmem:[%s17527_s6 + $0x21c] sm:$0xff] }
 0x8fc   :  { %9573 = vperm.xlu2 %12640, %v9560_v11  }
 0x8ff   :  { %v16473_v41 = vpop.f32.mrf.mxu2 }
 0x901   :  { %10972 = vmatmul.msk.bf16.gmra.mxu3 %vm5855_vm1, %v12421_v61 }
 0x904   :  { %9743 = vperm.xlu2 %12640, %v9735_v40   ;;  %v12458_v40 = vld [vmem:[%s17527_s6 + $0x1ac] sm:$0xff] }
 0x905   :  { %11210 = vmatmul.msk.bf16.gmra.mxu2 %vm5855_vm1, %v12447_v14 }
 0x907   :  { %v16483_v37 = vpop.f32.mrf.mxu2 }
 0x909   :  { %11109 = vmatmul.msk.bf16.gmra.mxu1 %vm5855_vm1, %v12434_v52  ;;  %v12452_v52 = vld [vmem:[%s17527_s6 + $0x178] sm:$0xff] }
 0x90a   :  { %11059 = vmatmul.msk.bf16.gmra.mxu0 %vm5855_vm1, %v12428_v58 }
 0x90f   :  { %v16496_v22 = vpop.f32.mrf.mxu2 }
 0x911   :  { %10973 = vmatmul.msk.bf16.gmra.mxu3 %vm5855_vm1, %v5838_v15 }
 0x915   :  { %11211 = vmatmul.msk.bf16.gmra.mxu2 %vm5855_vm1, %v12448_v34 }
 0x917   :  { %v16507_v43 = vpop.f32.mrf.mxu2 }
 0x919   :  { %11110 = vmatmul.msk.bf16.gmra.mxu1 %vm5855_vm1, %v12435_v45 }
 0x91a   :  { %11060 = vmatmul.msk.bf16.gmra.mxu0 %vm5855_vm1, %v6093_v29 }
 0x921   :  { %11155 = vmatmul.msk.bf16.vlgmr.msrb.gmra.mxu3 %vm5855_vm1, %v12436_v9 }
 0x922   :  { %7600 = vmatpush.bf16.msrb.mxu3 %v16309_v6  ;;  %v11177_v6 = vld [vmem:[%s17527_s6 + $0x164] sm:$0xf] }
 0x923   :  { %v6526_v60 = vunpack.c.l.b16 %v11177_v6 }
 0x924   :  { %v5889_v36 = vpop.f32.mrf.mxu3 }
 0x925   :  { %v6002_v13 = vadd.f32 %v16364_v17, %v5889_v36  ;;  %11212 = vmatmul.msk.bf16.gmra.mxu2 %vm5855_vm1, %v12449_v21  ;;  %v6534_v17 = vpack.c.b16 %v6526_v60, %v6526_v60  ;;  %v12459_v36 = vld [vmem:[%s17527_s6 + $0x1b4] sm:$0xff] }
 0x926   :  { %7601 = vmatpush.bf16.msrb.mxu3 %v16328_v42 }
 0x927   :  { %v6133_v3 = vpop.f32.mrf.mxu0 }
 0x928   :  { %v6172_v38 = vadd.f32 %v6133_v3, %v6002_v13 }
 0x929   :  { %11111 = vmatmul.msk.bf16.gmra.mxu1 %vm5855_vm1, %v6240_v33  ;;  %v12453_v33 = vld [vmem:[%s17527_s6 + $0x180] sm:$0xff] }
 0x92a   :  { %11257 = vmatmul.msk.bf16.vlgmr.msra.gmra.mxu0 %vm5855_vm1, %v12450_v4 }
 0x92b   :  { %7894 = vmatpush.bf16.msra.mxu0 %v7861_v24 }
 0x92c   :  { %v5891_v5 = vpop.f32.mrf.mxu3 }
 0x92d   :  { %v6004_v42 = vadd.f32 %v16386_v30, %v5891_v5  ;;  %v16522_v30 = vpop.f32.mrf.mxu2 }
 0x92f   :  { %7895 = vmatpush.bf16.msra.mxu0 %v7859_v53  ;;  %v6135_v63 = vpop.f32.mrf.mxu0 }
 0x930   :  { %v6173_v2 = vadd.f32 %v6135_v63, %v6004_v42  ;;  %v12440_v42 = vld [vmem:[%s17527_s6 + $0x110] sm:$0xff] }
 0x931   :  { %11156 = vmatmul.msk.bf16.gmra.mxu3 %vm5855_vm1, %v12437_v1 }
 0x934   :  { %v5894_v39 = vpop.f32.mrf.mxu3 }
 0x935   :  { %v6007_v23 = vadd.f32 %v16402_v31, %v5894_v39  ;;  %11213 = vmatmul.msk.bf16.gmra.mxu2 %vm5855_vm1, %v6534_v17  ;;  %v16534_v32 = vpop.f32.mrf.mxu2 }
 0x936   :  { %v6280_v0 = vpop.f32.mrf.mxu1 }
 0x937   :  { %v6138_v25 = vpop.f32.mrf.mxu0  ;;  %v16520_v50 = vadd.f32 %v6280_v0, %v6172_v38 }
 0x938   :  { %v6174_v12 = vadd.f32 %v6138_v25, %v6007_v23  ;;  %v12454_v23 = vld [vmem:[%s17527_s6 + $0x188] sm:$0xff] }
 0x939   :  { %11308 = vmatmul.msk.bf16.vlgmr.msra.gmra.mxu1 %vm5855_vm1, %v12457_v55 }
 0x93a   :  { %11258 = vmatmul.msk.bf16.gmra.mxu0 %vm5855_vm1, %v12451_v51  ;;  %8041 = vmatpush.bf16.msra.mxu1 %v8008_v19 }
 0x93c   :  { %v5896_v47 = vpop.f32.mrf.mxu3 }
 0x93d   :  { %v6009_v31 = vadd.f32 %v16424_v28, %v5896_v47  ;;  %v8302_v28 = vpop.permute.xlu1 %8301  ;;  %v16550_v35 = vpop.f32.mrf.mxu2  ;;  %v12441_v47 = vld [vmem:[%s17527_s6 + $0x118] sm:$0xff] }
 0x93e   :  { %8042 = vmatpush.bf16.msra.mxu1 %v8006_v54  ;;  %v6282_v62 = vpop.f32.mrf.mxu1 }
 0x93f   :  { %v6140_v16 = vpop.f32.mrf.mxu0  ;;  %v16532_v18 = vadd.f32 %v6282_v62, %v6173_v2  ;;  %v12473_v2 = vld [vmem:[%s17527_s6 + $0x22c] sm:$0xff] }
 0x940   :  { %v6175_v49 = vadd.f32 %v6140_v16, %v6009_v31  ;;  %v12474_v16 = vld [vmem:[%s17527_s6 + $0x234] sm:$0xff] }
 0x941   :  { %11157 = vmatmul.msk.bf16.gmra.mxu3 %vm5855_vm1, %v12438_v20 }
 0x944   :  { %v5899_v11 = vpop.f32.mrf.mxu3 }
 0x945   :  { %v6012_v61 = vadd.f32 %v16437_v44, %v5899_v11  ;;  %11410 = vmatmul.msk.bf16.vlgmr.msra.gmra.mxu2 %vm5855_vm1, %v12471_v8  ;;  %v16560_v27 = vpop.f32.mrf.mxu2  ;;  %v12461_v11 = vld [vmem:[%s17527_s6 + $0x1c4] sm:$0xff] }
 0x946   :  { %8335 = vmatpush.bf16.msra.mxu2 %v8302_v28  ;;  %v6285_v14 = vpop.f32.mrf.mxu1 }
 0x947   :  { %v6143_v58 = vpop.f32.mrf.mxu0  ;;  %v16548_v48 = vadd.f32 %v6285_v14, %v6174_v12 }
 0x948   :  { %v6176_v15 = vadd.f32 %v6143_v58, %v6012_v61  ;;  %v12455_v61 = vld [vmem:[%s17527_s6 + $0x190] sm:$0xff] }
 0x949   :  { %11309 = vmatmul.msk.bf16.gmra.mxu1 %vm5855_vm1, %v12458_v40 }
 0x94a   :  { %11259 = vmatmul.msk.bf16.gmra.mxu0 %vm5855_vm1, %v12452_v52  ;;  %8336 = vmatpush.bf16.msra.mxu2 %v8300_v10 }
 0x94c   :  { %v5901_v44 = vpop.f32.mrf.mxu3 }
 0x94d   :  { %v6014_v34 = vadd.f32 %v16456_v59, %v5901_v44  ;;  %v6038_v38 = vpop.f32.mrf.mxu2 }
 0x94e   :  { %v6287_v45 = vpop.f32.mrf.mxu1 }
 0x94f   :  { %v6145_v29 = vpop.f32.mrf.mxu0  ;;  %v16558_v9 = vadd.f32 %v6287_v45, %v6175_v49 }
 0x950   :  { %v6177_v21 = vadd.f32 %v6145_v29, %v6014_v34  ;;  %v12475_v29 = vld [vmem:[%s17527_s6 + $0x23c] sm:$0xff] }
 0x951   :  { %11158 = vmatmul.msk.bf16.gmra.mxu3 %vm5855_vm1, %v12439_v7 }
 0x954   :  { %v5904_v24 = vpop.f32.mrf.mxu3 }
 0x955   :  { %v6017_v59 = vadd.f32 %v16463_v46, %v5904_v24  ;;  %11411 = vmatmul.msk.bf16.gmra.mxu2 %vm5855_vm1, %v12472_v57  ;;  %v16599_v25 = vpop.f32.mrf.mxu2  ;;  %v12462_v57 = vld [vmem:[%s17527_s6 + $0x1cc] sm:$0xff] }
 0x956   :  { %v6290_v13 = vpop.f32.mrf.mxu1 }
 0x957   :  { %v6148_v4 = vpop.f32.mrf.mxu0  ;;  %v16574_v3 = vadd.f32 %v6290_v13, %v6176_v15  ;;  %v12442_v15 = vld [vmem:[%s17527_s6 + $0x120] sm:$0xff] }
 0x958   :  { %v6178_v6 = vadd.f32 %v6148_v4, %v6017_v59  ;;  %v12456_v59 = vld [vmem:[%s17527_s6 + $0x198] sm:$0xff] }
 0x959   :  { %11310 = vmatmul.msk.bf16.gmra.mxu1 %vm5855_vm1, %v12459_v36  ;;  %v11126_v36 = vld [vmem:[%s17527_s6 + $0x128] sm:$0xf] }
 0x95a   :  { %11260 = vmatmul.msk.bf16.gmra.mxu0 %vm5855_vm1, %v12453_v33  ;;  %v6379_v38 = vunpack.c.l.b16 %v11126_v36 }
 0x95c   :  { %v5906_v46 = vpop.f32.mrf.mxu3 }
 0x95d   :  { %v6019_v5 = vadd.f32 %v16473_v41, %v5906_v46  ;;  %v12460_v41 = vld [vmem:[%s17527_s6 + $0x1bc] sm:$0xff]  ;;  %v16612_v49 = vpop.f32.mrf.mxu2 }
 0x95e   :  { %v6292_v1 = vpop.f32.mrf.mxu1 }
 0x95f   :  { %v6150_v60 = vpop.f32.mrf.mxu0  ;;  %v16582_v53 = vadd.f32 %v6292_v1, %v6177_v21 }
 0x960   :  { %v6179_v63 = vadd.f32 %v6150_v60, %v6019_v5  ;;  %v6387_v5 = vpack.c.b16 %v6379_v38, %v6379_v38 }
 0x961   :  { %11159 = vmatmul.msk.bf16.gmra.mxu3 %vm5855_vm1, %v12440_v42 }
 0x964   :  { %v5909_v17 = vpop.f32.mrf.mxu3 }
 0x965   :  { %v6022_v19 = vadd.f32 %v16483_v37, %v5909_v17  ;;  %11412 = vmatmul.msk.bf16.gmra.mxu2 %vm5855_vm1, %v12473_v2  ;;  %v16630_v10 = vpop.f32.mrf.mxu2  ;;  %v12476_v17 = vld [vmem:[%s17527_s6 + $0x244] sm:$0xff] }
 0x966   :  { %v6295_v39 = vpop.f32.mrf.mxu1 }
 0x967   :  { %v6153_v55 = vpop.f32.mrf.mxu0  ;;  %v16596_v0 = vadd.f32 %v6295_v39, %v6178_v6 }
 0x968   :  { %v6180_v51 = vadd.f32 %v6153_v55, %v6022_v19 }
 0x969   :  { %11311 = vmatmul.msk.bf16.gmra.mxu1 %vm5855_vm1, %v12460_v41 }
 0x96a   :  { %11261 = vmatmul.msk.bf16.gmra.mxu0 %vm5855_vm1, %v12454_v23  ;;  %v12463_v23 = vld [vmem:[%s17527_s6 + $0x1d4] sm:$0xff] }
 0x96c   :  { %v5911_v37 = vpop.f32.mrf.mxu3 }
 0x96d   :  { %v6024_v12 = vadd.f32 %v16496_v22, %v5911_v37  ;;  %v16651_v4 = vpop.f32.mrf.mxu2 }
 0x96e   :  { %v6297_v54 = vpop.f32.mrf.mxu1 }
 0x96f   :  { %v6155_v31 = vpop.f32.mrf.mxu0  ;;  %v16606_v20 = vadd.f32 %v6297_v54, %v6179_v63  ;;  %v11228_v63 = vld [vmem:[%s17527_s6 + $0x1a0] sm:$0xf] }
 0x970   :  { %v6181_v62 = vadd.f32 %v6155_v31, %v6024_v12  ;;  %v6673_v41 = vunpack.c.l.b16 %v11228_v63 }
 0x971   :  { %11160 = vmatmul.msk.bf16.gmra.mxu3 %vm5855_vm1, %v12441_v47 }
 0x974   :  { %v5914_v8 = vpop.f32.mrf.mxu3 }
 0x975   :  { %v6027_v22 = vadd.f32 %v16507_v43, %v5914_v8  ;;  %11413 = vmatmul.msk.bf16.gmra.mxu2 %vm5855_vm1, %v12474_v16  ;;  %v16665_v19 = vpop.f32.mrf.mxu2  ;;  %v11279_v16 = vld [vmem:[%s17527_s6 + $0x1dc] sm:$0xf] }
 0x976   :  { %v6300_v28 = vpop.f32.mrf.mxu1 }
 0x977   :  { %v6158_v40 = vpop.f32.mrf.mxu0  ;;  %v16622_v14 = vadd.f32 %v6300_v28, %v6180_v51  ;;  %v6681_v51 = vpack.c.b16 %v6673_v41, %v6673_v41  ;;  %v6820_v28 = vunpack.c.l.b16 %v11279_v16 }
 0x978   :  { %v6182_v52 = vadd.f32 %v6158_v40, %v6027_v22 }
 0x979   :  { %11312 = vmatmul.msk.bf16.gmra.mxu1 %vm5855_vm1, %v12461_v11  ;;  %v12477_v11 = vld [vmem:[%s17527_s6 + $0x24c] sm:$0xff] }
 0x97a   :  { %11262 = vmatmul.msk.bf16.gmra.mxu0 %vm5855_vm1, %v12455_v61  ;;  %v8449_v61 = vpop.permute.xlu1 %8448 }
 0x97c   :  { %v5916_v43 = vpop.f32.mrf.mxu3 }
 0x97d   :  { %v6029_v58 = vadd.f32 %v16522_v30, %v5916_v43  ;;  %v16676_v54 = vpop.f32.mrf.mxu2  ;;  %v6828_v43 = vpack.c.b16 %v6820_v28, %v6820_v28 }
 0x97e   :  { %v6302_v44 = vpop.f32.mrf.mxu1 }
 0x97f   :  { %v6160_v34 = vpop.f32.mrf.mxu0  ;;  %v16632_v7 = vadd.f32 %v6302_v44, %v6181_v62  ;;  %v12478_v44 = vld [vmem:[%s17527_s6 + $0x258] sm:$0xff] }
 0x980   :  { %v6183_v45 = vadd.f32 %v6160_v34, %v6029_v58 }
 0x981   :  { %11161 = vmatmul.msk.bf16.gmra.mxu3 %vm5855_vm1, %v12442_v15 }
 0x984   :  { %v5919_v21 = vpop.f32.mrf.mxu3 }
 0x985   :  { %v6032_v30 = vadd.f32 %v16534_v32, %v5919_v21  ;;  %11414 = vmatmul.msk.bf16.gmra.mxu2 %vm5855_vm1, %v12475_v29  ;;  %v16693_v58 = vpop.f32.mrf.mxu2 }
 0x986   :  { %v6305_v24 = vpop.f32.mrf.mxu1 }
 0x987   :  { %v6163_v13 = vpop.f32.mrf.mxu0  ;;  %v16649_v33 = vadd.f32 %v6305_v24, %v6182_v52 }
 0x988   :  { %v6184_v32 = vadd.f32 %v6163_v13, %v6032_v30  ;;  %v12465_v30 = vld [vmem:[%s17527_s6 + $0x1e8] sm:$0xff] }
 0x989   :  { %11313 = vmatmul.msk.bf16.gmra.mxu1 %vm5855_vm1, %v12462_v57 }
 0x98a   :  { %11263 = vmatmul.msk.bf16.gmra.mxu0 %vm5855_vm1, %v12456_v59 }
 0x98c   :  { %v5921_v6 = vpop.f32.mrf.mxu3 }
 0x98d   :  { %v6034_v46 = vadd.f32 %v16550_v35, %v5921_v6  ;;  %v16712_v13 = vpop.f32.mrf.mxu2 }
 0x98e   :  { %v6307_v42 = vpop.f32.mrf.mxu1 }
 0x98f   :  { %v6165_v1 = vpop.f32.mrf.mxu0  ;;  %v16656_v60 = vadd.f32 %v6307_v42, %v6183_v45  ;;  %v12485_v42 = vld [vmem:[%s17527_s6 + $0x294] sm:$0xff] }
 0x990   :  { %v6185_v2 = vadd.f32 %v6165_v1, %v6034_v46  ;;  %v12479_v1 = vld [vmem:[%s17527_s6 + $0x260] sm:$0xff] }
 0x991   :  { %11162 = vmatmul.msk.bf16.gmra.mxu3 %vm5855_vm1, %v6387_v5 }
 0x994   :  { %v5924_v35 = vpop.f32.mrf.mxu3 }
 0x995   :  { %v6037_v39 = vadd.f32 %v16560_v27, %v5924_v35  ;;  %11415 = vmatmul.msk.bf16.gmra.mxu2 %vm5855_vm1, %v12476_v17  ;;  %v12464_v27 = vld [vmem:[%s17527_s6 + $0x1e0] sm:$0xff] }
 0x996   :  { %v6310_v55 = vpop.f32.mrf.mxu1 }
 0x997   :  { %v6168_v37 = vpop.f32.mrf.mxu0  ;;  %v16672_v12 = vadd.f32 %v6310_v55, %v6184_v32  ;;  %v16714_v32 = vpop.permute.xlu0 %8742 }
 0x998   :  { %v6186_v47 = vadd.f32 %v6168_v37, %v6037_v39 }
 0x999   :  { %11314 = vmatmul.msk.bf16.gmra.mxu1 %vm5855_vm1, %v12463_v23 }
 0x99a   :  { %11264 = vmatmul.msk.bf16.gmra.mxu0 %vm5855_vm1, %v6681_v51  ;;  %v12466_v51 = vld [vmem:[%s17527_s6 + $0x1f0] sm:$0xff] }
 0x99c   :  { %v5926_v31 = vpop.f32.mrf.mxu3 }
 0x99e   :  { %v6312_v62 = vpop.f32.mrf.mxu1 }
 0x99f   :  { %v16684_v8 = vadd.f32 %v6312_v62, %v6185_v2  ;;  %v6170_v22 = vpop.f32.mrf.mxu0  ;;  %v16732_v35 = vpop.permute.xlu0 %8740  ;;  %v12499_v62 = vld [vmem:[%s17527_s6 + $0x30c] sm:$0xff] }
 0x9a1   :  { %11359 = vmatmul.msk.bf16.vlgmr.msra.gmra.mxu3 %vm5855_vm1, %v12464_v27 }
 0x9a2   :  { %8188 = vmatpush.bf16.msra.mxu3 %v16509_v56 }
 0x9a4   :  { %v6427_v40 = vpop.f32.mrf.mxu3 }
 0x9a5   :  { %v6466_v52 = vadd.f32 %v6427_v40, %v16520_v50  ;;  %11416 = vmatmul.msk.bf16.gmra.mxu2 %vm5855_vm1, %v12477_v11  ;;  %v11381_v50 = vld [vmem:[%s17527_s6 + $0x254] sm:$0xf] }
 0x9a6   :  { %8189 = vmatpush.bf16.msra.mxu3 %v16526_v26  ;;  %v6315_v15 = vpop.f32.mrf.mxu1  ;;  %v7114_v57 = vunpack.c.l.b16 %v11381_v50 }
 0x9a7   :  { %v16699_v34 = vadd.f32 %v6315_v15, %v6186_v47  ;;  %v6613_v56 = vadd.f32 %v16599_v25, %v6466_v52  ;;  %v6721_v45 = vpop.f32.mrf.mxu0  ;;  %v8447_v25 = vpop.permute.xlu1 %8446 }
 0x9a8   :  { %v7122_v6 = vpack.c.b16 %v7114_v57, %v7114_v57  ;;  %v8890_v22 = vpop.permute.xlu0 %8889 }
 0x9a9   :  { %v6760_v29 = vadd.f32 %v6721_v45, %v6613_v56  ;;  %11315 = vmatmul.msk.bf16.gmra.mxu1 %vm5855_vm1, %v6828_v43  ;;  %v12467_v45 = vld [vmem:[%s17527_s6 + $0x1f8] sm:$0xff] }
 0x9aa   :  { %11461 = vmatmul.msk.bf16.vlgmr.msrb.gmra.mxu0 %vm5855_vm1, %v12478_v44 }
 0x9ab   :  { %8482 = vmatpush.bf16.msrb.mxu0 %v8449_v61  ;;  %v12480_v61 = vld [vmem:[%s17527_s6 + $0x268] sm:$0xff] }
 0x9ac   :  { %v6429_v26 = vpop.f32.mrf.mxu3 }
 0x9ad   :  { %v6467_v21 = vadd.f32 %v6429_v26, %v16532_v18  ;;  %v8596_v18 = vpop.permute.xlu2 %8595 }
 0x9ae   :  { %v6317_v24 = vpop.f32.mrf.mxu1 }
 0x9af   :  { %8483 = vmatpush.bf16.msrb.mxu0 %v8447_v25  ;;  %v6614_v59 = vadd.f32 %v16612_v49, %v6467_v21  ;;  %v6723_v36 = vpop.f32.mrf.mxu0  ;;  %v8888_v15 = vpop.permute.xlu1 %8887 }
 0x9b1   :  { %v6761_v38 = vadd.f32 %v6723_v36, %v6614_v59  ;;  %11360 = vmatmul.msk.bf16.gmra.mxu3 %vm5855_vm1, %v12465_v30  ;;  %v12481_v59 = vld [vmem:[%s17527_s6 + $0x270] sm:$0xff] }
 0x9b4   :  { %v6432_v46 = vpop.f32.mrf.mxu3 }
 0x9b5   :  { %v6468_v5 = vadd.f32 %v6432_v46, %v16548_v48  ;;  %11417 = vmatmul.msk.bf16.gmra.mxu2 %vm5855_vm1, %v7122_v6  ;;  %v16729_v48 = vpop.f32.mrf.mxu2  ;;  %v8594_v23 = vpop.permute.xlu2 %8593  ;;  %v12468_v46 = vld [vmem:[%s17527_s6 + $0x200] sm:$0xff] }
 0x9b6   :  { %v6868_v49 = vpop.f32.mrf.mxu1 }
 0x9b7   :  { %v16725_v63 = vadd.f32 %v6868_v49, %v6760_v29  ;;  %v6615_v2 = vadd.f32 %v16630_v10, %v6468_v5  ;;  %v6726_v17 = vpop.f32.mrf.mxu0 }
 0x9b9   :  { %v6762_v41 = vadd.f32 %v6726_v17, %v6615_v2  ;;  %11512 = vmatmul.msk.bf16.vlgmr.msrb.gmra.mxu1 %vm5855_vm1, %v12485_v42 }
 0x9ba   :  { %11462 = vmatmul.msk.bf16.gmra.mxu0 %vm5855_vm1, %v12479_v1  ;;  %8629 = vmatpush.bf16.msrb.mxu1 %v8596_v18 }
 0x9bc   :  { %v6434_v39 = vpop.f32.mrf.mxu3 }
 0x9bd   :  { %v6469_v55 = vadd.f32 %v6434_v39, %v16558_v9  ;;  %v16745_v16 = vpop.f32.mrf.mxu2 }
 0x9be   :  { %8630 = vmatpush.bf16.msrb.mxu1 %v8594_v23  ;;  %v6870_v10 = vpop.f32.mrf.mxu1 }
 0x9bf   :  { %v16738_v37 = vadd.f32 %v6870_v10, %v6761_v38  ;;  %v6616_v47 = vadd.f32 %v16651_v4, %v6469_v55  ;;  %v6728_v31 = vpop.f32.mrf.mxu0  ;;  %v12486_v4 = vld [vmem:[%s17527_s6 + $0x29c] sm:$0xff] }
 0x9c0   :  { %v12482_v55 = vld [vmem:[%s17527_s6 + $0x278] sm:$0xff] }
 0x9c1   :  { %v6763_v27 = vadd.f32 %v6728_v31, %v6616_v47  ;;  %11361 = vmatmul.msk.bf16.gmra.mxu3 %vm5855_vm1, %v12466_v51 }
 0x9c4   :  { %v6437_v9 = vpop.f32.mrf.mxu3 }
 0x9c5   :  { %v6470_v11 = vadd.f32 %v6437_v9, %v16574_v3  ;;  %11614 = vmatmul.msk.bf16.vlgmr.msrb.gmra.mxu2 %vm5855_vm1, %v12499_v62  ;;  %v6599_v25 = vpop.f32.mrf.mxu2 }
 0x9c6   :  { %8923 = vmatpush.bf16.msrb.mxu2 %v8890_v22  ;;  %v6873_v28 = vpop.f32.mrf.mxu1 }
 0x9c7   :  { %v16755_v40 = vadd.f32 %v6873_v28, %v6762_v41  ;;  %v6617_v52 = vadd.f32 %v16665_v19, %v6470_v11  ;;  %v6731_v43 = vpop.f32.mrf.mxu0 }
 0x9c9   :  { %v6764_v44 = vadd.f32 %v6731_v43, %v6617_v52  ;;  %11513 = vmatmul.msk.bf16.gmra.mxu1 %vm5855_vm1, %v12486_v4 }
 0x9ca   :  { %11463 = vmatmul.msk.bf16.gmra.mxu0 %vm5855_vm1, %v12480_v61  ;;  %8924 = vmatpush.bf16.msrb.mxu2 %v8888_v15  ;;  %v12483_v15 = vld [vmem:[%s17527_s6 + $0x280] sm:$0xff] }
 0x9cc   :  { %v6439_v3 = vpop.f32.mrf.mxu3 }
 0x9cd   :  { %v6471_v56 = vadd.f32 %v6439_v3, %v16582_v53  ;;  %v12487_v53 = vld [vmem:[%s17527_s6 + $0x2a4] sm:$0xff]  ;;  %v6601_v5 = vpop.f32.mrf.mxu2 }
 0x9ce   :  { %v6875_v29 = vpop.f32.mrf.mxu1 }
 0x9cf   :  { %v16764_v50 = vadd.f32 %v6875_v29, %v6763_v27  ;;  %v6618_v19 = vadd.f32 %v16676_v54, %v6471_v56  ;;  %v6733_v26 = vpop.f32.mrf.mxu0  ;;  %v12469_v27 = vld [vmem:[%s17527_s6 + $0x208] sm:$0xff]  ;;  %v12470_v29 = vld [vmem:[%s17527_s6 + $0x210] sm:$0xff] }
 0x9d1   :  { %v6765_v21 = vadd.f32 %v6733_v26, %v6618_v19  ;;  %11362 = vmatmul.msk.bf16.gmra.mxu3 %vm5855_vm1, %v12467_v45 }
 0x9d4   :  { %v6442_v30 = vpop.f32.mrf.mxu3 }
 0x9d5   :  { %v6472_v57 = vadd.f32 %v6442_v30, %v16596_v0  ;;  %v6604_v39 = vpop.f32.mrf.mxu2 }
 0x9d6   :  { %v6878_v24 = vpop.f32.mrf.mxu1 }
 0x9d7   :  { %v16775_v36 = vadd.f32 %v6878_v24, %v6764_v44  ;;  %v6619_v54 = vadd.f32 %v16693_v58, %v6472_v57  ;;  %v6736_v38 = vpop.f32.mrf.mxu0 }
 0x9d9   :  { %v6766_v6 = vadd.f32 %v6736_v38, %v6619_v54  ;;  %11514 = vmatmul.msk.bf16.gmra.mxu1 %vm5855_vm1, %v12487_v53  ;;  %v12484_v54 = vld [vmem:[%s17527_s6 + $0x288] sm:$0xff]  ;;  %v11330_v38 = vld [vmem:[%s17527_s6 + $0x218] sm:$0xf] }
 0x9da   :  { %11464 = vmatmul.msk.bf16.gmra.mxu0 %vm5855_vm1, %v12481_v59 }
 0x9dc   :  { %v6444_v0 = vpop.f32.mrf.mxu3 }
 0x9dd   :  { %v6473_v18 = vadd.f32 %v6444_v0, %v16606_v20  ;;  %v12488_v20 = vld [vmem:[%s17527_s6 + $0x2ac] sm:$0xff]  ;;  %v6606_v62 = vpop.f32.mrf.mxu2 }
 0x9de   :  { %v6880_v42 = vpop.f32.mrf.mxu1 }
 0x9df   :  { %v16784_v49 = vadd.f32 %v6880_v42, %v6765_v21  ;;  %v6620_v1 = vadd.f32 %v16712_v13, %v6473_v18  ;;  %v6738_v58 = vpop.f32.mrf.mxu0 }
 0x9e1   :  { %v6767_v2 = vadd.f32 %v6738_v58, %v6620_v1  ;;  %11363 = vmatmul.msk.bf16.gmra.mxu3 %vm5855_vm1, %v12468_v46 }
 0x9e4   :  { %v6447_v17 = vpop.f32.mrf.mxu3 }
 0x9e5   :  { %v6474_v41 = vadd.f32 %v6447_v17, %v16622_v14  ;;  %v6609_v52 = vpop.f32.mrf.mxu2 }
 0x9e6   :  { %v6883_v23 = vpop.f32.mrf.mxu1 }
 0x9e7   :  { %v16795_v51 = vadd.f32 %v6883_v23, %v6766_v6  ;;  %v6621_v13 = vadd.f32 %v16729_v48, %v6474_v41  ;;  %v6741_v10 = vpop.f32.mrf.mxu0 }
 0x9e9   :  { %v6768_v47 = vadd.f32 %v6741_v10, %v6621_v13  ;;  %11515 = vmatmul.msk.bf16.gmra.mxu1 %vm5855_vm1, %v12488_v20  ;;  %v12500_v13 = vld [vmem:[%s17527_s6 + $0x314] sm:$0xff] }
 0x9ea   :  { %11465 = vmatmul.msk.bf16.gmra.mxu0 %vm5855_vm1, %v12482_v55  ;;  %11615 = vmatmul.msk.bf16.gmra.mxu2 %vm5855_vm1, %v12500_v13 }
 0x9ec   :  { %v6449_v14 = vpop.f32.mrf.mxu3 }
 0x9ed   :  { %v6475_v31 = vadd.f32 %v6449_v14, %v16632_v7  ;;  %v12489_v7 = vld [vmem:[%s17527_s6 + $0x2b4] sm:$0xff]  ;;  %v6611_v19 = vpop.f32.mrf.mxu2  ;;  %v12491_v14 = vld [vmem:[%s17527_s6 + $0x2c4] sm:$0xff] }
 0x9ee   :  { %v6885_v9 = vpop.f32.mrf.mxu1 }
 0x9ef   :  { %v16804_v22 = vadd.f32 %v6885_v9, %v6767_v2  ;;  %v6622_v11 = vadd.f32 %v16745_v16, %v6475_v31  ;;  %v6743_v48 = vpop.f32.mrf.mxu0 }
 0x9f1   :  { %v6769_v4 = vadd.f32 %v6743_v48, %v6622_v11  ;;  %11364 = vmatmul.msk.bf16.gmra.mxu3 %vm5855_vm1, %v12469_v27 }
 0x9f4   :  { %v6452_v28 = vpop.f32.mrf.mxu3 }
 0x9f5   :  { %v6476_v61 = vadd.f32 %v6452_v28, %v16649_v33  ;;  %v7162_v46 = vpop.f32.mrf.mxu2 }
 0x9f6   :  { %v6888_v43 = vpop.f32.mrf.mxu1 }
 0x9f7   :  { %v6623_v44 = vadd.f32 %v6599_v25, %v6476_v61  ;;  %v16815_v3 = vadd.f32 %v6888_v43, %v6768_v47  ;;  %v6746_v16 = vpop.f32.mrf.mxu0 }
 0x9f9   :  { %v6770_v56 = vadd.f32 %v6746_v16, %v6623_v44  ;;  %11516 = vmatmul.msk.bf16.gmra.mxu1 %vm5855_vm1, %v12489_v7  ;;  %v11483_v7 = vld [vmem:[%s17527_s6 + $0x2cc] sm:$0xf]  ;;  %v12501_v16 = vld [vmem:[%s17527_s6 + $0x31c] sm:$0xff] }
 0x9fa   :  { %11466 = vmatmul.msk.bf16.gmra.mxu0 %vm5855_vm1, %v12483_v15  ;;  %v7408_v44 = vunpack.c.l.b16 %v11483_v7  ;;  %11616 = vmatmul.msk.bf16.gmra.mxu2 %vm5855_vm1, %v12501_v16 }
 0x9fc   :  { %v6454_v33 = vpop.f32.mrf.mxu3 }
 0x9fd   :  { %v6477_v45 = vadd.f32 %v6454_v33, %v16656_v60  ;;  %v12490_v60 = vld [vmem:[%s17527_s6 + $0x2bc] sm:$0xff]  ;;  %v7164_v23 = vpop.f32.mrf.mxu2 }
 0x9fe   :  { %v6890_v26 = vpop.f32.mrf.mxu1 }
 0x9ff   :  { %v6624_v21 = vadd.f32 %v6601_v5, %v6477_v45  ;;  %v16823_v30 = vadd.f32 %v6890_v26, %v6769_v4  ;;  %v6748_v57 = vpop.f32.mrf.mxu0  ;;  %v12506_v26 = vld [vmem:[%s17527_s6 + $0x348] sm:$0xff] }
 0xa01   :  { %v6771_v53 = vadd.f32 %v6748_v57, %v6624_v21  ;;  %11365 = vmatmul.msk.bf16.gmra.mxu3 %vm5855_vm1, %v12470_v29  ;;  %v7416_v29 = vpack.c.b16 %v7408_v44, %v7408_v44 }
 0xa04   :  { %v6457_v25 = vpop.f32.mrf.mxu3 }
 0xa05   :  { %v6478_v24 = vadd.f32 %v6457_v25, %v16672_v12  ;;  %v6967_v12 = vunpack.c.l.b16 %v11330_v38  ;;  %v7167_v48 = vpop.f32.mrf.mxu2 }
 0xa06   :  { %v6893_v59 = vpop.f32.mrf.mxu1 }
 0xa07   :  { %v6625_v6 = vadd.f32 %v6604_v39, %v6478_v24  ;;  %v16836_v0 = vadd.f32 %v6893_v59, %v6770_v56  ;;  %v6751_v18 = vpop.f32.mrf.mxu0  ;;  %v6975_v58 = vpack.c.b16 %v6967_v12, %v6967_v12  ;;  %v11432_v39 = vld [vmem:[%s17527_s6 + $0x290] sm:$0xf]  ;;  %v9037_v56 = vpop.permute.xlu0 %9036 }
 0xa08   :  { %v7261_v10 = vunpack.c.l.b16 %v11432_v39 }
 0xa09   :  { %v6772_v5 = vadd.f32 %v6751_v18, %v6625_v6  ;;  %11517 = vmatmul.msk.bf16.gmra.mxu1 %vm5855_vm1, %v12490_v60 }
 0xa0a   :  { %11467 = vmatmul.msk.bf16.gmra.mxu0 %vm5855_vm1, %v12484_v54  ;;  %v7269_v27 = vpack.c.b16 %v7261_v10, %v7261_v10  ;;  %v12494_v10 = vld [vmem:[%s17527_s6 + $0x2e0] sm:$0xff] }
 0xa0c   :  { %v6459_v42 = vpop.f32.mrf.mxu3 }
 0xa0d   :  { %v6479_v1 = vadd.f32 %v6459_v42, %v16684_v8  ;;  %v7169_v15 = vpop.f32.mrf.mxu2  ;;  %v12513_v42 = vld [vmem:[%s17527_s6 + $0x384] sm:$0xff] }
 0xa0e   :  { %v6895_v2 = vpop.f32.mrf.mxu1 }
 0xa0f   :  { %v6626_v17 = vadd.f32 %v6606_v62, %v6479_v1  ;;  %v16841_v41 = vadd.f32 %v6895_v2, %v6771_v53  ;;  %v6753_v20 = vpop.f32.mrf.mxu0  ;;  %v9035_v60 = vpop.permute.xlu0 %9034 }
 0xa11   :  { %v6773_v55 = vadd.f32 %v6753_v20, %v6626_v17  ;;  %11366 = vmatmul.msk.bf16.gmra.mxu3 %vm5855_vm1, %v6975_v58  ;;  %v12507_v58 = vld [vmem:[%s17527_s6 + $0x350] sm:$0xff] }
 0xa14   :  { %v6462_v8 = vpop.f32.mrf.mxu3 }
 0xa15   :  { %v6480_v47 = vadd.f32 %v6462_v8, %v16699_v34  ;;  %v12492_v34 = vld [vmem:[%s17527_s6 + $0x2d0] sm:$0xff]  ;;  %v7172_v25 = vpop.f32.mrf.mxu2 }
 0xa16   :  { %v6898_v31 = vpop.f32.mrf.mxu1 }
 0xa17   :  { %v6627_v62 = vadd.f32 %v6609_v52, %v6480_v47  ;;  %v16855_v9 = vadd.f32 %v6898_v31, %v6772_v5  ;;  %v6756_v11 = vpop.f32.mrf.mxu0  ;;  %v9184_v5 = vpop.permute.xlu1 %9183 }
 0xa19   :  { %v6774_v4 = vadd.f32 %v6756_v11, %v6627_v62  ;;  %11518 = vmatmul.msk.bf16.gmra.mxu1 %vm5855_vm1, %v12491_v14  ;;  %v12503_v11 = vld [vmem:[%s17527_s6 + $0x32c] sm:$0xff] }
 0xa1a   :  { %11468 = vmatmul.msk.bf16.gmra.mxu0 %vm5855_vm1, %v7269_v27 }
 0xa1c   :  { %v6464_v28 = vpop.f32.mrf.mxu3 }
 0xa1d   :  { %v7174_v6 = vpop.f32.mrf.mxu2 }
 0xa1e   :  { %v6900_v61 = vpop.f32.mrf.mxu1 }
 0xa1f   :  { %v16865_v52 = vadd.f32 %v6900_v61, %v6773_v55  ;;  %v6758_v43 = vpop.f32.mrf.mxu0  ;;  %v9182_v55 = vpop.permute.xlu1 %9181 }
 0xa21   :  { %11563 = vmatmul.msk.bf16.vlgmr.msrb.gmra.mxu3 %vm5855_vm1, %v12492_v34  ;;  %v12508_v34 = vld [vmem:[%s17527_s6 + $0x358] sm:$0xff] }
 0xa22   :  { %8776 = vmatpush.bf16.msrb.mxu3 %v16714_v32 }
 0xa24   :  { %v7015_v33 = vpop.f32.mrf.mxu3 }
 0xa25   :  { %v7054_v45 = vadd.f32 %v7015_v33, %v16725_v63  ;;  %v7177_v39 = vpop.f32.mrf.mxu2 }
 0xa26   :  { %8777 = vmatpush.bf16.msrb.mxu3 %v16732_v35  ;;  %v6903_v19 = vpop.f32.mrf.mxu1  ;;  %v12493_v35 = vld [vmem:[%s17527_s6 + $0x2d8] sm:$0xff] }
 0xa27   :  { %v16878_v21 = vadd.f32 %v6903_v19, %v6774_v4  ;;  %v7201_v57 = vadd.f32 %v7162_v46, %v7054_v45  ;;  %v7309_v53 = vpop.f32.mrf.mxu0  ;;  %v12502_v46 = vld [vmem:[%s17527_s6 + $0x324] sm:$0xff]  ;;  %v12514_v4 = vld [vmem:[%s17527_s6 + $0x38c] sm:$0xff] }
 0xa28   :  { %11617 = vmatmul.msk.bf16.gmra.mxu2 %vm5855_vm1, %v12502_v46 }
 0xa29   :  { %v7348_v32 = vadd.f32 %v7309_v53, %v7201_v57  ;;  %11519 = vmatmul.msk.bf16.gmra.mxu1 %vm5855_vm1, %v7416_v29  ;;  %v12504_v53 = vld [vmem:[%s17527_s6 + $0x334] sm:$0xff] }
 0xa2a   :  { %11665 = vmatmul.msk.bf16.vlgmr.msra.gmra.mxu0 %vm5855_vm1, %v12506_v26 }
 0xa2b   :  { %9070 = vmatpush.bf16.msra.mxu0 %v9037_v56  ;;  %v12495_v56 = vld [vmem:[%s17527_s6 + $0x2e8] sm:$0xff] }
 0xa2c   :  { %v7017_v63 = vpop.f32.mrf.mxu3 }
 0xa2d   :  { %v7055_v24 = vadd.f32 %v7017_v63, %v16738_v37  ;;  %v7179_v27 = vpop.f32.mrf.mxu2 }
 0xa2e   :  { %v6905_v59 = vpop.f32.mrf.mxu1 }
 0xa2f   :  { %9071 = vmatpush.bf16.msra.mxu0 %v9035_v60  ;;  %v7202_v54 = vadd.f32 %v7164_v23, %v7055_v24  ;;  %v7311_v38 = vpop.f32.mrf.mxu0  ;;  %v12509_v24 = vld [vmem:[%s17527_s6 + $0x360] sm:$0xff] }
 0xa31   :  { %v7349_v18 = vadd.f32 %v7311_v38, %v7202_v54  ;;  %11564 = vmatmul.msk.bf16.gmra.mxu3 %vm5855_vm1, %v12493_v35 }
 0xa34   :  { %v7020_v37 = vpop.f32.mrf.mxu3 }
 0xa35   :  { %v7056_v12 = vadd.f32 %v7020_v37, %v16755_v40 }
 0xa36   :  { %v7456_v1 = vpop.f32.mrf.mxu1 }
 0xa37   :  { %v7203_v2 = vadd.f32 %v7167_v48, %v7056_v12  ;;  %v16898_v17 = vadd.f32 %v7456_v1, %v7348_v32  ;;  %v7314_v20 = vpop.f32.mrf.mxu0  ;;  %v12515_v32 = vld [vmem:[%s17527_s6 + $0x394] sm:$0xff] }
 0xa38   :  { %11618 = vmatmul.msk.bf16.gmra.mxu2 %vm5855_vm1, %v12503_v11 }
 0xa39   :  { %v7350_v23 = vadd.f32 %v7314_v20, %v7203_v2  ;;  %11716 = vmatmul.msk.bf16.vlgmr.msra.gmra.mxu1 %vm5855_vm1, %v12513_v42  ;;  %v12516_v20 = vld [vmem:[%s17527_s6 + $0x39c] sm:$0xff] }
 0xa3a   :  { %9217 = vmatpush.bf16.msra.mxu1 %v9184_v5  ;;  %11666 = vmatmul.msk.bf16.gmra.mxu0 %vm5855_vm1, %v12507_v58  ;;  %v12505_v58 = vld [vmem:[%s17527_s6 + $0x33c] sm:$0xff] }
 0xa3c   :  { %v7022_v40 = vpop.f32.mrf.mxu3 }
 0xa3d   :  { %v7057_v13 = vadd.f32 %v7022_v40, %v16764_v50 }
 0xa3e   :  { %9218 = vmatpush.bf16.msra.mxu1 %v9182_v55  ;;  %v7458_v8 = vpop.f32.mrf.mxu1 }
 0xa3f   :  { %v7204_v47 = vadd.f32 %v7169_v15, %v7057_v13  ;;  %v16906_v14 = vadd.f32 %v7458_v8, %v7349_v18  ;;  %v7316_v31 = vpop.f32.mrf.mxu0  ;;  %v7182_v15 = vpop.f32.mrf.mxu2  ;;  %v12496_v18 = vld [vmem:[%s17527_s6 + $0x2f0] sm:$0xff] }
 0xa41   :  { %v7351_v62 = vadd.f32 %v7316_v31, %v7204_v47  ;;  %11565 = vmatmul.msk.bf16.gmra.mxu3 %vm5855_vm1, %v12494_v10  ;;  %v12497_v31 = vld [vmem:[%s17527_s6 + $0x2f8] sm:$0xff] }
 0xa44   :  { %v7025_v50 = vpop.f32.mrf.mxu3 }
 0xa45   :  { %v7058_v48 = vadd.f32 %v7025_v50, %v16775_v36 }
 0xa46   :  { %v7461_v28 = vpop.f32.mrf.mxu1 }
 0xa47   :  { %v7205_v61 = vadd.f32 %v7172_v25, %v7058_v48  ;;  %v16920_v7 = vadd.f32 %v7461_v28, %v7350_v23  ;;  %v7319_v43 = vpop.f32.mrf.mxu0  ;;  %v7184_v26 = vpop.f32.mrf.mxu2  ;;  %v12510_v23 = vld [vmem:[%s17527_s6 + $0x368] sm:$0xff] }
 0xa48   :  { %11619 = vmatmul.msk.bf16.gmra.mxu2 %vm5855_vm1, %v12504_v53 }
 0xa49   :  { %v7352_v44 = vadd.f32 %v7319_v43, %v7205_v61  ;;  %11717 = vmatmul.msk.bf16.gmra.mxu1 %vm5855_vm1, %v12514_v4  ;;  %v11585_v4 = vld [vmem:[%s17527_s6 + $0x344] sm:$0xf] }
 0xa4a   :  { %11667 = vmatmul.msk.bf16.gmra.mxu0 %vm5855_vm1, %v12508_v34  ;;  %v7702_v34 = vunpack.c.l.b16 %v11585_v4 }
 0xa4c   :  { %v7027_v36 = vpop.f32.mrf.mxu3  ;;  %v7710_v61 = vpack.c.b16 %v7702_v34, %v7702_v34 }
 0xa4d   :  { %v7059_v16 = vadd.f32 %v7027_v36, %v16784_v49  ;;  %v12511_v36 = vld [vmem:[%s17527_s6 + $0x370] sm:$0xff] }
 0xa4e   :  { %v7463_v33 = vpop.f32.mrf.mxu1 }
 0xa4f   :  { %v7206_v45 = vadd.f32 %v7174_v6, %v7059_v16  ;;  %v16928_v29 = vadd.f32 %v7463_v33, %v7351_v62  ;;  %v7321_v19 = vpop.f32.mrf.mxu0  ;;  %v7187_v54 = vpop.f32.mrf.mxu2 }
 0xa51   :  { %v7353_v57 = vadd.f32 %v7321_v19, %v7206_v45  ;;  %11566 = vmatmul.msk.bf16.gmra.mxu3 %vm5855_vm1, %v12495_v56 }
 0xa54   :  { %v7030_v49 = vpop.f32.mrf.mxu3 }
 0xa55   :  { %v7060_v25 = vadd.f32 %v7030_v49, %v16795_v51 }
 0xa56   :  { %v7466_v63 = vpop.f32.mrf.mxu1 }
 0xa57   :  { %v7207_v35 = vadd.f32 %v7177_v39, %v7060_v25  ;;  %v16942_v60 = vadd.f32 %v7466_v63, %v7352_v44  ;;  %v7324_v59 = vpop.f32.mrf.mxu0  ;;  %v7189_v42 = vpop.f32.mrf.mxu2 }
 0xa58   :  { %11620 = vmatmul.msk.bf16.gmra.mxu2 %vm5855_vm1, %v12505_v58 }
 0xa59   :  { %v7354_v38 = vadd.f32 %v7324_v59, %v7207_v35  ;;  %11718 = vmatmul.msk.bf16.gmra.mxu1 %vm5855_vm1, %v12515_v32  ;;  %v12527_v35 = vld [vmem:[%s17527_s6 + $0x3fc] sm:$0xff] }
 0xa5a   :  { %11668 = vmatmul.msk.bf16.gmra.mxu0 %vm5855_vm1, %v12509_v24 }
 0xa5c   :  { %v7032_v51 = vpop.f32.mrf.mxu3 }
 0xa5d   :  { %v7061_v6 = vadd.f32 %v7032_v51, %v16804_v22  ;;  %v12512_v51 = vld [vmem:[%s17527_s6 + $0x378] sm:$0xff] }
 0xa5e   :  { %v7468_v46 = vpop.f32.mrf.mxu1 }
 0xa5f   :  { %v7208_v5 = vadd.f32 %v7179_v27, %v7061_v6  ;;  %v16950_v37 = vadd.f32 %v7468_v46, %v7353_v57  ;;  %v7326_v12 = vpop.f32.mrf.mxu0  ;;  %v7192_v10 = vpop.f32.mrf.mxu2  ;;  %v12498_v57 = vld [vmem:[%s17527_s6 + $0x300] sm:$0xff]  ;;  %v11534_v6 = vld [vmem:[%s17527_s6 + $0x308] sm:$0xf] }
 0xa61   :  { %v7355_v1 = vadd.f32 %v7326_v12, %v7208_v5  ;;  %11567 = vmatmul.msk.bf16.gmra.mxu3 %vm5855_vm1, %v12496_v18 }
 0xa64   :  { %v7035_v22 = vpop.f32.mrf.mxu3 }
 0xa65   :  { %v7062_v2 = vadd.f32 %v7035_v22, %v16815_v3 }
 0xa66   :  { %v7471_v39 = vpop.f32.mrf.mxu1 }
 0xa67   :  { %v7209_v40 = vadd.f32 %v7182_v15, %v7062_v2  ;;  %v16964_v55 = vadd.f32 %v7471_v39, %v7354_v38  ;;  %v7329_v13 = vpop.f32.mrf.mxu0  ;;  %v7194_v48 = vpop.f32.mrf.mxu2  ;;  %v12517_v15 = vld [vmem:[%s17527_s6 + $0x3a4] sm:$0xff] }
 0xa68   :  { %11621 = vmatmul.msk.bf16.gmra.mxu2 %vm5855_vm1, %v7710_v61  ;;  %v9331_v61 = vpop.permute.xlu2 %9330 }
 0xa69   :  { %v7356_v8 = vadd.f32 %v7329_v13, %v7209_v40  ;;  %11719 = vmatmul.msk.bf16.gmra.mxu1 %vm5855_vm1, %v12516_v20  ;;  %v11636_v40 = vld [vmem:[%s17527_s6 + $0x380] sm:$0xf] }
 0xa6a   :  { %11669 = vmatmul.msk.bf16.gmra.mxu0 %vm5855_vm1, %v12510_v23 }
 0xa6c   :  { %v7037_v3 = vpop.f32.mrf.mxu3 }
 0xa6d   :  { %v7063_v47 = vadd.f32 %v7037_v3, %v16823_v30  ;;  %v7849_v3 = vunpack.c.l.b16 %v11636_v40 }
 0xa6e   :  { %v7473_v27 = vpop.f32.mrf.mxu1 }
 0xa6f   :  { %v7210_v62 = vadd.f32 %v7184_v26, %v7063_v47  ;;  %v16972_v11 = vadd.f32 %v7473_v27, %v7355_v1  ;;  %v7331_v50 = vpop.f32.mrf.mxu0  ;;  %v7197_v45 = vpop.f32.mrf.mxu2 }
 0xa71   :  { %v7357_v28 = vadd.f32 %v7331_v50, %v7210_v62  ;;  %11568 = vmatmul.msk.bf16.gmra.mxu3 %vm5855_vm1, %v12497_v31  ;;  %v12519_v31 = vld [vmem:[%s17527_s6 + $0x3b4] sm:$0xff]  ;;  %v7857_v62 = vpack.c.b16 %v7849_v3, %v7849_v3 }
 0xa74   :  { %v7040_v30 = vpop.f32.mrf.mxu3 }
 0xa75   :  { %v7064_v43 = vadd.f32 %v7040_v30, %v16836_v0  ;;  %v12520_v30 = vld [vmem:[%s17527_s6 + $0x3c0] sm:$0xff] }
 0xa76   :  { %v7476_v44 = vpop.f32.mrf.mxu1 }
 0xa77   :  { %v7211_v16 = vadd.f32 %v7187_v54, %v7064_v43  ;;  %v16986_v56 = vadd.f32 %v7476_v44, %v7356_v8  ;;  %v7334_v33 = vpop.f32.mrf.mxu0  ;;  %v7199_v63 = vpop.f32.mrf.mxu2  ;;  %v12518_v54 = vld [vmem:[%s17527_s6 + $0x3ac] sm:$0xff]  ;;  %v12528_v8 = vld [vmem:[%s17527_s6 + $0x404] sm:$0xff] }
 0xa78   :  { %11818 = vmatmul.msk.bf16.vlgmr.msra.gmra.mxu2 %vm5855_vm1, %v12527_v35 }
 0xa79   :  { %v7358_v19 = vadd.f32 %v7334_v33, %v7211_v16  ;;  %11720 = vmatmul.msk.bf16.gmra.mxu1 %vm5855_vm1, %v12517_v15  ;;  %v11687_v15 = vld [vmem:[%s17527_s6 + $0x3bc] sm:$0xf] }
 0xa7a   :  { %11670 = vmatmul.msk.bf16.gmra.mxu0 %vm5855_vm1, %v12511_v36  ;;  %v7996_v33 = vunpack.c.l.b16 %v11687_v15 }
 0xa7c   :  { %v7042_v0 = vpop.f32.mrf.mxu3 }
 0xa7d   :  { %v7065_v26 = vadd.f32 %v7042_v0, %v16841_v41  ;;  %v9329_v0 = vpop.permute.xlu2 %9328 }
 0xa7e   :  { %v7478_v53 = vpop.f32.mrf.mxu1 }
 0xa7f   :  { %v7212_v49 = vadd.f32 %v7189_v42, %v7065_v26  ;;  %v16994_v25 = vadd.f32 %v7478_v53, %v7357_v28  ;;  %v7336_v32 = vpop.f32.mrf.mxu0  ;;  %v7555_v42 = vunpack.c.l.b16 %v11534_v6 }
 0xa81   :  { %v7359_v24 = vadd.f32 %v7336_v32, %v7212_v49  ;;  %11569 = vmatmul.msk.bf16.gmra.mxu3 %vm5855_vm1, %v12498_v57  ;;  %v7563_v22 = vpack.c.b16 %v7555_v42, %v7555_v42  ;;  %v8004_v57 = vpack.c.b16 %v7996_v33, %v7996_v33  ;;  %v12534_v49 = vld [vmem:[%s17527_s6 + $0x438] sm:$0xff] }
 0xa84   :  { %v7045_v59 = vpop.f32.mrf.mxu3 }
 0xa85   :  { %v7066_v41 = vadd.f32 %v7045_v59, %v16855_v9  ;;  %v7750_v9 = vpop.f32.mrf.mxu2 }
 0xa86   :  { %v7481_v38 = vpop.f32.mrf.mxu1 }
 0xa87   :  { %v7213_v18 = vadd.f32 %v7192_v10, %v7066_v41  ;;  %v17011_v46 = vadd.f32 %v7481_v38, %v7358_v19  ;;  %v7339_v5 = vpop.f32.mrf.mxu0 }
 0xa88   :  { %11819 = vmatmul.msk.bf16.gmra.mxu2 %vm5855_vm1, %v12528_v8 }
 0xa89   :  { %v7360_v12 = vadd.f32 %v7339_v5, %v7213_v18  ;;  %11721 = vmatmul.msk.bf16.gmra.mxu1 %vm5855_vm1, %v12518_v54  ;;  %v12521_v54 = vld [vmem:[%s17527_s6 + $0x3c8] sm:$0xff] }
 0xa8a   :  { %11671 = vmatmul.msk.bf16.gmra.mxu0 %vm5855_vm1, %v12512_v51 }
 0xa8c   :  { %v7047_v1 = vpop.f32.mrf.mxu3 }
 0xa8d   :  { %v7067_v58 = vadd.f32 %v7047_v1, %v16865_v52  ;;  %v7752_v13 = vpop.f32.mrf.mxu2 }
 0xa8e   :  { %v7483_v2 = vpop.f32.mrf.mxu1 }
 0xa8f   :  { %v7214_v20 = vadd.f32 %v7194_v48, %v7067_v58  ;;  %v17016_v39 = vadd.f32 %v7483_v2, %v7359_v24  ;;  %v7341_v23 = vpop.f32.mrf.mxu0  ;;  %v12535_v58 = vld [vmem:[%s17527_s6 + $0x440] sm:$0xff] }
 0xa91   :  { %v7361_v10 = vadd.f32 %v7341_v23, %v7214_v20  ;;  %11570 = vmatmul.msk.bf16.gmra.mxu3 %vm5855_vm1, %v7563_v22 }
 0xa94   :  { %v7050_v52 = vpop.f32.mrf.mxu3 }
 0xa95   :  { %v7068_v47 = vadd.f32 %v7050_v52, %v16878_v21  ;;  %v7755_v28 = vpop.f32.mrf.mxu2 }
 0xa96   :  { %v7486_v27 = vpop.f32.mrf.mxu1 }
 0xa97   :  { %v7215_v50 = vadd.f32 %v7197_v45, %v7068_v47  ;;  %v17030_v48 = vadd.f32 %v7486_v27, %v7360_v12  ;;  %v7344_v4 = vpop.f32.mrf.mxu0  ;;  %v12529_v45 = vld [vmem:[%s17527_s6 + $0x40c] sm:$0xff] }
 0xa98   :  { %11820 = vmatmul.msk.bf16.gmra.mxu2 %vm5855_vm1, %v12529_v45 }
 0xa99   :  { %v7362_v34 = vadd.f32 %v7344_v4, %v7215_v50  ;;  %11722 = vmatmul.msk.bf16.gmra.mxu1 %vm5855_vm1, %v12519_v31  ;;  %v12542_v4 = vld [vmem:[%s17527_s6 + $0x47c] sm:$0xff] }
 0xa9a   :  { %11672 = vmatmul.msk.bf16.gmra.mxu0 %vm5855_vm1, %v7857_v62  ;;  %v12531_v62 = vld [vmem:[%s17527_s6 + $0x41c] sm:$0xff] }
 0xa9c   :  { %v7052_v21 = vpop.f32.mrf.mxu3 }
 0xa9d   :  { %v7757_v16 = vpop.f32.mrf.mxu2 }
 0xa9e   :  { %v7488_v43 = vpop.f32.mrf.mxu1 }
 0xa9f   :  { %v17040_v44 = vadd.f32 %v7488_v43, %v7361_v10  ;;  %v7346_v36 = vpop.f32.mrf.mxu0  ;;  %v12522_v10 = vld [vmem:[%s17527_s6 + $0x3d0] sm:$0xff] }
 0xaa1   :  { %11767 = vmatmul.msk.bf16.vlgmr.msra.gmra.mxu3 %vm5855_vm1, %v12520_v30 }
 0xaa2   :  { %9364 = vmatpush.bf16.msra.mxu3 %v9331_v61 }
 0xaa4   :  { %v7603_v19 = vpop.f32.mrf.mxu3 }
 0xaa5   :  { %v7642_v26 = vadd.f32 %v7603_v19, %v16898_v17  ;;  %v7760_v35 = vpop.f32.mrf.mxu2 }
 0xaa6   :  { %9365 = vmatpush.bf16.msra.mxu3 %v9329_v0  ;;  %v7491_v53 = vpop.f32.mrf.mxu1 }
 0xaa7   :  { %v17051_v32 = vadd.f32 %v7491_v53, %v7362_v34  ;;  %v7789_v63 = vadd.f32 %v7750_v9, %v7642_v26  ;;  %v7897_v24 = vpop.f32.mrf.mxu0  ;;  %v12530_v9 = vld [vmem:[%s17527_s6 + $0x414] sm:$0xff]  ;;  %v12536_v34 = vld [vmem:[%s17527_s6 + $0x448] sm:$0xff] }
 0xaa8   :  { %11821 = vmatmul.msk.bf16.gmra.mxu2 %vm5855_vm1, %v12530_v9  ;;  %v12532_v53 = vld [vmem:[%s17527_s6 + $0x424] sm:$0xff] }
 0xaa9   :  { %v7936_v59 = vadd.f32 %v7897_v24, %v7789_v63  ;;  %11723 = vmatmul.msk.bf16.gmra.mxu1 %vm5855_vm1, %v8004_v57  ;;  %v12543_v63 = vld [vmem:[%s17527_s6 + $0x484] sm:$0xff] }
 0xaaa   :  { %11869 = vmatmul.msk.bf16.vlgmr.msrb.gmra.mxu0 %vm5855_vm1, %v12534_v49 }
 0xaac   :  { %v7605_v17 = vpop.f32.mrf.mxu3 }
 0xaad   :  { %v7643_v41 = vadd.f32 %v7605_v17, %v16906_v14  ;;  %v7762_v18 = vpop.f32.mrf.mxu2  ;;  %v12541_v14 = vld [vmem:[%s17527_s6 + $0x474] sm:$0xff] }
 0xaae   :  { %v7493_v38 = vpop.f32.mrf.mxu1 }
 0xaaf   :  { %v7790_v51 = vadd.f32 %v7752_v13, %v7643_v41  ;;  %v7899_v6 = vpop.f32.mrf.mxu0 }
 0xab1   :  { %v7937_v5 = vadd.f32 %v7899_v6, %v7790_v51  ;;  %11768 = vmatmul.msk.bf16.gmra.mxu3 %vm5855_vm1, %v12521_v54  ;;  %v12524_v6 = vld [vmem:[%s17527_s6 + $0x3e0] sm:$0xff] }
 0xab4   :  { %v7608_v12 = vpop.f32.mrf.mxu3 }
 0xab5   :  { %v7644_v42 = vadd.f32 %v7608_v12, %v16920_v7  ;;  %v7765_v23 = vpop.f32.mrf.mxu2 }
 0xab6   :  { %v8044_v1 = vpop.f32.mrf.mxu1 }
 0xab7   :  { %v7791_v22 = vadd.f32 %v7755_v28, %v7644_v42  ;;  %v17071_v2 = vadd.f32 %v8044_v1, %v7936_v59  ;;  %v7902_v20 = vpop.f32.mrf.mxu0  ;;  %v12533_v1 = vld [vmem:[%s17527_s6 + $0x42c] sm:$0xff] }
 0xab8   :  { %11822 = vmatmul.msk.bf16.gmra.mxu2 %vm5855_vm1, %v12531_v62 }
 0xab9   :  { %v7938_v40 = vadd.f32 %v7902_v20, %v7791_v22  ;;  %11920 = vmatmul.msk.bf16.vlgmr.msrb.gmra.mxu1 %vm5855_vm1, %v12541_v14  ;;  %v12544_v22 = vld [vmem:[%s17527_s6 + $0x48c] sm:$0xff] }
 0xaba   :  { %11870 = vmatmul.msk.bf16.gmra.mxu0 %vm5855_vm1, %v12535_v58 }
 0xabc   :  { %v7610_v7 = vpop.f32.mrf.mxu3 }
 0xabd   :  { %v7645_v13 = vadd.f32 %v7610_v7, %v16928_v29  ;;  %v7767_v31 = vpop.f32.mrf.mxu2 }
 0xabe   :  { %v8046_v8 = vpop.f32.mrf.mxu1 }
 0xabf   :  { %v7792_v3 = vadd.f32 %v7757_v16, %v7645_v13  ;;  %v17079_v52 = vadd.f32 %v8046_v8, %v7937_v5  ;;  %v7904_v47 = vpop.f32.mrf.mxu0  ;;  %v12523_v16 = vld [vmem:[%s17527_s6 + $0x3d8] sm:$0xff] }
 0xac1   :  { %v7939_v27 = vadd.f32 %v7904_v47, %v7792_v3  ;;  %11769 = vmatmul.msk.bf16.gmra.mxu3 %vm5855_vm1, %v12522_v10  ;;  %v12525_v47 = vld [vmem:[%s17527_s6 + $0x3e8] sm:$0xff] }
 0xac4   :  { %v7613_v50 = vpop.f32.mrf.mxu3 }
 0xac5   :  { %v7646_v29 = vadd.f32 %v7613_v50, %v16942_v60  ;;  %v7770_v43 = vpop.f32.mrf.mxu2 }
 0xac6   :  { %v8049_v28 = vpop.f32.mrf.mxu1 }
 0xac7   :  { %v7793_v61 = vadd.f32 %v7760_v35, %v7646_v29  ;;  %v17093_v21 = vadd.f32 %v8049_v28, %v7938_v40  ;;  %v7907_v30 = vpop.f32.mrf.mxu0  ;;  %v12537_v35 = vld [vmem:[%s17527_s6 + $0x450] sm:$0xff] }
 0xac8   :  { %11823 = vmatmul.msk.bf16.gmra.mxu2 %vm5855_vm1, %v12532_v53 }
 0xac9   :  { %v7940_v15 = vadd.f32 %v7907_v30, %v7793_v61  ;;  %11921 = vmatmul.msk.bf16.gmra.mxu1 %vm5855_vm1, %v12542_v4  ;;  %v11789_v4 = vld [vmem:[%s17527_s6 + $0x434] sm:$0xf] }
 0xaca   :  { %11871 = vmatmul.msk.bf16.gmra.mxu0 %vm5855_vm1, %v12536_v34  ;;  %v8290_v34 = vunpack.c.l.b16 %v11789_v4 }
 0xacc   :  { %v7615_v60 = vpop.f32.mrf.mxu3  ;;  %v8298_v61 = vpack.c.b16 %v8290_v34, %v8290_v34 }
 0xacd   :  { %v7647_v36 = vadd.f32 %v7615_v60, %v16950_v37  ;;  %v7772_v26 = vpop.f32.mrf.mxu2  ;;  %v12539_v60 = vld [vmem:[%s17527_s6 + $0x460] sm:$0xff] }
 0xace   :  { %v8051_v33 = vpop.f32.mrf.mxu1 }
 0xacf   :  { %v7794_v45 = vadd.f32 %v7762_v18, %v7647_v36  ;;  %v17101_v19 = vadd.f32 %v8051_v33, %v7939_v27  ;;  %v7909_v0 = vpop.f32.mrf.mxu0 }
 0xad1   :  { %v7941_v57 = vadd.f32 %v7909_v0, %v7794_v45  ;;  %11770 = vmatmul.msk.bf16.gmra.mxu3 %vm5855_vm1, %v12523_v16 }
 0xad4   :  { %v7618_v49 = vpop.f32.mrf.mxu3 }
 0xad5   :  { %v7648_v37 = vadd.f32 %v7618_v49, %v16964_v55  ;;  %v7775_v54 = vpop.f32.mrf.mxu2 }
 0xad6   :  { %v8054_v24 = vpop.f32.mrf.mxu1 }
 0xad7   :  { %v7795_v59 = vadd.f32 %v7765_v23, %v7648_v37  ;;  %v17115_v17 = vadd.f32 %v8054_v24, %v7940_v15  ;;  %v7912_v41 = vpop.f32.mrf.mxu0  ;;  %v12538_v23 = vld [vmem:[%s17527_s6 + $0x458] sm:$0xff] }
 0xad8   :  { %11824 = vmatmul.msk.bf16.gmra.mxu2 %vm5855_vm1, %v12533_v1 }
 0xad9   :  { %v7942_v38 = vadd.f32 %v7912_v41, %v7795_v59  ;;  %11922 = vmatmul.msk.bf16.gmra.mxu1 %vm5855_vm1, %v12543_v63  ;;  %v12555_v59 = vld [vmem:[%s17527_s6 + $0x4ec] sm:$0xff] }
 0xada   :  { %11872 = vmatmul.msk.bf16.gmra.mxu0 %vm5855_vm1, %v12537_v35 }
 0xadc   :  { %v7620_v55 = vpop.f32.mrf.mxu3 }
 0xadd   :  { %v7649_v51 = vadd.f32 %v7620_v55, %v16972_v11  ;;  %v7777_v42 = vpop.f32.mrf.mxu2  ;;  %v12540_v55 = vld [vmem:[%s17527_s6 + $0x468] sm:$0xff] }
 0xade   :  { %v8056_v18 = vpop.f32.mrf.mxu1 }
 0xadf   :  { %v7796_v5 = vadd.f32 %v7767_v31, %v7649_v51  ;;  %v17123_v9 = vadd.f32 %v8056_v18, %v7941_v57  ;;  %v7914_v12 = vpop.f32.mrf.mxu0  ;;  %v12526_v57 = vld [vmem:[%s17527_s6 + $0x3f0] sm:$0xff]  ;;  %v11738_v51 = vld [vmem:[%s17527_s6 + $0x3f8] sm:$0xf] }
 0xae1   :  { %v7943_v14 = vadd.f32 %v7914_v12, %v7796_v5  ;;  %11771 = vmatmul.msk.bf16.gmra.mxu3 %vm5855_vm1, %v12524_v6 }
 0xae4   :  { %v7623_v58 = vpop.f32.mrf.mxu3 }
 0xae5   :  { %v7650_v11 = vadd.f32 %v7623_v58, %v16986_v56  ;;  %v7780_v10 = vpop.f32.mrf.mxu2 }
 0xae6   :  { %v8059_v20 = vpop.f32.mrf.mxu1 }
 0xae7   :  { %v7797_v40 = vadd.f32 %v7770_v43, %v7650_v11  ;;  %v17137_v7 = vadd.f32 %v8059_v20, %v7942_v38  ;;  %v7917_v13 = vpop.f32.mrf.mxu0  ;;  %v12545_v43 = vld [vmem:[%s17527_s6 + $0x494] sm:$0xff] }
 0xae8   :  { %11825 = vmatmul.msk.bf16.gmra.mxu2 %vm5855_vm1, %v8298_v61 }
 0xae9   :  { %v7944_v8 = vadd.f32 %v7917_v13, %v7797_v40  ;;  %11923 = vmatmul.msk.bf16.gmra.mxu1 %vm5855_vm1, %v12544_v22  ;;  %v11840_v40 = vld [vmem:[%s17527_s6 + $0x470] sm:$0xf] }
 0xaea   :  { %11873 = vmatmul.msk.bf16.gmra.mxu0 %vm5855_vm1, %v12538_v23 }
 0xaec   :  { %v7625_v56 = vpop.f32.mrf.mxu3 }
 0xaed   :  { %v7651_v3 = vadd.f32 %v7625_v56, %v16994_v25  ;;  %v7782_v29 = vpop.f32.mrf.mxu2  ;;  %v8437_v56 = vunpack.c.l.b16 %v11840_v40  ;;  %v12550_v40 = vld [vmem:[%s17527_s6 + $0x4c0] sm:$0xff] }
 0xaee   :  { %v8061_v31 = vpop.f32.mrf.mxu1 }
 0xaef   :  { %v7798_v27 = vadd.f32 %v7772_v26, %v7651_v3  ;;  %v17145_v62 = vadd.f32 %v8061_v31, %v7943_v14  ;;  %v7919_v50 = vpop.f32.mrf.mxu0 }
 0xaf1   :  { %v7945_v28 = vadd.f32 %v7919_v50, %v7798_v27  ;;  %11772 = vmatmul.msk.bf16.gmra.mxu3 %vm5855_vm1, %v12525_v47  ;;  %v12547_v47 = vld [vmem:[%s17527_s6 + $0x4a4] sm:$0xff]  ;;  %v8445_v27 = vpack.c.b16 %v8437_v56, %v8437_v56 }
 0xaf4   :  { %v7628_v25 = vpop.f32.mrf.mxu3 }
 0xaf5   :  { %v7652_v30 = vadd.f32 %v7628_v25, %v17011_v46  ;;  %v7785_v45 = vpop.f32.mrf.mxu2 }
 0xaf6   :  { %v8064_v15 = vpop.f32.mrf.mxu1 }
 0xaf7   :  { %v7799_v36 = vadd.f32 %v7775_v54, %v7652_v30  ;;  %v17159_v16 = vadd.f32 %v8064_v15, %v7944_v8  ;;  %v7922_v33 = vpop.f32.mrf.mxu0  ;;  %v12546_v54 = vld [vmem:[%s17527_s6 + $0x49c] sm:$0xff]  ;;  %v12556_v8 = vld [vmem:[%s17527_s6 + $0x4f4] sm:$0xff]  ;;  %v11891_v30 = vld [vmem:[%s17527_s6 + $0x4ac] sm:$0xf] }
 0xaf8   :  { %12022 = vmatmul.msk.bf16.vlgmr.msrb.gmra.mxu2 %vm5855_vm1, %v12555_v59 }
 0xaf9   :  { %v7946_v0 = vadd.f32 %v7922_v33, %v7799_v36  ;;  %11924 = vmatmul.msk.bf16.gmra.mxu1 %vm5855_vm1, %v12545_v43  ;;  %v8584_v36 = vunpack.c.l.b16 %v11891_v30  ;;  %v12557_v33 = vld [vmem:[%s17527_s6 + $0x4fc] sm:$0xff] }
 0xafa   :  { %11874 = vmatmul.msk.bf16.gmra.mxu0 %vm5855_vm1, %v12539_v60 }
 0xafc   :  { %v7630_v46 = vpop.f32.mrf.mxu3 }
 0xafd   :  { %v7653_v26 = vadd.f32 %v7630_v46, %v17016_v39  ;;  %v7787_v24 = vpop.f32.mrf.mxu2  ;;  %v8592_v46 = vpack.c.b16 %v8584_v36, %v8584_v36 }
 0xafe   :  { %v8066_v53 = vpop.f32.mrf.mxu1 }
 0xaff   :  { %v7800_v49 = vadd.f32 %v7777_v42, %v7653_v26  ;;  %v17167_v37 = vadd.f32 %v8066_v53, %v7945_v28  ;;  %v7924_v63 = vpop.f32.mrf.mxu0  ;;  %v8143_v42 = vunpack.c.l.b16 %v11738_v51 }
 0xb01   :  { %v7947_v35 = vadd.f32 %v7924_v63, %v7800_v49  ;;  %11773 = vmatmul.msk.bf16.gmra.mxu3 %vm5855_vm1, %v12526_v57  ;;  %v8151_v58 = vpack.c.b16 %v8143_v42, %v8143_v42  ;;  %v12562_v57 = vld [vmem:[%s17527_s6 + $0x528] sm:$0xff]  ;;  %v12563_v42 = vld [vmem:[%s17527_s6 + $0x530] sm:$0xff] }
 0xb04   :  { %v7633_v41 = vpop.f32.mrf.mxu3 }
 0xb05   :  { %v7654_v39 = vadd.f32 %v7633_v41, %v17030_v48  ;;  %v8338_v48 = vpop.f32.mrf.mxu2  ;;  %v12549_v41 = vld [vmem:[%s17527_s6 + $0x4b8] sm:$0xff] }
 0xb06   :  { %v8069_v38 = vpop.f32.mrf.mxu1 }
 0xb07   :  { %v7801_v6 = vadd.f32 %v7780_v10, %v7654_v39  ;;  %v17184_v18 = vadd.f32 %v8069_v38, %v7946_v0  ;;  %v7927_v5 = vpop.f32.mrf.mxu0 }
 0xb08   :  { %12023 = vmatmul.msk.bf16.gmra.mxu2 %vm5855_vm1, %v12556_v8 }
 0xb09   :  { %v7948_v12 = vadd.f32 %v7927_v5, %v7801_v6  ;;  %11925 = vmatmul.msk.bf16.gmra.mxu1 %vm5855_vm1, %v12546_v54  ;;  %v12558_v6 = vld [vmem:[%s17527_s6 + $0x504] sm:$0xff] }
 0xb0a   :  { %11875 = vmatmul.msk.bf16.gmra.mxu0 %vm5855_vm1, %v12540_v55 }
 0xb0c   :  { %v7635_v14 = vpop.f32.mrf.mxu3 }
 0xb0d   :  { %v7655_v1 = vadd.f32 %v7635_v14, %v17040_v44  ;;  %v8340_v13 = vpop.f32.mrf.mxu2 }
 0xb0e   :  { %v8071_v11 = vpop.f32.mrf.mxu1 }
 0xb0f   :  { %v7802_v22 = vadd.f32 %v7782_v29, %v7655_v1  ;;  %v17189_v20 = vadd.f32 %v8071_v11, %v7947_v35  ;;  %v7929_v23 = vpop.f32.mrf.mxu0 }
 0xb11   :  { %v7949_v10 = vadd.f32 %v7929_v23, %v7802_v22  ;;  %11774 = vmatmul.msk.bf16.gmra.mxu3 %vm5855_vm1, %v8151_v58 }
 0xb14   :  { %v7638_v44 = vpop.f32.mrf.mxu3 }
 0xb15   :  { %v7656_v3 = vadd.f32 %v7638_v44, %v17051_v32  ;;  %v8343_v28 = vpop.f32.mrf.mxu2  ;;  %v12548_v32 = vld [vmem:[%s17527_s6 + $0x4b0] sm:$0xff] }
 0xb16   :  { %v8074_v31 = vpop.f32.mrf.mxu1 }
 0xb17   :  { %v7803_v50 = vadd.f32 %v7785_v45, %v7656_v3  ;;  %v17203_v29 = vadd.f32 %v8074_v31, %v7948_v12  ;;  %v7932_v4 = vpop.f32.mrf.mxu0 }
 0xb18   :  { %12024 = vmatmul.msk.bf16.gmra.mxu2 %vm5855_vm1, %v12557_v33 }
 0xb19   :  { %v7950_v34 = vadd.f32 %v7932_v4, %v7803_v50  ;;  %11926 = vmatmul.msk.bf16.gmra.mxu1 %vm5855_vm1, %v12547_v47  ;;  %v12559_v47 = vld [vmem:[%s17527_s6 + $0x50c] sm:$0xff]  ;;  %v12564_v4 = vld [vmem:[%s17527_s6 + $0x538] sm:$0xff] }
 0xb1a   :  { %11876 = vmatmul.msk.bf16.gmra.mxu0 %vm5855_vm1, %v8445_v27  ;;  %v12570_v27 = vld [vmem:[%s17527_s6 + $0x56c] sm:$0xff] }
 0xb1c   :  { %v7640_v61 = vpop.f32.mrf.mxu3 }
 0xb1d   :  { %v8345_v60 = vpop.f32.mrf.mxu2 }
 0xb1e   :  { %v8076_v25 = vpop.f32.mrf.mxu1 }
 0xb1f   :  { %v17213_v43 = vadd.f32 %v8076_v25, %v7949_v10  ;;  %v7934_v15 = vpop.f32.mrf.mxu0 }
 0xb20   :  { %v12551_v15 = vld [vmem:[%s17527_s6 + $0x4c8] sm:$0xff] }
 0xb21   :  { %11971 = vmatmul.msk.bf16.vlgmr.msrb.gmra.mxu3 %vm5855_vm1, %v12548_v32 }
 0xb24   :  { %v8191_v45 = vpop.f32.mrf.mxu3 }
 0xb25   :  { %v8230_v0 = vadd.f32 %v8191_v45, %v17071_v2  ;;  %v8348_v24 = vpop.f32.mrf.mxu2 }
 0xb26   :  { %v8079_v26 = vpop.f32.mrf.mxu1 }
 0xb27   :  { %v17224_v53 = vadd.f32 %v8079_v26, %v7950_v34  ;;  %v8377_v49 = vadd.f32 %v8338_v48, %v8230_v0  ;;  %v8485_v63 = vpop.f32.mrf.mxu0  ;;  %v12560_v26 = vld [vmem:[%s17527_s6 + $0x514] sm:$0xff] }
 0xb28   :  { %12025 = vmatmul.msk.bf16.gmra.mxu2 %vm5855_vm1, %v12558_v6 }
 0xb29   :  { %v8524_v35 = vadd.f32 %v8485_v63, %v8377_v49  ;;  %11927 = vmatmul.msk.bf16.gmra.mxu1 %vm5855_vm1, %v8592_v46  ;;  %v12571_v49 = vld [vmem:[%s17527_s6 + $0x574] sm:$0xff] }
 0xb2a   :  { %12073 = vmatmul.msk.bf16.vlgmr.msra.gmra.mxu0 %vm5855_vm1, %v12562_v57 }
 0xb2c   :  { %v8193_v59 = vpop.f32.mrf.mxu3 }
 0xb2d   :  { %v8231_v2 = vadd.f32 %v8193_v59, %v17079_v52  ;;  %v8350_v55 = vpop.f32.mrf.mxu2  ;;  %v12569_v52 = vld [vmem:[%s17527_s6 + $0x564] sm:$0xff] }
 0xb2e   :  { %v8081_v39 = vpop.f32.mrf.mxu1 }
 0xb2f   :  { %v8378_v54 = vadd.f32 %v8340_v13, %v8231_v2  ;;  %v8487_v38 = vpop.f32.mrf.mxu0 }
 0xb31   :  { %v8525_v51 = vadd.f32 %v8487_v38, %v8378_v54  ;;  %11972 = vmatmul.msk.bf16.gmra.mxu3 %vm5855_vm1, %v12549_v41  ;;  %v12552_v38 = vld [vmem:[%s17527_s6 + $0x4d0] sm:$0xff] }
 0xb34   :  { %v8196_v5 = vpop.f32.mrf.mxu3 }
 0xb35   :  { %v8232_v48 = vadd.f32 %v8196_v5, %v17093_v21  ;;  %v8353_v11 = vpop.f32.mrf.mxu2 }
 0xb36   :  { %v8632_v12 = vpop.f32.mrf.mxu1 }
 0xb37   :  { %v8379_v14 = vadd.f32 %v8343_v28, %v8232_v48  ;;  %v17244_v1 = vadd.f32 %v8632_v12, %v8524_v35  ;;  %v8490_v58 = vpop.f32.mrf.mxu0  ;;  %v12561_v12 = vld [vmem:[%s17527_s6 + $0x51c] sm:$0xff] }
 0xb38   :  { %12026 = vmatmul.msk.bf16.gmra.mxu2 %vm5855_vm1, %v12559_v47 }
 0xb39   :  { %v8526_v22 = vadd.f32 %v8490_v58, %v8379_v14  ;;  %12124 = vmatmul.msk.bf16.vlgmr.msra.gmra.mxu1 %vm5855_vm1, %v12569_v52  ;;  %v12572_v14 = vld [vmem:[%s17527_s6 + $0x57c] sm:$0xff] }
 0xb3a   :  { %12074 = vmatmul.msk.bf16.gmra.mxu0 %vm5855_vm1, %v12563_v42 }
 0xb3c   :  { %v8198_v21 = vpop.f32.mrf.mxu3 }
 0xb3d   :  { %v8233_v23 = vadd.f32 %v8198_v21, %v17101_v19  ;;  %v8355_v44 = vpop.f32.mrf.mxu2 }
 0xb3e   :  { %v8634_v13 = vpop.f32.mrf.mxu1 }
 0xb3f   :  { %v8380_v10 = vadd.f32 %v8345_v60, %v8233_v23  ;;  %v17252_v8 = vadd.f32 %v8634_v13, %v8525_v51  ;;  %v8492_v56 = vpop.f32.mrf.mxu0 }
 0xb41   :  { %v8527_v3 = vadd.f32 %v8492_v56, %v8380_v10  ;;  %11973 = vmatmul.msk.bf16.gmra.mxu3 %vm5855_vm1, %v12550_v40  ;;  %v12553_v56 = vld [vmem:[%s17527_s6 + $0x4d8] sm:$0xff] }
 0xb44   :  { %v8201_v31 = vpop.f32.mrf.mxu3 }
 0xb45   :  { %v8234_v19 = vadd.f32 %v8201_v31, %v17115_v17  ;;  %v8358_v32 = vpop.f32.mrf.mxu2 }
 0xb46   :  { %v8637_v50 = vpop.f32.mrf.mxu1 }
 0xb47   :  { %v8381_v28 = vadd.f32 %v8348_v24, %v8234_v19  ;;  %v17266_v34 = vadd.f32 %v8637_v50, %v8526_v22  ;;  %v8495_v61 = vpop.f32.mrf.mxu0  ;;  %v12565_v24 = vld [vmem:[%s17527_s6 + $0x540] sm:$0xff] }
 0xb48   :  { %12027 = vmatmul.msk.bf16.gmra.mxu2 %vm5855_vm1, %v12560_v26  ;;  %v11993_v19 = vld [vmem:[%s17527_s6 + $0x524] sm:$0xf] }
 0xb49   :  { %v8528_v25 = vadd.f32 %v8495_v61, %v8381_v28  ;;  %12125 = vmatmul.msk.bf16.gmra.mxu1 %vm5855_vm1, %v12570_v27  ;;  %v8878_v27 = vunpack.c.l.b16 %v11993_v19  ;;  %v12573_v28 = vld [vmem:[%s17527_s6 + $0x584] sm:$0xff] }
 0xb4a   :  { %12075 = vmatmul.msk.bf16.gmra.mxu0 %vm5855_vm1, %v12564_v4  ;;  %v12554_v26 = vld [vmem:[%s17527_s6 + $0x4e0] sm:$0xff] }
 0xb4b   :  { %v8886_v50 = vpack.c.b16 %v8878_v27, %v8878_v27 }
 0xb4c   :  { %v8203_v17 = vpop.f32.mrf.mxu3 }
 0xb4d   :  { %v8235_v30 = vadd.f32 %v8203_v17, %v17123_v9  ;;  %v8360_v0 = vpop.f32.mrf.mxu2 }
 0xb4e   :  { %v8639_v60 = vpop.f32.mrf.mxu1 }
 0xb4f   :  { %v8382_v36 = vadd.f32 %v8350_v55, %v8235_v30  ;;  %v17274_v33 = vadd.f32 %v8639_v60, %v8527_v3  ;;  %v8497_v45 = vpop.f32.mrf.mxu0 }
 0xb51   :  { %v8529_v46 = vadd.f32 %v8497_v45, %v8382_v36  ;;  %11974 = vmatmul.msk.bf16.gmra.mxu3 %vm5855_vm1, %v12551_v15 }
 0xb54   :  { %v8206_v57 = vpop.f32.mrf.mxu3 }
 0xb55   :  { %v8236_v9 = vadd.f32 %v8206_v57, %v17137_v7  ;;  %v8363_v41 = vpop.f32.mrf.mxu2 }
 0xb56   :  { %v8642_v63 = vpop.f32.mrf.mxu1 }
 0xb57   :  { %v8383_v35 = vadd.f32 %v8353_v11, %v8236_v9  ;;  %v17288_v59 = vadd.f32 %v8642_v63, %v8528_v25  ;;  %v8500_v2 = vpop.f32.mrf.mxu0  ;;  %v12566_v11 = vld [vmem:[%s17527_s6 + $0x548] sm:$0xff] }
 0xb58   :  { %12028 = vmatmul.msk.bf16.gmra.mxu2 %vm5855_vm1, %v12561_v12 }
 0xb59   :  { %v8530_v39 = vadd.f32 %v8500_v2, %v8383_v35  ;;  %12126 = vmatmul.msk.bf16.gmra.mxu1 %vm5855_vm1, %v12571_v49 }
 0xb5a   :  { %12076 = vmatmul.msk.bf16.gmra.mxu0 %vm5855_vm1, %v12565_v24 }
 0xb5c   :  { %v8208_v7 = vpop.f32.mrf.mxu3 }
 0xb5d   :  { %v8237_v54 = vadd.f32 %v8208_v7, %v17145_v62  ;;  %v8365_v48 = vpop.f32.mrf.mxu2  ;;  %v11942_v7 = vld [vmem:[%s17527_s6 + $0x4e8] sm:$0xf] }
 0xb5e   :  { %v8644_v55 = vpop.f32.mrf.mxu1 }
 0xb5f   :  { %v8384_v51 = vadd.f32 %v8355_v44, %v8237_v54  ;;  %v17296_v6 = vadd.f32 %v8644_v55, %v8529_v46  ;;  %v8502_v5 = vpop.f32.mrf.mxu0 }
 0xb61   :  { %v8531_v52 = vadd.f32 %v8502_v5, %v8384_v51  ;;  %11975 = vmatmul.msk.bf16.gmra.mxu3 %vm5855_vm1, %v12552_v38 }
 0xb64   :  { %v8211_v42 = vpop.f32.mrf.mxu3 }
 0xb65   :  { %v8238_v62 = vadd.f32 %v8211_v42, %v17159_v16  ;;  %v8368_v40 = vpop.f32.mrf.mxu2 }
 0xb66   :  { %v8647_v58 = vpop.f32.mrf.mxu1 }
 0xb67   :  { %v8385_v22 = vadd.f32 %v8358_v32, %v8238_v62  ;;  %v17310_v21 = vadd.f32 %v8647_v58, %v8530_v39  ;;  %v8505_v23 = vpop.f32.mrf.mxu0  ;;  %v12567_v32 = vld [vmem:[%s17527_s6 + $0x550] sm:$0xff]  ;;  %v12568_v39 = vld [vmem:[%s17527_s6 + $0x558] sm:$0xff] }
 0xb68   :  { %12029 = vmatmul.msk.bf16.gmra.mxu2 %vm5855_vm1, %v8886_v50 }
 0xb69   :  { %v8532_v13 = vadd.f32 %v8505_v23, %v8385_v22  ;;  %12127 = vmatmul.msk.bf16.gmra.mxu1 %vm5855_vm1, %v12572_v14 }
 0xb6a   :  { %12077 = vmatmul.msk.bf16.gmra.mxu0 %vm5855_vm1, %v12566_v11  ;;  %v12044_v11 = vld [vmem:[%s17527_s6 + $0x560] sm:$0xf] }
 0xb6c   :  { %v8213_v16 = vpop.f32.mrf.mxu3 }
 0xb6d   :  { %v8239_v10 = vadd.f32 %v8213_v16, %v17167_v37  ;;  %v8370_v31 = vpop.f32.mrf.mxu2 }
 0xb6e   :  { %v8649_v44 = vpop.f32.mrf.mxu1 }
 0xb6f   :  { %v17318_v3 = vadd.f32 %v8649_v44, %v8531_v52  ;;  %v8507_v47 = vpop.f32.mrf.mxu0  ;;  %v8386_v60 = vadd.f32 %v8360_v0, %v8239_v10 }
 0xb71   :  { %11976 = vmatmul.msk.bf16.gmra.mxu3 %vm5855_vm1, %v12553_v56  ;;  %v8533_v45 = vadd.f32 %v8507_v47, %v8386_v60 }
 0xb74   :  { %v8216_v4 = vpop.f32.mrf.mxu3 }
 0xb75   :  { %v8240_v37 = vadd.f32 %v8216_v4, %v17184_v18  ;;  %v8373_v15 = vpop.f32.mrf.mxu2 }
 0xb76   :  { %v8652_v61 = vpop.f32.mrf.mxu1 }
 0xb77   :  { %v8387_v25 = vadd.f32 %v8363_v41, %v8240_v37  ;;  %v17332_v17 = vadd.f32 %v8652_v61, %v8532_v13  ;;  %v8510_v30 = vpop.f32.mrf.mxu0  ;;  %v12095_v37 = vld [vmem:[%s17527_s6 + $0x59c] sm:$0xf] }
 0xb79   :  { %v8534_v36 = vadd.f32 %v8510_v30, %v8387_v25  ;;  %12128 = vmatmul.msk.bf16.gmra.mxu1 %vm5855_vm1, %v12573_v28  ;;  %v9172_v25 = vunpack.c.l.b16 %v12095_v37 }
 0xb7a   :  { %12078 = vmatmul.msk.bf16.gmra.mxu0 %vm5855_vm1, %v12567_v32 }
 0xb7b   :  { %v9180_v60 = vpack.c.b16 %v9172_v25, %v9172_v25 }
 0xb7c   :  { %v8218_v18 = vpop.f32.mrf.mxu3 }
 0xb7d   :  { %v8241_v46 = vadd.f32 %v8218_v18, %v17189_v20  ;;  %v8375_v24 = vpop.f32.mrf.mxu2  ;;  %v12574_v20 = vld [vmem:[%s17527_s6 + $0x58c] sm:$0xff] }
 0xb7e   :  { %v8654_v57 = vpop.f32.mrf.mxu1  ;;  %v12577_v24 = vld [vmem:[%s17527_s6 + $0x5a8] sm:$0xff] }
 0xb7f   :  { %v8388_v9 = vadd.f32 %v8365_v48, %v8241_v46  ;;  %v17340_v49 = vadd.f32 %v8654_v57, %v8533_v45  ;;  %v8512_v63 = vpop.f32.mrf.mxu0 }
 0xb81   :  { %v8535_v0 = vadd.f32 %v8512_v63, %v8388_v9  ;;  %11977 = vmatmul.msk.bf16.gmra.mxu3 %vm5855_vm1, %v12554_v26 }
 0xb84   :  { %v8221_v35 = vpop.f32.mrf.mxu3 }
 0xb85   :  { %v8242_v2 = vadd.f32 %v8221_v35, %v17203_v29  ;;  %v8926_v51 = vpop.f32.mrf.mxu2  ;;  %v8731_v29 = vunpack.c.l.b16 %v11942_v7 }
 0xb86   :  { %v8657_v41 = vpop.f32.mrf.mxu1 }
 0xb87   :  { %v8389_v54 = vadd.f32 %v8368_v40, %v8242_v2  ;;  %v17353_v38 = vadd.f32 %v8657_v41, %v8534_v36  ;;  %v8515_v55 = vpop.f32.mrf.mxu0  ;;  %v8739_v12 = vpack.c.b16 %v8731_v29, %v8731_v29  ;;  %v9025_v40 = vunpack.c.l.b16 %v12044_v11 }
 0xb89   :  { %v8536_v5 = vadd.f32 %v8515_v55, %v8389_v54  ;;  %12129 = vmatmul.msk.bf16.gmra.mxu1 %vm5855_vm1, %v12574_v20  ;;  %v9033_v56 = vpack.c.b16 %v9025_v40, %v9025_v40 }
 0xb8a   :  { %12079 = vmatmul.msk.bf16.gmra.mxu0 %vm5855_vm1, %v12568_v39 }
 0xb8c   :  { %v8223_v48 = vpop.f32.mrf.mxu3 }
 0xb8d   :  { %v8243_v52 = vadd.f32 %v8223_v48, %v17213_v43  ;;  %v8928_v22 = vpop.f32.mrf.mxu2  ;;  %v12575_v43 = vld [vmem:[%s17527_s6 + $0x594] sm:$0xff] }
 0xb8e   :  { %v8659_v42 = vpop.f32.mrf.mxu1 }
 0xb8f   :  { %v8390_v62 = vadd.f32 %v8370_v31, %v8243_v52  ;;  %v17358_v14 = vadd.f32 %v8659_v42, %v8535_v0  ;;  %v8517_v58 = vpop.f32.mrf.mxu0  ;;  %v12578_v52 = vld [vmem:[%s17527_s6 + $0x5b0] sm:$0xff] }
 0xb91   :  { %v8537_v23 = vadd.f32 %v8517_v58, %v8390_v62  ;;  %11978 = vmatmul.msk.bf16.gmra.mxu3 %vm5855_vm1, %v8739_v12 }
 0xb94   :  { %v8226_v13 = vpop.f32.mrf.mxu3 }
 0xb95   :  { %v8244_v16 = vadd.f32 %v8226_v13, %v17224_v53  ;;  %v8931_v19 = vpop.f32.mrf.mxu2  ;;  %v12576_v53 = vld [vmem:[%s17527_s6 + $0x5a0] sm:$0xff] }
 0xb96   :  { %v8662_v10 = vpop.f32.mrf.mxu1 }
 0xb97   :  { %v8391_v44 = vadd.f32 %v8373_v15, %v8244_v16  ;;  %v17368_v47 = vadd.f32 %v8662_v10, %v8536_v5  ;;  %v8520_v31 = vpop.f32.mrf.mxu0 }
 0xb99   :  { %v8538_v27 = vadd.f32 %v8520_v31, %v8391_v44  ;;  %12130 = vmatmul.msk.bf16.gmra.mxu1 %vm5855_vm1, %v12575_v43  ;;  %v12579_v31 = vld [vmem:[%s17527_s6 + $0x5b8] sm:$0xff] }
 0xb9a   :  { %12080 = vmatmul.msk.bf16.gmra.mxu0 %vm5855_vm1, %v9033_v56 }
 0xb9c   :  { %v8228_v50 = vpop.f32.mrf.mxu3 }
 0xb9d   :  { %v8933_v32 = vpop.f32.mrf.mxu2 }
 0xb9e   :  { %v8664_v4 = vpop.f32.mrf.mxu1 }
 0xb9f   :  { %v17378_v28 = vadd.f32 %v8664_v4, %v8537_v23  ;;  %v8522_v61 = vpop.f32.mrf.mxu0 }
 0xba1   :  { %12175 = vmatmul.msk.bf16.vlgmr.msra.gmra.mxu3 %vm5855_vm1, %v12576_v53 }
 0xba4   :  { %v8779_v30 = vpop.f32.mrf.mxu3 }
 0xba5   :  { %v8818_v15 = vadd.f32 %v8779_v30, %v17244_v1  ;;  %v8936_v26 = vpop.f32.mrf.mxu2 }
 0xba6   :  { %v8667_v36 = vpop.f32.mrf.mxu1 }
 0xba7   :  { %v17382_v18 = vadd.f32 %v8667_v36, %v8538_v27  ;;  %v8965_v45 = vadd.f32 %v8926_v51, %v8818_v15  ;;  %v9073_v46 = vpop.f32.mrf.mxu0 }
 0xba9   :  { %v9112_v57 = vadd.f32 %v9073_v46, %v8965_v45  ;;  %12131 = vmatmul.msk.bf16.gmra.mxu1 %vm5855_vm1, %v9180_v60  ;;  %v12580_v46 = vld [vmem:[%s17527_s6 + $0x5c0] sm:$0xff] }
 0xbac   :  { %v8781_v9 = vpop.f32.mrf.mxu3 }
 0xbad   :  { %v8819_v63 = vadd.f32 %v8781_v9, %v17252_v8  ;;  %v8938_v2 = vpop.f32.mrf.mxu2 }
 0xbae   :  { %v8669_v0 = vpop.f32.mrf.mxu1 }
 0xbaf   :  { %v8966_v35 = vadd.f32 %v8928_v22, %v8819_v63  ;;  %v9075_v1 = vpop.f32.mrf.mxu0 }
 0xbb1   :  { %v9113_v20 = vadd.f32 %v9075_v1, %v8966_v35  ;;  %12176 = vmatmul.msk.bf16.gmra.mxu3 %vm5855_vm1, %v12577_v24 }
 0xbb4   :  { %v8784_v41 = vpop.f32.mrf.mxu3 }
 0xbb5   :  { %v8820_v39 = vadd.f32 %v8784_v41, %v17266_v34  ;;  %v8941_v8 = vpop.f32.mrf.mxu2 }
 0xbb6   :  { %v9220_v7 = vpop.f32.mrf.mxu1 }
 0xbb7   :  { %v8967_v54 = vadd.f32 %v8931_v19, %v8820_v39  ;;  %v17391_v55 = vadd.f32 %v9220_v7, %v9112_v57  ;;  %v9078_v51 = vpop.f32.mrf.mxu0 }
 0xbb9   :  { %v9114_v5 = vadd.f32 %v9078_v51, %v8967_v54  ;;  %v12581_v51 = vld [vmem:[%s17527_s6 + $0x5c8] sm:$0xff] }
 0xbbc   :  { %v8786_v29 = vpop.f32.mrf.mxu3 }
 0xbbd   :  { %v8821_v48 = vadd.f32 %v8786_v29, %v17274_v33  ;;  %v8943_v34 = vpop.f32.mrf.mxu2 }
 0xbbe   :  { %v9222_v12 = vpop.f32.mrf.mxu1 }
 0xbbf   :  { %v8968_v42 = vadd.f32 %v8933_v32, %v8821_v48  ;;  %v17397_v62 = vadd.f32 %v9222_v12, %v9113_v20  ;;  %v9080_v58 = vpop.f32.mrf.mxu0 }
 0xbc1   :  { %v9115_v11 = vadd.f32 %v9080_v58, %v8968_v42  ;;  %12177 = vmatmul.msk.bf16.gmra.mxu3 %vm5855_vm1, %v12578_v52 }
 0xbc4   :  { %v8789_v22 = vpop.f32.mrf.mxu3 }
 0xbc5   :  { %v8822_v23 = vadd.f32 %v8789_v22, %v17288_v59  ;;  %v8946_v43 = vpop.f32.mrf.mxu2 }
 0xbc6   :  { %v9225_v40 = vpop.f32.mrf.mxu1 }
 0xbc7   :  { %v8969_v13 = vadd.f32 %v8936_v26, %v8822_v23  ;;  %v17401_v16 = vadd.f32 %v9225_v40, %v9114_v5  ;;  %v9083_v33 = vpop.f32.mrf.mxu0 }
 0xbc9   :  { %v9116_v10 = vadd.f32 %v9083_v33, %v8969_v13  ;;  %v12582_v33 = vld [vmem:[%s17527_s6 + $0x5d0] sm:$0xff] }
 0xbcc   :  { %v8791_v56 = vpop.f32.mrf.mxu3 }
 0xbcd   :  { %v8823_v44 = vadd.f32 %v8791_v56, %v17296_v6  ;;  %v8948_v59 = vpop.f32.mrf.mxu2 }
 0xbce   :  { %v9227_v19 = vpop.f32.mrf.mxu1 }
 0xbcf   :  { %v8970_v27 = vadd.f32 %v8938_v2, %v8823_v44  ;;  %v17407_v50 = vadd.f32 %v9227_v19, %v9115_v11  ;;  %v9085_v53 = vpop.f32.mrf.mxu0  ;;  %v17440_v19 = vpop.permute.xlu0 %9498 }
 0xbd1   :  { %v9117_v4 = vadd.f32 %v9085_v53, %v8970_v27  ;;  %12178 = vmatmul.msk.bf16.gmra.mxu3 %vm5855_vm1, %v12579_v31 }
 0xbd4   :  { %v8794_v37 = vpop.f32.mrf.mxu3 }
 0xbd5   :  { %v8824_v61 = vadd.f32 %v8794_v37, %v17310_v21  ;;  %v8951_v15 = vpop.f32.mrf.mxu2 }
 0xbd6   :  { %v9230_v32 = vpop.f32.mrf.mxu1 }
 0xbd7   :  { %v8971_v25 = vadd.f32 %v8941_v8, %v8824_v61  ;;  %v17411_v30 = vadd.f32 %v9230_v32, %v9116_v10  ;;  %v9088_v6 = vpop.f32.mrf.mxu0 }
 0xbd9   :  { %v9118_v60 = vadd.f32 %v9088_v6, %v8971_v25 }
 0xbdc   :  { %v8796_v36 = vpop.f32.mrf.mxu3 }
 0xbdd   :  { %v8825_v45 = vadd.f32 %v8796_v36, %v17318_v3  ;;  %v8953_v21 = vpop.f32.mrf.mxu2 }
 0xbde   :  { %v9232_v26 = vpop.f32.mrf.mxu1 }
 0xbdf   :  { %v8972_v57 = vadd.f32 %v8943_v34, %v8825_v45  ;;  %v17417_v9 = vadd.f32 %v9232_v26, %v9117_v4  ;;  %v9090_v63 = vpop.f32.mrf.mxu0  ;;  %v12146_v4 = vld [vmem:[%s17527_s6 + $0x5d8] sm:$0xf]  ;;  %v17451_v45 = vpop.permute.xlu0 %9493 }
 0xbe0   :  { %v9319_v6 = vunpack.c.l.b16 %v12146_v4 }
 0xbe1   :  { %v9119_v24 = vadd.f32 %v9090_v63, %v8972_v57  ;;  %12179 = vmatmul.msk.bf16.gmra.mxu3 %vm5855_vm1, %v12580_v46 }
 0xbe2   :  { %v9327_v36 = vpack.c.b16 %v9319_v6, %v9319_v6 }
 0xbe4   :  { %v8799_v0 = vpop.f32.mrf.mxu3 }
 0xbe5   :  { %v8826_v35 = vadd.f32 %v8799_v0, %v17332_v17  ;;  %v8956_v41 = vpop.f32.mrf.mxu2 }
 0xbe6   :  { %v9235_v1 = vpop.f32.mrf.mxu1 }
 0xbe7   :  { %v8973_v2 = vadd.f32 %v8946_v43, %v8826_v35  ;;  %v17421_v20 = vadd.f32 %v9235_v1, %v9118_v60  ;;  %v9093_v3 = vpop.f32.mrf.mxu0  ;;  %v17459_v35 = vpop.permute.xlu2 %9508 }
 0xbe9   :  { %v9120_v39 = vadd.f32 %v9093_v3, %v8973_v2 }
 0xbec   :  { %v8801_v7 = vpop.f32.mrf.mxu3 }
 0xbed   :  { %v8827_v54 = vadd.f32 %v8801_v7, %v17340_v49  ;;  %v8958_v17 = vpop.f32.mrf.mxu2 }
 0xbee   :  { %v9237_v8 = vpop.f32.mrf.mxu1 }
 0xbef   :  { %v8974_v5 = vadd.f32 %v8948_v59, %v8827_v54  ;;  %v17427_v29 = vadd.f32 %v9237_v8, %v9119_v24  ;;  %v9095_v48 = vpop.f32.mrf.mxu0  ;;  %v17443_v59 = vpop.permute.xlu1 %9503 }
 0xbf1   :  { %v9121_v52 = vadd.f32 %v9095_v48, %v8974_v5  ;;  %12180 = vmatmul.msk.bf16.gmra.mxu3 %vm5855_vm1, %v12581_v51  ;;  %v9489_v48 = vpop.permute.xlu2 %9488 }
 0xbf4   :  { %v8804_v12 = vpop.f32.mrf.mxu3 }
 0xbf5   :  { %v8828_v42 = vadd.f32 %v8804_v12, %v17353_v38  ;;  %v8961_v22 = vpop.f32.mrf.mxu2 }
 0xbf6   :  { %v9240_v58 = vpop.f32.mrf.mxu1 }
 0xbf7   :  { %v8975_v34 = vadd.f32 %v8951_v15, %v8828_v42  ;;  %v17431_v11 = vadd.f32 %v9240_v58, %v9120_v39  ;;  %v9098_v49 = vpop.f32.mrf.mxu0  ;;  %v17455_v63 = vpop.permute.xlu1 %9478 }
 0xbf9   :  { %v9122_v23 = vadd.f32 %v9098_v49, %v8975_v34  ;;  %v9484_v34 = vpop.permute.xlu2 %9483 }
 0xbfc   :  { %v8806_v40 = vpop.f32.mrf.mxu3 }
 0xbfd   :  { %v8829_v13 = vadd.f32 %v8806_v40, %v17358_v14  ;;  %v8963_v38 = vpop.f32.mrf.mxu2 }
 0xbfe   :  { %v9242_v43 = vpop.f32.mrf.mxu1 }
 0xbff   :  { %v8976_v10 = vadd.f32 %v8953_v21, %v8829_v13  ;;  %v17437_v56 = vadd.f32 %v9242_v43, %v9121_v52  ;;  %v9100_v44 = vpop.f32.mrf.mxu0  ;;  %v9474_v7 = vpop.permute.xlu1 %9473 }
 0xc01   :  { %v9123_v31 = vadd.f32 %v9100_v44, %v8976_v10  ;;  %12181 = vmatmul.msk.bf16.gmra.mxu3 %vm5855_vm1, %v12582_v33 }
 0xc04   :  { %v8809_v27 = vpop.f32.mrf.mxu3 }
 0xc05   :  { %v8830_v53 = vadd.f32 %v8809_v27, %v17368_v47 }
 0xc06   :  { %v9245_v14 = vpop.f32.mrf.mxu1 }
 0xc07   :  { %v8977_v37 = vadd.f32 %v8956_v41, %v8830_v53  ;;  %v17448_v61 = vadd.f32 %v9245_v14, %v9122_v23  ;;  %v9103_v32 = vpop.f32.mrf.mxu0  ;;  %v9469_v41 = vpop.permute.xlu0 %9468 }
 0xc08   :  { %v9449_v52 = vpop.permute.xlu1 %9448 }
 0xc09   :  { %v9124_v25 = vadd.f32 %v9103_v32, %v8977_v37 }
 0xc0c   :  { %v8811_v15 = vpop.f32.mrf.mxu3 }
 0xc0d   :  { %v8831_v60 = vadd.f32 %v8811_v15, %v17378_v28 }
 0xc0e   :  { %v9247_v47 = vpop.f32.mrf.mxu1 }
 0xc0f   :  { %v8978_v46 = vadd.f32 %v8958_v17, %v8831_v60  ;;  %v17453_v26 = vadd.f32 %v9247_v47, %v9123_v31  ;;  %v9105_v57 = vpop.f32.mrf.mxu0  ;;  %v9464_v17 = vpop.permute.xlu0 %9463 }
 0xc10   :  { %v9444_v13 = vpop.permute.xlu1 %9443  ;;  %v9459_v31 = vpop.permute.xlu2 %9458 }
 0xc11   :  { %v9125_v21 = vadd.f32 %v9105_v57, %v8978_v46  ;;  %12182 = vmatmul.msk.bf16.gmra.mxu3 %vm5855_vm1, %v9327_v36 }
 0xc14   :  { %v8814_v24 = vpop.f32.mrf.mxu3 }
 0xc15   :  { %v8832_v0 = vadd.f32 %v8814_v24, %v17382_v18 }
 0xc16   :  { %v9250_v1 = vpop.f32.mrf.mxu1 }
 0xc17   :  { %v8979_v28 = vadd.f32 %v8961_v22, %v8832_v0  ;;  %v17461_v2 = vadd.f32 %v9250_v1, %v9124_v25  ;;  %v9108_v3 = vpop.f32.mrf.mxu0  ;;  %v9439_v49 = vpop.permute.xlu0 %9438 }
 0xc18   :  { %v9454_v37 = vpop.permute.xlu2 %9453 }
 0xc19   :  { %v9126_v39 = vadd.f32 %v9108_v3, %v8979_v28 }
 0xc1c   :  { %v8816_v54 = vpop.f32.mrf.mxu3 }
 0xc1e   :  { %v9252_v51 = vpop.f32.mrf.mxu1 }
 0xc1f   :  { %v17463_v8 = vadd.f32 %v9252_v51, %v9125_v21  ;;  %v9110_v5 = vpop.f32.mrf.mxu0 }
 0xc24   :  { %v9367_v12 = vpop.f32.mrf.mxu3 }
 0xc25   :  { %v9406_v18 = vadd.f32 %v9367_v12, %v17391_v55 }
 0xc26   :  { %v9255_v42 = vpop.f32.mrf.mxu1 }
 0xc27   :  { %v17466_v58 = vadd.f32 %v9255_v42, %v9126_v39  ;;  %v9511_v23 = vadd.f32 %v9439_v49, %v9406_v18 }
 0xc29   :  { %v9526_v10 = vmax.f32 %v9511_v23, 0.0 }
 0xc2c   :  { %v9369_v22 = vpop.f32.mrf.mxu3 }
 0xc2d   :  { %v9407_v40 = vadd.f32 %v9369_v22, %v17397_v62 }
 0xc2e   :  { %v9257_v33 = vpop.f32.mrf.mxu1 }
 0xc2f   :  { %v9512_v43 = vadd.f32 %v9444_v13, %v9407_v40 }
 0xc31   :  { %v9527_v44 = vmax.f32 %v9512_v43, 0.0 }
 0xc33   :  { %v17469_v38 = vpack.c.bf16 %v9527_v44, %v9526_v10 }
 0xc34   :  { %v9372_v27 = vpop.f32.mrf.mxu3 }
 0xc35   :  { %v9408_v55 = vadd.f32 %v9372_v27, %v17401_v16 }
 0xc37   :  { %v9513_v14 = vadd.f32 %v9449_v52, %v9408_v55 }
 0xc39   :  { %v9528_v25 = vmax.f32 %v9513_v14, 0.0 }
 0xc3c   :  { %v9374_v53 = vpop.f32.mrf.mxu3 }
 0xc3d   :  { %v9409_v4 = vadd.f32 %v9374_v53, %v17407_v50 }
 0xc3f   :  { %v9514_v32 = vadd.f32 %v9454_v37, %v9409_v4 }
 0xc41   :  { %v9529_v6 = vmax.f32 %v9514_v32, 0.0  ;;  %v9624_v32 = vpop.permute.xlu2 %9623 }
 0xc43   :  { %v9542_v62 = vpack.c.bf16 %v9529_v6, %v9528_v25  ;;  %v9614_v25 = vpop.permute.xlu0 %9613 }
 0xc44   :  { %v9377_v15 = vpop.f32.mrf.mxu3 }
 0xc45   :  { %v9410_v60 = vadd.f32 %v9377_v15, %v17411_v30 }
 0xc47   :  { %v9515_v47 = vadd.f32 %v9459_v31, %v9410_v60 }
 0xc49   :  { %v9530_v21 = vmax.f32 %v9515_v47, 0.0  ;;  %v9604_v6 = vpop.permute.xlu2 %9603  ;;  %v9619_v47 = vpop.permute.xlu1 %9618 }
 0xc4c   :  { %v9379_v36 = vpop.f32.mrf.mxu3 }
 0xc4d   :  { %v9411_v46 = vadd.f32 %v9379_v36, %v17417_v9 }
 0xc4f   :  { %v9516_v57 = vadd.f32 %v9464_v17, %v9411_v46 }
 0xc51   :  { %v9531_v24 = vmax.f32 %v9516_v57, 0.0  ;;  %v9599_v15 = vpop.permute.xlu2 %9598 }
 0xc53   :  { %v9543_v16 = vpack.c.bf16 %v9531_v24, %v9530_v21 }
 0xc54   :  { %v9382_v0 = vpop.f32.mrf.mxu3 }
 0xc55   :  { %v9412_v1 = vadd.f32 %v9382_v0, %v17421_v20 }
 0xc57   :  { %v9517_v28 = vadd.f32 %v9469_v41, %v9412_v1 }
 0xc59   :  { %v9532_v54 = vmax.f32 %v9517_v28, 0.0  ;;  %v9574_v46 = vpop.permute.xlu2 %9573  ;;  %v9594_v28 = vpop.permute.xlu1 %9593 }
 0xc5c   :  { %v9384_v50 = vpop.f32.mrf.mxu3 }
 0xc5d   :  { %v9413_v3 = vadd.f32 %v9384_v50, %v17427_v29 }
 0xc5f   :  { %v9518_v39 = vadd.f32 %v9474_v7, %v9413_v3 }
 0xc61   :  { %v9533_v51 = vmax.f32 %v9518_v39, 0.0 }
 0xc63   :  { %v9544_v5 = vpack.c.bf16 %v9533_v51, %v9532_v54  ;;  %v9589_v54 = vpop.permute.xlu1 %9588 }
 0xc64   :  { %v9387_v30 = vpop.f32.mrf.mxu3 }
 0xc65   :  { %v9414_v52 = vadd.f32 %v9387_v30, %v17431_v11 }
 0xc67   :  { %v9519_v9 = vadd.f32 %v17455_v63, %v9414_v52 }
 0xc69   :  { %v9534_v42 = vmax.f32 %v9519_v9, 0.0 }
 0xc6c   :  { %v9389_v12 = vpop.f32.mrf.mxu3 }
 0xc6d   :  { %v9415_v17 = vadd.f32 %v9389_v12, %v17437_v56 }
 0xc6f   :  { %v9520_v18 = vadd.f32 %v9484_v34, %v9415_v17 }
 0xc71   :  { %v9535_v49 = vmax.f32 %v9520_v18, 0.0 }
 0xc73   :  { %v9545_v20 = vpack.c.bf16 %v9535_v49, %v9534_v42 }
 0xc74   :  { %v9392_v22 = vpop.f32.mrf.mxu3 }
 0xc75   :  { %v9416_v41 = vadd.f32 %v9392_v22, %v17448_v61 }
 0xc77   :  { %v9521_v7 = vadd.f32 %v9489_v48, %v9416_v41 }
 0xc79   :  { %v9536_v13 = vmax.f32 %v9521_v7, 0.0 }
 0xc7c   :  { %v9394_v29 = vpop.f32.mrf.mxu3 }
 0xc7d   :  { %v9417_v23 = vadd.f32 %v9394_v29, %v17453_v26 }
 0xc7f   :  { %v9522_v40 = vadd.f32 %v17451_v45, %v9417_v23 }
 0xc81   :  { %v9537_v11 = vmax.f32 %v9522_v40, 0.0 }
 0xc83   :  { %v9546_v33 = vpack.c.bf16 %v9537_v11, %v9536_v13 }
 0xc84   :  { %v9397_v43 = vpop.f32.mrf.mxu3 }
 0xc85   :  { %v9418_v63 = vadd.f32 %v9397_v43, %v17461_v2 }
 0xc87   :  { %v9523_v34 = vadd.f32 %v17440_v19, %v9418_v63  ;;  %v12583_v19 = vld [vmem:[%s17531_s8] sm:$0xff] }
 0xc89   :  { %v9538_v61 = vmax.f32 %v9523_v34, 0.0 }
 0xc8c   :  { %v9399_v56 = vpop.f32.mrf.mxu3 }
 0xc8d   :  { %v9419_v10 = vadd.f32 %v9399_v56, %v17463_v8  ;;  %v12586_v8 = vld [vmem:[%s17531_s8 + $0x18] sm:$0xff] }
 0xc8f   :  { %v9524_v44 = vadd.f32 %v17443_v59, %v9419_v10  ;;  %v12584_v59 = vld [vmem:[%s17531_s8 + $0x8] sm:$0xff] }
 0xc91   :  { %v9539_v31 = vmax.f32 %v9524_v44, 0.0 }
 0xc93   :  { %v9547_v48 = vpack.c.bf16 %v9539_v31, %v9538_v61 }
 0xc94   :  { %v9402_v27 = vpop.f32.mrf.mxu3 }
 0xc95   :  { %v9420_v26 = vadd.f32 %v9402_v27, %v17466_v58  ;;  %v12587_v58 = vld [vmem:[%s17531_s8 + $0x20] sm:$0xff] }
 0xc97   :  { %v9525_v45 = vadd.f32 %v17459_v35, %v9420_v26  ;;  %v12585_v35 = vld [vmem:[%s17531_s8 + $0x10] sm:$0xff] }
 0xc99   :  { %v9540_v55 = vmax.f32 %v9525_v45, 0.0 }
 0xc9b   :  { %v9548_v53 = vpack.c.bf16 %v9540_v55, %v9540_v55  ;;  %v12211_v55 = vld [vmem:[%s17532_s10] sm:$0xf] }
 0xc9c   :  { %v9404_v14 = vpop.f32.mrf.mxu3 }
 0xc9d   :  { %v9675_v2 = vsel %vm9673_vm2, %v9548_v53, 0  ;;  %v12588_v53 = vld [vmem:[%s17532_s10] sm:$0x10] }
 0xc9e   :  { %9677 = vmatpush.bf16.msra.mxu2 %v9675_v2  ;;  %v12212_v14 = vor.u32 %v12588_v53, %v12211_v55  ;;  %v9739_v2 = vpop.permute.xlu1 %9738 }
 0xca2   :  { %9678 = vmatpush.bf16.msra.mxu2 %v9547_v48 }
 0xca6   :  { %9679 = vmatpush.bf16.msra.mxu2 %v9546_v33 }
 0xcaa   :  { %9680 = vmatpush.bf16.msra.mxu2 %v9545_v20 }
 0xcae   :  { %9681 = vmatpush.bf16.msra.mxu2 %v9544_v5 }
 0xcb2   :  { %9682 = vmatpush.bf16.msra.mxu2 %v9543_v16 }
 0xcb6   :  { %9683 = vmatpush.bf16.msra.mxu2 %v9542_v62  ;;  %v9609_v62 = vpop.permute.xlu0 %9608 }
 0xcba   :  { %9684 = vmatpush.bf16.msra.mxu2 %v17469_v38  ;;  %v9559_v38 = vld [vmem:[%s17531_s8 + $0x28] sm:$0x3] }
 0xcbb   :  { %v9647_v4 = vunpack.c.l.b16 %v9559_v38 }
 0xcbd   :  { %12203 = vmatmul.msk.bf16.vlgmr.msra.gmra.mxu2 %vm9654_vm6, %v12583_v19  ;;  %v9653_v37 = vpack.c.b16 %v9647_v4, %v9647_v4 }
 0xcbe   :  { %v9584_v60 = vpop.permute.xlu0 %9583 }
 0xcc6   :  { %v9579_v21 = vpop.permute.xlu0 %9578 }
 0xccd   :  { %12204 = vmatmul.msk.bf16.gmra.mxu2 %vm9654_vm6, %v12584_v59 }
 0xcdd   :  { %12205 = vmatmul.msk.bf16.gmra.mxu2 %vm9654_vm6, %v12585_v35  ;;  %v9744_v35 = vpop.permute.xlu2 %9743 }
 0xced   :  { %12206 = vmatmul.msk.bf16.gmra.mxu2 %vm9654_vm6, %v12586_v8 }
 0xcfd   :  { %12207 = vmatmul.msk.bf16.gmra.mxu2 %vm9654_vm6, %v12587_v58 }
 0xd0d   :  { %12208 = vmatmul.msk.bf16.gmra.mxu2 %vm9654_vm6, %v9653_v37 }
 0xd40   :  { %v9686_v36 = vpop.f32.mrf.mxu2 }
 0xd41   :  { %v9687_v57 = vadd.f32 %v9686_v36, %v9574_v46 }
 0xd43   :  { %v9715_v0 = vmax.f32 %v9687_v57, 0.0 }
 0xd48   :  { %v9688_v24 = vpop.f32.mrf.mxu2 }
 0xd49   :  { %v9689_v16 = vadd.f32 %v9688_v24, %v9579_v21 }
 0xd4b   :  { %v9716_v1 = vmax.f32 %v9689_v16, 0.0 }
 0xd4d   :  { %v9726_v50 = vpack.c.bf16 %v9716_v1, %v9715_v0 }
 0xd50   :  { %v9691_v3 = vpop.f32.mrf.mxu2 }
 0xd51   :  { %v9692_v39 = vadd.f32 %v9691_v3, %v9584_v60 }
 0xd53   :  { %v9717_v30 = vmax.f32 %v9692_v39, 0.0 }
 0xd58   :  { %v9693_v51 = vpop.f32.mrf.mxu2 }
 0xd59   :  { %v9694_v5 = vadd.f32 %v9693_v51, %v9589_v54 }
 0xd5b   :  { %v9718_v52 = vmax.f32 %v9694_v5, 0.0 }
 0xd5d   :  { %v9727_v12 = vpack.c.bf16 %v9718_v52, %v9717_v30 }
 0xd60   :  { %v9696_v9 = vpop.f32.mrf.mxu2 }
 0xd61   :  { %v9697_v61 = vadd.f32 %v9696_v9, %v9594_v28 }
 0xd63   :  { %v9719_v26 = vmax.f32 %v9697_v61, 0.0 }
 0xd68   :  { %v9698_v17 = vpop.f32.mrf.mxu2 }
 0xd69   :  { %v9699_v34 = vadd.f32 %v9698_v17, %v9599_v15 }
 0xd6b   :  { %v9720_v48 = vmax.f32 %v9699_v34, 0.0 }
 0xd6d   :  { %v9728_v45 = vpack.c.bf16 %v9720_v48, %v9719_v26 }
 0xd70   :  { %v9701_v18 = vpop.f32.mrf.mxu2 }
 0xd71   :  { %v9702_v43 = vadd.f32 %v9701_v18, %v9604_v6 }
 0xd73   :  { %v9721_v31 = vmax.f32 %v9702_v43, 0.0 }
 0xd78   :  { %v9703_v42 = vpop.f32.mrf.mxu2 }
 0xd79   :  { %v9704_v13 = vadd.f32 %v9703_v42, %v9609_v62 }
 0xd7b   :  { %v9722_v10 = vmax.f32 %v9704_v13, 0.0 }
 0xd7d   :  { %v9729_v27 = vpack.c.bf16 %v9722_v10, %v9721_v31 }
 0xd80   :  { %v9706_v49 = vpop.f32.mrf.mxu2 }
 0xd81   :  { %v9707_v23 = vadd.f32 %v9706_v49, %v9614_v25 }
 0xd83   :  { %v9723_v63 = vmax.f32 %v9707_v23, 0.0 }
 0xd88   :  { %v9708_v20 = vpop.f32.mrf.mxu2 }
 0xd89   :  { %v9709_v29 = vadd.f32 %v9708_v20, %v9619_v47 }
 0xd8b   :  { %v9724_v11 = vmax.f32 %v9709_v29, 0.0 }
 0xd8d   :  { %v9730_v44 = vpack.c.bf16 %v9724_v11, %v9723_v63 }
 0xd90   :  { %v9711_v22 = vpop.f32.mrf.mxu2 }
 0xd91   :  { %v9712_v41 = vadd.f32 %v9711_v22, %v9624_v32 }
 0xd93   :  { %v9725_v7 = vmax.f32 %v9712_v41, 0.0 }
 0xd95   :  { %v9731_v40 = vpack.c.bf16 %v9725_v7, %v9725_v7 }
 0xd97   :  { %v9757_v33 = vsel %vm9755_vm13, %v9731_v40, 0 }
 0xd98   :  { %v9713_v56 = vpop.f32.mrf.mxu2  ;;  %9761 = vmatpush.bf16.msrb.mxu0 %v9757_v33 }
 0xd9c   :  { %9762 = vmatpush.bf16.msrb.mxu0 %v9730_v44 }
 0xda0   :  { %9763 = vmatpush.bf16.msrb.mxu0 %v9729_v27 }
 0xda4   :  { %9764 = vmatpush.bf16.msrb.mxu0 %v9728_v45 }
 0xda8   :  { %9765 = vmatpush.bf16.msrb.mxu0 %v9727_v12 }
 0xdac   :  { %9766 = vmatpush.bf16.msrb.mxu0 %v9726_v50 }
 0xdaf   :  { %12213 = vmatmul.msk.bf16.vlgmr.msrb.gmra.mxu0 %vm3917_vm12, %v12212_v14 }
 0xe2c   :  { %v9768_v19 = vpop.f32.mrf.mxu0 }
 0xe2d   :  { %v9769_v59 = vadd.f32 %v9768_v19, %v9739_v2 }
 0xe2f   :  { %9774 = vst.msk [vmem:[%s17533_s12] sm:$0xff] %vm9773_vm14, %v9769_v59 }
 0xe34   :  { %v9770_v8 = vpop.f32.mrf.mxu0 }
 0xe35   :  { %v9771_v58 = vadd.f32 %v9770_v8, %v9744_v35 }
 0xe37   :  { %9776 = vst.msk [vmem:[%s17533_s12 + $0x8] sm:$0x3] %vm9775_vm15, %v9771_v58 }

</bundles_post_ra>
